<compile_context>
chip_gen: v7x
topology: tpu7x:2x2x1
jax: 0.10.0
libtpu: 0.0.40
codegen_flags: <defaults>
</compile_context>

<pallas_src>
import functools

import jax
import jax.numpy as jnp
from jax.experimental import pallas as pl
from jax.experimental.pallas import tpu as pltpu

BN_EPS = 1e-5
KSIZE = 4
LANE = 128
VMEM_LIMIT = 32 * 1024 * 1024  # safe on v5e/v6e/v7x, far above actual use here

# Sub-pixel tap map: output parity r -> original kernel tap for window offsets (0, 1)
_TAPS = ((3, 1), (2, 0))


def _round_up(x, m):
    return (x + m - 1) // m * m


def _padded_k(k):
    kp = _round_up(k, LANE)
    if kp > 512:
        kp = _round_up(kp, 512)
    return kp


def _pick_tile(n, candidates):
    for t in candidates:
        if n % t == 0:
            return t
    return n


def _choose_mk_tiles(m, k):
    if m >= 256:
        tm = 256
        mp = _round_up(m, tm)
    else:
        mp = _round_up(m, 16)
        tm = mp
    kp = _padded_k(k)
    tk = kp if kp <= 512 else 512
    return tm, mp, tk, kp


# ---------------------------------------------------------------------------
# Kernel 1: batched tiled matmul (bf16 -> f32 acc) with resident B and a fused
#           epilogue that also emits per-tile BatchNorm partial statistics.
# ---------------------------------------------------------------------------
def _convmm_bn_kernel(a_ref, b_ref, y_ref, stats_ref, acc_ref, *, tk):
    k = pl.program_id(2)

    @pl.when(k == 0)
    def _init():
        acc_ref[...] = jnp.zeros_like(acc_ref)

    koff = pl.multiple_of(k * tk, tk)
    acc_ref[...] += jnp.dot(
        a_ref[0],
        b_ref[0, pl.ds(koff, tk), :],  # slice the K chunk of the resident B
        preferred_element_type=jnp.float32,
    )

    @pl.when(k == pl.num_programs(2) - 1)
    def _epilogue():
        acc = acc_ref[...]
        y_ref[0] = acc.astype(y_ref.dtype)
        s1 = jnp.sum(acc, axis=0, keepdims=True)
        s2 = jnp.sum(acc * acc, axis=0, keepdims=True)
        stats_ref[0, 0] = jnp.concatenate([s1, s2], axis=0)


def convmm_bn(a, b, out_dtype=jnp.bfloat16):
    """a: (R, M, K) bf16, b: (R, Kp, Np) bf16 -> (Y (R, Mp, Np), stats (R, nM, 2, Np))."""
    r, m, k = a.shape
    _, kp_b, np_ = b.shape
    tm, mp, tk, kp = _choose_mk_tiles(m, k)
    assert kp == kp_b, (kp, kp_b)
    if (mp, kp) != (m, k):
        a = jnp.pad(a, ((0, 0), (0, mp - m), (0, kp - k)))
    n_m, n_k = mp // tm, kp // tk

    return pl.pallas_call(
        functools.partial(_convmm_bn_kernel, tk=tk),
        out_shape=(
            jax.ShapeDtypeStruct((r, mp, np_), out_dtype),
            jax.ShapeDtypeStruct((r, n_m, 2, np_), jnp.float32),
        ),
        grid_spec=pltpu.PrefetchScalarGridSpec(
            num_scalar_prefetch=0,
            grid=(r, n_m, n_k),
            in_specs=[
                pl.BlockSpec((1, tm, tk), lambda rr, i, kk: (rr, i, kk)),
                # B resident in VMEM: constant block over (i, k), refetched only per r
                pl.BlockSpec((1, kp, np_), lambda rr, i, kk: (rr, 0, 0)),
            ],
            out_specs=(
                pl.BlockSpec((1, tm, np_), lambda rr, i, kk: (rr, i, 0)),
                pl.BlockSpec((1, 1, 2, np_), lambda rr, i, kk: (rr, i, 0, 0)),
            ),
            scratch_shapes=[pltpu.VMEM((tm, np_), jnp.float32)],
        ),
        compiler_params=pltpu.CompilerParams(
            dimension_semantics=("parallel", "parallel", "arbitrary"),
            vmem_limit_bytes=VMEM_LIMIT,
        ),
    )(a, b)


# ---------------------------------------------------------------------------
# Kernel 2: fused BatchNorm affine (folded scale/bias) + ReLU, large tiles.
# ---------------------------------------------------------------------------
def _bn_relu_kernel(y_ref, s_ref, b_ref, o_ref):
    y = y_ref[...].astype(jnp.float32)
    o_ref[...] = jnp.maximum(y * s_ref[...] + b_ref[...], 0.0).astype(o_ref.dtype)


def bn_relu_apply(y, scale_col, bias_col):
    r, mp, np_ = y.shape
    tm = 512 if mp % 512 == 0 else _pick_tile(mp, (256, 128, 64, 32, 16, 8))
    s = scale_col.reshape(1, 1, np_).astype(jnp.float32)
    b = bias_col.reshape(1, 1, np_).astype(jnp.float32)
    return pl.pallas_call(
        _bn_relu_kernel,
        out_shape=jax.ShapeDtypeStruct((r, mp, np_), jnp.bfloat16),
        grid_spec=pltpu.PrefetchScalarGridSpec(
            num_scalar_prefetch=0,
            grid=(mp // tm,),
            in_specs=[
                pl.BlockSpec((r, tm, np_), lambda i: (0, i, 0)),
                pl.BlockSpec((1, 1, np_), lambda i: (0, 0, 0)),
                pl.BlockSpec((1, 1, np_), lambda i: (0, 0, 0)),
            ],
            out_specs=pl.BlockSpec((r, tm, np_), lambda i: (0, i, 0)),
        ),
        compiler_params=pltpu.CompilerParams(
            dimension_semantics=("parallel",),
            vmem_limit_bytes=VMEM_LIMIT,
        ),
    )(y, s, b)


# ---------------------------------------------------------------------------
# Kernel 3: final layer, computed transposed (Cout on sublanes, spatial on the
#           128-lane axis) with tanh fused into the epilogue -> lane-dense out.
# ---------------------------------------------------------------------------
def _convmm_tanh_t_kernel(bt_ref, at_ref, o_ref):
    y = jnp.dot(bt_ref[0], at_ref[0], preferred_element_type=jnp.float32)
    o_ref[0] = jnp.tanh(y)


def convmm_tanh_t(bt, at):
    """bt: (R, 8, Kp) bf16, at: (R, Kp, M) bf16 -> (R, 8, M) f32 (tanh applied)."""
    r, c8, kp = bt.shape
    _, _, m = at.shape
    t_m = _pick_tile(m, (2048, 1024, 512, 256, 128))
    return pl.pallas_call(
        _convmm_tanh_t_kernel,
        out_shape=jax.ShapeDtypeStruct((r, c8, m), jnp.float32),
        grid_spec=pltpu.PrefetchScalarGridSpec(
            num_scalar_prefetch=0,
            grid=(r, m // t_m),
            in_specs=[
                pl.BlockSpec((1, c8, kp), lambda rr, j: (rr, 0, 0)),   # resident B^T
                pl.BlockSpec((1, kp, t_m), lambda rr, j: (rr, 0, j)),
            ],
            out_specs=pl.BlockSpec((1, c8, t_m), lambda rr, j: (rr, 0, j)),
        ),
        compiler_params=pltpu.CompilerParams(
            dimension_semantics=("parallel", "parallel"),
            vmem_limit_bytes=VMEM_LIMIT,
        ),
    )(bt, at)


# ---------------------------------------------------------------------------
# Plain-JAX glue: sub-pixel im2col (regular & transposed), BN finalize.
# ---------------------------------------------------------------------------
def _subpixel_im2col(x):
    """x: (N, H, W, Cp) -> A: (4, N*H*W, 4*Cp); K ordered (dh, dw, ci)."""
    n, h, w, cp = x.shape
    xp = jnp.pad(x, ((0, 0), (1, 1), (1, 1), (0, 0)))
    blocks = []
    for rh in range(2):
        for rw in range(2):
            taps = [
                xp[:, rh + dh : rh + dh + h, rw + dw : rw + dw + w, :]
                for dh in range(2) for dw in range(2)
            ]
            a = jnp.stack(taps, axis=3)                  # (N, H, W, 4, Cp)
            blocks.append(a.reshape(n * h * w, 4 * cp))
    return jnp.stack(blocks, axis=0)


def _subpixel_im2col_t(x):
    """Transposed im2col: (4, 4*Cp, N*H*W); K rows (dh, dw, ci), M cols (n, q, s)."""
    n, h, w, cp = x.shape
    xp = jnp.pad(x, ((0, 0), (1, 1), (1, 1), (0, 0)))
    blocks = []
    for rh in range(2):
        for rw in range(2):
            taps = [
                xp[:, rh + dh : rh + dh + h, rw + dw : rw + dw + w, :]
                for dh in range(2) for dw in range(2)
            ]
            a = jnp.stack(taps, axis=0)                  # (4, N, H, W, Cp)
            a = jnp.transpose(a, (0, 4, 1, 2, 3))        # (4, Cp, N, H, W)
            blocks.append(a.reshape(4 * cp, n * h * w))
    return jnp.stack(blocks, axis=0)


def _bn_scale_bias(stats, gamma, beta, count, cols_per_ch):
    """Finalize BN (training-mode batch stats, biased variance) from partial sums."""
    col = jnp.sum(stats, axis=(0, 1))                    # (2, Np)
    cp = gamma.shape[0]
    ch = col.reshape(2, cols_per_ch, cp).sum(axis=1)     # (2, Cp)
    mean = ch[0] / count
    var = jnp.maximum(ch[1] / count - mean * mean, 0.0)  # clamp: cancellation guard
    scale = gamma * jax.lax.rsqrt(var + BN_EPS)
    bias = beta - mean * scale
    return jnp.tile(scale, cols_per_ch), jnp.tile(bias, cols_per_ch)


# ---------------------------------------------------------------------------
# Parameter preparation (padding / reordering / bf16 casts done once).
# ---------------------------------------------------------------------------
def init_params(key, latent_dim, img_channels, feature_map_size):
    f = feature_map_size
    chans = [latent_dim, f * 8, f * 4, f * 2, f, img_channels]
    weights, gammas, betas = [], [], []
    for i in range(5):
        key, sub = jax.random.split(key)
        # nn.ConvTranspose2d weight layout: (in_channels, out_channels, 4, 4)
        w = 0.02 * jax.random.normal(sub, (chans[i], chans[i + 1], KSIZE, KSIZE), jnp.float32)
        weights.append(w)
        if i < 4:
            gammas.append(jnp.ones((chans[i + 1],), jnp.float32))   # BN defaults
            betas.append(jnp.zeros((chans[i + 1],), jnp.float32))
    return {"weights": weights, "gammas": gammas, "betas": betas}


def prepare_params(params, latent_dim, img_channels, feature_map_size):
    f = feature_map_size
    chans = [latent_dim, f * 8, f * 4, f * 2, f, img_channels]
    prep = {"img_channels": img_channels}

    # Layer 0: 1x1 input, stride 1, pad 0  ==  plain matmul over (a, b, co) columns.
    w0 = params["weights"][0]
    cin, cout = chans[0], chans[1]
    kp0 = _padded_k(cin)
    cp0 = _round_up(cout, LANE)
    w0p = jnp.pad(w0, ((0, kp0 - cin), (0, cp0 - cout), (0, 0), (0, 0)))
    b0 = jnp.transpose(w0p, (0, 2, 3, 1)).reshape(kp0, KSIZE * KSIZE * cp0)
    prep["B0"] = b0[None].astype(jnp.bfloat16)
    prep["cp"] = [cp0]
    prep["gamma"] = [jnp.pad(params["gammas"][0], (0, cp0 - cout))]
    prep["beta"] = [jnp.pad(params["betas"][0], (0, cp0 - cout))]

    # Layers 1..3: stride-2 sub-pixel kernels, (tap, ci) x co.
    prep["B"] = []
    cp_prev = cp0
    for li in range(1, 4):
        w = params["weights"][li]
        cin, cout = chans[li], chans[li + 1]
        cp = _round_up(cout, LANE)
        wp = jnp.pad(w, ((0, cp_prev - cin), (0, cp - cout), (0, 0), (0, 0)))
        subs = []
        for rh in range(2):
            for rw in range(2):
                taps = [wp[:, :, _TAPS[rh][dh], _TAPS[rw][dw]]
                        for dh in range(2) for dw in range(2)]
                subs.append(jnp.stack(taps, axis=0).reshape(4 * cp_prev, cp))
        prep["B"].append(jnp.stack(subs, axis=0).astype(jnp.bfloat16))
        prep["gamma"].append(jnp.pad(params["gammas"][li], (0, cp - cout)))
        prep["beta"].append(jnp.pad(params["betas"][li], (0, cp - cout)))
        prep["cp"].append(cp)
        cp_prev = cp

    # Layer 4 (final): transposed weights, Cout (=3) padded to 8 sublanes.
    w = params["weights"][4]
    cin, cout = chans[4], chans[5]
    cp_out = 8
    wp = jnp.pad(w, ((0, cp_prev - cin), (0, cp_out - cout), (0, 0), (0, 0)))
    subs = []
    for rh in range(2):
        for rw in range(2):
            taps = [wp[:, :, _TAPS[rh][dh], _TAPS[rw][dw]]
                    for dh in range(2) for dw in range(2)]
            subs.append(jnp.stack(taps, axis=0).reshape(4 * cp_prev, cp_out).T)
    prep["Bt_last"] = jnp.stack(subs, axis=0).astype(jnp.bfloat16)   # (4, 8, K)
    return prep


# ---------------------------------------------------------------------------
# Full Generator128 forward (NCHW in -> NCHW out).
# ---------------------------------------------------------------------------
def generator128_forward(x_nchw, prep):
    n = x_nchw.shape[0]
    cin = x_nchw.shape[1]

    # Layer 0: ConvT(latent -> 8f, 4, 1, 0) on a 1x1 input.
    a0 = x_nchw.reshape(n, cin).astype(jnp.bfloat16)[None]          # (1, N, Cin)
    y, stats = convmm_bn(a0, prep["B0"])
    cp = prep["cp"][0]
    scale, bias = _bn_scale_bias(stats, prep["gamma"][0], prep["beta"][0],
                                 count=n * KSIZE * KSIZE, cols_per_ch=KSIZE * KSIZE)
    y = bn_relu_apply(y, scale, bias)
    x = y[0, :n, :].reshape(n, KSIZE, KSIZE, cp)                     # NHWC, channel-padded

    # Layers 1..3: ConvT(4, 2, 1) + BN + ReLU via sub-pixel decomposition.
    for li in range(1, 4):
        nn_, h, w, _ = x.shape
        a = _subpixel_im2col(x)                                      # (4, N*H*W, 4*Cp_in)
        y, stats = convmm_bn(a, prep["B"][li - 1])
        cp = prep["cp"][li]
        scale, bias = _bn_scale_bias(stats, prep["gamma"][li], prep["beta"][li],
                                     count=4 * nn_ * h * w, cols_per_ch=1)
        y = bn_relu_apply(y, scale, bias)                            # (4, Mp, Cp)
        m = nn_ * h * w
        y = y[:, :m, :].reshape(2, 2, nn_, h, w, cp)
        # Interleave the 4 sub-pixel outputs -> (N, 2H, 2W, Cp) NHWC.
        x = jnp.transpose(y, (2, 3, 0, 4, 1, 5)).reshape(nn_, 2 * h, 2 * w, cp)

    # Layer 4 (final): ConvT(4, 2, 1) + tanh, transposed / lane-dense.
    nn_, h, w, _ = x.shape
    at = _subpixel_im2col_t(x)                                       # (4, 4*Cp_in, N*H*W)
    yt = convmm_tanh_t(prep["Bt_last"], at)                          # (4, 8, N*H*W) f32
    c = prep["img_channels"]
    yt = yt[:, :c, :].reshape(2, 2, c, nn_, h, w)
    out = jnp.transpose(yt, (3, 2, 4, 0, 5, 1)).reshape(nn_, c, 2 * h, 2 * w)
    return out                                                       # NCHW


if __name__ == "__main__":
    # Small config consistent with the module (spatial pipeline 1->4->8->16->32->64
    # is fixed by the architecture; channel widths kept small for the demo).
    batch, latent_dim, img_channels, feature_map_size = 2, 16, 3, 8

    key = jax.random.PRNGKey(0)
    kp_, kx_ = jax.random.split(key)
    params = init_params(kp_, latent_dim, img_channels, feature_map_size)
    prep = prepare_params(params, latent_dim, img_channels, feature_map_size)
    x = 0.5 * jax.random.normal(kx_, (batch, latent_dim, 1, 1), jnp.float32)

    fwd = jax.jit(lambda z: generator128_forward(z, prep))
    out = jax.block_until_ready(fwd(x))

    assert out.shape == (batch, img_channels, 64, 64), out.shape
    assert bool(jnp.all(jnp.isfinite(out)))
    assert bool(jnp.all(jnp.abs(out) <= 1.0))  # tanh range
    print("KERNEL_OK")
</pallas_src>

<mosaic_0001>
module attributes {stable_mosaic.version = 11 : i64} {
  func.func @_convmm_bn_kernel(%arg0: i32, %arg1: i32, %arg2: i32, %arg3: memref<1x16x128xbf16, #tpu.memory_space<vmem>>, %arg4: memref<1x128x2048xbf16, #tpu.memory_space<vmem>>, %arg5: memref<1x16x2048xbf16, #tpu.memory_space<vmem>>, %arg6: memref<1x1x2x2048xf32, #tpu.memory_space<vmem>>, %arg7: memref<16x2048xf32, #tpu.memory_space<vmem>>) attributes {dimension_semantics = [#tpu.dimension_semantics<parallel>, #tpu.dimension_semantics<parallel>, #tpu.dimension_semantics<arbitrary>], iteration_bounds = array<i64: 1, 1, 1>, scalar_prefetch = 0 : i64, scratch_operands = 1 : i64, tpu.core_type = #tpu.core_type<tc>, window_params = [{transform_indices = @transform_0, window_bounds = array<i64: 1, 16, 128>}, {transform_indices = @transform_1, window_bounds = array<i64: 1, 128, 2048>}, {transform_indices = @transform_2, window_bounds = array<i64: 1, 16, 2048>}, {transform_indices = @transform_3, window_bounds = array<i64: 1, 1, 2, 2048>}]} {
    %c0_i32 = arith.constant 0 : i32
    %0 = arith.cmpi eq, %arg2, %c0_i32 : i32
    %1 = arith.extui %0 : i1 to i32
    %c0_i32_0 = arith.constant 0 : i32
    %2 = arith.cmpi ne, %1, %c0_i32_0 : i32
    scf.if %2 {
      %cst_11 = arith.constant 0.000000e+00 : f32
      %17 = vector.broadcast %cst_11 : f32 to vector<16x2048xf32>
      %c0_12 = arith.constant 0 : index
      %c0_13 = arith.constant 0 : index
      %18 = vector.load %arg7[%c0_12, %c0_13] : memref<16x2048xf32, #tpu.memory_space<vmem>>, vector<16x2048xf32>
      tpu.vector_store %arg7[%c0_12, %c0_13], %17 {strides = array<i32>} : memref<16x2048xf32, #tpu.memory_space<vmem>>, vector<16x2048xf32>,
    } else {
    }
    %c128_i32 = arith.constant 128 : i32
    %3 = arith.muli %arg2, %c128_i32 : i32
    %4 = tpu.assume_multiple %3, 128 : i32
    %c0 = arith.constant 0 : index
    %c0_1 = arith.constant 0 : index
    %5 = vector.load %arg7[%c0, %c0_1] : memref<16x2048xf32, #tpu.memory_space<vmem>>, vector<16x2048xf32>
    %c0_2 = arith.constant 0 : index
    %c0_3 = arith.constant 0 : index
    %c0_4 = arith.constant 0 : index
    %6 = vector.load %arg3[%c0_2, %c0_3, %c0_4] : memref<1x16x128xbf16, #tpu.memory_space<vmem>>, vector<1x16x128xbf16>
    %7 = vector.shape_cast %6 : vector<1x16x128xbf16> to vector<16x128xbf16>
    %c0_5 = arith.constant 0 : index
    %8 = arith.index_cast %4 : i32 to index
    %c0_6 = arith.constant 0 : index
    %9 = vector.load %arg4[%c0_5, %8, %c0_6] : memref<1x128x2048xbf16, #tpu.memory_space<vmem>>, vector<1x128x2048xbf16>
    %10 = vector.shape_cast %9 : vector<1x128x2048xbf16> to vector<128x2048xbf16>
    %cst = arith.constant dense<0.000000e+00> : vector<16x2048xf32>
    %11 = tpu.matmul %7, %10, %cst {dimension_numbers = #tpu.dot_dimension_numbers<[1], [0], [0], [1], [0, 0, 1, 1], [], []>} : vector<16x128xbf16>, vector<128x2048xbf16>, vector<16x2048xf32> -> vector<16x2048xf32>
    %12 = arith.addf %5, %11 : vector<16x2048xf32>
    %c0_7 = arith.constant 0 : index
    %c0_8 = arith.constant 0 : index
    %13 = vector.load %arg7[%c0_7, %c0_8] : memref<16x2048xf32, #tpu.memory_space<vmem>>, vector<16x2048xf32>
    tpu.vector_store %arg7[%c0_7, %c0_8], %12 {strides = array<i32>} : memref<16x2048xf32, #tpu.memory_space<vmem>>, vector<16x2048xf32>,
    %c0_i32_9 = arith.constant 0 : i32
    %14 = arith.cmpi eq, %arg2, %c0_i32_9 : i32
    %15 = arith.extui %14 : i1 to i32
    %c0_i32_10 = arith.constant 0 : i32
    %16 = arith.cmpi ne, %15, %c0_i32_10 : i32
    scf.if %16 {
      %c0_11 = arith.constant 0 : index
      %c0_12 = arith.constant 0 : index
      %17 = vector.load %arg7[%c0_11, %c0_12] : memref<16x2048xf32, #tpu.memory_space<vmem>>, vector<16x2048xf32>
      %18 = arith.truncf %17 : vector<16x2048xf32> to vector<16x2048xbf16>
      %c0_13 = arith.constant 0 : index
      %c0_14 = arith.constant 0 : index
      %c0_15 = arith.constant 0 : index
      %19 = vector.load %arg5[%c0_13, %c0_14, %c0_15] : memref<1x16x2048xbf16, #tpu.memory_space<vmem>>, vector<1x16x2048xbf16>
      %20 = vector.shape_cast %19 : vector<1x16x2048xbf16> to vector<16x2048xbf16>
      %21 = vector.shape_cast %18 : vector<16x2048xbf16> to vector<1x16x2048xbf16>
      tpu.vector_store %arg5[%c0_13, %c0_14, %c0_15], %21 {strides = array<i32>} : memref<1x16x2048xbf16, #tpu.memory_space<vmem>>, vector<1x16x2048xbf16>,
      %cst_16 = arith.constant dense<0.000000e+00> : vector<2048xf32>
      %22 = vector.multi_reduction <add>, %17, %cst_16 [0] : vector<16x2048xf32> to vector<2048xf32>
      %23 = vector.shape_cast %22 : vector<2048xf32> to vector<1x2048xf32>
      %24 = arith.mulf %17, %17 : vector<16x2048xf32>
      %cst_17 = arith.constant dense<0.000000e+00> : vector<2048xf32>
      %25 = vector.multi_reduction <add>, %24, %cst_17 [0] : vector<16x2048xf32> to vector<2048xf32>
      %26 = vector.shape_cast %25 : vector<2048xf32> to vector<1x2048xf32>
      %27 = tpu.concatenate %23, %26 in 0 : vector<1x2048xf32>, vector<1x2048xf32> -> vector<2x2048xf32>
      %c0_18 = arith.constant 0 : index
      %c0_19 = arith.constant 0 : index
      %c0_20 = arith.constant 0 : index
      %c0_21 = arith.constant 0 : index
      %28 = vector.load %arg6[%c0_18, %c0_19, %c0_20, %c0_21] : memref<1x1x2x2048xf32, #tpu.memory_space<vmem>>, vector<1x1x2x2048xf32>
      %29 = vector.shape_cast %28 : vector<1x1x2x2048xf32> to vector<2x2048xf32>
      %30 = vector.shape_cast %27 : vector<2x2048xf32> to vector<1x1x2x2048xf32>
      tpu.vector_store %arg6[%c0_18, %c0_19, %c0_20, %c0_21], %30 {strides = array<i32>} : memref<1x1x2x2048xf32, #tpu.memory_space<vmem>>, vector<1x1x2x2048xf32>,
    } else {
    }
    return
  }
  func.func @transform_0(%arg0: i32, %arg1: i32, %arg2: i32) -> (i32, i32, i32) {
    %c0_i32 = arith.constant 0 : i32
    return %arg0, %arg1, %arg2 : i32, i32, i32
  }
  func.func @transform_1(%arg0: i32, %arg1: i32, %arg2: i32) -> (i32, i32, i32) {
    %c0_i32 = arith.constant 0 : i32
    %c0_i32_0 = arith.constant 0 : i32
    %c0_i32_1 = arith.constant 0 : i32
    return %arg0, %c0_i32, %c0_i32_0 : i32, i32, i32
  }
  func.func @transform_2(%arg0: i32, %arg1: i32, %arg2: i32) -> (i32, i32, i32) {
    %c0_i32 = arith.constant 0 : i32
    %c0_i32_0 = arith.constant 0 : i32
    return %arg0, %arg1, %c0_i32 : i32, i32, i32
  }
  func.func @transform_3(%arg0: i32, %arg1: i32, %arg2: i32) -> (i32, i32, i32, i32) {
    %c0_i32 = arith.constant 0 : i32
    %c0_i32_0 = arith.constant 0 : i32
    %c0_i32_1 = arith.constant 0 : i32
    return %arg0, %arg1, %c0_i32, %c0_i32_0 : i32, i32, i32, i32
  }
}

module attributes {stable_mosaic.version = 11 : i64} {
  func.func @_bn_relu_kernel(%arg0: i32, %arg1: memref<1x16x2048xbf16, #tpu.memory_space<vmem>>, %arg2: memref<1x1x2048xf32, #tpu.memory_space<vmem>>, %arg3: memref<1x1x2048xf32, #tpu.memory_space<vmem>>, %arg4: memref<1x16x2048xbf16, #tpu.memory_space<vmem>>) attributes {dimension_semantics = [#tpu.dimension_semantics<parallel>], iteration_bounds = array<i64: 1>, scalar_prefetch = 0 : i64, scratch_operands = 0 : i64, tpu.core_type = #tpu.core_type<tc>, window_params = [{transform_indices = @transform_0, window_bounds = array<i64: 1, 16, 2048>}, {pipeline_mode = #tpu.pipeline_mode<synchronous>, transform_indices = @transform_1, window_bounds = array<i64: 1, 1, 2048>}, {pipeline_mode = #tpu.pipeline_mode<synchronous>, transform_indices = @transform_2, window_bounds = array<i64: 1, 1, 2048>}, {transform_indices = @transform_3, window_bounds = array<i64: 1, 16, 2048>}]} {
    %c0 = arith.constant 0 : index
    %c0_0 = arith.constant 0 : index
    %c0_1 = arith.constant 0 : index
    %0 = vector.load %arg1[%c0, %c0_0, %c0_1] : memref<1x16x2048xbf16, #tpu.memory_space<vmem>>, vector<1x16x2048xbf16>
    %1 = arith.extf %0 : vector<1x16x2048xbf16> to vector<1x16x2048xf32>
    %c0_2 = arith.constant 0 : index
    %c0_3 = arith.constant 0 : index
    %c0_4 = arith.constant 0 : index
    %2 = vector.load %arg2[%c0_2, %c0_3, %c0_4] : memref<1x1x2048xf32, #tpu.memory_space<vmem>>, vector<1x1x2048xf32>
    %3 = vector.broadcast %2 : vector<1x1x2048xf32> to vector<1x16x2048xf32>
    %4 = arith.mulf %1, %3 : vector<1x16x2048xf32>
    %c0_5 = arith.constant 0 : index
    %c0_6 = arith.constant 0 : index
    %c0_7 = arith.constant 0 : index
    %5 = vector.load %arg3[%c0_5, %c0_6, %c0_7] : memref<1x1x2048xf32, #tpu.memory_space<vmem>>, vector<1x1x2048xf32>
    %6 = vector.broadcast %5 : vector<1x1x2048xf32> to vector<1x16x2048xf32>
    %7 = arith.addf %4, %6 : vector<1x16x2048xf32>
    %cst = arith.constant 0.000000e+00 : f32
    %8 = vector.broadcast %cst : f32 to vector<1x16x2048xf32>
    %9 = arith.maximumf %7, %8 : vector<1x16x2048xf32>
    %10 = arith.truncf %9 : vector<1x16x2048xf32> to vector<1x16x2048xbf16>
    %c0_8 = arith.constant 0 : index
    %c0_9 = arith.constant 0 : index
    %c0_10 = arith.constant 0 : index
    %11 = vector.load %arg4[%c0_8, %c0_9, %c0_10] : memref<1x16x2048xbf16, #tpu.memory_space<vmem>>, vector<1x16x2048xbf16>
    tpu.vector_store %arg4[%c0_8, %c0_9, %c0_10], %10 {strides = array<i32>} : memref<1x16x2048xbf16, #tpu.memory_space<vmem>>, vector<1x16x2048xbf16>,
    return
  }
  func.func @transform_0(%arg0: i32) -> (i32, i32, i32) {
    %c0_i32 = arith.constant 0 : i32
    %c0_i32_0 = arith.constant 0 : i32
    %c0_i32_1 = arith.constant 0 : i32
    return %c0_i32, %arg0, %c0_i32_0 : i32, i32, i32
  }
  func.func @transform_1(%arg0: i32) -> (i32, i32, i32) {
    %c0_i32 = arith.constant 0 : i32
    %c0_i32_0 = arith.constant 0 : i32
    %c0_i32_1 = arith.constant 0 : i32
    %c0_i32_2 = arith.constant 0 : i32
    return %c0_i32, %c0_i32_0, %c0_i32_1 : i32, i32, i32
  }
  func.func @transform_2(%arg0: i32) -> (i32, i32, i32) {
    %c0_i32 = arith.constant 0 : i32
    %c0_i32_0 = arith.constant 0 : i32
    %c0_i32_1 = arith.constant 0 : i32
    %c0_i32_2 = arith.constant 0 : i32
    return %c0_i32, %c0_i32_0, %c0_i32_1 : i32, i32, i32
  }
  func.func @transform_3(%arg0: i32) -> (i32, i32, i32) {
    %c0_i32 = arith.constant 0 : i32
    %c0_i32_0 = arith.constant 0 : i32
    %c0_i32_1 = arith.constant 0 : i32
    return %c0_i32, %arg0, %c0_i32_0 : i32, i32, i32
  }
}

module attributes {stable_mosaic.version = 11 : i64} {
  func.func @_convmm_bn_kernel(%arg0: i32, %arg1: i32, %arg2: i32, %arg3: memref<1x32x512xbf16, #tpu.memory_space<vmem>>, %arg4: memref<1x512x128xbf16, #tpu.memory_space<vmem>>, %arg5: memref<1x32x128xbf16, #tpu.memory_space<vmem>>, %arg6: memref<1x1x2x128xf32, #tpu.memory_space<vmem>>, %arg7: memref<32x128xf32, #tpu.memory_space<vmem>>) attributes {dimension_semantics = [#tpu.dimension_semantics<parallel>, #tpu.dimension_semantics<parallel>, #tpu.dimension_semantics<arbitrary>], iteration_bounds = array<i64: 4, 1, 1>, scalar_prefetch = 0 : i64, scratch_operands = 1 : i64, tpu.core_type = #tpu.core_type<tc>, window_params = [{transform_indices = @transform_0, window_bounds = array<i64: 1, 32, 512>}, {transform_indices = @transform_1, window_bounds = array<i64: 1, 512, 128>}, {transform_indices = @transform_2, window_bounds = array<i64: 1, 32, 128>}, {transform_indices = @transform_3, window_bounds = array<i64: 1, 1, 2, 128>}]} {
    %c0_i32 = arith.constant 0 : i32
    %0 = arith.cmpi eq, %arg2, %c0_i32 : i32
    %1 = arith.extui %0 : i1 to i32
    %c0_i32_0 = arith.constant 0 : i32
    %2 = arith.cmpi ne, %1, %c0_i32_0 : i32
    scf.if %2 {
      %cst_11 = arith.constant 0.000000e+00 : f32
      %17 = vector.broadcast %cst_11 : f32 to vector<32x128xf32>
      %c0_12 = arith.constant 0 : index
      %c0_13 = arith.constant 0 : index
      %18 = vector.load %arg7[%c0_12, %c0_13] : memref<32x128xf32, #tpu.memory_space<vmem>>, vector<32x128xf32>
      tpu.vector_store %arg7[%c0_12, %c0_13], %17 {strides = array<i32>} : memref<32x128xf32, #tpu.memory_space<vmem>>, vector<32x128xf32>,
    } else {
    }
    %c512_i32 = arith.constant 512 : i32
    %3 = arith.muli %arg2, %c512_i32 : i32
    %4 = tpu.assume_multiple %3, 512 : i32
    %c0 = arith.constant 0 : index
    %c0_1 = arith.constant 0 : index
    %5 = vector.load %arg7[%c0, %c0_1] : memref<32x128xf32, #tpu.memory_space<vmem>>, vector<32x128xf32>
    %c0_2 = arith.constant 0 : index
    %c0_3 = arith.constant 0 : index
    %c0_4 = arith.constant 0 : index
    %6 = vector.load %arg3[%c0_2, %c0_3, %c0_4] : memref<1x32x512xbf16, #tpu.memory_space<vmem>>, vector<1x32x512xbf16>
    %7 = vector.shape_cast %6 : vector<1x32x512xbf16> to vector<32x512xbf16>
    %c0_5 = arith.constant 0 : index
    %8 = arith.index_cast %4 : i32 to index
    %c0_6 = arith.constant 0 : index
    %9 = vector.load %arg4[%c0_5, %8, %c0_6] : memref<1x512x128xbf16, #tpu.memory_space<vmem>>, vector<1x512x128xbf16>
    %10 = vector.shape_cast %9 : vector<1x512x128xbf16> to vector<512x128xbf16>
    %cst = arith.constant dense<0.000000e+00> : vector<32x128xf32>
    %11 = tpu.matmul %7, %10, %cst {dimension_numbers = #tpu.dot_dimension_numbers<[1], [0], [0], [1], [0, 0, 1, 1], [], []>} : vector<32x512xbf16>, vector<512x128xbf16>, vector<32x128xf32> -> vector<32x128xf32>
    %12 = arith.addf %5, %11 : vector<32x128xf32>
    %c0_7 = arith.constant 0 : index
    %c0_8 = arith.constant 0 : index
    %13 = vector.load %arg7[%c0_7, %c0_8] : memref<32x128xf32, #tpu.memory_space<vmem>>, vector<32x128xf32>
    tpu.vector_store %arg7[%c0_7, %c0_8], %12 {strides = array<i32>} : memref<32x128xf32, #tpu.memory_space<vmem>>, vector<32x128xf32>,
    %c0_i32_9 = arith.constant 0 : i32
    %14 = arith.cmpi eq, %arg2, %c0_i32_9 : i32
    %15 = arith.extui %14 : i1 to i32
    %c0_i32_10 = arith.constant 0 : i32
    %16 = arith.cmpi ne, %15, %c0_i32_10 : i32
    scf.if %16 {
      %c0_11 = arith.constant 0 : index
      %c0_12 = arith.constant 0 : index
      %17 = vector.load %arg7[%c0_11, %c0_12] : memref<32x128xf32, #tpu.memory_space<vmem>>, vector<32x128xf32>
      %18 = arith.truncf %17 : vector<32x128xf32> to vector<32x128xbf16>
      %c0_13 = arith.constant 0 : index
      %c0_14 = arith.constant 0 : index
      %c0_15 = arith.constant 0 : index
      %19 = vector.load %arg5[%c0_13, %c0_14, %c0_15] : memref<1x32x128xbf16, #tpu.memory_space<vmem>>, vector<1x32x128xbf16>
      %20 = vector.shape_cast %19 : vector<1x32x128xbf16> to vector<32x128xbf16>
      %21 = vector.shape_cast %18 : vector<32x128xbf16> to vector<1x32x128xbf16>
      tpu.vector_store %arg5[%c0_13, %c0_14, %c0_15], %21 {strides = array<i32>} : memref<1x32x128xbf16, #tpu.memory_space<vmem>>, vector<1x32x128xbf16>,
      %cst_16 = arith.constant dense<0.000000e+00> : vector<128xf32>
      %22 = vector.multi_reduction <add>, %17, %cst_16 [0] : vector<32x128xf32> to vector<128xf32>
      %23 = vector.shape_cast %22 : vector<128xf32> to vector<1x128xf32>
      %24 = arith.mulf %17, %17 : vector<32x128xf32>
      %cst_17 = arith.constant dense<0.000000e+00> : vector<128xf32>
      %25 = vector.multi_reduction <add>, %24, %cst_17 [0] : vector<32x128xf32> to vector<128xf32>
      %26 = vector.shape_cast %25 : vector<128xf32> to vector<1x128xf32>
      %27 = tpu.concatenate %23, %26 in 0 : vector<1x128xf32>, vector<1x128xf32> -> vector<2x128xf32>
      %c0_18 = arith.constant 0 : index
      %c0_19 = arith.constant 0 : index
      %c0_20 = arith.constant 0 : index
      %c0_21 = arith.constant 0 : index
      %28 = vector.load %arg6[%c0_18, %c0_19, %c0_20, %c0_21] : memref<1x1x2x128xf32, #tpu.memory_space<vmem>>, vector<1x1x2x128xf32>
      %29 = vector.shape_cast %28 : vector<1x1x2x128xf32> to vector<2x128xf32>
      %30 = vector.shape_cast %27 : vector<2x128xf32> to vector<1x1x2x128xf32>
      tpu.vector_store %arg6[%c0_18, %c0_19, %c0_20, %c0_21], %30 {strides = array<i32>} : memref<1x1x2x128xf32, #tpu.memory_space<vmem>>, vector<1x1x2x128xf32>,
    } else {
    }
    return
  }
  func.func @transform_0(%arg0: i32, %arg1: i32, %arg2: i32) -> (i32, i32, i32) {
    %c0_i32 = arith.constant 0 : i32
    return %arg0, %arg1, %arg2 : i32, i32, i32
  }
  func.func @transform_1(%arg0: i32, %arg1: i32, %arg2: i32) -> (i32, i32, i32) {
    %c0_i32 = arith.constant 0 : i32
    %c0_i32_0 = arith.constant 0 : i32
    %c0_i32_1 = arith.constant 0 : i32
    return %arg0, %c0_i32, %c0_i32_0 : i32, i32, i32
  }
  func.func @transform_2(%arg0: i32, %arg1: i32, %arg2: i32) -> (i32, i32, i32) {
    %c0_i32 = arith.constant 0 : i32
    %c0_i32_0 = arith.constant 0 : i32
    return %arg0, %arg1, %c0_i32 : i32, i32, i32
  }
  func.func @transform_3(%arg0: i32, %arg1: i32, %arg2: i32) -> (i32, i32, i32, i32) {
    %c0_i32 = arith.constant 0 : i32
    %c0_i32_0 = arith.constant 0 : i32
    %c0_i32_1 = arith.constant 0 : i32
    return %arg0, %arg1, %c0_i32, %c0_i32_0 : i32, i32, i32, i32
  }
}

module attributes {stable_mosaic.version = 11 : i64} {
  func.func @_bn_relu_kernel(%arg0: i32, %arg1: memref<4x32x128xbf16, #tpu.memory_space<vmem>>, %arg2: memref<1x1x128xf32, #tpu.memory_space<vmem>>, %arg3: memref<1x1x128xf32, #tpu.memory_space<vmem>>, %arg4: memref<4x32x128xbf16, #tpu.memory_space<vmem>>) attributes {dimension_semantics = [#tpu.dimension_semantics<parallel>], iteration_bounds = array<i64: 1>, scalar_prefetch = 0 : i64, scratch_operands = 0 : i64, tpu.core_type = #tpu.core_type<tc>, window_params = [{transform_indices = @transform_0, window_bounds = array<i64: 4, 32, 128>}, {pipeline_mode = #tpu.pipeline_mode<synchronous>, transform_indices = @transform_1, window_bounds = array<i64: 1, 1, 128>}, {pipeline_mode = #tpu.pipeline_mode<synchronous>, transform_indices = @transform_2, window_bounds = array<i64: 1, 1, 128>}, {transform_indices = @transform_3, window_bounds = array<i64: 4, 32, 128>}]} {
    %c0 = arith.constant 0 : index
    %c0_0 = arith.constant 0 : index
    %c0_1 = arith.constant 0 : index
    %0 = vector.load %arg1[%c0, %c0_0, %c0_1] : memref<4x32x128xbf16, #tpu.memory_space<vmem>>, vector<4x32x128xbf16>
    %1 = arith.extf %0 : vector<4x32x128xbf16> to vector<4x32x128xf32>
    %c0_2 = arith.constant 0 : index
    %c0_3 = arith.constant 0 : index
    %c0_4 = arith.constant 0 : index
    %2 = vector.load %arg2[%c0_2, %c0_3, %c0_4] : memref<1x1x128xf32, #tpu.memory_space<vmem>>, vector<1x1x128xf32>
    %3 = vector.broadcast %2 : vector<1x1x128xf32> to vector<4x32x128xf32>
    %4 = arith.mulf %1, %3 : vector<4x32x128xf32>
    %c0_5 = arith.constant 0 : index
    %c0_6 = arith.constant 0 : index
    %c0_7 = arith.constant 0 : index
    %5 = vector.load %arg3[%c0_5, %c0_6, %c0_7] : memref<1x1x128xf32, #tpu.memory_space<vmem>>, vector<1x1x128xf32>
    %6 = vector.broadcast %5 : vector<1x1x128xf32> to vector<4x32x128xf32>
    %7 = arith.addf %4, %6 : vector<4x32x128xf32>
    %cst = arith.constant 0.000000e+00 : f32
    %8 = vector.broadcast %cst : f32 to vector<4x32x128xf32>
    %9 = arith.maximumf %7, %8 : vector<4x32x128xf32>
    %10 = arith.truncf %9 : vector<4x32x128xf32> to vector<4x32x128xbf16>
    %c0_8 = arith.constant 0 : index
    %c0_9 = arith.constant 0 : index
    %c0_10 = arith.constant 0 : index
    %11 = vector.load %arg4[%c0_8, %c0_9, %c0_10] : memref<4x32x128xbf16, #tpu.memory_space<vmem>>, vector<4x32x128xbf16>
    tpu.vector_store %arg4[%c0_8, %c0_9, %c0_10], %10 {strides = array<i32>} : memref<4x32x128xbf16, #tpu.memory_space<vmem>>, vector<4x32x128xbf16>,
    return
  }
  func.func @transform_0(%arg0: i32) -> (i32, i32, i32) {
    %c0_i32 = arith.constant 0 : i32
    %c0_i32_0 = arith.constant 0 : i32
    %c0_i32_1 = arith.constant 0 : i32
    return %c0_i32, %arg0, %c0_i32_0 : i32, i32, i32
  }
  func.func @transform_1(%arg0: i32) -> (i32, i32, i32) {
    %c0_i32 = arith.constant 0 : i32
    %c0_i32_0 = arith.constant 0 : i32
    %c0_i32_1 = arith.constant 0 : i32
    %c0_i32_2 = arith.constant 0 : i32
    return %c0_i32, %c0_i32_0, %c0_i32_1 : i32, i32, i32
  }
  func.func @transform_2(%arg0: i32) -> (i32, i32, i32) {
    %c0_i32 = arith.constant 0 : i32
    %c0_i32_0 = arith.constant 0 : i32
    %c0_i32_1 = arith.constant 0 : i32
    %c0_i32_2 = arith.constant 0 : i32
    return %c0_i32, %c0_i32_0, %c0_i32_1 : i32, i32, i32
  }
  func.func @transform_3(%arg0: i32) -> (i32, i32, i32) {
    %c0_i32 = arith.constant 0 : i32
    %c0_i32_0 = arith.constant 0 : i32
    %c0_i32_1 = arith.constant 0 : i32
    return %c0_i32, %arg0, %c0_i32_0 : i32, i32, i32
  }
}

module attributes {stable_mosaic.version = 11 : i64} {
  func.func @_convmm_bn_kernel(%arg0: i32, %arg1: i32, %arg2: i32, %arg3: memref<1x128x512xbf16, #tpu.memory_space<vmem>>, %arg4: memref<1x512x128xbf16, #tpu.memory_space<vmem>>, %arg5: memref<1x128x128xbf16, #tpu.memory_space<vmem>>, %arg6: memref<1x1x2x128xf32, #tpu.memory_space<vmem>>, %arg7: memref<128x128xf32, #tpu.memory_space<vmem>>) attributes {dimension_semantics = [#tpu.dimension_semantics<parallel>, #tpu.dimension_semantics<parallel>, #tpu.dimension_semantics<arbitrary>], iteration_bounds = array<i64: 4, 1, 1>, scalar_prefetch = 0 : i64, scratch_operands = 1 : i64, tpu.core_type = #tpu.core_type<tc>, window_params = [{transform_indices = @transform_0, window_bounds = array<i64: 1, 128, 512>}, {transform_indices = @transform_1, window_bounds = array<i64: 1, 512, 128>}, {transform_indices = @transform_2, window_bounds = array<i64: 1, 128, 128>}, {transform_indices = @transform_3, window_bounds = array<i64: 1, 1, 2, 128>}]} {
    %c0_i32 = arith.constant 0 : i32
    %0 = arith.cmpi eq, %arg2, %c0_i32 : i32
    %1 = arith.extui %0 : i1 to i32
    %c0_i32_0 = arith.constant 0 : i32
    %2 = arith.cmpi ne, %1, %c0_i32_0 : i32
    scf.if %2 {
      %cst_11 = arith.constant 0.000000e+00 : f32
      %17 = vector.broadcast %cst_11 : f32 to vector<128x128xf32>
      %c0_12 = arith.constant 0 : index
      %c0_13 = arith.constant 0 : index
      %18 = vector.load %arg7[%c0_12, %c0_13] : memref<128x128xf32, #tpu.memory_space<vmem>>, vector<128x128xf32>
      tpu.vector_store %arg7[%c0_12, %c0_13], %17 {strides = array<i32>} : memref<128x128xf32, #tpu.memory_space<vmem>>, vector<128x128xf32>,
    } else {
    }
    %c512_i32 = arith.constant 512 : i32
    %3 = arith.muli %arg2, %c512_i32 : i32
    %4 = tpu.assume_multiple %3, 512 : i32
    %c0 = arith.constant 0 : index
    %c0_1 = arith.constant 0 : index
    %5 = vector.load %arg7[%c0, %c0_1] : memref<128x128xf32, #tpu.memory_space<vmem>>, vector<128x128xf32>
    %c0_2 = arith.constant 0 : index
    %c0_3 = arith.constant 0 : index
    %c0_4 = arith.constant 0 : index
    %6 = vector.load %arg3[%c0_2, %c0_3, %c0_4] : memref<1x128x512xbf16, #tpu.memory_space<vmem>>, vector<1x128x512xbf16>
    %7 = vector.shape_cast %6 : vector<1x128x512xbf16> to vector<128x512xbf16>
    %c0_5 = arith.constant 0 : index
    %8 = arith.index_cast %4 : i32 to index
    %c0_6 = arith.constant 0 : index
    %9 = vector.load %arg4[%c0_5, %8, %c0_6] : memref<1x512x128xbf16, #tpu.memory_space<vmem>>, vector<1x512x128xbf16>
    %10 = vector.shape_cast %9 : vector<1x512x128xbf16> to vector<512x128xbf16>
    %cst = arith.constant dense<0.000000e+00> : vector<128x128xf32>
    %11 = tpu.matmul %7, %10, %cst {dimension_numbers = #tpu.dot_dimension_numbers<[1], [0], [0], [1], [0, 0, 1, 1], [], []>} : vector<128x512xbf16>, vector<512x128xbf16>, vector<128x128xf32> -> vector<128x128xf32>
    %12 = arith.addf %5, %11 : vector<128x128xf32>
    %c0_7 = arith.constant 0 : index
    %c0_8 = arith.constant 0 : index
    %13 = vector.load %arg7[%c0_7, %c0_8] : memref<128x128xf32, #tpu.memory_space<vmem>>, vector<128x128xf32>
    tpu.vector_store %arg7[%c0_7, %c0_8], %12 {strides = array<i32>} : memref<128x128xf32, #tpu.memory_space<vmem>>, vector<128x128xf32>,
    %c0_i32_9 = arith.constant 0 : i32
    %14 = arith.cmpi eq, %arg2, %c0_i32_9 : i32
    %15 = arith.extui %14 : i1 to i32
    %c0_i32_10 = arith.constant 0 : i32
    %16 = arith.cmpi ne, %15, %c0_i32_10 : i32
    scf.if %16 {
      %c0_11 = arith.constant 0 : index
      %c0_12 = arith.constant 0 : index
      %17 = vector.load %arg7[%c0_11, %c0_12] : memref<128x128xf32, #tpu.memory_space<vmem>>, vector<128x128xf32>
      %18 = arith.truncf %17 : vector<128x128xf32> to vector<128x128xbf16>
      %c0_13 = arith.constant 0 : index
      %c0_14 = arith.constant 0 : index
      %c0_15 = arith.constant 0 : index
      %19 = vector.load %arg5[%c0_13, %c0_14, %c0_15] : memref<1x128x128xbf16, #tpu.memory_space<vmem>>, vector<1x128x128xbf16>
      %20 = vector.shape_cast %19 : vector<1x128x128xbf16> to vector<128x128xbf16>
      %21 = vector.shape_cast %18 : vector<128x128xbf16> to vector<1x128x128xbf16>
      tpu.vector_store %arg5[%c0_13, %c0_14, %c0_15], %21 {strides = array<i32>} : memref<1x128x128xbf16, #tpu.memory_space<vmem>>, vector<1x128x128xbf16>,
      %cst_16 = arith.constant dense<0.000000e+00> : vector<128xf32>
      %22 = vector.multi_reduction <add>, %17, %cst_16 [0] : vector<128x128xf32> to vector<128xf32>
      %23 = vector.shape_cast %22 : vector<128xf32> to vector<1x128xf32>
      %24 = arith.mulf %17, %17 : vector<128x128xf32>
      %cst_17 = arith.constant dense<0.000000e+00> : vector<128xf32>
      %25 = vector.multi_reduction <add>, %24, %cst_17 [0] : vector<128x128xf32> to vector<128xf32>
      %26 = vector.shape_cast %25 : vector<128xf32> to vector<1x128xf32>
      %27 = tpu.concatenate %23, %26 in 0 : vector<1x128xf32>, vector<1x128xf32> -> vector<2x128xf32>
      %c0_18 = arith.constant 0 : index
      %c0_19 = arith.constant 0 : index
      %c0_20 = arith.constant 0 : index
      %c0_21 = arith.constant 0 : index
      %28 = vector.load %arg6[%c0_18, %c0_19, %c0_20, %c0_21] : memref<1x1x2x128xf32, #tpu.memory_space<vmem>>, vector<1x1x2x128xf32>
      %29 = vector.shape_cast %28 : vector<1x1x2x128xf32> to vector<2x128xf32>
      %30 = vector.shape_cast %27 : vector<2x128xf32> to vector<1x1x2x128xf32>
      tpu.vector_store %arg6[%c0_18, %c0_19, %c0_20, %c0_21], %30 {strides = array<i32>} : memref<1x1x2x128xf32, #tpu.memory_space<vmem>>, vector<1x1x2x128xf32>,
    } else {
    }
    return
  }
  func.func @transform_0(%arg0: i32, %arg1: i32, %arg2: i32) -> (i32, i32, i32) {
    %c0_i32 = arith.constant 0 : i32
    return %arg0, %arg1, %arg2 : i32, i32, i32
  }
  func.func @transform_1(%arg0: i32, %arg1: i32, %arg2: i32) -> (i32, i32, i32) {
    %c0_i32 = arith.constant 0 : i32
    %c0_i32_0 = arith.constant 0 : i32
    %c0_i32_1 = arith.constant 0 : i32
    return %arg0, %c0_i32, %c0_i32_0 : i32, i32, i32
  }
  func.func @transform_2(%arg0: i32, %arg1: i32, %arg2: i32) -> (i32, i32, i32) {
    %c0_i32 = arith.constant 0 : i32
    %c0_i32_0 = arith.constant 0 : i32
    return %arg0, %arg1, %c0_i32 : i32, i32, i32
  }
  func.func @transform_3(%arg0: i32, %arg1: i32, %arg2: i32) -> (i32, i32, i32, i32) {
    %c0_i32 = arith.constant 0 : i32
    %c0_i32_0 = arith.constant 0 : i32
    %c0_i32_1 = arith.constant 0 : i32
    return %arg0, %arg1, %c0_i32, %c0_i32_0 : i32, i32, i32, i32
  }
}

module attributes {stable_mosaic.version = 11 : i64} {
  func.func @_bn_relu_kernel(%arg0: i32, %arg1: memref<4x128x128xbf16, #tpu.memory_space<vmem>>, %arg2: memref<1x1x128xf32, #tpu.memory_space<vmem>>, %arg3: memref<1x1x128xf32, #tpu.memory_space<vmem>>, %arg4: memref<4x128x128xbf16, #tpu.memory_space<vmem>>) attributes {dimension_semantics = [#tpu.dimension_semantics<parallel>], iteration_bounds = array<i64: 1>, scalar_prefetch = 0 : i64, scratch_operands = 0 : i64, tpu.core_type = #tpu.core_type<tc>, window_params = [{transform_indices = @transform_0, window_bounds = array<i64: 4, 128, 128>}, {pipeline_mode = #tpu.pipeline_mode<synchronous>, transform_indices = @transform_1, window_bounds = array<i64: 1, 1, 128>}, {pipeline_mode = #tpu.pipeline_mode<synchronous>, transform_indices = @transform_2, window_bounds = array<i64: 1, 1, 128>}, {transform_indices = @transform_3, window_bounds = array<i64: 4, 128, 128>}]} {
    %c0 = arith.constant 0 : index
    %c0_0 = arith.constant 0 : index
    %c0_1 = arith.constant 0 : index
    %0 = vector.load %arg1[%c0, %c0_0, %c0_1] : memref<4x128x128xbf16, #tpu.memory_space<vmem>>, vector<4x128x128xbf16>
    %1 = arith.extf %0 : vector<4x128x128xbf16> to vector<4x128x128xf32>
    %c0_2 = arith.constant 0 : index
    %c0_3 = arith.constant 0 : index
    %c0_4 = arith.constant 0 : index
    %2 = vector.load %arg2[%c0_2, %c0_3, %c0_4] : memref<1x1x128xf32, #tpu.memory_space<vmem>>, vector<1x1x128xf32>
    %3 = vector.broadcast %2 : vector<1x1x128xf32> to vector<4x128x128xf32>
    %4 = arith.mulf %1, %3 : vector<4x128x128xf32>
    %c0_5 = arith.constant 0 : index
    %c0_6 = arith.constant 0 : index
    %c0_7 = arith.constant 0 : index
    %5 = vector.load %arg3[%c0_5, %c0_6, %c0_7] : memref<1x1x128xf32, #tpu.memory_space<vmem>>, vector<1x1x128xf32>
    %6 = vector.broadcast %5 : vector<1x1x128xf32> to vector<4x128x128xf32>
    %7 = arith.addf %4, %6 : vector<4x128x128xf32>
    %cst = arith.constant 0.000000e+00 : f32
    %8 = vector.broadcast %cst : f32 to vector<4x128x128xf32>
    %9 = arith.maximumf %7, %8 : vector<4x128x128xf32>
    %10 = arith.truncf %9 : vector<4x128x128xf32> to vector<4x128x128xbf16>
    %c0_8 = arith.constant 0 : index
    %c0_9 = arith.constant 0 : index
    %c0_10 = arith.constant 0 : index
    %11 = vector.load %arg4[%c0_8, %c0_9, %c0_10] : memref<4x128x128xbf16, #tpu.memory_space<vmem>>, vector<4x128x128xbf16>
    tpu.vector_store %arg4[%c0_8, %c0_9, %c0_10], %10 {strides = array<i32>} : memref<4x128x128xbf16, #tpu.memory_space<vmem>>, vector<4x128x128xbf16>,
    return
  }
  func.func @transform_0(%arg0: i32) -> (i32, i32, i32) {
    %c0_i32 = arith.constant 0 : i32
    %c0_i32_0 = arith.constant 0 : i32
    %c0_i32_1 = arith.constant 0 : i32
    return %c0_i32, %arg0, %c0_i32_0 : i32, i32, i32
  }
  func.func @transform_1(%arg0: i32) -> (i32, i32, i32) {
    %c0_i32 = arith.constant 0 : i32
    %c0_i32_0 = arith.constant 0 : i32
    %c0_i32_1 = arith.constant 0 : i32
    %c0_i32_2 = arith.constant 0 : i32
    return %c0_i32, %c0_i32_0, %c0_i32_1 : i32, i32, i32
  }
  func.func @transform_2(%arg0: i32) -> (i32, i32, i32) {
    %c0_i32 = arith.constant 0 : i32
    %c0_i32_0 = arith.constant 0 : i32
    %c0_i32_1 = arith.constant 0 : i32
    %c0_i32_2 = arith.constant 0 : i32
    return %c0_i32, %c0_i32_0, %c0_i32_1 : i32, i32, i32
  }
  func.func @transform_3(%arg0: i32) -> (i32, i32, i32) {
    %c0_i32 = arith.constant 0 : i32
    %c0_i32_0 = arith.constant 0 : i32
    %c0_i32_1 = arith.constant 0 : i32
    return %c0_i32, %arg0, %c0_i32_0 : i32, i32, i32
  }
}

module attributes {stable_mosaic.version = 11 : i64} {
  func.func @_convmm_bn_kernel(%arg0: i32, %arg1: i32, %arg2: i32, %arg3: memref<1x256x512xbf16, #tpu.memory_space<vmem>>, %arg4: memref<1x512x128xbf16, #tpu.memory_space<vmem>>, %arg5: memref<1x256x128xbf16, #tpu.memory_space<vmem>>, %arg6: memref<1x1x2x128xf32, #tpu.memory_space<vmem>>, %arg7: memref<256x128xf32, #tpu.memory_space<vmem>>) attributes {dimension_semantics = [#tpu.dimension_semantics<parallel>, #tpu.dimension_semantics<parallel>, #tpu.dimension_semantics<arbitrary>], iteration_bounds = array<i64: 4, 2, 1>, scalar_prefetch = 0 : i64, scratch_operands = 1 : i64, tpu.core_type = #tpu.core_type<tc>, window_params = [{transform_indices = @transform_0, window_bounds = array<i64: 1, 256, 512>}, {transform_indices = @transform_1, window_bounds = array<i64: 1, 512, 128>}, {transform_indices = @transform_2, window_bounds = array<i64: 1, 256, 128>}, {transform_indices = @transform_3, window_bounds = array<i64: 1, 1, 2, 128>}]} {
    %c0_i32 = arith.constant 0 : i32
    %0 = arith.cmpi eq, %arg2, %c0_i32 : i32
    %1 = arith.extui %0 : i1 to i32
    %c0_i32_0 = arith.constant 0 : i32
    %2 = arith.cmpi ne, %1, %c0_i32_0 : i32
    scf.if %2 {
      %cst_11 = arith.constant 0.000000e+00 : f32
      %17 = vector.broadcast %cst_11 : f32 to vector<256x128xf32>
      %c0_12 = arith.constant 0 : index
      %c0_13 = arith.constant 0 : index
      %18 = vector.load %arg7[%c0_12, %c0_13] : memref<256x128xf32, #tpu.memory_space<vmem>>, vector<256x128xf32>
      tpu.vector_store %arg7[%c0_12, %c0_13], %17 {strides = array<i32>} : memref<256x128xf32, #tpu.memory_space<vmem>>, vector<256x128xf32>,
    } else {
    }
    %c512_i32 = arith.constant 512 : i32
    %3 = arith.muli %arg2, %c512_i32 : i32
    %4 = tpu.assume_multiple %3, 512 : i32
    %c0 = arith.constant 0 : index
    %c0_1 = arith.constant 0 : index
    %5 = vector.load %arg7[%c0, %c0_1] : memref<256x128xf32, #tpu.memory_space<vmem>>, vector<256x128xf32>
    %c0_2 = arith.constant 0 : index
    %c0_3 = arith.constant 0 : index
    %c0_4 = arith.constant 0 : index
    %6 = vector.load %arg3[%c0_2, %c0_3, %c0_4] : memref<1x256x512xbf16, #tpu.memory_space<vmem>>, vector<1x256x512xbf16>
    %7 = vector.shape_cast %6 : vector<1x256x512xbf16> to vector<256x512xbf16>
    %c0_5 = arith.constant 0 : index
    %8 = arith.index_cast %4 : i32 to index
    %c0_6 = arith.constant 0 : index
    %9 = vector.load %arg4[%c0_5, %8, %c0_6] : memref<1x512x128xbf16, #tpu.memory_space<vmem>>, vector<1x512x128xbf16>
    %10 = vector.shape_cast %9 : vector<1x512x128xbf16> to vector<512x128xbf16>
    %cst = arith.constant dense<0.000000e+00> : vector<256x128xf32>
    %11 = tpu.matmul %7, %10, %cst {dimension_numbers = #tpu.dot_dimension_numbers<[1], [0], [0], [1], [0, 0, 1, 1], [], []>} : vector<256x512xbf16>, vector<512x128xbf16>, vector<256x128xf32> -> vector<256x128xf32>
    %12 = arith.addf %5, %11 : vector<256x128xf32>
    %c0_7 = arith.constant 0 : index
    %c0_8 = arith.constant 0 : index
    %13 = vector.load %arg7[%c0_7, %c0_8] : memref<256x128xf32, #tpu.memory_space<vmem>>, vector<256x128xf32>
    tpu.vector_store %arg7[%c0_7, %c0_8], %12 {strides = array<i32>} : memref<256x128xf32, #tpu.memory_space<vmem>>, vector<256x128xf32>,
    %c0_i32_9 = arith.constant 0 : i32
    %14 = arith.cmpi eq, %arg2, %c0_i32_9 : i32
    %15 = arith.extui %14 : i1 to i32
    %c0_i32_10 = arith.constant 0 : i32
    %16 = arith.cmpi ne, %15, %c0_i32_10 : i32
    scf.if %16 {
      %c0_11 = arith.constant 0 : index
      %c0_12 = arith.constant 0 : index
      %17 = vector.load %arg7[%c0_11, %c0_12] : memref<256x128xf32, #tpu.memory_space<vmem>>, vector<256x128xf32>
      %18 = arith.truncf %17 : vector<256x128xf32> to vector<256x128xbf16>
      %c0_13 = arith.constant 0 : index
      %c0_14 = arith.constant 0 : index
      %c0_15 = arith.constant 0 : index
      %19 = vector.load %arg5[%c0_13, %c0_14, %c0_15] : memref<1x256x128xbf16, #tpu.memory_space<vmem>>, vector<1x256x128xbf16>
      %20 = vector.shape_cast %19 : vector<1x256x128xbf16> to vector<256x128xbf16>
      %21 = vector.shape_cast %18 : vector<256x128xbf16> to vector<1x256x128xbf16>
      tpu.vector_store %arg5[%c0_13, %c0_14, %c0_15], %21 {strides = array<i32>} : memref<1x256x128xbf16, #tpu.memory_space<vmem>>, vector<1x256x128xbf16>,
      %cst_16 = arith.constant dense<0.000000e+00> : vector<128xf32>
      %22 = vector.multi_reduction <add>, %17, %cst_16 [0] : vector<256x128xf32> to vector<128xf32>
      %23 = vector.shape_cast %22 : vector<128xf32> to vector<1x128xf32>
      %24 = arith.mulf %17, %17 : vector<256x128xf32>
      %cst_17 = arith.constant dense<0.000000e+00> : vector<128xf32>
      %25 = vector.multi_reduction <add>, %24, %cst_17 [0] : vector<256x128xf32> to vector<128xf32>
      %26 = vector.shape_cast %25 : vector<128xf32> to vector<1x128xf32>
      %27 = tpu.concatenate %23, %26 in 0 : vector<1x128xf32>, vector<1x128xf32> -> vector<2x128xf32>
      %c0_18 = arith.constant 0 : index
      %c0_19 = arith.constant 0 : index
      %c0_20 = arith.constant 0 : index
      %c0_21 = arith.constant 0 : index
      %28 = vector.load %arg6[%c0_18, %c0_19, %c0_20, %c0_21] : memref<1x1x2x128xf32, #tpu.memory_space<vmem>>, vector<1x1x2x128xf32>
      %29 = vector.shape_cast %28 : vector<1x1x2x128xf32> to vector<2x128xf32>
      %30 = vector.shape_cast %27 : vector<2x128xf32> to vector<1x1x2x128xf32>
      tpu.vector_store %arg6[%c0_18, %c0_19, %c0_20, %c0_21], %30 {strides = array<i32>} : memref<1x1x2x128xf32, #tpu.memory_space<vmem>>, vector<1x1x2x128xf32>,
    } else {
    }
    return
  }
  func.func @transform_0(%arg0: i32, %arg1: i32, %arg2: i32) -> (i32, i32, i32) {
    %c0_i32 = arith.constant 0 : i32
    return %arg0, %arg1, %arg2 : i32, i32, i32
  }
  func.func @transform_1(%arg0: i32, %arg1: i32, %arg2: i32) -> (i32, i32, i32) {
    %c0_i32 = arith.constant 0 : i32
    %c0_i32_0 = arith.constant 0 : i32
    %c0_i32_1 = arith.constant 0 : i32
    return %arg0, %c0_i32, %c0_i32_0 : i32, i32, i32
  }
  func.func @transform_2(%arg0: i32, %arg1: i32, %arg2: i32) -> (i32, i32, i32) {
    %c0_i32 = arith.constant 0 : i32
    %c0_i32_0 = arith.constant 0 : i32
    return %arg0, %arg1, %c0_i32 : i32, i32, i32
  }
  func.func @transform_3(%arg0: i32, %arg1: i32, %arg2: i32) -> (i32, i32, i32, i32) {
    %c0_i32 = arith.constant 0 : i32
    %c0_i32_0 = arith.constant 0 : i32
    %c0_i32_1 = arith.constant 0 : i32
    return %arg0, %arg1, %c0_i32, %c0_i32_0 : i32, i32, i32, i32
  }
}

module attributes {stable_mosaic.version = 11 : i64} {
  func.func @_bn_relu_kernel(%arg0: i32, %arg1: memref<4x512x128xbf16, #tpu.memory_space<vmem>>, %arg2: memref<1x1x128xf32, #tpu.memory_space<vmem>>, %arg3: memref<1x1x128xf32, #tpu.memory_space<vmem>>, %arg4: memref<4x512x128xbf16, #tpu.memory_space<vmem>>) attributes {dimension_semantics = [#tpu.dimension_semantics<parallel>], iteration_bounds = array<i64: 1>, scalar_prefetch = 0 : i64, scratch_operands = 0 : i64, tpu.core_type = #tpu.core_type<tc>, window_params = [{transform_indices = @transform_0, window_bounds = array<i64: 4, 512, 128>}, {pipeline_mode = #tpu.pipeline_mode<synchronous>, transform_indices = @transform_1, window_bounds = array<i64: 1, 1, 128>}, {pipeline_mode = #tpu.pipeline_mode<synchronous>, transform_indices = @transform_2, window_bounds = array<i64: 1, 1, 128>}, {transform_indices = @transform_3, window_bounds = array<i64: 4, 512, 128>}]} {
    %c0 = arith.constant 0 : index
    %c0_0 = arith.constant 0 : index
    %c0_1 = arith.constant 0 : index
    %0 = vector.load %arg1[%c0, %c0_0, %c0_1] : memref<4x512x128xbf16, #tpu.memory_space<vmem>>, vector<4x512x128xbf16>
    %1 = arith.extf %0 : vector<4x512x128xbf16> to vector<4x512x128xf32>
    %c0_2 = arith.constant 0 : index
    %c0_3 = arith.constant 0 : index
    %c0_4 = arith.constant 0 : index
    %2 = vector.load %arg2[%c0_2, %c0_3, %c0_4] : memref<1x1x128xf32, #tpu.memory_space<vmem>>, vector<1x1x128xf32>
    %3 = vector.broadcast %2 : vector<1x1x128xf32> to vector<4x512x128xf32>
    %4 = arith.mulf %1, %3 : vector<4x512x128xf32>
    %c0_5 = arith.constant 0 : index
    %c0_6 = arith.constant 0 : index
    %c0_7 = arith.constant 0 : index
    %5 = vector.load %arg3[%c0_5, %c0_6, %c0_7] : memref<1x1x128xf32, #tpu.memory_space<vmem>>, vector<1x1x128xf32>
    %6 = vector.broadcast %5 : vector<1x1x128xf32> to vector<4x512x128xf32>
    %7 = arith.addf %4, %6 : vector<4x512x128xf32>
    %cst = arith.constant 0.000000e+00 : f32
    %8 = vector.broadcast %cst : f32 to vector<4x512x128xf32>
    %9 = arith.maximumf %7, %8 : vector<4x512x128xf32>
    %10 = arith.truncf %9 : vector<4x512x128xf32> to vector<4x512x128xbf16>
    %c0_8 = arith.constant 0 : index
    %c0_9 = arith.constant 0 : index
    %c0_10 = arith.constant 0 : index
    %11 = vector.load %arg4[%c0_8, %c0_9, %c0_10] : memref<4x512x128xbf16, #tpu.memory_space<vmem>>, vector<4x512x128xbf16>
    tpu.vector_store %arg4[%c0_8, %c0_9, %c0_10], %10 {strides = array<i32>} : memref<4x512x128xbf16, #tpu.memory_space<vmem>>, vector<4x512x128xbf16>,
    return
  }
  func.func @transform_0(%arg0: i32) -> (i32, i32, i32) {
    %c0_i32 = arith.constant 0 : i32
    %c0_i32_0 = arith.constant 0 : i32
    %c0_i32_1 = arith.constant 0 : i32
    return %c0_i32, %arg0, %c0_i32_0 : i32, i32, i32
  }
  func.func @transform_1(%arg0: i32) -> (i32, i32, i32) {
    %c0_i32 = arith.constant 0 : i32
    %c0_i32_0 = arith.constant 0 : i32
    %c0_i32_1 = arith.constant 0 : i32
    %c0_i32_2 = arith.constant 0 : i32
    return %c0_i32, %c0_i32_0, %c0_i32_1 : i32, i32, i32
  }
  func.func @transform_2(%arg0: i32) -> (i32, i32, i32) {
    %c0_i32 = arith.constant 0 : i32
    %c0_i32_0 = arith.constant 0 : i32
    %c0_i32_1 = arith.constant 0 : i32
    %c0_i32_2 = arith.constant 0 : i32
    return %c0_i32, %c0_i32_0, %c0_i32_1 : i32, i32, i32
  }
  func.func @transform_3(%arg0: i32) -> (i32, i32, i32) {
    %c0_i32 = arith.constant 0 : i32
    %c0_i32_0 = arith.constant 0 : i32
    %c0_i32_1 = arith.constant 0 : i32
    return %c0_i32, %arg0, %c0_i32_0 : i32, i32, i32
  }
}

module attributes {stable_mosaic.version = 11 : i64} {
  func.func @_convmm_tanh_t_kernel(%arg0: i32, %arg1: i32, %arg2: memref<1x8x512xbf16, #tpu.memory_space<vmem>>, %arg3: memref<1x512x2048xbf16, #tpu.memory_space<vmem>>, %arg4: memref<1x8x2048xf32, #tpu.memory_space<vmem>>) attributes {dimension_semantics = [#tpu.dimension_semantics<parallel>, #tpu.dimension_semantics<parallel>], iteration_bounds = array<i64: 4, 1>, scalar_prefetch = 0 : i64, scratch_operands = 0 : i64, tpu.core_type = #tpu.core_type<tc>, window_params = [{transform_indices = @transform_0, window_bounds = array<i64: 1, 8, 512>}, {transform_indices = @transform_1, window_bounds = array<i64: 1, 512, 2048>}, {transform_indices = @transform_2, window_bounds = array<i64: 1, 8, 2048>}]} {
    %c0 = arith.constant 0 : index
    %c0_0 = arith.constant 0 : index
    %c0_1 = arith.constant 0 : index
    %0 = vector.load %arg2[%c0, %c0_0, %c0_1] : memref<1x8x512xbf16, #tpu.memory_space<vmem>>, vector<1x8x512xbf16>
    %1 = vector.shape_cast %0 : vector<1x8x512xbf16> to vector<8x512xbf16>
    %c0_2 = arith.constant 0 : index
    %c0_3 = arith.constant 0 : index
    %c0_4 = arith.constant 0 : index
    %2 = vector.load %arg3[%c0_2, %c0_3, %c0_4] : memref<1x512x2048xbf16, #tpu.memory_space<vmem>>, vector<1x512x2048xbf16>
    %3 = vector.shape_cast %2 : vector<1x512x2048xbf16> to vector<512x2048xbf16>
    %cst = arith.constant dense<0.000000e+00> : vector<8x2048xf32>
    %4 = tpu.matmul %1, %3, %cst {dimension_numbers = #tpu.dot_dimension_numbers<[1], [0], [0], [1], [0, 0, 1, 1], [], []>} : vector<8x512xbf16>, vector<512x2048xbf16>, vector<8x2048xf32> -> vector<8x2048xf32>
    %5 = math.tanh %4 : vector<8x2048xf32>
    %c0_5 = arith.constant 0 : index
    %c0_6 = arith.constant 0 : index
    %c0_7 = arith.constant 0 : index
    %6 = vector.load %arg4[%c0_5, %c0_6, %c0_7] : memref<1x8x2048xf32, #tpu.memory_space<vmem>>, vector<1x8x2048xf32>
    %7 = vector.shape_cast %6 : vector<1x8x2048xf32> to vector<8x2048xf32>
    %8 = vector.shape_cast %5 : vector<8x2048xf32> to vector<1x8x2048xf32>
    tpu.vector_store %arg4[%c0_5, %c0_6, %c0_7], %8 {strides = array<i32>} : memref<1x8x2048xf32, #tpu.memory_space<vmem>>, vector<1x8x2048xf32>,
    return
  }
  func.func @transform_0(%arg0: i32, %arg1: i32) -> (i32, i32, i32) {
    %c0_i32 = arith.constant 0 : i32
    %c0_i32_0 = arith.constant 0 : i32
    %c0_i32_1 = arith.constant 0 : i32
    return %arg0, %c0_i32, %c0_i32_0 : i32, i32, i32
  }
  func.func @transform_1(%arg0: i32, %arg1: i32) -> (i32, i32, i32) {
    %c0_i32 = arith.constant 0 : i32
    %c0_i32_0 = arith.constant 0 : i32
    return %arg0, %c0_i32, %arg1 : i32, i32, i32
  }
  func.func @transform_2(%arg0: i32, %arg1: i32) -> (i32, i32, i32) {
    %c0_i32 = arith.constant 0 : i32
    %c0_i32_0 = arith.constant 0 : i32
    return %arg0, %c0_i32, %arg1 : i32, i32, i32
  }
}

</mosaic_0001>

<bundles_post_ra>
// kernel: tile.19
= control target key start
LH: loop header
LB: loop body
LE: loop exit
PB: predicated region body
PF: predicated region fallthrough
CT: control target
= control target key end

     0   :  { %s28_s0 = inlined_call_operand.vmem [shape: f32[128], index: 0, kind: input, shape index: {}]   ;;  %s29_s1 = inlined_call_operand.vmem [shape: f32[16,128], index: 1, kind: output, shape index: {}]  }
   0x1   :  { %v4_v0 = vld [vmem:[%s28_s0] ss:$0 sm:$0xff] }
   0x2   :  { %5 = vst [vmem:[%s29_s1] sm:$0xff] %v4_v0  ;;  %8 = vst [vmem:[%s29_s1 + $0x8] sm:$0xff] %v4_v0 }

// kernel: squeeze.11
= control target key start
LH: loop header
LB: loop body
LE: loop exit
PB: predicated region body
PF: predicated region fallthrough
CT: control target
= control target key end

     0   :  { %v450_v51 = vmov 0.0   ;;  %s533_s0 = inlined_call_operand.vmem [shape: bf16[1,2,2048], index: 0, kind: input, shape index: {}]   ;;  %s534_s1 = inlined_call_operand.vmem [shape: bf16[2,4,4,128], index: 1, kind: output, shape index: {}]  }
   0x1   :  { %v427_v0 = vld [vmem:[%s533_s0 + $0xf] sm:$0x1]  ;;  %v428_v1 = vld [vmem:[%s533_s0 + $0xe] sm:$0x1]  ;;  %v429_v2 = vld [vmem:[%s533_s0 + $0xd] sm:$0x1] }
   0x2   :  { %v17_v3 = vunpack.c.l.bf16 %v427_v0  ;;  %v33_v4 = vunpack.c.l.bf16 %v428_v1  ;;  %v49_v5 = vunpack.c.l.bf16 %v429_v2  ;;  %v430_v6 = vld [vmem:[%s533_s0 + $0xc] sm:$0x1]  ;;  %v431_v7 = vld [vmem:[%s533_s0 + $0xb] sm:$0x1]  ;;  %v432_v8 = vld [vmem:[%s533_s0 + $0xa] sm:$0x1] }
   0x3   :  { %v65_v9 = vunpack.c.l.bf16 %v430_v6  ;;  %v81_v10 = vunpack.c.l.bf16 %v431_v7  ;;  %v97_v11 = vunpack.c.l.bf16 %v432_v8  ;;  %v433_v12 = vld [vmem:[%s533_s0 + $0x9] sm:$0x1]  ;;  %v434_v13 = vld [vmem:[%s533_s0 + $0x8] sm:$0x1]  ;;  %v435_v14 = vld [vmem:[%s533_s0 + $0x7] sm:$0x1] }
   0x4   :  { %20 = vst [vmem:[#allocation1 + $0x78] sm:$0x3] %v17_v3  ;;  %36 = vst [vmem:[#allocation1 + $0x70] sm:$0x3] %v33_v4  ;;  %v113_v15 = vunpack.c.l.bf16 %v433_v12  ;;  %v129_v16 = vunpack.c.l.bf16 %v434_v13  ;;  %v145_v17 = vunpack.c.l.bf16 %v435_v14  ;;  %v436_v18 = vld [vmem:[%s533_s0 + $0x6] sm:$0x1] }
   0x5   :  { %52 = vst [vmem:[#allocation1 + $0x68] sm:$0x3] %v49_v5  ;;  %v437_v19 = vld [vmem:[%s533_s0 + $0x5] sm:$0x1]  ;;  %v438_v20 = vld [vmem:[%s533_s0 + $0x4] sm:$0x1]  ;;  %v161_v21 = vunpack.c.l.bf16 %v436_v18 }
   0x6   :  { %68 = vst [vmem:[#allocation1 + $0x60] sm:$0x3] %v65_v9  ;;  %84 = vst [vmem:[#allocation1 + $0x58] sm:$0x3] %v81_v10  ;;  %v177_v22 = vunpack.c.l.bf16 %v437_v19  ;;  %v193_v23 = vunpack.c.l.bf16 %v438_v20  ;;  %v439_v24 = vld [vmem:[%s533_s0 + $0x3] sm:$0x1] }
   0x7   :  { %100 = vst [vmem:[#allocation1 + $0x50] sm:$0x3] %v97_v11  ;;  %v440_v25 = vld [vmem:[%s533_s0 + $0x2] sm:$0x1]  ;;  %v441_v26 = vld [vmem:[%s533_s0 + $0x1] sm:$0x1]  ;;  %v209_v27 = vunpack.c.l.bf16 %v439_v24 }
   0x8   :  { %116 = vst [vmem:[#allocation1 + $0x48] sm:$0x3] %v113_v15  ;;  %132 = vst [vmem:[#allocation1 + $0x40] sm:$0x3] %v129_v16  ;;  %v225_v28 = vunpack.c.l.bf16 %v440_v25  ;;  %v240_v29 = vunpack.c.l.bf16 %v441_v26  ;;  %v253_v30 = vld [vmem:[%s533_s0] sm:$0x1] }
   0x9   :  { %148 = vst [vmem:[#allocation1 + $0x38] sm:$0x3] %v145_v17  ;;  %164 = vst [vmem:[#allocation1 + $0x30] sm:$0x3] %v161_v21  ;;  %v254_v31 = vunpack.c.l.bf16 %v253_v30 }
   0xa   :  { %180 = vst [vmem:[#allocation1 + $0x28] sm:$0x3] %v177_v22  ;;  %196 = vst [vmem:[#allocation1 + $0x20] sm:$0x3] %v193_v23 }
   0xb   :  { %212 = vst [vmem:[#allocation1 + $0x18] sm:$0x3] %v209_v27  ;;  %228 = vst [vmem:[#allocation1 + $0x10] sm:$0x3] %v225_v28  ;;  %v340_v33 = vld [vmem:[#allocation1 + $0x70] sm:$0x3]  }
   0xc   :  { %243 = vst [vmem:[#allocation1 + $0x8] sm:$0x3] %v240_v29  ;;  %256 = vst [vmem:[#allocation1] sm:$0x3] %v254_v31  ;;  %v334_v32 = vld [vmem:[#allocation1 + $0x68] sm:$0x3]  }
   0xd   :  { %v346_v34 = vld [vmem:[#allocation1 + $0x78] sm:$0x3]   ;;  %v328_v37 = vld [vmem:[#allocation1 + $0x60] sm:$0x3]   ;;  %336 = vst [vmem:[#allocation0 + $0x19] sm:$0x1] %v334_v32  }
   0xe   :  { %v316_v35 = vld [vmem:[#allocation1 + $0x50] sm:$0x3]   ;;  %v322_v36 = vld [vmem:[#allocation1 + $0x58] sm:$0x3]   ;;  %338 = vst [vmem:[#allocation0 + $0x38] sm:$0x2] %v334_v32  }
   0xf   :  { %342 = vst [vmem:[#allocation0 + $0x1a] sm:$0x1] %v340_v33   ;;  %344 = vst [vmem:[#allocation0 + $0x39] sm:$0x2] %v340_v33   ;;  %v304_v39 = vld [vmem:[#allocation1 + $0x40] sm:$0x3]  }
  0x10   :  { %348 = vst [vmem:[#allocation0 + $0x1b] sm:$0x1] %v346_v34   ;;  %350 = vst [vmem:[#allocation0 + $0x3a] sm:$0x2] %v346_v34   ;;  %v298_v38 = vld [vmem:[#allocation1 + $0x38] sm:$0x3]  }
  0x11   :  { %v310_v40 = vld [vmem:[#allocation1 + $0x48] sm:$0x3]   ;;  %318 = vst [vmem:[#allocation0 + $0x12] sm:$0x1] %v316_v35   ;;  %320 = vst [vmem:[#allocation0 + $0x31] sm:$0x2] %v316_v35  }
  0x12   :  { %324 = vst [vmem:[#allocation0 + $0x13] sm:$0x1] %v322_v36   ;;  %326 = vst [vmem:[#allocation0 + $0x32] sm:$0x2] %v322_v36   ;;  %v280_v41 = vld [vmem:[#allocation1 + $0x20] sm:$0x3]  }
  0x13   :  { %330 = vst [vmem:[#allocation0 + $0x18] sm:$0x1] %v328_v37   ;;  %332 = vst [vmem:[#allocation0 + $0x37] sm:$0x2] %v328_v37   ;;  %v286_v42 = vld [vmem:[#allocation1 + $0x28] sm:$0x3]  }
  0x14   :  { %v292_v43 = vld [vmem:[#allocation1 + $0x30] sm:$0x3]   ;;  %300 = vst [vmem:[#allocation0 + $0xb] sm:$0x1] %v298_v38   ;;  %302 = vst [vmem:[#allocation0 + $0x2a] sm:$0x2] %v298_v38  }
  0x15   :  { %306 = vst [vmem:[#allocation0 + $0x10] sm:$0x1] %v304_v39   ;;  %308 = vst [vmem:[#allocation0 + $0x2f] sm:$0x2] %v304_v39   ;;  %v262_v44 = vld [vmem:[#allocation1 + $0x8] sm:$0x3]  }
  0x16   :  { %312 = vst [vmem:[#allocation0 + $0x11] sm:$0x1] %v310_v40   ;;  %314 = vst [vmem:[#allocation0 + $0x30] sm:$0x2] %v310_v40   ;;  %v268_v45 = vld [vmem:[#allocation1 + $0x10] sm:$0x3]  }
  0x17   :  { %v274_v46 = vld [vmem:[#allocation1 + $0x18] sm:$0x3]   ;;  %282 = vst [vmem:[#allocation0 + $0x8] sm:$0x1] %v280_v41   ;;  %284 = vst [vmem:[#allocation0 + $0x27] sm:$0x2] %v280_v41  }
  0x18   :  { %288 = vst [vmem:[#allocation0 + $0x9] sm:$0x1] %v286_v42   ;;  %290 = vst [vmem:[#allocation0 + $0x28] sm:$0x2] %v286_v42   ;;  %v257_v47 = vld [vmem:[#allocation1] sm:$0x3]  }
  0x19   :  { %294 = vst [vmem:[#allocation0 + $0xa] sm:$0x1] %v292_v43   ;;  %296 = vst [vmem:[#allocation0 + $0x29] sm:$0x2] %v292_v43  }
  0x1a   :  { %264 = vst [vmem:[#allocation0 + $0x1] sm:$0x1] %v262_v44   ;;  %266 = vst [vmem:[#allocation0 + $0x20] sm:$0x2] %v262_v44   ;;  %v373_v48 = vld [vmem:[#allocation0 + $0x18] sm:$0xf] }
  0x1b   :  { %270 = vst [vmem:[#allocation0 + $0x2] sm:$0x1] %v268_v45   ;;  %272 = vst [vmem:[#allocation0 + $0x21] sm:$0x2] %v268_v45   ;;  %v401_v49 = vld [vmem:[#allocation0 + $0x38] sm:$0xf]  ;;  %v374_v52 = vpack.c.bf16 %v450_v51, %v373_v48 }
  0x1c   :  { %276 = vst [vmem:[#allocation0 + $0x3] sm:$0x1] %v274_v46   ;;  %278 = vst [vmem:[#allocation0 + $0x22] sm:$0x2] %v274_v46   ;;  %v402_v54 = vpack.c.bf16 %v450_v51, %v401_v49 }
  0x1d   :  { %258 = vst [vmem:[#allocation0] sm:$0x1] %v257_v47   ;;  %260 = vst [vmem:[#allocation0 + $0x1f] sm:$0x2] %v257_v47   ;;  %v366_v50 = vld [vmem:[#allocation0 + $0x10] sm:$0xf] }
  0x1e   :  { %v394_v53 = vld [vmem:[#allocation0 + $0x30] sm:$0xf]  ;;  %v367_v56 = vpack.c.bf16 %v450_v51, %v366_v50  ;;  %444 = vst [vmem:[%s534_s1 + $0x6] sm:$0x3] %v374_v52  ;;  %448 = vst [vmem:[%s534_s1 + $0xe] sm:$0x3] %v402_v54 }
  0x1f   :  { %v395_v58 = vpack.c.bf16 %v450_v51, %v394_v53 }
  0x20   :  { %v360_v55 = vld [vmem:[#allocation0 + $0x8] sm:$0xf]  ;;  %443 = vst [vmem:[%s534_s1 + $0x4] sm:$0x3] %v367_v56 }
  0x21   :  { %v387_v57 = vld [vmem:[#allocation0 + $0x28] sm:$0xf]  ;;  %v361_v59 = vpack.c.bf16 %v450_v51, %v360_v55  ;;  %447 = vst [vmem:[%s534_s1 + $0xc] sm:$0x3] %v395_v58 }
  0x22   :  { %v388_v60 = vpack.c.bf16 %v450_v51, %v387_v57 }
  0x23   :  { %442 = vst [vmem:[%s534_s1 + $0x2] sm:$0x3] %v361_v59 }
  0x24   :  { %v355_v61 = vld [vmem:[#allocation0] sm:$0xf]  ;;  %446 = vst [vmem:[%s534_s1 + $0xa] sm:$0x3] %v388_v60 }
  0x25   :  { %v380_v62 = vld [vmem:[#allocation0 + $0x20] sm:$0xf]  ;;  %v356_v63 = vpack.c.bf16 %v450_v51, %v355_v61 }
  0x26   :  { %v381_v0 = vpack.c.bf16 %v450_v51, %v380_v62 }
  0x27   :  { %358 = vst [vmem:[%s534_s1] sm:$0x3] %v356_v63 }
  0x28   :  { %445 = vst [vmem:[%s534_s1 + $0x8] sm:$0x3] %v381_v0 }

// kernel: _lambda_.10
= control target key start
LH: loop header
LB: loop body
LE: loop exit
PB: predicated region body
PF: predicated region fallthrough
CT: control target
= control target key end

     0   :  { %v66_v0 = vlaneseq  ;;  %s772_s0 = inlined_call_operand.vmem [shape: bf16[1,16,2048], index: 0, kind: input, shape index: {}]   ;;  %s773_s1 = inlined_call_operand.vmem [shape: f32[1,1,2048], index: 1, kind: input, shape index: {}]   ;;  %s774_s2 = inlined_call_operand.vmem [shape: f32[1,1,2048], index: 2, kind: input, shape index: {}]   ;;  %s775_s3 = inlined_call_operand.vmem [shape: bf16[1,16,2048], index: 3, kind: output, shape index: {}]  }
   0x1   :  { %v14_v1 = vld [vmem:[%s772_s0] sm:$0xff]  ;;  %v15_v5 = vld [vmem:[%s772_s0 + $0x8] sm:$0xff]  ;;  %v16_v6 = vld [vmem:[%s772_s0 + $0x10] sm:$0xff] }
   0x2   :  { %v30_v2 = vunpack.c.l.bf16 %v14_v1  ;;  %v31_v3 = vunpack.c.h.bf16 %v14_v1  ;;  %v67_v4 = vshrl.u32 %v66_v0, 7  ;;  %v17_v7 = vld [vmem:[%s772_s0 + $0x18] sm:$0xff]  ;;  %v62_v8 = vld [vmem:[%s773_s1] sm:$0xff]  ;;  %v32_v10 = vunpack.c.l.bf16 %v15_v5  ;;  %v63_v55 = vld [vmem:[%s773_s1 + $0x8] sm:$0xff] }
   0x3   :  { %v178_v9 = vld [vmem:[%s774_s2] sm:$0xff]  ;;  %v33_v11 = vunpack.c.h.bf16 %v15_v5  ;;  %v34_v12 = vunpack.c.l.bf16 %v16_v6  ;;  %v35_v13 = vunpack.c.h.bf16 %v16_v6  ;;  %v36_v20 = vunpack.c.l.bf16 %v17_v7  ;;  %v179_v60 = vld [vmem:[%s774_s2 + $0x8] sm:$0xff] }
   0x4   :  { %v68_v14 = vsub.s32 0, %v67_v4  ;;  %v512_v15 = vsub.s32 1, %v67_v4  ;;  %v514_v16 = vsub.s32 2, %v67_v4  ;;  %v516_v17 = vsub.s32 3, %v67_v4  ;;  %v18_v54 = vld [vmem:[%s772_s0 + $0x20] sm:$0xff]  ;;  %v19_v1 = vld [vmem:[%s772_s0 + $0x28] sm:$0xff] }
   0x5   :  { %v518_v18 = vsub.s32 4, %v67_v4  ;;  %v520_v19 = vsub.s32 5, %v67_v4  ;;  %v37_v21 = vunpack.c.h.bf16 %v17_v7  ;;  %v566_v44 = vsub.s32 6, %v67_v4 }
   0x6   :  { %v522_v22 = vrot.slane %v62_v8, %v68_v14  ;;  %v525_v23 = vrot.slane %v62_v8, %v512_v15  ;;  %v527_v24 = vrot.slane %v178_v9, %v68_v14  ;;  %v530_v25 = vrot.slane %v178_v9, %v512_v15 }
   0x7   :  { %v533_v26 = vrot.slane %v62_v8, %v514_v16  ;;  %v536_v27 = vrot.slane %v62_v8, %v516_v17  ;;  %v539_v28 = vrot.slane %v178_v9, %v514_v16  ;;  %v542_v29 = vrot.slane %v178_v9, %v516_v17 }
   0x8   :  { %v146_v30 = vmul.f32 %v522_v22, %v30_v2  ;;  %v147_v31 = vmul.f32 %v525_v23, %v31_v3  ;;  %v547_v32 = vrot.slane %v62_v8, %v518_v18  ;;  %v550_v33 = vrot.slane %v62_v8, %v520_v19 }
   0x9   :  { %v148_v34 = vmul.f32 %v533_v26, %v32_v10  ;;  %v149_v35 = vmul.f32 %v536_v27, %v33_v11  ;;  %v555_v36 = vrot.slane %v178_v9, %v518_v18  ;;  %v558_v37 = vrot.slane %v178_v9, %v520_v19 }
   0xa   :  { %v262_v38 = vadd.f32 %v527_v24, %v146_v30  ;;  %v263_v39 = vadd.f32 %v530_v25, %v147_v31  ;;  %v150_v40 = vmul.f32 %v547_v32, %v34_v12  ;;  %v151_v41 = vmul.f32 %v550_v33, %v35_v13 }
   0xb   :  { %v264_v42 = vadd.f32 %v539_v28, %v148_v34  ;;  %v265_v43 = vadd.f32 %v542_v29, %v149_v35  ;;  %v568_v45 = vsub.s32 7, %v67_v4  ;;  %v573_v52 = vrot.slane %v62_v8, %v566_v44 }
   0xc   :  { %v294_v46 = vmax.f32 %v262_v38, 0.0  ;;  %v295_v47 = vmax.f32 %v263_v39, 0.0  ;;  %v266_v48 = vadd.f32 %v555_v36, %v150_v40  ;;  %v267_v49 = vadd.f32 %v558_v37, %v151_v41 }
   0xd   :  { %v296_v50 = vmax.f32 %v264_v42, 0.0  ;;  %v297_v51 = vmax.f32 %v265_v43, 0.0  ;;  %v576_v53 = vrot.slane %v62_v8, %v568_v45  ;;  %v585_v59 = vrot.slane %v178_v9, %v566_v44  ;;  %v21_v43 = vld [vmem:[%s772_s0 + $0x38] sm:$0xff] }
   0xe   :  { %v458_v56 = vpack.c.bf16 %v295_v47, %v294_v46  ;;  %v298_v57 = vmax.f32 %v266_v48, 0.0  ;;  %v299_v58 = vmax.f32 %v267_v49, 0.0  ;;  %v152_v62 = vmul.f32 %v573_v52, %v36_v20  ;;  %v20_v20 = vld [vmem:[%s772_s0 + $0x30] sm:$0xff] }
   0xf   :  { %v459_v61 = vpack.c.bf16 %v297_v51, %v296_v50  ;;  %v153_v63 = vmul.f32 %v576_v53, %v37_v21  ;;  %v593_v0 = vrot.slane %v178_v9, %v568_v45  ;;  %v38_v3 = vunpack.c.l.bf16 %v18_v54 }
  0x10   :  { %422 = vst [vmem:[%s775_s3] sm:$0xff] %v458_v56  ;;  %v460_v2 = vpack.c.bf16 %v299_v58, %v298_v57  ;;  %v39_v4 = vunpack.c.h.bf16 %v18_v54  ;;  %v601_v5 = vrot.slane %v63_v55, %v68_v14  ;;  %v268_v6 = vadd.f32 %v585_v59, %v152_v62 }
  0x11   :  { %423 = vst [vmem:[%s775_s3 + $0x8] sm:$0xff] %v459_v61  ;;  %v269_v7 = vadd.f32 %v593_v0, %v153_v63  ;;  %v609_v8 = vrot.slane %v63_v55, %v512_v15  ;;  %v611_v9 = vrot.slane %v179_v60, %v68_v14  ;;  %v618_v11 = vrot.slane %v179_v60, %v512_v15  ;;  %v22_v61 = vld [vmem:[%s772_s0 + $0x40] sm:$0xff] }
  0x12   :  { %424 = vst [vmem:[%s775_s3 + $0x10] sm:$0xff] %v460_v2  ;;  %v154_v10 = vmul.f32 %v601_v5, %v38_v3  ;;  %v40_v12 = vunpack.c.l.bf16 %v19_v1  ;;  %v41_v13 = vunpack.c.h.bf16 %v19_v1  ;;  %v300_v21 = vmax.f32 %v268_v6, 0.0 }
  0x13   :  { %v301_v30 = vmax.f32 %v269_v7, 0.0  ;;  %v155_v14 = vmul.f32 %v609_v8, %v39_v4  ;;  %v625_v31 = vrot.slane %v63_v55, %v514_v16  ;;  %v629_v35 = vrot.slane %v63_v55, %v516_v17 }
  0x14   :  { %v270_v34 = vadd.f32 %v611_v9, %v154_v10  ;;  %v632_v15 = vrot.slane %v179_v60, %v514_v16  ;;  %v635_v38 = vrot.slane %v179_v60, %v516_v17  ;;  %v42_v42 = vunpack.c.l.bf16 %v20_v20 }
  0x15   :  { %v461_v39 = vpack.c.bf16 %v301_v30, %v300_v21  ;;  %v271_v40 = vadd.f32 %v618_v11, %v155_v14  ;;  %v156_v41 = vmul.f32 %v625_v31, %v40_v12  ;;  %v157_v47 = vmul.f32 %v629_v35, %v41_v13 }
  0x16   :  { %v302_v46 = vmax.f32 %v270_v34, 0.0  ;;  %v43_v48 = vunpack.c.h.bf16 %v20_v20  ;;  %v644_v16 = vrot.slane %v63_v55, %v518_v18  ;;  %v651_v50 = vrot.slane %v63_v55, %v520_v19 }
  0x17   :  { %425 = vst [vmem:[%s775_s3 + $0x18] sm:$0xff] %v461_v39  ;;  %v303_v17 = vmax.f32 %v271_v40, 0.0  ;;  %v272_v49 = vadd.f32 %v632_v15, %v156_v41  ;;  %v654_v51 = vrot.slane %v179_v60, %v518_v18  ;;  %v273_v54 = vadd.f32 %v635_v38, %v157_v47 }
  0x18   :  { %v158_v56 = vmul.f32 %v644_v16, %v42_v42  ;;  %v659_v57 = vrot.slane %v179_v60, %v520_v19  ;;  %v44_v58 = vunpack.c.l.bf16 %v21_v43  ;;  %v159_v1 = vmul.f32 %v651_v50, %v43_v48  ;;  %v23_v19 = vld [vmem:[%s772_s0 + $0x48] sm:$0xff] }
  0x19   :  { %v462_v62 = vpack.c.bf16 %v303_v17, %v302_v46  ;;  %v304_v63 = vmax.f32 %v272_v49, 0.0  ;;  %v45_v2 = vunpack.c.h.bf16 %v21_v43  ;;  %v305_v3 = vmax.f32 %v273_v54, 0.0 }
  0x1a   :  { %v274_v18 = vadd.f32 %v654_v51, %v158_v56  ;;  %v667_v4 = vrot.slane %v63_v55, %v566_v44  ;;  %v670_v6 = vrot.slane %v63_v55, %v568_v45  ;;  %v275_v7 = vadd.f32 %v659_v57, %v159_v1  ;;  %v24_v55 = vld [vmem:[%s772_s0 + $0x50] sm:$0xff] }
  0x1b   :  { %426 = vst [vmem:[%s775_s3 + $0x20] sm:$0xff] %v462_v62  ;;  %v680_v10 = vrot.slane %v179_v60, %v566_v44  ;;  %v683_v12 = vrot.slane %v179_v60, %v568_v45  ;;  %v46_v13 = vunpack.c.l.bf16 %v22_v61  ;;  %v463_v20 = vpack.c.bf16 %v305_v3, %v304_v63 }
  0x1c   :  { %v306_v21 = vmax.f32 %v274_v18, 0.0  ;;  %v160_v30 = vmul.f32 %v667_v4, %v44_v58  ;;  %v161_v14 = vmul.f32 %v670_v6, %v45_v2  ;;  %v307_v34 = vmax.f32 %v275_v7, 0.0 }
  0x1d   :  { %v47_v39 = vunpack.c.h.bf16 %v22_v61  ;;  %v162_v40 = vmul.f32 %v522_v22, %v46_v13  ;;  %v48_v44 = vunpack.c.l.bf16 %v23_v19  ;;  %427 = vst [vmem:[%s775_s3 + $0x28] sm:$0xff] %v463_v20  ;;  %v49_v41 = vunpack.c.h.bf16 %v23_v19  ;;  %v25_v22 = vld [vmem:[%s772_s0 + $0x58] sm:$0xff]  ;;  %v26_v61 = vld [vmem:[%s772_s0 + $0x60] sm:$0xff]  ;;  %v28_v20 = vld [vmem:[%s772_s0 + $0x70] sm:$0xff] }
  0x1e   :  { %v276_v45 = vadd.f32 %v680_v10, %v160_v30  ;;  %v277_v60 = vadd.f32 %v683_v12, %v161_v14  ;;  %v50_v42 = vunpack.c.l.bf16 %v24_v55  ;;  %v464_v43 = vpack.c.bf16 %v307_v34, %v306_v21 }
  0x1f   :  { %v163_v46 = vmul.f32 %v525_v23, %v47_v39  ;;  %v278_v47 = vadd.f32 %v527_v24, %v162_v40  ;;  %v164_v48 = vmul.f32 %v533_v26, %v48_v44  ;;  %v165_v54 = vmul.f32 %v536_v27, %v49_v41  ;;  %v29_v40 = vld [vmem:[%s772_s0 + $0x78] sm:$0xff] }
  0x20   :  { %v308_v17 = vmax.f32 %v276_v45, 0.0  ;;  %v309_v49 = vmax.f32 %v277_v60, 0.0  ;;  %v51_v56 = vunpack.c.h.bf16 %v24_v55  ;;  %428 = vst [vmem:[%s775_s3 + $0x30] sm:$0xff] %v464_v43  ;;  %v166_v26 = vmul.f32 %v547_v32, %v50_v42 }
  0x21   :  { %v279_v58 = vadd.f32 %v530_v25, %v163_v46  ;;  %v310_v23 = vmax.f32 %v278_v47, 0.0  ;;  %v280_v24 = vadd.f32 %v539_v28, %v164_v48  ;;  %v281_v63 = vadd.f32 %v542_v29, %v165_v54  ;;  %v27_v29 = vld [vmem:[%s772_s0 + $0x68] sm:$0xff] }
  0x22   :  { %v465_v62 = vpack.c.bf16 %v309_v49, %v308_v17  ;;  %v167_v27 = vmul.f32 %v550_v33, %v51_v56  ;;  %v52_v1 = vunpack.c.l.bf16 %v25_v22  ;;  %v282_v18 = vadd.f32 %v555_v36, %v166_v26 }
  0x23   :  { %v311_v2 = vmax.f32 %v279_v58, 0.0  ;;  %v312_v3 = vmax.f32 %v280_v24, 0.0  ;;  %v53_v25 = vunpack.c.h.bf16 %v25_v22  ;;  %v313_v28 = vmax.f32 %v281_v63, 0.0 }
  0x24   :  { %429 = vst [vmem:[%s775_s3 + $0x38] sm:$0xff] %v465_v62  ;;  %v283_v32 = vadd.f32 %v558_v37, %v167_v27  ;;  %v168_v19 = vmul.f32 %v573_v52, %v52_v1  ;;  %v54_v7 = vunpack.c.l.bf16 %v26_v61  ;;  %v314_v13 = vmax.f32 %v282_v18, 0.0 }
  0x25   :  { %v466_v33 = vpack.c.bf16 %v311_v2, %v310_v23  ;;  %v169_v55 = vmul.f32 %v576_v53, %v53_v25  ;;  %v55_v36 = vunpack.c.h.bf16 %v26_v61  ;;  %v467_v21 = vpack.c.bf16 %v313_v28, %v312_v3 }
  0x26   :  { %v315_v30 = vmax.f32 %v283_v32, 0.0  ;;  %v284_v37 = vadd.f32 %v585_v59, %v168_v19  ;;  %v170_v52 = vmul.f32 %v601_v5, %v54_v7  ;;  %v56_v53 = vunpack.c.l.bf16 %v27_v29 }
  0x27   :  { %430 = vst [vmem:[%s775_s3 + $0x40] sm:$0xff] %v466_v33  ;;  %v285_v14 = vadd.f32 %v593_v0, %v169_v55  ;;  %v171_v34 = vmul.f32 %v609_v8, %v55_v36  ;;  %v57_v39 = vunpack.c.h.bf16 %v27_v29  ;;  %431 = vst [vmem:[%s775_s3 + $0x48] sm:$0xff] %v467_v21  ;;  %v58_v45 = vunpack.c.l.bf16 %v28_v20 }
  0x28   :  { %v468_v59 = vpack.c.bf16 %v315_v30, %v314_v13  ;;  %v316_v5 = vmax.f32 %v284_v37, 0.0  ;;  %v286_v44 = vadd.f32 %v611_v9, %v170_v52  ;;  %v172_v8 = vmul.f32 %v625_v31, %v56_v53 }
  0x29   :  { %v317_v60 = vmax.f32 %v285_v14, 0.0  ;;  %v287_v0 = vadd.f32 %v618_v11, %v171_v34  ;;  %v173_v41 = vmul.f32 %v629_v35, %v57_v39  ;;  %v59_v43 = vunpack.c.h.bf16 %v28_v20 }
  0x2a   :  { %432 = vst [vmem:[%s775_s3 + $0x50] sm:$0xff] %v468_v59  ;;  %v318_v42 = vmax.f32 %v286_v44, 0.0  ;;  %v174_v46 = vmul.f32 %v644_v16, %v58_v45  ;;  %v60_v47 = vunpack.c.l.bf16 %v29_v40  ;;  %v288_v9 = vadd.f32 %v632_v15, %v172_v8 }
  0x2b   :  { %v469_v48 = vpack.c.bf16 %v317_v60, %v316_v5  ;;  %v319_v22 = vmax.f32 %v287_v0, 0.0  ;;  %v289_v17 = vadd.f32 %v635_v38, %v173_v41  ;;  %v175_v11 = vmul.f32 %v651_v50, %v59_v43 }
  0x2c   :  { %v290_v31 = vadd.f32 %v654_v51, %v174_v46  ;;  %v61_v35 = vunpack.c.h.bf16 %v29_v40  ;;  %v176_v49 = vmul.f32 %v667_v4, %v60_v47  ;;  %v320_v16 = vmax.f32 %v288_v9, 0.0 }
  0x2d   :  { %433 = vst [vmem:[%s775_s3 + $0x58] sm:$0xff] %v469_v48  ;;  %v470_v54 = vpack.c.bf16 %v319_v22, %v318_v42  ;;  %v321_v56 = vmax.f32 %v289_v17, 0.0  ;;  %v291_v58 = vadd.f32 %v659_v57, %v175_v11 }
  0x2e   :  { %v322_v23 = vmax.f32 %v290_v31, 0.0  ;;  %v177_v15 = vmul.f32 %v670_v6, %v61_v35  ;;  %v292_v38 = vadd.f32 %v680_v10, %v176_v49 }
  0x2f   :  { %434 = vst [vmem:[%s775_s3 + $0x60] sm:$0xff] %v470_v54  ;;  %v471_v50 = vpack.c.bf16 %v321_v56, %v320_v16  ;;  %v323_v51 = vmax.f32 %v291_v58, 0.0 }
  0x30   :  { %v293_v4 = vadd.f32 %v683_v12, %v177_v15  ;;  %v324_v24 = vmax.f32 %v292_v38, 0.0 }
  0x31   :  { %435 = vst [vmem:[%s775_s3 + $0x68] sm:$0xff] %v471_v50  ;;  %v472_v26 = vpack.c.bf16 %v323_v51, %v322_v23 }
  0x32   :  { %v325_v57 = vmax.f32 %v293_v4, 0.0 }
  0x33   :  { %436 = vst [vmem:[%s775_s3 + $0x70] sm:$0xff] %v472_v26 }
  0x34   :  { %v473_v6 = vpack.c.bf16 %v325_v57, %v324_v24 }
  0x36   :  { %437 = vst [vmem:[%s775_s3 + $0x78] sm:$0xff] %v473_v6 }

// kernel: _lambda_.11
= control target key start
LH: loop header
LB: loop body
LE: loop exit
PB: predicated region body
PF: predicated region fallthrough
CT: control target
= control target key end

     0   :  { %s1150_s12 = smov 0   ;;  %s1152_s13 = smov 0   ;;  %s1229_s0 = inlined_call_operand.vmem [shape: bf16[4,32,512], index: 0, kind: input, shape index: {}]   ;;  %s1230_s1 = inlined_call_operand.vmem [shape: bf16[4,512,128], index: 1, kind: input, shape index: {}]   ;;  %s1231_s2 = inlined_call_operand.vmem [shape: bf16[4,32,128], index: 2, kind: output, shape index: {0}]   ;;  %s1232_s3 = inlined_call_operand.vmem [shape: f32[4,1,2,128], index: 3, kind: output, shape index: {1}]  }
   0x1   :  { %s1154_s14 = smov 0  }
   0x2 LB: > { %s33_s15 = sadd.s32 1, %s1124_s13  ;;  %p910_p0 = scmp.ge.s32.totalorder %s1128_s14, 1  ;;  %s1128_s14 = sphi %s1154_s14, %s14_s14   ;;  %s1124_s13 = sphi %s1152_s13, %s1234_s13   ;;  %s1120_s12 = sphi %s1150_s12, %s1233_s12  }
   0x3   : > { %p35_p1 = scmp.ge.s32.totalorder %s33_s15, 4  ;;  %p188_p2 = scmp.lt.s32.totalorder %s1128_s14, 5 }
   0x5   : > { %s1236_s15 = smov (%p35_p1, %s33_s15), 0  ;;  %p189_p3 = pnand %p910_p0, %p188_p2 }
   0x6   : > { %p239_p4 = scmp.lt.s32.totalorder (!%p189_p3), %s1120_s12, 3  ;;  %vm752_vm0 = vcmask (!%p189_p3), 1040384  }
   0x7   : > { %192 = sbr.rel (%p189_p3) target bundleno = 297 (0x129), region = 28 }
   0xe   : > { %s1238_s12 = smov (!%p239_p4, %s1120_s12), 3 }
   0xf   : > { %s965_s16 = sshll.u32 %s1238_s12, 8  ;;  %s964_s20 = sshll.u32 %s1238_s12, 6 }
  0x10   : > { %s1174_s19 = scalar_lea.vmem %s1230_s1, %s965_s16  ;;  %s250_s23 = scalar_lea.vmem %s1229_s0, %s964_s20 }
  0x11   : > { %v1062_v0 = vld [vmem:[%s1174_s19 + $0x40] sm:$0xff]   ;;  %v1066_v4 = vld [vmem:[%s1174_s19 + $0x48] sm:$0xff]   ;;  %v1070_v8 = vld [vmem:[%s1174_s19 + $0x50] sm:$0xff]   ;;  %s966_s24 = sshll.u32 %s1238_s12, 4  ;;  %s917_s28 = sshll.u32 %s1238_s12, 1 }
  0x12   : > { %v1063_v1 = vld [vmem:[%s1174_s19 + $0xc0] sm:$0xff]   ;;  %982 = vmatprep.subr.bf16.mxu0 %v1062_v0  ;;  %v1067_v5 = vld [vmem:[%s1174_s19 + $0xc8] sm:$0xff]   ;;  %v1071_v9 = vld [vmem:[%s1174_s19 + $0xd0] sm:$0xff]   ;;  %s266_s27 = scalar_lea.vmem %s1231_s2, %s966_s24  ;;  %s274_s4 = scalar_lea.vmem %s1232_s3, %s917_s28 }
  0x13   : > { %v1064_v2 = vld [vmem:[%s1174_s19] sm:$0xff]   ;;  %1010 = vmatprep.subr.bf16.mxu1 %v1063_v1  ;;  %v1068_v6 = vld [vmem:[%s1174_s19 + $0x8] sm:$0xff]   ;;  %v1072_v10 = vld [vmem:[%s1174_s19 + $0x10] sm:$0xff]  }
  0x14   : > { %v1065_v3 = vld [vmem:[%s1174_s19 + $0x80] sm:$0xff]   ;;  %983 = vmatpush3.bf16.msra.mxu0 %v1064_v2  ;;  %v1069_v7 = vld [vmem:[%s1174_s19 + $0x88] sm:$0xff]   ;;  %v1073_v11 = vld [vmem:[%s1174_s19 + $0x90] sm:$0xff]  }
  0x15   : > { %1011 = vmatpush3.bf16.msra.mxu1 %v1065_v3  ;;  %984 = vmatprep.subr.bf16.mxu0 %v1066_v4  ;;  %v1074_v12 = vld [vmem:[%s1174_s19 + $0x58] sm:$0xff]   ;;  %v1078_v16 = vld [vmem:[%s1174_s19 + $0x60] sm:$0xff]   ;;  %v1082_v20 = vld [vmem:[%s1174_s19 + $0x68] sm:$0xff]  }
  0x16   : > { %1012 = vmatprep.subr.bf16.mxu1 %v1067_v5  ;;  %v1075_v13 = vld [vmem:[%s1174_s19 + $0xd8] sm:$0xff]   ;;  %v1079_v17 = vld [vmem:[%s1174_s19 + $0xe0] sm:$0xff]   ;;  %v1083_v21 = vld [vmem:[%s1174_s19 + $0xe8] sm:$0xff]  }
  0x17   : > { %v1076_v14 = vld [vmem:[%s1174_s19 + $0x18] sm:$0xff]   ;;  %v1080_v18 = vld [vmem:[%s1174_s19 + $0x20] sm:$0xff]   ;;  %v1084_v22 = vld [vmem:[%s1174_s19 + $0x28] sm:$0xff]  }
  0x18   : > { %985 = vmatpush3.bf16.msra.mxu0 %v1068_v6  ;;  %v1077_v15 = vld [vmem:[%s1174_s19 + $0x98] sm:$0xff]   ;;  %v1081_v19 = vld [vmem:[%s1174_s19 + $0xa0] sm:$0xff]   ;;  %v1085_v23 = vld [vmem:[%s1174_s19 + $0xa8] sm:$0xff]  }
  0x19   : > { %1013 = vmatpush3.bf16.msra.mxu1 %v1069_v7  ;;  %986 = vmatprep.subr.bf16.mxu0 %v1070_v8  ;;  %v1086_v24 = vld [vmem:[%s1174_s19 + $0x70] sm:$0xff]   ;;  %v1090_v28 = vld [vmem:[%s1174_s19 + $0x78] sm:$0xff]  }
  0x1a   : > { %1014 = vmatprep.subr.bf16.mxu1 %v1071_v9  ;;  %v1087_v25 = vld [vmem:[%s1174_s19 + $0xf0] sm:$0xff]   ;;  %v1091_v29 = vld [vmem:[%s1174_s19 + $0xf8] sm:$0xff]  }
  0x1b   : > { %v1088_v26 = vld [vmem:[%s1174_s19 + $0x30] sm:$0xff]   ;;  %v1092_v30 = vld [vmem:[%s1174_s19 + $0x38] sm:$0xff]  }
  0x1c   : > { %987 = vmatpush3.bf16.msra.mxu0 %v1072_v10  ;;  %v1089_v27 = vld [vmem:[%s1174_s19 + $0xb0] sm:$0xff]   ;;  %v1093_v31 = vld [vmem:[%s1174_s19 + $0xb8] sm:$0xff]  }
  0x1d   : > { %1015 = vmatpush3.bf16.msra.mxu1 %v1073_v11  ;;  %988 = vmatprep.subr.bf16.mxu0 %v1074_v12  ;;  %v1094_v32 = vld [vmem:[%s250_s23] ss:$16 sps:$4 sm:$0xff]   ;;  %v1096_v33 = vld [vmem:[%s250_s23 + $0x4] ss:$16 sps:$4 sm:$0xff]   ;;  %v1097_v34 = vld [vmem:[%s250_s23 + $0x8] ss:$16 sps:$4 sm:$0xff]  }
  0x1e   : > { %1016 = vmatprep.subr.bf16.mxu1 %v1075_v13  ;;  %v1099_v35 = vld [vmem:[%s250_s23 + $0xc] ss:$16 sps:$4 sm:$0xff]   ;;  %629 = vmatprep.mubr.bf16.mxu0 %v1096_v33  ;;  %v1100_v36 = vld [vmem:[%s250_s23 + $0x24] ss:$16 sps:$4 sm:$0xff]   ;;  %v1104_v38 = vld [vmem:[%s250_s23 + $0x20] ss:$16 sps:$4 sm:$0xff]  }
  0x1f   : > { %678 = vmatprep.mubr.bf16.mxu1 %v1099_v35  ;;  %v1102_v37 = vld [vmem:[%s250_s23 + $0x2c] ss:$16 sps:$4 sm:$0xff]   ;;  %v1105_v39 = vld [vmem:[%s250_s23 + $0x28] ss:$16 sps:$4 sm:$0xff]  }
  0x20   : > { %989 = vmatpush3.bf16.msra.mxu0 %v1076_v14 }
  0x21   : > { %1017 = vmatpush3.bf16.msra.mxu1 %v1077_v15  ;;  %990 = vmatprep.subr.bf16.mxu0 %v1078_v16 }
  0x22   : > { %1018 = vmatprep.subr.bf16.mxu1 %v1079_v17 }
  0x24   : > { %991 = vmatpush3.bf16.msra.mxu0 %v1080_v18 }
  0x25   : > { %1019 = vmatpush3.bf16.msra.mxu1 %v1081_v19  ;;  %992 = vmatprep.subr.bf16.mxu0 %v1082_v20 }
  0x26   : > { %1020 = vmatprep.subr.bf16.mxu1 %v1083_v21 }
  0x28   : > { %993 = vmatpush3.bf16.msra.mxu0 %v1084_v22 }
  0x29   : > { %1021 = vmatpush3.bf16.msra.mxu1 %v1085_v23  ;;  %994 = vmatprep.subr.bf16.mxu0 %v1086_v24 }
  0x2a   : > { %1022 = vmatprep.subr.bf16.mxu1 %v1087_v25 }
  0x2c   : > { %995 = vmatpush3.bf16.msra.mxu0 %v1088_v26 }
  0x2d   : > { %1023 = vmatpush3.bf16.msra.mxu1 %v1089_v27  ;;  %996 = vmatprep.subr.bf16.mxu0 %v1090_v28 }
  0x2e   : > { %1024 = vmatprep.subr.bf16.mxu1 %v1091_v29 }
  0x30   : > { %997 = vmatpush3.bf16.msra.mxu0 %v1092_v30 }
  0x31   : > { %1025 = vmatpush3.bf16.msra.mxu1 %v1093_v31 }
  0x33   : > { %630 = vmatmul.mubr.bf16.vlgmr.msra.gmra.mrb[0].mxu0 %v1094_v32 }
  0x34   : > { %679 = vmatmul.mubr.bf16.vlgmr.msra.gmra.mrb[0].mxu1 %v1097_v34  ;;  %637 = vmatprep.mubr.bf16.mxu0 %v1100_v36 }
  0x35   : > { %686 = vmatprep.mubr.bf16.mxu1 %v1102_v37 }
  0x3b   : > { %638 = vmatmul.mubr.bf16.gmra.mrb[4].mxu0 %v1104_v38 }
  0x3c   : > { %687 = vmatmul.mubr.bf16.gmra.mrb[4].mxu1 %v1105_v39 }
 0x106   : > { %v998_v40 = vpop.f32.mrb[0].mxu0 }
 0x107   : > { %v1026_v41 = vpop.f32.mrb[0].mxu1  ;;  %v999_v42 = vpop.f32.mrb[1].mxu0 }
 0x108   : > { %v1000_v43 = vadd.f32 %v999_v42, %v998_v40  ;;  %v1027_v44 = vpop.f32.mrb[1].mxu1  ;;  %v1001_v45 = vpop.f32.mrb[2].mxu0 }
 0x109   : > { %v1028_v46 = vadd.f32 %v1027_v44, %v1026_v41  ;;  %v1029_v47 = vpop.f32.mrb[2].mxu1  ;;  %v1002_v48 = vpop.f32.mrb[3].mxu0 }
 0x10a   : > { %v1003_v49 = vadd.f32 %v1002_v48, %v1001_v45  ;;  %v1030_v50 = vpop.f32.mrb[3].mxu1 }
 0x10b   : > { %v681_v51 = vadd.f32 %v1028_v46, %v1000_v43  ;;  %v1031_v52 = vadd.f32 %v1030_v50, %v1029_v47 }
 0x10d   : > { %v684_v53 = vadd.f32 %v1031_v52, %v1003_v49  ;;  %v739_v55 = vmul.f32 %v681_v51, %v681_v51 }
 0x10e   : > { %v1004_v54 = vpop.f32.mrb[4].mxu0 }
 0x10f   : > { %v974_v56 = vpack.c.bf16 %v684_v53, %v681_v51  ;;  %v730_v57 = vadd.f32 %v684_v53, %v681_v51  ;;  %v740_v58 = vmul.f32 %v684_v53, %v684_v53  ;;  %v1032_v59 = vpop.f32.mrb[4].mxu1  ;;  %v1005_v60 = vpop.f32.mrb[5].mxu0 }
 0x110   : > { %v1006_v61 = vadd.f32 %v1005_v60, %v1004_v54  ;;  %v1033_v62 = vpop.f32.mrb[5].mxu1  ;;  %v1007_v63 = vpop.f32.mrb[6].mxu0 }
 0x111   : > { %975 = vst [vmem:[%s266_s27] sm:$0xff] %v974_v56   ;;  %v743_v0 = vadd.f32 %v740_v58, %v739_v55  ;;  %v1034_v1 = vadd.f32 %v1033_v62, %v1032_v59  ;;  %v1035_v2 = vpop.f32.mrb[6].mxu1  ;;  %v1008_v3 = vpop.f32.mrb[7].mxu0 }
 0x112   : > { %v1009_v4 = vadd.f32 %v1008_v3, %v1007_v63  ;;  %v1036_v5 = vpop.f32.mrb[7].mxu1 }
 0x113   : > { %v689_v6 = vadd.f32 %v1034_v1, %v1006_v61  ;;  %v1037_v7 = vadd.f32 %v1036_v5, %v1035_v2 }
 0x115   : > { %v731_v8 = vadd.f32 %v730_v57, %v689_v6  ;;  %v741_v9 = vmul.f32 %v689_v6, %v689_v6  ;;  %v692_v10 = vadd.f32 %v1037_v7, %v1009_v4 }
 0x117   : > { %v744_v11 = vadd.f32 %v743_v0, %v741_v9  ;;  %v979_v12 = vpack.c.bf16 %v692_v10, %v689_v6  ;;  %v732_v13 = vadd.f32 %v731_v8, %v692_v10  ;;  %v742_v14 = vmul.f32 %v692_v10, %v692_v10 }
 0x119   : > { %981 = vst [vmem:[%s266_s27 + $0x8] sm:$0xff] %v979_v12   ;;  %v733_v15 = vrot.slane %v732_v13, 4  ;;  %v745_v16 = vadd.f32 %v744_v11, %v742_v14 }
 0x11b   : > { %v734_v17 = vadd.f32 %v733_v15, %v732_v13  ;;  %v746_v18 = vrot.slane %v745_v16, 4 }
 0x11d   : > { %v735_v19 = vrot.slane %v734_v17, 2  ;;  %v747_v20 = vadd.f32 %v746_v18, %v745_v16 }
 0x11f   : > { %v736_v21 = vadd.f32 %v735_v19, %v734_v17  ;;  %v748_v22 = vrot.slane %v747_v20, 2 }
 0x121   : > { %v737_v23 = vrot.slane %v736_v21, 1  ;;  %v749_v24 = vadd.f32 %v748_v22, %v747_v20 }
 0x123   : > { %v750_v25 = vrot.slane %v749_v24, 1  ;;  %v738_v26 = vadd.f32 %v737_v23, %v736_v21 }
 0x125   : > { %v751_v27 = vadd.f32 %v750_v25, %v749_v24 }
 0x127   : > { %v753_v28 = vsel %vm752_vm0, %v738_v26, %v751_v27 }
 0x128   : > { %754 = vst [vmem:[%s274_s4] sm:$0x3] %v753_v28 }
 0x129 PF: > { %s14_s14 = sadd.s32 1, %s1128_s14   ;;  %s1233_s12 = smov %s1124_s13 }
 0x12a   : > { %p11_p5 = scmp.ge.s32.totalorder %s14_s14, 6   ;;  %s1234_s13 = smov %s1236_s15 }
 0x12c   :  { %13 = sbr.rel (!%p11_p5) target bundleno = 2 (0x2), region = 82 }

// kernel: _lambda_.9
= control target key start
LH: loop header
LB: loop body
LE: loop exit
PB: predicated region body
PF: predicated region fallthrough
CT: control target
= control target key end

     0   :  { %v1958_v3 = vmov 0   ;;  %vm1675_vm0 = vcmask 1040384   ;;  %s2474_s1 = inlined_call_operand.vmem [shape: bf16[1,128,2048], index: 1, kind: input, shape index: {}]   ;;  %s2475_s0 = inlined_call_operand.vmem [shape: bf16[1,16,128], index: 0, kind: input, shape index: {}]   ;;  %s2476_s2 = inlined_call_operand.vmem [shape: bf16[1,16,2048], index: 2, kind: output, shape index: {0}]   ;;  %s2477_s3 = inlined_call_operand.vmem [shape: f32[1,1,2,2048], index: 3, kind: output, shape index: {1}]  }
   0x1   :  { %v90_v0 = vld [vmem:[%s2474_s1] sm:$0xff]  ;;  %v91_v2 = vld [vmem:[%s2474_s1 + $0x8] sm:$0xff]  ;;  %896 = vmatprep.mubr.bf16.mxu0 %v1958_v3  ;;  %939 = vmatprep.mubr.bf16.mxu1 %v1958_v3  ;;  %v92_v63 = vld [vmem:[%s2474_s1 + $0x10] sm:$0xff] }
   0x2   :  { %v98_v1 = vld [vmem:[%s2474_s1 + $0x40] sm:$0xff]  ;;  %v99_v5 = vld [vmem:[%s2474_s1 + $0x48] sm:$0xff] }
   0x3   :  { %v1796_v4 = vcombine.high %v90_v0, %v98_v1  ;;  %v1795_v6 = vcombine.low %v90_v0, %v98_v1  ;;  %v106_v7 = vld [vmem:[%s2474_s1 + $0x80] sm:$0xff]  ;;  %v1798_v9 = vcombine.high %v91_v2, %v99_v5  ;;  %v1797_v10 = vcombine.low %v91_v2, %v99_v5  ;;  %v107_v12 = vld [vmem:[%s2474_s1 + $0x88] sm:$0xff]  ;;  %v100_v0 = vld [vmem:[%s2474_s1 + $0x50] sm:$0xff] }
   0x4   :  { %v114_v8 = vld [vmem:[%s2474_s1 + $0xc0] sm:$0xff]  ;;  %v115_v13 = vld [vmem:[%s2474_s1 + $0xc8] sm:$0xff]  ;;  %v93_v1 = vld [vmem:[%s2474_s1 + $0x18] sm:$0xff] }
   0x5   :  { %v1812_v11 = vcombine.high %v106_v7, %v114_v8  ;;  %v122_v14 = vld [vmem:[%s2474_s1 + $0x100] sm:$0xff]  ;;  %864 = vmatprep.subr.bf16.mxu0 %v1796_v4  ;;  %v1814_v15 = vcombine.high %v107_v12, %v115_v13  ;;  %v123_v17 = vld [vmem:[%s2474_s1 + $0x108] sm:$0xff]  ;;  %907 = vmatprep.subr.bf16.mxu1 %v1798_v9  ;;  %v1811_v19 = vcombine.low %v106_v7, %v114_v8  ;;  %v101_v2 = vld [vmem:[%s2474_s1 + $0x58] sm:$0xff] }
   0x6   :  { %v130_v16 = vld [vmem:[%s2474_s1 + $0x140] sm:$0xff]  ;;  %v131_v18 = vld [vmem:[%s2474_s1 + $0x148] sm:$0xff]  ;;  %865 = vmatpush1.bf16.msra.mxu0 %v1795_v6  ;;  %908 = vmatpush1.bf16.msra.mxu1 %v1797_v10  ;;  %v1813_v20 = vcombine.low %v107_v12, %v115_v13  ;;  %v1800_v6 = vcombine.high %v92_v63, %v100_v0  ;;  %v1802_v7 = vcombine.high %v93_v1, %v101_v2  ;;  %v108_v8 = vld [vmem:[%s2474_s1 + $0x90] sm:$0xff] }
   0x7   :  { %866 = vmatprep.subr.bf16.mxu0 %v1812_v11  ;;  %v1828_v21 = vcombine.high %v122_v14, %v130_v16  ;;  %909 = vmatprep.subr.bf16.mxu1 %v1814_v15  ;;  %v1830_v22 = vcombine.high %v123_v17, %v131_v18  ;;  %v138_v23 = vld [vmem:[%s2474_s1 + $0x180] sm:$0xff]  ;;  %v139_v25 = vld [vmem:[%s2474_s1 + $0x188] sm:$0xff]  ;;  %v1827_v27 = vcombine.low %v122_v14, %v130_v16  ;;  %v116_v9 = vld [vmem:[%s2474_s1 + $0xd0] sm:$0xff] }
   0x8   :  { %v146_v24 = vld [vmem:[%s2474_s1 + $0x1c0] sm:$0xff]  ;;  %v147_v26 = vld [vmem:[%s2474_s1 + $0x1c8] sm:$0xff]  ;;  %v1829_v28 = vcombine.low %v123_v17, %v131_v18  ;;  %v109_v11 = vld [vmem:[%s2474_s1 + $0x98] sm:$0xff]  ;;  %v1799_v13 = vcombine.low %v92_v63, %v100_v0  ;;  %v1801_v14 = vcombine.low %v93_v1, %v101_v2  ;;  %v1816_v15 = vcombine.high %v108_v8, %v116_v9 }
   0x9   :  { %v1844_v29 = vcombine.high %v138_v23, %v146_v24  ;;  %v1846_v30 = vcombine.high %v139_v25, %v147_v26  ;;  %v154_v31 = vld [vmem:[%s2474_s1 + $0x200] sm:$0xff]  ;;  %v155_v33 = vld [vmem:[%s2474_s1 + $0x208] sm:$0xff]  ;;  %v1843_v35 = vcombine.low %v138_v23, %v146_v24  ;;  %v1845_v36 = vcombine.low %v139_v25, %v147_v26  ;;  %v117_v12 = vld [vmem:[%s2474_s1 + $0xd8] sm:$0xff] }
   0xa   :  { %867 = vmatpush1.bf16.msra.mxu0 %v1811_v19  ;;  %910 = vmatpush1.bf16.msra.mxu1 %v1813_v20  ;;  %v162_v32 = vld [vmem:[%s2474_s1 + $0x240] sm:$0xff]  ;;  %v163_v34 = vld [vmem:[%s2474_s1 + $0x248] sm:$0xff]  ;;  %v1818_v16 = vcombine.high %v109_v11, %v117_v12  ;;  %v124_v17 = vld [vmem:[%s2474_s1 + $0x110] sm:$0xff] }
   0xb   :  { %868 = vmatprep.subr.bf16.mxu0 %v1828_v21  ;;  %911 = vmatprep.subr.bf16.mxu1 %v1830_v22  ;;  %v1860_v37 = vcombine.high %v154_v31, %v162_v32  ;;  %v1862_v38 = vcombine.high %v155_v33, %v163_v34  ;;  %v170_v39 = vld [vmem:[%s2474_s1 + $0x280] sm:$0xff]  ;;  %v171_v41 = vld [vmem:[%s2474_s1 + $0x288] sm:$0xff]  ;;  %v1859_v43 = vcombine.low %v154_v31, %v162_v32  ;;  %v132_v18 = vld [vmem:[%s2474_s1 + $0x150] sm:$0xff] }
   0xc   :  { %v178_v40 = vld [vmem:[%s2474_s1 + $0x2c0] sm:$0xff]  ;;  %v179_v42 = vld [vmem:[%s2474_s1 + $0x2c8] sm:$0xff]  ;;  %v1861_v44 = vcombine.low %v155_v33, %v163_v34  ;;  %v125_v19 = vld [vmem:[%s2474_s1 + $0x118] sm:$0xff]  ;;  %v1815_v21 = vcombine.low %v108_v8, %v116_v9  ;;  %v1817_v22 = vcombine.low %v109_v11, %v117_v12  ;;  %v1832_v23 = vcombine.high %v124_v17, %v132_v18 }
   0xd   :  { %v1876_v45 = vcombine.high %v170_v39, %v178_v40  ;;  %v1878_v46 = vcombine.high %v171_v41, %v179_v42  ;;  %v186_v47 = vld [vmem:[%s2474_s1 + $0x300] sm:$0xff]  ;;  %v187_v49 = vld [vmem:[%s2474_s1 + $0x308] sm:$0xff]  ;;  %v1875_v51 = vcombine.low %v170_v39, %v178_v40  ;;  %v1877_v52 = vcombine.low %v171_v41, %v179_v42  ;;  %v133_v20 = vld [vmem:[%s2474_s1 + $0x158] sm:$0xff] }
   0xe   :  { %869 = vmatpush1.bf16.msra.mxu0 %v1827_v27  ;;  %912 = vmatpush1.bf16.msra.mxu1 %v1829_v28  ;;  %v194_v48 = vld [vmem:[%s2474_s1 + $0x340] sm:$0xff]  ;;  %v195_v50 = vld [vmem:[%s2474_s1 + $0x348] sm:$0xff]  ;;  %v1834_v24 = vcombine.high %v125_v19, %v133_v20  ;;  %v140_v25 = vld [vmem:[%s2474_s1 + $0x190] sm:$0xff] }
   0xf   :  { %870 = vmatprep.subr.bf16.mxu0 %v1844_v29  ;;  %913 = vmatprep.subr.bf16.mxu1 %v1846_v30  ;;  %v1892_v53 = vcombine.high %v186_v47, %v194_v48  ;;  %v1894_v54 = vcombine.high %v187_v49, %v195_v50  ;;  %v202_v55 = vld [vmem:[%s2474_s1 + $0x380] sm:$0xff]  ;;  %v203_v57 = vld [vmem:[%s2474_s1 + $0x388] sm:$0xff]  ;;  %v1891_v59 = vcombine.low %v186_v47, %v194_v48  ;;  %v148_v26 = vld [vmem:[%s2474_s1 + $0x1d0] sm:$0xff] }
  0x10   :  { %v210_v56 = vld [vmem:[%s2474_s1 + $0x3c0] sm:$0xff]  ;;  %v211_v58 = vld [vmem:[%s2474_s1 + $0x3c8] sm:$0xff]  ;;  %v1893_v60 = vcombine.low %v187_v49, %v195_v50  ;;  %v141_v27 = vld [vmem:[%s2474_s1 + $0x198] sm:$0xff]  ;;  %v1831_v29 = vcombine.low %v124_v17, %v132_v18  ;;  %v1833_v30 = vcombine.low %v125_v19, %v133_v20  ;;  %v1848_v31 = vcombine.high %v140_v25, %v148_v26 }
  0x11   :  { %v1908_v61 = vcombine.high %v202_v55, %v210_v56  ;;  %v1910_v62 = vcombine.high %v203_v57, %v211_v58  ;;  %v1907_v4 = vcombine.low %v202_v55, %v210_v56  ;;  %v1909_v5 = vcombine.low %v203_v57, %v211_v58  ;;  %v2099_v10 = vld [vmem:[%s2475_s0] sm:$0xff]   ;;  %v149_v28 = vld [vmem:[%s2474_s1 + $0x1d8] sm:$0xff]  ;;  %v156_v33 = vld [vmem:[%s2474_s1 + $0x210] sm:$0xff] }
  0x12   :  { %871 = vmatpush1.bf16.msra.mxu0 %v1843_v35  ;;  %914 = vmatpush1.bf16.msra.mxu1 %v1845_v36  ;;  %v1850_v32 = vcombine.high %v141_v27, %v149_v28  ;;  %v164_v34 = vld [vmem:[%s2474_s1 + $0x250] sm:$0xff]  ;;  %v157_v35 = vld [vmem:[%s2474_s1 + $0x218] sm:$0xff]  ;;  %v94_v1 = vld [vmem:[%s2474_s1 + $0x20] sm:$0xff] }
  0x13   :  { %872 = vmatprep.subr.bf16.mxu0 %v1860_v37  ;;  %915 = vmatprep.subr.bf16.mxu1 %v1862_v38  ;;  %v165_v36 = vld [vmem:[%s2474_s1 + $0x258] sm:$0xff]  ;;  %v1847_v37 = vcombine.low %v140_v25, %v148_v26  ;;  %v1849_v38 = vcombine.low %v141_v27, %v149_v28  ;;  %v1864_v39 = vcombine.high %v156_v33, %v164_v34  ;;  %v172_v41 = vld [vmem:[%s2474_s1 + $0x290] sm:$0xff]  ;;  %v102_v2 = vld [vmem:[%s2474_s1 + $0x60] sm:$0xff] }
  0x14   :  { %v1866_v40 = vcombine.high %v157_v35, %v165_v36  ;;  %v180_v42 = vld [vmem:[%s2474_s1 + $0x2d0] sm:$0xff]  ;;  %v1804_v8 = vcombine.high %v94_v1, %v102_v2  ;;  %v110_v11 = vld [vmem:[%s2474_s1 + $0xa0] sm:$0xff] }
  0x15   :  { %v1880_v47 = vcombine.high %v172_v41, %v180_v42  ;;  %v188_v49 = vld [vmem:[%s2474_s1 + $0x310] sm:$0xff]  ;;  %v118_v12 = vld [vmem:[%s2474_s1 + $0xe0] sm:$0xff] }
  0x16   :  { %873 = vmatpush1.bf16.msra.mxu0 %v1859_v43  ;;  %916 = vmatpush1.bf16.msra.mxu1 %v1861_v44  ;;  %v173_v43 = vld [vmem:[%s2474_s1 + $0x298] sm:$0xff]  ;;  %v196_v50 = vld [vmem:[%s2474_s1 + $0x350] sm:$0xff]  ;;  %v1820_v17 = vcombine.high %v110_v11, %v118_v12  ;;  %v126_v19 = vld [vmem:[%s2474_s1 + $0x120] sm:$0xff] }
  0x17   :  { %874 = vmatprep.subr.bf16.mxu0 %v1876_v45  ;;  %917 = vmatprep.subr.bf16.mxu1 %v1878_v46  ;;  %v181_v44 = vld [vmem:[%s2474_s1 + $0x2d8] sm:$0xff]  ;;  %v1863_v45 = vcombine.low %v156_v33, %v164_v34  ;;  %v1865_v46 = vcombine.low %v157_v35, %v165_v36  ;;  %v1896_v55 = vcombine.high %v188_v49, %v196_v50  ;;  %v204_v57 = vld [vmem:[%s2474_s1 + $0x390] sm:$0xff]  ;;  %v134_v20 = vld [vmem:[%s2474_s1 + $0x160] sm:$0xff] }
  0x18   :  { %v1882_v48 = vcombine.high %v173_v43, %v181_v44  ;;  %v212_v58 = vld [vmem:[%s2474_s1 + $0x3d0] sm:$0xff]  ;;  %v1836_v25 = vcombine.high %v126_v19, %v134_v20  ;;  %v142_v27 = vld [vmem:[%s2474_s1 + $0x1a0] sm:$0xff] }
  0x19   :  { %v1912_v63 = vcombine.high %v204_v57, %v212_v58  ;;  %v150_v28 = vld [vmem:[%s2474_s1 + $0x1e0] sm:$0xff] }
  0x1a   :  { %875 = vmatpush1.bf16.msra.mxu0 %v1875_v51  ;;  %918 = vmatpush1.bf16.msra.mxu1 %v1877_v52  ;;  %v189_v51 = vld [vmem:[%s2474_s1 + $0x318] sm:$0xff]  ;;  %v1852_v33 = vcombine.high %v142_v27, %v150_v28  ;;  %v158_v35 = vld [vmem:[%s2474_s1 + $0x220] sm:$0xff] }
  0x1b   :  { %876 = vmatprep.subr.bf16.mxu0 %v1892_v53  ;;  %919 = vmatprep.subr.bf16.mxu1 %v1894_v54  ;;  %v197_v52 = vld [vmem:[%s2474_s1 + $0x358] sm:$0xff]  ;;  %v1879_v53 = vcombine.low %v172_v41, %v180_v42  ;;  %v1881_v54 = vcombine.low %v173_v43, %v181_v44  ;;  %v166_v36 = vld [vmem:[%s2474_s1 + $0x260] sm:$0xff] }
  0x1c   :  { %v1898_v56 = vcombine.high %v189_v51, %v197_v52  ;;  %v1868_v41 = vcombine.high %v158_v35, %v166_v36  ;;  %v174_v43 = vld [vmem:[%s2474_s1 + $0x2a0] sm:$0xff] }
  0x1d   :  { %v182_v44 = vld [vmem:[%s2474_s1 + $0x2e0] sm:$0xff] }
  0x1e   :  { %877 = vmatpush1.bf16.msra.mxu0 %v1891_v59  ;;  %920 = vmatpush1.bf16.msra.mxu1 %v1893_v60  ;;  %v205_v59 = vld [vmem:[%s2474_s1 + $0x398] sm:$0xff] }
  0x1f   :  { %878 = vmatprep.subr.bf16.mxu0 %v1908_v61  ;;  %921 = vmatprep.subr.bf16.mxu1 %v1910_v62  ;;  %v213_v60 = vld [vmem:[%s2474_s1 + $0x3d8] sm:$0xff]  ;;  %v1895_v61 = vcombine.low %v188_v49, %v196_v50  ;;  %v1897_v62 = vcombine.low %v189_v51, %v197_v52  ;;  %v1884_v49 = vcombine.high %v174_v43, %v182_v44  ;;  %v190_v51 = vld [vmem:[%s2474_s1 + $0x320] sm:$0xff] }
  0x20   :  { %v1914_v0 = vcombine.high %v205_v59, %v213_v60  ;;  %v198_v52 = vld [vmem:[%s2474_s1 + $0x360] sm:$0xff] }
  0x22   :  { %879 = vmatpush1.bf16.msra.mxu0 %v1907_v4  ;;  %922 = vmatpush1.bf16.msra.mxu1 %v1909_v5  ;;  %v95_v4 = vld [vmem:[%s2474_s1 + $0x28] sm:$0xff] }
  0x23   :  { %950 = vmatprep.subr.bf16.mxu0 %v1800_v6  ;;  %993 = vmatprep.subr.bf16.mxu1 %v1802_v7  ;;  %v103_v5 = vld [vmem:[%s2474_s1 + $0x68] sm:$0xff]  ;;  %v1911_v6 = vcombine.low %v204_v57, %v212_v58  ;;  %v1913_v7 = vcombine.low %v205_v59, %v213_v60  ;;  %v1900_v57 = vcombine.high %v190_v51, %v198_v52  ;;  %v206_v59 = vld [vmem:[%s2474_s1 + $0x3a0] sm:$0xff] }
  0x24   :  { %v1806_v9 = vcombine.high %v95_v4, %v103_v5  ;;  %v214_v60 = vld [vmem:[%s2474_s1 + $0x3e0] sm:$0xff] }
  0x25   :  { %897 = vmatmul.mubr.bf16.vlgmr.msra.gmra.mrb[0].mxu0 %v2099_v10  ;;  %940 = vmatmul.mubr.bf16.vlgmr.msra.gmra.mrb[0].mxu1 %v2099_v10 }
  0x26   :  { %951 = vmatpush1.bf16.msra.mxu0 %v1799_v13  ;;  %994 = vmatpush1.bf16.msra.mxu1 %v1801_v14  ;;  %v111_v13 = vld [vmem:[%s2474_s1 + $0xa8] sm:$0xff] }
  0x27   :  { %952 = vmatprep.subr.bf16.mxu0 %v1816_v15  ;;  %995 = vmatprep.subr.bf16.mxu1 %v1818_v16  ;;  %v119_v14 = vld [vmem:[%s2474_s1 + $0xe8] sm:$0xff]  ;;  %v1803_v15 = vcombine.low %v94_v1, %v102_v2  ;;  %v1805_v16 = vcombine.low %v95_v4, %v103_v5  ;;  %v1916_v1 = vcombine.high %v206_v59, %v214_v60  ;;  %v96_v4 = vld [vmem:[%s2474_s1 + $0x30] sm:$0xff] }
  0x28   :  { %982 = vmatprep.mubr.bf16.mxu0 %v1958_v3  ;;  %1025 = vmatprep.mubr.bf16.mxu1 %v1958_v3  ;;  %v1822_v18 = vcombine.high %v111_v13, %v119_v14  ;;  %v104_v5 = vld [vmem:[%s2474_s1 + $0x70] sm:$0xff] }
  0x2a   :  { %953 = vmatpush1.bf16.msra.mxu0 %v1815_v21  ;;  %996 = vmatpush1.bf16.msra.mxu1 %v1817_v22  ;;  %v127_v21 = vld [vmem:[%s2474_s1 + $0x128] sm:$0xff] }
  0x2b   :  { %954 = vmatprep.subr.bf16.mxu0 %v1832_v23  ;;  %997 = vmatprep.subr.bf16.mxu1 %v1834_v24  ;;  %v135_v22 = vld [vmem:[%s2474_s1 + $0x168] sm:$0xff]  ;;  %v1819_v23 = vcombine.low %v110_v11, %v118_v12  ;;  %v1821_v24 = vcombine.low %v111_v13, %v119_v14  ;;  %v1808_v11 = vcombine.high %v96_v4, %v104_v5  ;;  %v112_v13 = vld [vmem:[%s2474_s1 + $0xb0] sm:$0xff] }
  0x2c   :  { %v1838_v26 = vcombine.high %v127_v21, %v135_v22  ;;  %v120_v14 = vld [vmem:[%s2474_s1 + $0xf0] sm:$0xff] }
  0x2e   :  { %955 = vmatpush1.bf16.msra.mxu0 %v1831_v29  ;;  %998 = vmatpush1.bf16.msra.mxu1 %v1833_v30  ;;  %v143_v29 = vld [vmem:[%s2474_s1 + $0x1a8] sm:$0xff] }
  0x2f   :  { %956 = vmatprep.subr.bf16.mxu0 %v1848_v31  ;;  %999 = vmatprep.subr.bf16.mxu1 %v1850_v32  ;;  %v151_v30 = vld [vmem:[%s2474_s1 + $0x1e8] sm:$0xff]  ;;  %v1835_v31 = vcombine.low %v126_v19, %v134_v20  ;;  %v1837_v32 = vcombine.low %v127_v21, %v135_v22  ;;  %v1824_v19 = vcombine.high %v112_v13, %v120_v14  ;;  %v128_v21 = vld [vmem:[%s2474_s1 + $0x130] sm:$0xff] }
  0x30   :  { %v1854_v34 = vcombine.high %v143_v29, %v151_v30  ;;  %v136_v22 = vld [vmem:[%s2474_s1 + $0x170] sm:$0xff] }
  0x32   :  { %957 = vmatpush1.bf16.msra.mxu0 %v1847_v37  ;;  %1000 = vmatpush1.bf16.msra.mxu1 %v1849_v38  ;;  %v159_v37 = vld [vmem:[%s2474_s1 + $0x228] sm:$0xff] }
  0x33   :  { %958 = vmatprep.subr.bf16.mxu0 %v1864_v39  ;;  %1001 = vmatprep.subr.bf16.mxu1 %v1866_v40  ;;  %v167_v38 = vld [vmem:[%s2474_s1 + $0x268] sm:$0xff]  ;;  %v1851_v39 = vcombine.low %v142_v27, %v150_v28  ;;  %v1853_v40 = vcombine.low %v143_v29, %v151_v30  ;;  %v1840_v27 = vcombine.high %v128_v21, %v136_v22  ;;  %v144_v29 = vld [vmem:[%s2474_s1 + $0x1b0] sm:$0xff] }
  0x34   :  { %v1870_v42 = vcombine.high %v159_v37, %v167_v38  ;;  %v152_v30 = vld [vmem:[%s2474_s1 + $0x1f0] sm:$0xff] }
  0x36   :  { %959 = vmatpush1.bf16.msra.mxu0 %v1863_v45  ;;  %1002 = vmatpush1.bf16.msra.mxu1 %v1865_v46  ;;  %v175_v45 = vld [vmem:[%s2474_s1 + $0x2a8] sm:$0xff] }
  0x37   :  { %960 = vmatprep.subr.bf16.mxu0 %v1880_v47  ;;  %1003 = vmatprep.subr.bf16.mxu1 %v1882_v48  ;;  %v183_v46 = vld [vmem:[%s2474_s1 + $0x2e8] sm:$0xff]  ;;  %v1867_v47 = vcombine.low %v158_v35, %v166_v36  ;;  %v1869_v48 = vcombine.low %v159_v37, %v167_v38  ;;  %v1856_v35 = vcombine.high %v144_v29, %v152_v30  ;;  %v160_v37 = vld [vmem:[%s2474_s1 + $0x230] sm:$0xff] }
  0x38   :  { %v1886_v50 = vcombine.high %v175_v45, %v183_v46  ;;  %v168_v38 = vld [vmem:[%s2474_s1 + $0x270] sm:$0xff] }
  0x3a   :  { %961 = vmatpush1.bf16.msra.mxu0 %v1879_v53  ;;  %1004 = vmatpush1.bf16.msra.mxu1 %v1881_v54  ;;  %v191_v53 = vld [vmem:[%s2474_s1 + $0x328] sm:$0xff] }
  0x3b   :  { %962 = vmatprep.subr.bf16.mxu0 %v1896_v55  ;;  %1005 = vmatprep.subr.bf16.mxu1 %v1898_v56  ;;  %v199_v54 = vld [vmem:[%s2474_s1 + $0x368] sm:$0xff]  ;;  %v1883_v55 = vcombine.low %v174_v43, %v182_v44  ;;  %v1885_v56 = vcombine.low %v175_v45, %v183_v46  ;;  %v176_v44 = vld [vmem:[%s2474_s1 + $0x2b0] sm:$0xff]  ;;  %v177_v46 = vld [vmem:[%s2474_s1 + $0x2b8] sm:$0xff] }
  0x3c   :  { %v1902_v58 = vcombine.high %v191_v53, %v199_v54  ;;  %v184_v45 = vld [vmem:[%s2474_s1 + $0x2f0] sm:$0xff] }
  0x3e   :  { %963 = vmatpush1.bf16.msra.mxu0 %v1895_v61  ;;  %1006 = vmatpush1.bf16.msra.mxu1 %v1897_v62  ;;  %v207_v61 = vld [vmem:[%s2474_s1 + $0x3a8] sm:$0xff] }
  0x3f   :  { %964 = vmatprep.subr.bf16.mxu0 %v1912_v63  ;;  %1007 = vmatprep.subr.bf16.mxu1 %v1914_v0  ;;  %v215_v62 = vld [vmem:[%s2474_s1 + $0x3e8] sm:$0xff]  ;;  %v1899_v63 = vcombine.low %v190_v51, %v198_v52  ;;  %v1901_v0 = vcombine.low %v191_v53, %v199_v54  ;;  %v192_v52 = vld [vmem:[%s2474_s1 + $0x330] sm:$0xff]  ;;  %v193_v54 = vld [vmem:[%s2474_s1 + $0x338] sm:$0xff] }
  0x40   :  { %v1918_v2 = vcombine.high %v207_v61, %v215_v62  ;;  %v200_v53 = vld [vmem:[%s2474_s1 + $0x370] sm:$0xff] }
  0x42   :  { %965 = vmatpush1.bf16.msra.mxu0 %v1911_v6  ;;  %1008 = vmatpush1.bf16.msra.mxu1 %v1913_v7  ;;  %v97_v6 = vld [vmem:[%s2474_s1 + $0x38] sm:$0xff] }
  0x43   :  { %1036 = vmatprep.subr.bf16.mxu0 %v1804_v8  ;;  %1079 = vmatprep.subr.bf16.mxu1 %v1806_v9  ;;  %v105_v7 = vld [vmem:[%s2474_s1 + $0x78] sm:$0xff]  ;;  %v1915_v8 = vcombine.low %v206_v59, %v214_v60  ;;  %v1917_v9 = vcombine.low %v207_v61, %v215_v62  ;;  %v208_v60 = vld [vmem:[%s2474_s1 + $0x3b0] sm:$0xff] }
  0x44   :  { %v1810_v12 = vcombine.high %v97_v6, %v105_v7  ;;  %v216_v61 = vld [vmem:[%s2474_s1 + $0x3f0] sm:$0xff]  ;;  %v209_v62 = vld [vmem:[%s2474_s1 + $0x3b8] sm:$0xff] }
  0x45   :  { %983 = vmatmul.mubr.bf16.vlgmr.msra.gmra.mrb[4].mxu0 %v2099_v10  ;;  %1026 = vmatmul.mubr.bf16.vlgmr.msra.gmra.mrb[4].mxu1 %v2099_v10 }
  0x46   :  { %1037 = vmatpush1.bf16.msra.mxu0 %v1803_v15  ;;  %1080 = vmatpush1.bf16.msra.mxu1 %v1805_v16  ;;  %v113_v15 = vld [vmem:[%s2474_s1 + $0xb8] sm:$0xff] }
  0x47   :  { %1038 = vmatprep.subr.bf16.mxu0 %v1820_v17  ;;  %1081 = vmatprep.subr.bf16.mxu1 %v1822_v18  ;;  %v121_v16 = vld [vmem:[%s2474_s1 + $0xf8] sm:$0xff]  ;;  %v1807_v17 = vcombine.low %v96_v4, %v104_v5  ;;  %v1809_v18 = vcombine.low %v97_v6, %v105_v7  ;;  %v1919_v5 = vcombine.low %v208_v60, %v216_v61 }
  0x48   :  { %1068 = vmatprep.mubr.bf16.mxu0 %v1958_v3  ;;  %1111 = vmatprep.mubr.bf16.mxu1 %v1958_v3  ;;  %v1826_v20 = vcombine.high %v113_v15, %v121_v16 }
  0x4a   :  { %1039 = vmatpush1.bf16.msra.mxu0 %v1819_v23  ;;  %1082 = vmatpush1.bf16.msra.mxu1 %v1821_v24  ;;  %v129_v23 = vld [vmem:[%s2474_s1 + $0x138] sm:$0xff] }
  0x4b   :  { %1040 = vmatprep.subr.bf16.mxu0 %v1836_v25  ;;  %1083 = vmatprep.subr.bf16.mxu1 %v1838_v26  ;;  %v137_v24 = vld [vmem:[%s2474_s1 + $0x178] sm:$0xff]  ;;  %v1823_v25 = vcombine.low %v112_v13, %v120_v14  ;;  %v1825_v26 = vcombine.low %v113_v15, %v121_v16 }
  0x4c   :  { %v1842_v28 = vcombine.high %v129_v23, %v137_v24 }
  0x4e   :  { %1041 = vmatpush1.bf16.msra.mxu0 %v1835_v31  ;;  %1084 = vmatpush1.bf16.msra.mxu1 %v1837_v32  ;;  %v145_v31 = vld [vmem:[%s2474_s1 + $0x1b8] sm:$0xff] }
  0x4f   :  { %1042 = vmatprep.subr.bf16.mxu0 %v1852_v33  ;;  %1085 = vmatprep.subr.bf16.mxu1 %v1854_v34  ;;  %v153_v32 = vld [vmem:[%s2474_s1 + $0x1f8] sm:$0xff]  ;;  %v1839_v33 = vcombine.low %v128_v21, %v136_v22  ;;  %v1841_v34 = vcombine.low %v129_v23, %v137_v24 }
  0x50   :  { %v1858_v36 = vcombine.high %v145_v31, %v153_v32 }
  0x52   :  { %1043 = vmatpush1.bf16.msra.mxu0 %v1851_v39  ;;  %1086 = vmatpush1.bf16.msra.mxu1 %v1853_v40  ;;  %v169_v39 = vld [vmem:[%s2474_s1 + $0x278] sm:$0xff]  ;;  %v1855_v40 = vcombine.low %v144_v29, %v152_v30 }
  0x53   :  { %1044 = vmatprep.subr.bf16.mxu0 %v1868_v41  ;;  %1087 = vmatprep.subr.bf16.mxu1 %v1870_v42  ;;  %v1857_v41 = vcombine.low %v145_v31, %v153_v32  ;;  %v1872_v42 = vcombine.high %v160_v37, %v168_v38 }
  0x56   :  { %1045 = vmatpush1.bf16.msra.mxu0 %v1867_v47  ;;  %1088 = vmatpush1.bf16.msra.mxu1 %v1869_v48  ;;  %v185_v47 = vld [vmem:[%s2474_s1 + $0x2f8] sm:$0xff]  ;;  %v1871_v48 = vcombine.low %v160_v37, %v168_v38 }
  0x57   :  { %1046 = vmatprep.subr.bf16.mxu0 %v1884_v49  ;;  %1089 = vmatprep.subr.bf16.mxu1 %v1886_v50  ;;  %v1888_v50 = vcombine.high %v176_v44, %v184_v45  ;;  %v1890_v51 = vcombine.high %v177_v46, %v185_v47 }
  0x5a   :  { %1047 = vmatpush1.bf16.msra.mxu0 %v1883_v55  ;;  %1090 = vmatpush1.bf16.msra.mxu1 %v1885_v56  ;;  %v201_v55 = vld [vmem:[%s2474_s1 + $0x378] sm:$0xff]  ;;  %v1887_v56 = vcombine.low %v176_v44, %v184_v45 }
  0x5b   :  { %1048 = vmatprep.subr.bf16.mxu0 %v1900_v57  ;;  %1091 = vmatprep.subr.bf16.mxu1 %v1902_v58  ;;  %v1889_v57 = vcombine.low %v177_v46, %v185_v47  ;;  %v1904_v58 = vcombine.high %v192_v52, %v200_v53  ;;  %v1906_v59 = vcombine.high %v193_v54, %v201_v55 }
  0x5e   :  { %1049 = vmatpush1.bf16.msra.mxu0 %v1899_v63  ;;  %1092 = vmatpush1.bf16.msra.mxu1 %v1901_v0  ;;  %v217_v63 = vld [vmem:[%s2474_s1 + $0x3f8] sm:$0xff]  ;;  %v1903_v0 = vcombine.low %v192_v52, %v200_v53 }
  0x5f   :  { %1050 = vmatprep.subr.bf16.mxu0 %v1916_v1  ;;  %1093 = vmatprep.subr.bf16.mxu1 %v1918_v2  ;;  %v1905_v1 = vcombine.low %v193_v54, %v201_v55  ;;  %v1920_v2 = vcombine.high %v208_v60, %v216_v61  ;;  %v1922_v4 = vcombine.high %v209_v62, %v217_v63 }
  0x60   :  { %v1921_v6 = vcombine.low %v209_v62, %v217_v63 }
  0x62   :  { %1051 = vmatpush1.bf16.msra.mxu0 %v1915_v8  ;;  %1094 = vmatpush1.bf16.msra.mxu1 %v1917_v9 }
  0x63   :  { %1122 = vmatprep.subr.bf16.mxu0 %v1808_v11  ;;  %1165 = vmatprep.subr.bf16.mxu1 %v1810_v12  ;;  %v1959_v12 = vmov 1983009808  }
  0x64   :  { %v2385_v13 = vunpack.c.l.s4 %v1959_v12 }
  0x65   :  { %1069 = vmatmul.mubr.bf16.vlgmr.msra.gmra.mrb[8].mxu0 %v2099_v10  ;;  %1112 = vmatmul.mubr.bf16.vlgmr.msra.gmra.mrb[8].mxu1 %v2099_v10 }
  0x66   :  { %1123 = vmatpush1.bf16.msra.mxu0 %v1807_v17  ;;  %1166 = vmatpush1.bf16.msra.mxu1 %v1809_v18  ;;  %v1712_v12 = vunpack.c.0.s8 %v2385_v13 }
  0x67   :  { %1124 = vmatprep.subr.bf16.mxu0 %v1824_v19  ;;  %1167 = vmatprep.subr.bf16.mxu1 %v1826_v20  ;;  %v1713_v19 = vlaneseq }
  0x68   :  { %1154 = vmatprep.mubr.bf16.mxu0 %v1958_v3  ;;  %1197 = vmatprep.mubr.bf16.mxu1 %v1958_v3  ;;  %v161_v3 = vld [vmem:[%s2474_s1 + $0x238] sm:$0xff] }
  0x69   :  { %v1874_v43 = vcombine.high %v161_v3, %v169_v39  ;;  %v1873_v49 = vcombine.low %v161_v3, %v169_v39 }
  0x6a   :  { %1125 = vmatpush1.bf16.msra.mxu0 %v1823_v25  ;;  %1168 = vmatpush1.bf16.msra.mxu1 %v1825_v26 }
  0x6b   :  { %1126 = vmatprep.subr.bf16.mxu0 %v1840_v27  ;;  %1169 = vmatprep.subr.bf16.mxu1 %v1842_v28 }
  0x6e   :  { %1127 = vmatpush1.bf16.msra.mxu0 %v1839_v33  ;;  %1170 = vmatpush1.bf16.msra.mxu1 %v1841_v34 }
  0x6f   :  { %1128 = vmatprep.subr.bf16.mxu0 %v1856_v35  ;;  %1171 = vmatprep.subr.bf16.mxu1 %v1858_v36 }
  0x72   :  { %1129 = vmatpush1.bf16.msra.mxu0 %v1855_v40  ;;  %1172 = vmatpush1.bf16.msra.mxu1 %v1857_v41 }
  0x73   :  { %1130 = vmatprep.subr.bf16.mxu0 %v1872_v42  ;;  %1173 = vmatprep.subr.bf16.mxu1 %v1874_v43 }
  0x76   :  { %1131 = vmatpush1.bf16.msra.mxu0 %v1871_v48  ;;  %1174 = vmatpush1.bf16.msra.mxu1 %v1873_v49 }
  0x77   :  { %1132 = vmatprep.subr.bf16.mxu0 %v1888_v50  ;;  %1175 = vmatprep.subr.bf16.mxu1 %v1890_v51 }
  0x7a   :  { %1133 = vmatpush1.bf16.msra.mxu0 %v1887_v56  ;;  %1176 = vmatpush1.bf16.msra.mxu1 %v1889_v57 }
  0x7b   :  { %1134 = vmatprep.subr.bf16.mxu0 %v1904_v58  ;;  %1177 = vmatprep.subr.bf16.mxu1 %v1906_v59 }
  0x7e   :  { %1135 = vmatpush1.bf16.msra.mxu0 %v1903_v0  ;;  %1178 = vmatpush1.bf16.msra.mxu1 %v1905_v1 }
  0x7f   :  { %1136 = vmatprep.subr.bf16.mxu0 %v1920_v2  ;;  %1179 = vmatprep.subr.bf16.mxu1 %v1922_v4 }
  0x82   :  { %1137 = vmatpush1.bf16.msra.mxu0 %v1919_v5  ;;  %1180 = vmatpush1.bf16.msra.mxu1 %v1921_v6 }
  0x85   :  { %1155 = vmatmul.mubr.bf16.vlgmr.msra.gmra.mrb[12].mxu0 %v2099_v10  ;;  %1198 = vmatmul.mubr.bf16.vlgmr.msra.gmra.mrb[12].mxu1 %v2099_v10 }
  0xf8   :  { %v898_v7 = vpop.f32.mrb[0].mxu0  ;;  %v941_v9 = vpop.f32.mrb[0].mxu1 }
  0xf9   :  { %v1531_v8 = vmul.f32 %v898_v7, %v898_v7  ;;  %v900_v11 = vpop.f32.mrb[1].mxu0  ;;  %v1533_v14 = vmul.f32 %v941_v9, %v941_v9  ;;  %v943_v17 = vpop.f32.mrb[1].mxu1 }
  0xfa   :  { %v1939_v15 = vpack.c.bf16 %v900_v11, %v898_v7  ;;  %v1532_v16 = vmul.f32 %v900_v11, %v900_v11  ;;  %v902_v18 = vpop.f32.mrb[2].mxu0  ;;  %v1940_v20 = vpack.c.bf16 %v943_v17, %v941_v9  ;;  %v1534_v21 = vmul.f32 %v943_v17, %v943_v17  ;;  %v945_v24 = vpop.f32.mrb[2].mxu1 }
  0xfb   :  { %v1419_v22 = vadd.f32 %v902_v18, %v898_v7  ;;  %v1547_v23 = vmul.f32 %v902_v18, %v902_v18  ;;  %v904_v25 = vpop.f32.mrb[3].mxu0  ;;  %v1433_v10 = vadd.f32 %v945_v24, %v941_v9  ;;  %v1549_v26 = vmul.f32 %v945_v24, %v945_v24  ;;  %v947_v29 = vpop.f32.mrb[3].mxu1 }
  0xfc   :  { %1403 = vst [vmem:[%s2476_s2] sm:$0xff] %v1939_v15  ;;  %v1947_v27 = vpack.c.bf16 %v904_v25, %v902_v18  ;;  %v1426_v28 = vadd.f32 %v904_v25, %v900_v11  ;;  %1404 = vst [vmem:[%s2476_s2 + $0x8] sm:$0xff] %v1940_v20  ;;  %v1548_v32 = vmul.f32 %v904_v25, %v904_v25 }
  0xfd   :  { %v1420_v30 = vrot.slane %v1419_v22, 4  ;;  %v1563_v31 = vadd.f32 %v1547_v23, %v1531_v8  ;;  %v1948_v33 = vpack.c.bf16 %v947_v29, %v945_v24  ;;  %v1434_v34 = vrot.slane %v1433_v10, 4 }
  0xfe   :  { %v1577_v35 = vadd.f32 %v1549_v26, %v1533_v14  ;;  %1411 = vst [vmem:[%s2476_s2 + $0x40] sm:$0xff] %v1947_v27  ;;  %v1427_v36 = vrot.slane %v1426_v28, 4  ;;  %v1440_v37 = vadd.f32 %v947_v29, %v943_v17  ;;  %v1570_v39 = vadd.f32 %v1548_v32, %v1532_v16 }
  0xff   :  { %v1421_v38 = vadd.f32 %v1420_v30, %v1419_v22  ;;  %v1564_v3 = vrot.slane %v1563_v31, 4  ;;  %1412 = vst [vmem:[%s2476_s2 + $0x48] sm:$0xff] %v1948_v33  ;;  %v1550_v40 = vmul.f32 %v947_v29, %v947_v29  ;;  %v1435_v41 = vadd.f32 %v1434_v34, %v1433_v10 }
 0x100   :  { %v1578_v42 = vrot.slane %v1577_v35, 4  ;;  %v1428_v43 = vadd.f32 %v1427_v36, %v1426_v28  ;;  %v1441_v44 = vrot.slane %v1440_v37, 4  ;;  %v1571_v47 = vrot.slane %v1570_v39, 4 }
 0x101   :  { %v1422_v45 = vrot.slane %v1421_v38, 2  ;;  %v1565_v46 = vadd.f32 %v1564_v3, %v1563_v31  ;;  %v1584_v48 = vadd.f32 %v1550_v40, %v1534_v21  ;;  %v1436_v49 = vrot.slane %v1435_v41, 2 }
 0x102   :  { %v1579_v50 = vadd.f32 %v1578_v42, %v1577_v35  ;;  %v1429_v51 = vrot.slane %v1428_v43, 2  ;;  %v1442_v52 = vadd.f32 %v1441_v44, %v1440_v37  ;;  %v1572_v55 = vadd.f32 %v1571_v47, %v1570_v39 }
 0x103   :  { %v1423_v53 = vadd.f32 %v1422_v45, %v1421_v38  ;;  %v1566_v54 = vrot.slane %v1565_v46, 2  ;;  %v1585_v56 = vrot.slane %v1584_v48, 4  ;;  %v1437_v57 = vadd.f32 %v1436_v49, %v1435_v41 }
 0x104   :  { %v1580_v58 = vrot.slane %v1579_v50, 2  ;;  %v1430_v59 = vadd.f32 %v1429_v51, %v1428_v43  ;;  %v1443_v60 = vrot.slane %v1442_v52, 2  ;;  %v1573_v63 = vrot.slane %v1572_v55, 2 }
 0x105   :  { %v1424_v61 = vrot.slane %v1423_v53, 1  ;;  %v1567_v62 = vadd.f32 %v1566_v54, %v1565_v46  ;;  %v1586_v0 = vadd.f32 %v1585_v56, %v1584_v48  ;;  %v1438_v1 = vrot.slane %v1437_v57, 1 }
 0x106   :  { %v1581_v2 = vadd.f32 %v1580_v58, %v1579_v50  ;;  %v1444_v4 = vadd.f32 %v1443_v60, %v1442_v52  ;;  %v1431_v6 = vrot.slane %v1430_v59, 1  ;;  %v1574_v7 = vadd.f32 %v1573_v63, %v1572_v55 }
 0x107   :  { %v1568_v5 = vrot.slane %v1567_v62, 1  ;;  %v1587_v8 = vrot.slane %v1586_v0, 2  ;;  %v1425_v9 = vadd.f32 %v1424_v61, %v1423_v53  ;;  %v1714_v14 = vshrl.u32 %v1713_v19, 7 }
 0x108   :  { %v1582_v11 = vrot.slane %v1581_v2, 1  ;;  %v1575_v16 = vrot.slane %v1574_v7, 1  ;;  %v1445_v17 = vrot.slane %v1444_v4, 1  ;;  %v1439_v20 = vadd.f32 %v1438_v1, %v1437_v57 }
 0x109   :  { %v1569_v15 = vadd.f32 %v1568_v5, %v1567_v62  ;;  %v1588_v18 = vadd.f32 %v1587_v8, %v1586_v0  ;;  %v1432_v23 = vadd.f32 %v1431_v6, %v1430_v59  ;;  %v2402_v26 = vsub.s32 %v1712_v12, %v1714_v14 }
 0x10a   :  { %v1583_v21 = vadd.f32 %v1582_v11, %v1581_v2  ;;  %v1576_v24 = vadd.f32 %v1575_v16, %v1574_v7  ;;  %v1446_v28 = vadd.f32 %v1445_v17, %v1444_v4 }
 0x10b   :  { %v1676_v22 = vsel %vm1675_vm0, %v1425_v9, %v1569_v15  ;;  %v1589_v25 = vrot.slane %v1588_v18, 1 }
 0x10c   :  { %v1678_v10 = vsel %vm1675_vm0, %v1439_v20, %v1583_v21  ;;  %v1677_v27 = vsel %vm1675_vm0, %v1432_v23, %v1576_v24 }
 0x10d   :  { %v1590_v13 = vadd.f32 %v1589_v25, %v1588_v18  ;;  %v1708_v19 = vcombine.low %v1676_v22, %v1677_v27 }
 0x10f   :  { %v1679_v29 = vsel %vm1675_vm0, %v1446_v28, %v1590_v13  ;;  %v1716_v30 = vrot.slane %v1708_v19, %v2402_v26 }
 0x110   :  { %v1709_v31 = vcombine.low %v1678_v10, %v1679_v29 }
 0x112   :  { %v1723_v32 = vrot.slane %v1709_v31, %v2402_v26 }
 0x114   :  { %v1724_v33 = vcombine.low %v1716_v30, %v1723_v32 }
 0x116   :  { %1780 = vst [vmem:[%s2477_s3] sm:$0xff] %v1724_v33 }
 0x118   :  { %v984_v34 = vpop.f32.mrb[4].mxu0  ;;  %v1027_v36 = vpop.f32.mrb[4].mxu1 }
 0x119   :  { %v1535_v35 = vmul.f32 %v984_v34, %v984_v34  ;;  %v986_v37 = vpop.f32.mrb[5].mxu0  ;;  %v1537_v38 = vmul.f32 %v1027_v36, %v1027_v36  ;;  %v1029_v40 = vpop.f32.mrb[5].mxu1 }
 0x11a   :  { %v1941_v3 = vpack.c.bf16 %v986_v37, %v984_v34  ;;  %v1536_v39 = vmul.f32 %v986_v37, %v986_v37  ;;  %v988_v41 = vpop.f32.mrb[6].mxu0  ;;  %v1942_v42 = vpack.c.bf16 %v1029_v40, %v1027_v36  ;;  %v1538_v43 = vmul.f32 %v1029_v40, %v1029_v40  ;;  %v1031_v46 = vpop.f32.mrb[6].mxu1 }
 0x11b   :  { %v1447_v44 = vadd.f32 %v988_v41, %v984_v34  ;;  %v1551_v45 = vmul.f32 %v988_v41, %v988_v41  ;;  %v990_v47 = vpop.f32.mrb[7].mxu0  ;;  %v1461_v48 = vadd.f32 %v1031_v46, %v1027_v36  ;;  %v1553_v49 = vmul.f32 %v1031_v46, %v1031_v46  ;;  %v1033_v52 = vpop.f32.mrb[7].mxu1 }
 0x11c   :  { %1405 = vst [vmem:[%s2476_s2 + $0x10] sm:$0xff] %v1941_v3  ;;  %v1949_v50 = vpack.c.bf16 %v990_v47, %v988_v41  ;;  %v1454_v51 = vadd.f32 %v990_v47, %v986_v37  ;;  %1406 = vst [vmem:[%s2476_s2 + $0x18] sm:$0xff] %v1942_v42  ;;  %v1552_v55 = vmul.f32 %v990_v47, %v990_v47 }
 0x11d   :  { %v1448_v53 = vrot.slane %v1447_v44, 4  ;;  %v1591_v54 = vadd.f32 %v1551_v45, %v1535_v35  ;;  %v1950_v56 = vpack.c.bf16 %v1033_v52, %v1031_v46  ;;  %v1462_v57 = vrot.slane %v1461_v48, 4 }
 0x11e   :  { %v1605_v58 = vadd.f32 %v1553_v49, %v1537_v38  ;;  %1413 = vst [vmem:[%s2476_s2 + $0x50] sm:$0xff] %v1949_v50  ;;  %v1455_v59 = vrot.slane %v1454_v51, 4  ;;  %v1468_v60 = vadd.f32 %v1033_v52, %v1029_v40  ;;  %v1598_v63 = vadd.f32 %v1552_v55, %v1536_v39 }
 0x11f   :  { %v1449_v61 = vadd.f32 %v1448_v53, %v1447_v44  ;;  %v1592_v62 = vrot.slane %v1591_v54, 4  ;;  %1414 = vst [vmem:[%s2476_s2 + $0x58] sm:$0xff] %v1950_v56  ;;  %v1554_v0 = vmul.f32 %v1033_v52, %v1033_v52  ;;  %v1463_v1 = vadd.f32 %v1462_v57, %v1461_v48 }
 0x120   :  { %v1606_v2 = vrot.slane %v1605_v58, 4  ;;  %v1456_v4 = vadd.f32 %v1455_v59, %v1454_v51  ;;  %v1469_v5 = vrot.slane %v1468_v60, 4  ;;  %v1599_v8 = vrot.slane %v1598_v63, 4 }
 0x121   :  { %v1450_v6 = vrot.slane %v1449_v61, 2  ;;  %v1593_v7 = vadd.f32 %v1592_v62, %v1591_v54  ;;  %v1612_v9 = vadd.f32 %v1554_v0, %v1538_v43  ;;  %v1464_v11 = vrot.slane %v1463_v1, 2 }
 0x122   :  { %v1607_v12 = vadd.f32 %v1606_v2, %v1605_v58  ;;  %v1457_v14 = vrot.slane %v1456_v4, 2  ;;  %v1470_v15 = vadd.f32 %v1469_v5, %v1468_v60  ;;  %v1600_v18 = vadd.f32 %v1599_v8, %v1598_v63 }
 0x123   :  { %v1451_v16 = vadd.f32 %v1450_v6, %v1449_v61  ;;  %v1594_v17 = vrot.slane %v1593_v7, 2  ;;  %v1613_v20 = vrot.slane %v1612_v9, 4  ;;  %v1465_v21 = vadd.f32 %v1464_v11, %v1463_v1 }
 0x124   :  { %v1608_v22 = vrot.slane %v1607_v12, 2  ;;  %v1458_v23 = vadd.f32 %v1457_v14, %v1456_v4  ;;  %v1471_v24 = vrot.slane %v1470_v15, 2  ;;  %v1601_v27 = vrot.slane %v1600_v18, 2 }
 0x125   :  { %v1452_v25 = vrot.slane %v1451_v16, 1  ;;  %v1595_v10 = vadd.f32 %v1594_v17, %v1593_v7  ;;  %v1614_v28 = vadd.f32 %v1613_v20, %v1612_v9  ;;  %v1466_v13 = vrot.slane %v1465_v21, 1 }
 0x126   :  { %v1609_v19 = vadd.f32 %v1608_v22, %v1607_v12  ;;  %v1472_v29 = vadd.f32 %v1471_v24, %v1470_v15  ;;  %v1459_v31 = vrot.slane %v1458_v23, 1  ;;  %v1602_v32 = vadd.f32 %v1601_v27, %v1600_v18 }
 0x127   :  { %v1596_v30 = vrot.slane %v1595_v10, 1  ;;  %v1615_v33 = vrot.slane %v1614_v28, 2  ;;  %v1453_v34 = vadd.f32 %v1452_v25, %v1451_v16  ;;  %v1467_v39 = vadd.f32 %v1466_v13, %v1465_v21 }
 0x128   :  { %v1610_v35 = vrot.slane %v1609_v19, 1  ;;  %v1603_v37 = vrot.slane %v1602_v32, 1  ;;  %v1473_v38 = vrot.slane %v1472_v29, 1  ;;  %v1460_v42 = vadd.f32 %v1459_v31, %v1458_v23 }
 0x129   :  { %v1597_v36 = vadd.f32 %v1596_v30, %v1595_v10  ;;  %v1616_v3 = vadd.f32 %v1615_v33, %v1614_v28 }
 0x12a   :  { %v1611_v40 = vadd.f32 %v1610_v35, %v1609_v19  ;;  %v1604_v43 = vadd.f32 %v1603_v37, %v1602_v32  ;;  %v1474_v47 = vadd.f32 %v1473_v38, %v1472_v29 }
 0x12b   :  { %v1680_v41 = vsel %vm1675_vm0, %v1453_v34, %v1597_v36  ;;  %v1617_v44 = vrot.slane %v1616_v3, 1 }
 0x12c   :  { %v1682_v45 = vsel %vm1675_vm0, %v1467_v39, %v1611_v40  ;;  %v1681_v46 = vsel %vm1675_vm0, %v1460_v42, %v1604_v43 }
 0x12d   :  { %v1618_v48 = vadd.f32 %v1617_v44, %v1616_v3  ;;  %v1725_v49 = vcombine.low %v1680_v41, %v1681_v46 }
 0x12f   :  { %v1683_v50 = vsel %vm1675_vm0, %v1474_v47, %v1618_v48  ;;  %v1733_v51 = vrot.slane %v1725_v49, %v2402_v26 }
 0x130   :  { %v1726_v52 = vcombine.low %v1682_v45, %v1683_v50 }
 0x132   :  { %v1740_v53 = vrot.slane %v1726_v52, %v2402_v26 }
 0x134   :  { %v1741_v54 = vcombine.low %v1733_v51, %v1740_v53 }
 0x136   :  { %1781 = vst [vmem:[%s2477_s3 + $0x8] sm:$0xff] %v1741_v54 }
 0x138   :  { %v1070_v55 = vpop.f32.mrb[8].mxu0  ;;  %v1113_v57 = vpop.f32.mrb[8].mxu1 }
 0x139   :  { %v1539_v56 = vmul.f32 %v1070_v55, %v1070_v55  ;;  %v1072_v58 = vpop.f32.mrb[9].mxu0  ;;  %v1541_v59 = vmul.f32 %v1113_v57, %v1113_v57  ;;  %v1115_v62 = vpop.f32.mrb[9].mxu1 }
 0x13a   :  { %v1943_v60 = vpack.c.bf16 %v1072_v58, %v1070_v55  ;;  %v1540_v61 = vmul.f32 %v1072_v58, %v1072_v58  ;;  %v1074_v63 = vpop.f32.mrb[10].mxu0  ;;  %v1944_v0 = vpack.c.bf16 %v1115_v62, %v1113_v57  ;;  %v1542_v1 = vmul.f32 %v1115_v62, %v1115_v62  ;;  %v1117_v5 = vpop.f32.mrb[10].mxu1 }
 0x13b   :  { %v1475_v2 = vadd.f32 %v1074_v63, %v1070_v55  ;;  %v1555_v4 = vmul.f32 %v1074_v63, %v1074_v63  ;;  %v1076_v6 = vpop.f32.mrb[11].mxu0  ;;  %v1489_v7 = vadd.f32 %v1117_v5, %v1113_v57  ;;  %v1557_v8 = vmul.f32 %v1117_v5, %v1117_v5  ;;  %v1119_v12 = vpop.f32.mrb[11].mxu1 }
 0x13c   :  { %1407 = vst [vmem:[%s2476_s2 + $0x20] sm:$0xff] %v1943_v60  ;;  %v1951_v9 = vpack.c.bf16 %v1076_v6, %v1074_v63  ;;  %v1482_v11 = vadd.f32 %v1076_v6, %v1072_v58  ;;  %1408 = vst [vmem:[%s2476_s2 + $0x28] sm:$0xff] %v1944_v0  ;;  %v1556_v16 = vmul.f32 %v1076_v6, %v1076_v6 }
 0x13d   :  { %v1476_v14 = vrot.slane %v1475_v2, 4  ;;  %v1619_v15 = vadd.f32 %v1555_v4, %v1539_v56  ;;  %v1952_v17 = vpack.c.bf16 %v1119_v12, %v1117_v5  ;;  %v1490_v18 = vrot.slane %v1489_v7, 4 }
 0x13e   :  { %v1633_v20 = vadd.f32 %v1557_v8, %v1541_v59  ;;  %1415 = vst [vmem:[%s2476_s2 + $0x60] sm:$0xff] %v1951_v9  ;;  %v1483_v21 = vrot.slane %v1482_v11, 4  ;;  %v1496_v22 = vadd.f32 %v1119_v12, %v1115_v62  ;;  %v1626_v25 = vadd.f32 %v1556_v16, %v1540_v61 }
 0x13f   :  { %v1477_v23 = vadd.f32 %v1476_v14, %v1475_v2  ;;  %v1620_v24 = vrot.slane %v1619_v15, 4  ;;  %1416 = vst [vmem:[%s2476_s2 + $0x68] sm:$0xff] %v1952_v17  ;;  %v1558_v10 = vmul.f32 %v1119_v12, %v1119_v12  ;;  %v1491_v27 = vadd.f32 %v1490_v18, %v1489_v7 }
 0x140   :  { %v1634_v28 = vrot.slane %v1633_v20, 4  ;;  %v1484_v13 = vadd.f32 %v1483_v21, %v1482_v11  ;;  %v1497_v19 = vrot.slane %v1496_v22, 4  ;;  %v1627_v31 = vrot.slane %v1626_v25, 4 }
 0x141   :  { %v1478_v29 = vrot.slane %v1477_v23, 2  ;;  %v1621_v30 = vadd.f32 %v1620_v24, %v1619_v15  ;;  %v1640_v32 = vadd.f32 %v1558_v10, %v1542_v1  ;;  %v1492_v33 = vrot.slane %v1491_v27, 2 }
 0x142   :  { %v1635_v34 = vadd.f32 %v1634_v28, %v1633_v20  ;;  %v1485_v35 = vrot.slane %v1484_v13, 2  ;;  %v1498_v36 = vadd.f32 %v1497_v19, %v1496_v22  ;;  %v1628_v3 = vadd.f32 %v1627_v31, %v1626_v25 }
 0x143   :  { %v1479_v37 = vadd.f32 %v1478_v29, %v1477_v23  ;;  %v1622_v38 = vrot.slane %v1621_v30, 2  ;;  %v1641_v39 = vrot.slane %v1640_v32, 4  ;;  %v1493_v40 = vadd.f32 %v1492_v33, %v1491_v27 }
 0x144   :  { %v1636_v41 = vrot.slane %v1635_v34, 2  ;;  %v1486_v42 = vadd.f32 %v1485_v35, %v1484_v13  ;;  %v1499_v43 = vrot.slane %v1498_v36, 2  ;;  %v1629_v46 = vrot.slane %v1628_v3, 2 }
 0x145   :  { %v1480_v44 = vrot.slane %v1479_v37, 1  ;;  %v1623_v45 = vadd.f32 %v1622_v38, %v1621_v30  ;;  %v1642_v47 = vadd.f32 %v1641_v39, %v1640_v32  ;;  %v1494_v48 = vrot.slane %v1493_v40, 1 }
 0x146   :  { %v1637_v49 = vadd.f32 %v1636_v41, %v1635_v34  ;;  %v1500_v50 = vadd.f32 %v1499_v43, %v1498_v36  ;;  %v1487_v52 = vrot.slane %v1486_v42, 1  ;;  %v1630_v53 = vadd.f32 %v1629_v46, %v1628_v3 }
 0x147   :  { %v1624_v51 = vrot.slane %v1623_v45, 1  ;;  %v1643_v54 = vrot.slane %v1642_v47, 2  ;;  %v1481_v55 = vadd.f32 %v1480_v44, %v1479_v37  ;;  %v1495_v61 = vadd.f32 %v1494_v48, %v1493_v40 }
 0x148   :  { %v1638_v56 = vrot.slane %v1637_v49, 1  ;;  %v1631_v58 = vrot.slane %v1630_v53, 1  ;;  %v1501_v59 = vrot.slane %v1500_v50, 1  ;;  %v1488_v0 = vadd.f32 %v1487_v52, %v1486_v42 }
 0x149   :  { %v1625_v57 = vadd.f32 %v1624_v51, %v1623_v45  ;;  %v1644_v60 = vadd.f32 %v1643_v54, %v1642_v47 }
 0x14a   :  { %v1639_v62 = vadd.f32 %v1638_v56, %v1637_v49  ;;  %v1632_v1 = vadd.f32 %v1631_v58, %v1630_v53  ;;  %v1502_v6 = vadd.f32 %v1501_v59, %v1500_v50 }
 0x14b   :  { %v1684_v63 = vsel %vm1675_vm0, %v1481_v55, %v1625_v57  ;;  %v1645_v2 = vrot.slane %v1644_v60, 1 }
 0x14c   :  { %v1686_v4 = vsel %vm1675_vm0, %v1495_v61, %v1639_v62  ;;  %v1685_v5 = vsel %vm1675_vm0, %v1488_v0, %v1632_v1 }
 0x14d   :  { %v1646_v7 = vadd.f32 %v1645_v2, %v1644_v60  ;;  %v1742_v8 = vcombine.low %v1684_v63, %v1685_v5 }
 0x14f   :  { %v1687_v9 = vsel %vm1675_vm0, %v1502_v6, %v1646_v7  ;;  %v1750_v11 = vrot.slane %v1742_v8, %v2402_v26 }
 0x150   :  { %v1743_v12 = vcombine.low %v1686_v4, %v1687_v9 }
 0x152   :  { %v1757_v14 = vrot.slane %v1743_v12, %v2402_v26 }
 0x154   :  { %v1758_v15 = vcombine.low %v1750_v11, %v1757_v14 }
 0x156   :  { %1782 = vst [vmem:[%s2477_s3 + $0x10] sm:$0xff] %v1758_v15 }
 0x158   :  { %v1156_v16 = vpop.f32.mrb[12].mxu0  ;;  %v1199_v17 = vpop.f32.mrb[12].mxu1 }
 0x159   :  { %v1158_v18 = vpop.f32.mrb[13].mxu0  ;;  %v1543_v20 = vmul.f32 %v1156_v16, %v1156_v16  ;;  %v1545_v21 = vmul.f32 %v1199_v17, %v1199_v17  ;;  %v1201_v24 = vpop.f32.mrb[13].mxu1 }
 0x15a   :  { %v1945_v22 = vpack.c.bf16 %v1158_v18, %v1156_v16  ;;  %v1544_v23 = vmul.f32 %v1158_v18, %v1158_v18  ;;  %v1160_v25 = vpop.f32.mrb[14].mxu0  ;;  %v1946_v10 = vpack.c.bf16 %v1201_v24, %v1199_v17  ;;  %v1546_v27 = vmul.f32 %v1201_v24, %v1201_v24  ;;  %v1203_v19 = vpop.f32.mrb[14].mxu1 }
 0x15b   :  { %v1503_v28 = vadd.f32 %v1160_v25, %v1156_v16  ;;  %v1559_v13 = vmul.f32 %v1160_v25, %v1160_v25  ;;  %v1162_v29 = vpop.f32.mrb[15].mxu0  ;;  %v1517_v30 = vadd.f32 %v1203_v19, %v1199_v17  ;;  %v1561_v31 = vmul.f32 %v1203_v19, %v1203_v19  ;;  %v1205_v34 = vpop.f32.mrb[15].mxu1 }
 0x15c   :  { %1409 = vst [vmem:[%s2476_s2 + $0x30] sm:$0xff] %v1945_v22  ;;  %v1953_v32 = vpack.c.bf16 %v1162_v29, %v1160_v25  ;;  %v1510_v33 = vadd.f32 %v1162_v29, %v1158_v18  ;;  %1410 = vst [vmem:[%s2476_s2 + $0x38] sm:$0xff] %v1946_v10  ;;  %v1560_v37 = vmul.f32 %v1162_v29, %v1162_v29 }
 0x15d   :  { %v1504_v35 = vrot.slane %v1503_v28, 4  ;;  %v1647_v36 = vadd.f32 %v1559_v13, %v1543_v20  ;;  %v1954_v38 = vpack.c.bf16 %v1205_v34, %v1203_v19  ;;  %v1518_v3 = vrot.slane %v1517_v30, 4 }
 0x15e   :  { %v1661_v39 = vadd.f32 %v1561_v31, %v1545_v21  ;;  %1417 = vst [vmem:[%s2476_s2 + $0x70] sm:$0xff] %v1953_v32  ;;  %v1511_v40 = vrot.slane %v1510_v33, 4  ;;  %v1524_v41 = vadd.f32 %v1205_v34, %v1201_v24  ;;  %v1654_v44 = vadd.f32 %v1560_v37, %v1544_v23 }
 0x15f   :  { %v1505_v42 = vadd.f32 %v1504_v35, %v1503_v28  ;;  %v1648_v43 = vrot.slane %v1647_v36, 4  ;;  %1418 = vst [vmem:[%s2476_s2 + $0x78] sm:$0xff] %v1954_v38  ;;  %v1562_v45 = vmul.f32 %v1205_v34, %v1205_v34  ;;  %v1519_v46 = vadd.f32 %v1518_v3, %v1517_v30 }
 0x160   :  { %v1662_v47 = vrot.slane %v1661_v39, 4  ;;  %v1512_v48 = vadd.f32 %v1511_v40, %v1510_v33  ;;  %v1525_v49 = vrot.slane %v1524_v41, 4  ;;  %v1655_v52 = vrot.slane %v1654_v44, 4 }
 0x161   :  { %v1506_v50 = vrot.slane %v1505_v42, 2  ;;  %v1649_v51 = vadd.f32 %v1648_v43, %v1647_v36  ;;  %v1668_v53 = vadd.f32 %v1562_v45, %v1546_v27  ;;  %v1520_v54 = vrot.slane %v1519_v46, 2 }
 0x162   :  { %v1663_v55 = vadd.f32 %v1662_v47, %v1661_v39  ;;  %v1513_v56 = vrot.slane %v1512_v48, 2  ;;  %v1526_v57 = vadd.f32 %v1525_v49, %v1524_v41  ;;  %v1656_v60 = vadd.f32 %v1655_v52, %v1654_v44 }
 0x163   :  { %v1507_v58 = vadd.f32 %v1506_v50, %v1505_v42  ;;  %v1650_v59 = vrot.slane %v1649_v51, 2  ;;  %v1669_v61 = vrot.slane %v1668_v53, 4  ;;  %v1521_v62 = vadd.f32 %v1520_v54, %v1519_v46 }
 0x164   :  { %v1664_v63 = vrot.slane %v1663_v55, 2  ;;  %v1514_v0 = vadd.f32 %v1513_v56, %v1512_v48  ;;  %v1527_v1 = vrot.slane %v1526_v57, 2  ;;  %v1657_v5 = vrot.slane %v1656_v60, 2 }
 0x165   :  { %v1508_v2 = vrot.slane %v1507_v58, 1  ;;  %v1651_v4 = vadd.f32 %v1650_v59, %v1649_v51  ;;  %v1670_v6 = vadd.f32 %v1669_v61, %v1668_v53  ;;  %v1522_v7 = vrot.slane %v1521_v62, 1 }
 0x166   :  { %v1665_v8 = vadd.f32 %v1664_v63, %v1663_v55  ;;  %v1528_v9 = vadd.f32 %v1527_v1, %v1526_v57  ;;  %v1515_v12 = vrot.slane %v1514_v0, 1  ;;  %v1658_v14 = vadd.f32 %v1657_v5, %v1656_v60 }
 0x167   :  { %v1652_v11 = vrot.slane %v1651_v4, 1  ;;  %v1671_v15 = vrot.slane %v1670_v6, 2  ;;  %v1509_v16 = vadd.f32 %v1508_v2, %v1507_v58  ;;  %v1523_v23 = vadd.f32 %v1522_v7, %v1521_v62 }
 0x168   :  { %v1666_v17 = vrot.slane %v1665_v8, 1  ;;  %v1659_v20 = vrot.slane %v1658_v14, 1  ;;  %v1529_v21 = vrot.slane %v1528_v9, 1  ;;  %v1516_v10 = vadd.f32 %v1515_v12, %v1514_v0 }
 0x169   :  { %v1653_v18 = vadd.f32 %v1652_v11, %v1651_v4  ;;  %v1672_v22 = vadd.f32 %v1671_v15, %v1670_v6 }
 0x16a   :  { %v1667_v24 = vadd.f32 %v1666_v17, %v1665_v8  ;;  %v1660_v27 = vadd.f32 %v1659_v20, %v1658_v14  ;;  %v1530_v29 = vadd.f32 %v1529_v21, %v1528_v9 }
 0x16b   :  { %v1688_v25 = vsel %vm1675_vm0, %v1509_v16, %v1653_v18  ;;  %v1673_v28 = vrot.slane %v1672_v22, 1 }
 0x16c   :  { %v1690_v13 = vsel %vm1675_vm0, %v1523_v23, %v1667_v24  ;;  %v1689_v19 = vsel %vm1675_vm0, %v1516_v10, %v1660_v27 }
 0x16d   :  { %v1674_v30 = vadd.f32 %v1673_v28, %v1672_v22  ;;  %v1759_v31 = vcombine.low %v1688_v25, %v1689_v19 }
 0x16f   :  { %v1691_v32 = vsel %vm1675_vm0, %v1530_v29, %v1674_v30  ;;  %v1767_v33 = vrot.slane %v1759_v31, %v2402_v26 }
 0x170   :  { %v1760_v34 = vcombine.low %v1690_v13, %v1691_v32 }
 0x172   :  { %v1774_v35 = vrot.slane %v1760_v34, %v2402_v26 }
 0x174   :  { %v1775_v36 = vcombine.low %v1767_v33, %v1774_v35 }
 0x176   :  { %1783 = vst [vmem:[%s2477_s3 + $0x18] sm:$0xff] %v1775_v36 }

// kernel: _lambda_.12
= control target key start
LH: loop header
LB: loop body
LE: loop exit
PB: predicated region body
PF: predicated region fallthrough
CT: control target
= control target key end

     0   :  { %s422_s0 = inlined_call_operand.vmem [shape: bf16[4,32,128], index: 0, kind: input, shape index: {}]   ;;  %s423_s1 = inlined_call_operand.vmem [shape: f32[1,1,128], index: 1, kind: input, shape index: {}]   ;;  %s424_s2 = inlined_call_operand.vmem [shape: f32[1,1,128], index: 2, kind: input, shape index: {}]   ;;  %s425_s3 = inlined_call_operand.vmem [shape: bf16[4,32,128], index: 3, kind: output, shape index: {}]  }
   0x1   :  { %v227_v0 = vld [vmem:[%s422_s0] sm:$0xff]   ;;  %v298_v4 = vld [vmem:[%s422_s0 + $0x8] sm:$0xff]   ;;  %v299_v5 = vld [vmem:[%s422_s0 + $0x10] sm:$0xff]  }
   0x2   :  { %v338_v1 = vld [vmem:[%s423_s1] ss:$0 sm:$0xff]  ;;  %v228_v2 = vunpack.c.l.bf16 %v227_v0  ;;  %v229_v3 = vunpack.c.h.bf16 %v227_v0  ;;  %v300_v6 = vld [vmem:[%s422_s0 + $0x18] sm:$0xff]   ;;  %v232_v8 = vunpack.c.l.bf16 %v298_v4  ;;  %v233_v9 = vunpack.c.h.bf16 %v298_v4  ;;  %v302_v33 = vld [vmem:[%s422_s0 + $0x28] sm:$0xff]  }
   0x3   :  { %v352_v7 = vld [vmem:[%s424_s2] ss:$0 sm:$0xff]  ;;  %v236_v10 = vunpack.c.l.bf16 %v299_v5  ;;  %v237_v11 = vunpack.c.h.bf16 %v299_v5  ;;  %v240_v14 = vunpack.c.l.bf16 %v300_v6  ;;  %v241_v15 = vunpack.c.h.bf16 %v300_v6  ;;  %v303_v38 = vld [vmem:[%s422_s0 + $0x30] sm:$0xff]   ;;  %v304_v43 = vld [vmem:[%s422_s0 + $0x38] sm:$0xff]  }
   0x4   :  { %v53_v12 = vmul.f32 %v228_v2, %v338_v1  ;;  %v54_v13 = vmul.f32 %v229_v3, %v338_v1  ;;  %v55_v16 = vmul.f32 %v232_v8, %v338_v1  ;;  %v56_v17 = vmul.f32 %v233_v9, %v338_v1  ;;  %v301_v28 = vld [vmem:[%s422_s0 + $0x20] sm:$0xff]  }
   0x5   :  { %v57_v18 = vmul.f32 %v236_v10, %v338_v1  ;;  %v58_v19 = vmul.f32 %v237_v11, %v338_v1  ;;  %v59_v22 = vmul.f32 %v240_v14, %v338_v1  ;;  %v60_v23 = vmul.f32 %v241_v15, %v338_v1 }
   0x6   :  { %v76_v20 = vadd.f32 %v352_v7, %v53_v12  ;;  %v77_v21 = vadd.f32 %v352_v7, %v54_v13  ;;  %v78_v24 = vadd.f32 %v352_v7, %v55_v16  ;;  %v79_v25 = vadd.f32 %v352_v7, %v56_v17 }
   0x7   :  { %v80_v26 = vadd.f32 %v352_v7, %v57_v18  ;;  %v81_v27 = vadd.f32 %v352_v7, %v58_v19  ;;  %v82_v31 = vadd.f32 %v352_v7, %v59_v22  ;;  %v83_v32 = vadd.f32 %v352_v7, %v60_v23 }
   0x8   :  { %v92_v29 = vmax.f32 %v76_v20, 0.0  ;;  %v93_v30 = vmax.f32 %v77_v21, 0.0  ;;  %v94_v34 = vmax.f32 %v78_v24, 0.0  ;;  %v95_v35 = vmax.f32 %v79_v25, 0.0 }
   0x9   :  { %v96_v36 = vmax.f32 %v80_v26, 0.0  ;;  %v97_v37 = vmax.f32 %v81_v27, 0.0  ;;  %v98_v40 = vmax.f32 %v82_v31, 0.0  ;;  %v99_v41 = vmax.f32 %v83_v32, 0.0 }
   0xa   :  { %v261_v39 = vpack.c.bf16 %v93_v30, %v92_v29  ;;  %v244_v42 = vunpack.c.l.bf16 %v301_v28  ;;  %v266_v44 = vpack.c.bf16 %v95_v35, %v94_v34  ;;  %v245_v46 = vunpack.c.h.bf16 %v301_v28 }
   0xb   :  { %v271_v45 = vpack.c.bf16 %v97_v37, %v96_v36  ;;  %v248_v47 = vunpack.c.l.bf16 %v302_v33  ;;  %v276_v48 = vpack.c.bf16 %v99_v41, %v98_v40  ;;  %v249_v50 = vunpack.c.h.bf16 %v302_v33 }
   0xc   :  { %262 = vst [vmem:[%s425_s3] sm:$0xff] %v261_v39   ;;  %v61_v49 = vmul.f32 %v244_v42, %v338_v1  ;;  %v252_v51 = vunpack.c.l.bf16 %v303_v38  ;;  %305 = vst [vmem:[%s425_s3 + $0x8] sm:$0xff] %v266_v44   ;;  %v62_v52 = vmul.f32 %v245_v46, %v338_v1  ;;  %v253_v54 = vunpack.c.h.bf16 %v303_v38 }
   0xd   :  { %306 = vst [vmem:[%s425_s3 + $0x10] sm:$0xff] %v271_v45   ;;  %v63_v53 = vmul.f32 %v248_v47, %v338_v1  ;;  %v256_v55 = vunpack.c.l.bf16 %v304_v43  ;;  %307 = vst [vmem:[%s425_s3 + $0x18] sm:$0xff] %v276_v48   ;;  %v64_v57 = vmul.f32 %v249_v50, %v338_v1  ;;  %v257_v59 = vunpack.c.h.bf16 %v304_v43 }
   0xe   :  { %v84_v56 = vadd.f32 %v352_v7, %v61_v49  ;;  %v65_v58 = vmul.f32 %v252_v51, %v338_v1  ;;  %v85_v60 = vadd.f32 %v352_v7, %v62_v52  ;;  %v66_v62 = vmul.f32 %v253_v54, %v338_v1 }
   0xf   :  { %v86_v61 = vadd.f32 %v352_v7, %v63_v53  ;;  %v67_v63 = vmul.f32 %v256_v55, %v338_v1  ;;  %v87_v2 = vadd.f32 %v352_v7, %v64_v57  ;;  %v68_v4 = vmul.f32 %v257_v59, %v338_v1 }
  0x10   :  { %v100_v0 = vmax.f32 %v84_v56, 0.0  ;;  %v88_v3 = vadd.f32 %v352_v7, %v65_v58  ;;  %v101_v5 = vmax.f32 %v85_v60, 0.0  ;;  %v89_v8 = vadd.f32 %v352_v7, %v66_v62 }
  0x11   :  { %v102_v6 = vmax.f32 %v86_v61, 0.0  ;;  %v90_v9 = vadd.f32 %v352_v7, %v67_v63  ;;  %v103_v10 = vmax.f32 %v87_v2, 0.0  ;;  %v91_v12 = vadd.f32 %v352_v7, %v68_v4 }
  0x12   :  { %v104_v11 = vmax.f32 %v88_v3, 0.0  ;;  %v281_v13 = vpack.c.bf16 %v101_v5, %v100_v0  ;;  %v105_v14 = vmax.f32 %v89_v8, 0.0 }
  0x13   :  { %v106_v15 = vmax.f32 %v90_v9, 0.0  ;;  %v286_v16 = vpack.c.bf16 %v103_v10, %v102_v6  ;;  %v107_v17 = vmax.f32 %v91_v12, 0.0 }
  0x14   :  { %308 = vst [vmem:[%s425_s3 + $0x20] sm:$0xff] %v281_v13   ;;  %v291_v1 = vpack.c.bf16 %v105_v14, %v104_v11 }
  0x15   :  { %309 = vst [vmem:[%s425_s3 + $0x28] sm:$0xff] %v286_v16   ;;  %v296_v18 = vpack.c.bf16 %v107_v17, %v106_v15 }
  0x16   :  { %310 = vst [vmem:[%s425_s3 + $0x30] sm:$0xff] %v291_v1  }
  0x17   :  { %311 = vst [vmem:[%s425_s3 + $0x38] sm:$0xff] %v296_v18  }

// kernel: _lambda_.13
= control target key start
LH: loop header
LB: loop body
LE: loop exit
PB: predicated region body
PF: predicated region fallthrough
CT: control target
= control target key end

     0   :  { %s1738_s12 = smov 0   ;;  %s1740_s13 = smov 0   ;;  %s1864_s0 = inlined_call_operand.vmem [shape: bf16[4,128,512], index: 0, kind: input, shape index: {}]   ;;  %s1865_s1 = inlined_call_operand.vmem [shape: bf16[4,512,128], index: 1, kind: input, shape index: {}]   ;;  %s1866_s2 = inlined_call_operand.vmem [shape: bf16[4,128,128], index: 2, kind: output, shape index: {0}]   ;;  %s1867_s3 = inlined_call_operand.vmem [shape: f32[4,1,2,128], index: 3, kind: output, shape index: {1}]  }
   0x1   :  { %s1742_s14 = smov 0  }
   0x2 LB: > { %s33_s15 = sadd.s32 1, %s1712_s13  ;;  %p1306_p0 = scmp.ge.s32.totalorder %s1716_s14, 1  ;;  %s1716_s14 = sphi %s1742_s14, %s14_s14   ;;  %s1712_s13 = sphi %s1740_s13, %s1869_s13   ;;  %s1708_s12 = sphi %s1738_s12, %s1868_s12  }
   0x3   : > { %p35_p1 = scmp.ge.s32.totalorder %s33_s15, 4  ;;  %p188_p2 = scmp.lt.s32.totalorder %s1716_s14, 5 }
   0x5   : > { %s1871_s15 = smov (%p35_p1, %s33_s15), 0  ;;  %p189_p3 = pnand %p1306_p0, %p188_p2 }
   0x6   : > { %p239_p4 = scmp.lt.s32.totalorder (!%p189_p3), %s1708_s12, 3  ;;  %vm1148_vm0 = vcmask (!%p189_p3), 1040384  }
   0x7   : > { %192 = sbr.rel (%p189_p3) target bundleno = 345 (0x159), region = 28 }
   0xe   : > { %s1873_s12 = smov (!%p239_p4, %s1708_s12), 3 }
   0xf   : > { %s1396_s16 = sshll.u32 %s1873_s12, 8  ;;  %s1398_s23 = sshll.u32 %s1873_s12, 6 }
  0x10   : > { %s1764_s19 = scalar_lea.vmem %s1865_s1, %s1396_s16  ;;  %s1801_s22 = scalar_lea.vmem %s1864_s0, %s1396_s16 }
  0x11   : > { %v1614_v0 = vld [vmem:[%s1764_s19 + $0x40] sm:$0xff]   ;;  %v1618_v4 = vld [vmem:[%s1764_s19 + $0x48] sm:$0xff]   ;;  %v1622_v8 = vld [vmem:[%s1764_s19 + $0x50] sm:$0xff]   ;;  %s1841_s26 = scalar_lea.vmem %s1866_s2, %s1398_s23  ;;  %s1313_s27 = sshll.u32 %s1873_s12, 1 }
  0x12   : > { %v1615_v1 = vld [vmem:[%s1764_s19 + $0xc0] sm:$0xff]   ;;  %1462 = vmatprep.subr.bf16.mxu0 %v1614_v0  ;;  %v1619_v5 = vld [vmem:[%s1764_s19 + $0xc8] sm:$0xff]   ;;  %v1623_v9 = vld [vmem:[%s1764_s19 + $0xd0] sm:$0xff]   ;;  %s274_s30 = scalar_lea.vmem %s1867_s3, %s1313_s27 }
  0x13   : > { %v1616_v2 = vld [vmem:[%s1764_s19] sm:$0xff]   ;;  %1526 = vmatprep.subr.bf16.mxu1 %v1615_v1  ;;  %v1620_v6 = vld [vmem:[%s1764_s19 + $0x8] sm:$0xff]   ;;  %v1624_v10 = vld [vmem:[%s1764_s19 + $0x10] sm:$0xff]  }
  0x14   : > { %v1617_v3 = vld [vmem:[%s1764_s19 + $0x80] sm:$0xff]   ;;  %1463 = vmatpush3.bf16.msra.mxu0 %v1616_v2  ;;  %v1621_v7 = vld [vmem:[%s1764_s19 + $0x88] sm:$0xff]   ;;  %v1625_v11 = vld [vmem:[%s1764_s19 + $0x90] sm:$0xff]  }
  0x15   : > { %1527 = vmatpush3.bf16.msra.mxu1 %v1617_v3  ;;  %1464 = vmatprep.subr.bf16.mxu0 %v1618_v4  ;;  %v1626_v12 = vld [vmem:[%s1764_s19 + $0x58] sm:$0xff]   ;;  %v1630_v16 = vld [vmem:[%s1764_s19 + $0x60] sm:$0xff]   ;;  %v1634_v20 = vld [vmem:[%s1764_s19 + $0x68] sm:$0xff]  }
  0x16   : > { %1528 = vmatprep.subr.bf16.mxu1 %v1619_v5  ;;  %v1627_v13 = vld [vmem:[%s1764_s19 + $0xd8] sm:$0xff]   ;;  %v1631_v17 = vld [vmem:[%s1764_s19 + $0xe0] sm:$0xff]   ;;  %v1635_v21 = vld [vmem:[%s1764_s19 + $0xe8] sm:$0xff]  }
  0x17   : > { %v1628_v14 = vld [vmem:[%s1764_s19 + $0x18] sm:$0xff]   ;;  %v1632_v18 = vld [vmem:[%s1764_s19 + $0x20] sm:$0xff]   ;;  %v1636_v22 = vld [vmem:[%s1764_s19 + $0x28] sm:$0xff]  }
  0x18   : > { %1465 = vmatpush3.bf16.msra.mxu0 %v1620_v6  ;;  %v1629_v15 = vld [vmem:[%s1764_s19 + $0x98] sm:$0xff]   ;;  %v1633_v19 = vld [vmem:[%s1764_s19 + $0xa0] sm:$0xff]   ;;  %v1637_v23 = vld [vmem:[%s1764_s19 + $0xa8] sm:$0xff]  }
  0x19   : > { %1529 = vmatpush3.bf16.msra.mxu1 %v1621_v7  ;;  %1466 = vmatprep.subr.bf16.mxu0 %v1622_v8  ;;  %v1638_v24 = vld [vmem:[%s1764_s19 + $0x70] sm:$0xff]   ;;  %v1642_v28 = vld [vmem:[%s1764_s19 + $0x78] sm:$0xff]  }
  0x1a   : > { %1530 = vmatprep.subr.bf16.mxu1 %v1623_v9  ;;  %v1639_v25 = vld [vmem:[%s1764_s19 + $0xf0] sm:$0xff]   ;;  %v1643_v29 = vld [vmem:[%s1764_s19 + $0xf8] sm:$0xff]  }
  0x1b   : > { %v1640_v26 = vld [vmem:[%s1764_s19 + $0x30] sm:$0xff]   ;;  %v1644_v30 = vld [vmem:[%s1764_s19 + $0x38] sm:$0xff]  }
  0x1c   : > { %1467 = vmatpush3.bf16.msra.mxu0 %v1624_v10  ;;  %v1641_v27 = vld [vmem:[%s1764_s19 + $0xb0] sm:$0xff]   ;;  %v1645_v31 = vld [vmem:[%s1764_s19 + $0xb8] sm:$0xff]  }
  0x1d   : > { %1531 = vmatpush3.bf16.msra.mxu1 %v1625_v11  ;;  %1468 = vmatprep.subr.bf16.mxu0 %v1626_v12  ;;  %v1646_v32 = vld [vmem:[%s1801_s22] ss:$16 sps:$4 sm:$0xff]   ;;  %v1648_v33 = vld [vmem:[%s1801_s22 + $0x4] ss:$16 sps:$4 sm:$0xff]   ;;  %v1649_v34 = vld [vmem:[%s1801_s22 + $0x8] ss:$16 sps:$4 sm:$0xff]  }
  0x1e   : > { %1532 = vmatprep.subr.bf16.mxu1 %v1627_v13  ;;  %v1651_v35 = vld [vmem:[%s1801_s22 + $0xc] ss:$16 sps:$4 sm:$0xff]   ;;  %797 = vmatprep.mubr.bf16.mxu0 %v1648_v33  ;;  %v1652_v36 = vld [vmem:[%s1801_s22 + $0x24] ss:$16 sps:$4 sm:$0xff]   ;;  %v1656_v38 = vld [vmem:[%s1801_s22 + $0x20] ss:$16 sps:$4 sm:$0xff]  }
  0x1f   : > { %894 = vmatprep.mubr.bf16.mxu1 %v1651_v35  ;;  %v1654_v37 = vld [vmem:[%s1801_s22 + $0x2c] ss:$16 sps:$4 sm:$0xff]   ;;  %v1657_v39 = vld [vmem:[%s1801_s22 + $0x28] ss:$16 sps:$4 sm:$0xff]   ;;  %v1658_v40 = vld [vmem:[%s1801_s22 + $0x44] ss:$16 sps:$4 sm:$0xff]  }
  0x20   : > { %1469 = vmatpush3.bf16.msra.mxu0 %v1628_v14  ;;  %v1660_v41 = vld [vmem:[%s1801_s22 + $0x4c] ss:$16 sps:$4 sm:$0xff]   ;;  %v1662_v42 = vld [vmem:[%s1801_s22 + $0x40] ss:$16 sps:$4 sm:$0xff]   ;;  %v1663_v43 = vld [vmem:[%s1801_s22 + $0x48] ss:$16 sps:$4 sm:$0xff]  }
  0x21   : > { %1533 = vmatpush3.bf16.msra.mxu1 %v1629_v15  ;;  %1470 = vmatprep.subr.bf16.mxu0 %v1630_v16  ;;  %v1664_v44 = vld [vmem:[%s1801_s22 + $0x64] ss:$16 sps:$4 sm:$0xff]   ;;  %v1666_v45 = vld [vmem:[%s1801_s22 + $0x6c] ss:$16 sps:$4 sm:$0xff]   ;;  %v1668_v46 = vld [vmem:[%s1801_s22 + $0x60] ss:$16 sps:$4 sm:$0xff]  }
  0x22   : > { %1534 = vmatprep.subr.bf16.mxu1 %v1631_v17  ;;  %v1669_v47 = vld [vmem:[%s1801_s22 + $0x68] ss:$16 sps:$4 sm:$0xff]   ;;  %v1670_v48 = vld [vmem:[%s1801_s22 + $0x84] ss:$16 sps:$4 sm:$0xff]   ;;  %v1672_v49 = vld [vmem:[%s1801_s22 + $0x8c] ss:$16 sps:$4 sm:$0xff]  }
  0x23   : > { %v1674_v50 = vld [vmem:[%s1801_s22 + $0x80] ss:$16 sps:$4 sm:$0xff]   ;;  %v1675_v51 = vld [vmem:[%s1801_s22 + $0x88] ss:$16 sps:$4 sm:$0xff]   ;;  %v1676_v52 = vld [vmem:[%s1801_s22 + $0xa4] ss:$16 sps:$4 sm:$0xff]  }
  0x24   : > { %1471 = vmatpush3.bf16.msra.mxu0 %v1632_v18  ;;  %v1678_v53 = vld [vmem:[%s1801_s22 + $0xac] ss:$16 sps:$4 sm:$0xff]   ;;  %v1680_v54 = vld [vmem:[%s1801_s22 + $0xa0] ss:$16 sps:$4 sm:$0xff]   ;;  %v1681_v55 = vld [vmem:[%s1801_s22 + $0xa8] ss:$16 sps:$4 sm:$0xff]  }
  0x25   : > { %1535 = vmatpush3.bf16.msra.mxu1 %v1633_v19  ;;  %1472 = vmatprep.subr.bf16.mxu0 %v1634_v20  ;;  %v1682_v56 = vld [vmem:[%s1801_s22 + $0xc4] ss:$16 sps:$4 sm:$0xff]   ;;  %v1684_v57 = vld [vmem:[%s1801_s22 + $0xcc] ss:$16 sps:$4 sm:$0xff]   ;;  %v1686_v58 = vld [vmem:[%s1801_s22 + $0xc0] ss:$16 sps:$4 sm:$0xff]  }
  0x26   : > { %1536 = vmatprep.subr.bf16.mxu1 %v1635_v21  ;;  %v1687_v59 = vld [vmem:[%s1801_s22 + $0xc8] ss:$16 sps:$4 sm:$0xff]   ;;  %v1688_v60 = vld [vmem:[%s1801_s22 + $0xe4] ss:$16 sps:$4 sm:$0xff]   ;;  %v1690_v61 = vld [vmem:[%s1801_s22 + $0xec] ss:$16 sps:$4 sm:$0xff]  }
  0x27   : > { %v1692_v62 = vld [vmem:[%s1801_s22 + $0xe0] ss:$16 sps:$4 sm:$0xff]   ;;  %v1693_v63 = vld [vmem:[%s1801_s22 + $0xe8] ss:$16 sps:$4 sm:$0xff]  }
  0x28   : > { %1473 = vmatpush3.bf16.msra.mxu0 %v1636_v22 }
  0x29   : > { %1537 = vmatpush3.bf16.msra.mxu1 %v1637_v23  ;;  %1474 = vmatprep.subr.bf16.mxu0 %v1638_v24 }
  0x2a   : > { %1538 = vmatprep.subr.bf16.mxu1 %v1639_v25 }
  0x2c   : > { %1475 = vmatpush3.bf16.msra.mxu0 %v1640_v26 }
  0x2d   : > { %1539 = vmatpush3.bf16.msra.mxu1 %v1641_v27  ;;  %1476 = vmatprep.subr.bf16.mxu0 %v1642_v28 }
  0x2e   : > { %1540 = vmatprep.subr.bf16.mxu1 %v1643_v29 }
  0x30   : > { %1477 = vmatpush3.bf16.msra.mxu0 %v1644_v30 }
  0x31   : > { %1541 = vmatpush3.bf16.msra.mxu1 %v1645_v31 }
  0x33   : > { %798 = vmatmul.mubr.bf16.vlgmr.msra.gmra.mrb[0].mxu0 %v1646_v32 }
  0x34   : > { %895 = vmatmul.mubr.bf16.vlgmr.msra.gmra.mrb[0].mxu1 %v1649_v34  ;;  %805 = vmatprep.mubr.bf16.mxu0 %v1652_v36 }
  0x35   : > { %902 = vmatprep.mubr.bf16.mxu1 %v1654_v37 }
  0x3b   : > { %806 = vmatmul.mubr.bf16.gmra.mrb[4].mxu0 %v1656_v38 }
  0x3c   : > { %903 = vmatmul.mubr.bf16.gmra.mrb[4].mxu1 %v1657_v39  ;;  %813 = vmatprep.mubr.bf16.mxu0 %v1658_v40 }
  0x3d   : > { %910 = vmatprep.mubr.bf16.mxu1 %v1660_v41 }
  0x43   : > { %814 = vmatmul.mubr.bf16.gmra.mrb[8].mxu0 %v1662_v42 }
  0x44   : > { %911 = vmatmul.mubr.bf16.gmra.mrb[8].mxu1 %v1663_v43  ;;  %821 = vmatprep.mubr.bf16.mxu0 %v1664_v44 }
  0x45   : > { %918 = vmatprep.mubr.bf16.mxu1 %v1666_v45 }
  0x4b   : > { %822 = vmatmul.mubr.bf16.gmra.mrb[12].mxu0 %v1668_v46 }
  0x4c   : > { %919 = vmatmul.mubr.bf16.gmra.mrb[12].mxu1 %v1669_v47  ;;  %829 = vmatprep.mubr.bf16.mxu0 %v1670_v48 }
  0x4d   : > { %926 = vmatprep.mubr.bf16.mxu1 %v1672_v49 }
  0x53   : > { %830 = vmatmul.mubr.bf16.gmra.mrb[16].mxu0 %v1674_v50 }
  0x54   : > { %927 = vmatmul.mubr.bf16.gmra.mrb[16].mxu1 %v1675_v51  ;;  %837 = vmatprep.mubr.bf16.mxu0 %v1676_v52 }
  0x55   : > { %934 = vmatprep.mubr.bf16.mxu1 %v1678_v53 }
  0x5b   : > { %838 = vmatmul.mubr.bf16.gmra.mrb[20].mxu0 %v1680_v54 }
  0x5c   : > { %935 = vmatmul.mubr.bf16.gmra.mrb[20].mxu1 %v1681_v55  ;;  %845 = vmatprep.mubr.bf16.mxu0 %v1682_v56 }
  0x5d   : > { %942 = vmatprep.mubr.bf16.mxu1 %v1684_v57 }
  0x63   : > { %846 = vmatmul.mubr.bf16.gmra.mrb[24].mxu0 %v1686_v58 }
  0x64   : > { %943 = vmatmul.mubr.bf16.gmra.mrb[24].mxu1 %v1687_v59  ;;  %853 = vmatprep.mubr.bf16.mxu0 %v1688_v60 }
  0x65   : > { %950 = vmatprep.mubr.bf16.mxu1 %v1690_v61 }
  0x6b   : > { %854 = vmatmul.mubr.bf16.gmra.mrb[28].mxu0 %v1692_v62 }
  0x6c   : > { %951 = vmatmul.mubr.bf16.gmra.mrb[28].mxu1 %v1693_v63 }
 0x106   : > { %v1478_v0 = vpop.f32.mrb[0].mxu0 }
 0x107   : > { %v1542_v1 = vpop.f32.mrb[0].mxu1  ;;  %v1479_v2 = vpop.f32.mrb[1].mxu0 }
 0x108   : > { %v1480_v3 = vadd.f32 %v1479_v2, %v1478_v0  ;;  %v1543_v4 = vpop.f32.mrb[1].mxu1  ;;  %v1481_v5 = vpop.f32.mrb[2].mxu0 }
 0x109   : > { %v1544_v6 = vadd.f32 %v1543_v4, %v1542_v1  ;;  %v1545_v7 = vpop.f32.mrb[2].mxu1  ;;  %v1482_v8 = vpop.f32.mrb[3].mxu0 }
 0x10a   : > { %v1483_v9 = vadd.f32 %v1482_v8, %v1481_v5  ;;  %v1546_v10 = vpop.f32.mrb[3].mxu1 }
 0x10b   : > { %v897_v11 = vadd.f32 %v1544_v6, %v1480_v3  ;;  %v1547_v12 = vadd.f32 %v1546_v10, %v1545_v7 }
 0x10d   : > { %v900_v13 = vadd.f32 %v1547_v12, %v1483_v9  ;;  %v1111_v15 = vmul.f32 %v897_v11, %v897_v11 }
 0x10e   : > { %v1484_v14 = vpop.f32.mrb[4].mxu0 }
 0x10f   : > { %v1418_v16 = vpack.c.bf16 %v900_v13, %v897_v11  ;;  %v1090_v17 = vadd.f32 %v900_v13, %v897_v11  ;;  %v1112_v18 = vmul.f32 %v900_v13, %v900_v13  ;;  %v1548_v19 = vpop.f32.mrb[4].mxu1  ;;  %v1485_v20 = vpop.f32.mrb[5].mxu0 }
 0x110   : > { %v1486_v21 = vadd.f32 %v1485_v20, %v1484_v14  ;;  %v1549_v22 = vpop.f32.mrb[5].mxu1  ;;  %v1487_v23 = vpop.f32.mrb[6].mxu0 }
 0x111   : > { %1419 = vst [vmem:[%s1841_s26] sm:$0xff] %v1418_v16   ;;  %v1127_v24 = vadd.f32 %v1112_v18, %v1111_v15  ;;  %v1550_v25 = vadd.f32 %v1549_v22, %v1548_v19  ;;  %v1551_v26 = vpop.f32.mrb[6].mxu1  ;;  %v1488_v27 = vpop.f32.mrb[7].mxu0 }
 0x112   : > { %v1489_v28 = vadd.f32 %v1488_v27, %v1487_v23  ;;  %v1552_v29 = vpop.f32.mrb[7].mxu1 }
 0x113   : > { %v905_v30 = vadd.f32 %v1550_v25, %v1486_v21  ;;  %v1553_v31 = vadd.f32 %v1552_v29, %v1551_v26 }
 0x115   : > { %v1091_v32 = vadd.f32 %v1090_v17, %v905_v30  ;;  %v1113_v33 = vmul.f32 %v905_v30, %v905_v30  ;;  %v908_v34 = vadd.f32 %v1553_v31, %v1489_v28 }
 0x116   : > { %v1490_v35 = vpop.f32.mrb[8].mxu0 }
 0x117   : > { %v1128_v36 = vadd.f32 %v1127_v24, %v1113_v33  ;;  %v1423_v37 = vpack.c.bf16 %v908_v34, %v905_v30  ;;  %v1092_v38 = vadd.f32 %v1091_v32, %v908_v34  ;;  %v1114_v39 = vmul.f32 %v908_v34, %v908_v34  ;;  %v1554_v40 = vpop.f32.mrb[8].mxu1  ;;  %v1491_v41 = vpop.f32.mrb[9].mxu0 }
 0x118   : > { %v1492_v42 = vadd.f32 %v1491_v41, %v1490_v35  ;;  %v1555_v43 = vpop.f32.mrb[9].mxu1  ;;  %v1493_v44 = vpop.f32.mrb[10].mxu0 }
 0x119   : > { %1455 = vst [vmem:[%s1841_s26 + $0x8] sm:$0xff] %v1423_v37   ;;  %v1129_v45 = vadd.f32 %v1128_v36, %v1114_v39  ;;  %v1556_v46 = vadd.f32 %v1555_v43, %v1554_v40  ;;  %v1557_v47 = vpop.f32.mrb[10].mxu1  ;;  %v1494_v48 = vpop.f32.mrb[11].mxu0 }
 0x11a   : > { %v1495_v49 = vadd.f32 %v1494_v48, %v1493_v44  ;;  %v1558_v50 = vpop.f32.mrb[11].mxu1 }
 0x11b   : > { %v913_v51 = vadd.f32 %v1556_v46, %v1492_v42  ;;  %v1559_v52 = vadd.f32 %v1558_v50, %v1557_v47 }
 0x11d   : > { %v1093_v53 = vadd.f32 %v1092_v38, %v913_v51  ;;  %v1115_v54 = vmul.f32 %v913_v51, %v913_v51  ;;  %v916_v55 = vadd.f32 %v1559_v52, %v1495_v49 }
 0x11e   : > { %v1496_v56 = vpop.f32.mrb[12].mxu0 }
 0x11f   : > { %v1130_v57 = vadd.f32 %v1129_v45, %v1115_v54  ;;  %v1428_v58 = vpack.c.bf16 %v916_v55, %v913_v51  ;;  %v1094_v59 = vadd.f32 %v1093_v53, %v916_v55  ;;  %v1116_v60 = vmul.f32 %v916_v55, %v916_v55  ;;  %v1560_v61 = vpop.f32.mrb[12].mxu1  ;;  %v1497_v62 = vpop.f32.mrb[13].mxu0 }
 0x120   : > { %v1498_v63 = vadd.f32 %v1497_v62, %v1496_v56  ;;  %v1561_v0 = vpop.f32.mrb[13].mxu1  ;;  %v1499_v1 = vpop.f32.mrb[14].mxu0 }
 0x121   : > { %1456 = vst [vmem:[%s1841_s26 + $0x10] sm:$0xff] %v1428_v58   ;;  %v1131_v2 = vadd.f32 %v1130_v57, %v1116_v60  ;;  %v1562_v3 = vadd.f32 %v1561_v0, %v1560_v61  ;;  %v1563_v4 = vpop.f32.mrb[14].mxu1  ;;  %v1500_v5 = vpop.f32.mrb[15].mxu0 }
 0x122   : > { %v1501_v6 = vadd.f32 %v1500_v5, %v1499_v1  ;;  %v1564_v7 = vpop.f32.mrb[15].mxu1 }
 0x123   : > { %v921_v8 = vadd.f32 %v1562_v3, %v1498_v63  ;;  %v1565_v9 = vadd.f32 %v1564_v7, %v1563_v4 }
 0x125   : > { %v1095_v10 = vadd.f32 %v1094_v59, %v921_v8  ;;  %v1117_v11 = vmul.f32 %v921_v8, %v921_v8  ;;  %v924_v12 = vadd.f32 %v1565_v9, %v1501_v6 }
 0x126   : > { %v1502_v13 = vpop.f32.mrb[16].mxu0 }
 0x127   : > { %v1132_v14 = vadd.f32 %v1131_v2, %v1117_v11  ;;  %v1433_v15 = vpack.c.bf16 %v924_v12, %v921_v8  ;;  %v1096_v16 = vadd.f32 %v1095_v10, %v924_v12  ;;  %v1118_v17 = vmul.f32 %v924_v12, %v924_v12  ;;  %v1566_v18 = vpop.f32.mrb[16].mxu1  ;;  %v1503_v19 = vpop.f32.mrb[17].mxu0 }
 0x128   : > { %v1504_v20 = vadd.f32 %v1503_v19, %v1502_v13  ;;  %v1567_v21 = vpop.f32.mrb[17].mxu1  ;;  %v1505_v22 = vpop.f32.mrb[18].mxu0 }
 0x129   : > { %1457 = vst [vmem:[%s1841_s26 + $0x18] sm:$0xff] %v1433_v15   ;;  %v1133_v23 = vadd.f32 %v1132_v14, %v1118_v17  ;;  %v1568_v24 = vadd.f32 %v1567_v21, %v1566_v18  ;;  %v1569_v25 = vpop.f32.mrb[18].mxu1  ;;  %v1506_v26 = vpop.f32.mrb[19].mxu0 }
 0x12a   : > { %v1507_v27 = vadd.f32 %v1506_v26, %v1505_v22  ;;  %v1570_v28 = vpop.f32.mrb[19].mxu1 }
 0x12b   : > { %v929_v29 = vadd.f32 %v1568_v24, %v1504_v20  ;;  %v1571_v30 = vadd.f32 %v1570_v28, %v1569_v25 }
 0x12d   : > { %v1097_v31 = vadd.f32 %v1096_v16, %v929_v29  ;;  %v1119_v32 = vmul.f32 %v929_v29, %v929_v29  ;;  %v932_v33 = vadd.f32 %v1571_v30, %v1507_v27 }
 0x12e   : > { %v1508_v34 = vpop.f32.mrb[20].mxu0 }
 0x12f   : > { %v1134_v35 = vadd.f32 %v1133_v23, %v1119_v32  ;;  %v1438_v36 = vpack.c.bf16 %v932_v33, %v929_v29  ;;  %v1098_v37 = vadd.f32 %v1097_v31, %v932_v33  ;;  %v1120_v38 = vmul.f32 %v932_v33, %v932_v33  ;;  %v1572_v39 = vpop.f32.mrb[20].mxu1  ;;  %v1509_v40 = vpop.f32.mrb[21].mxu0 }
 0x130   : > { %v1510_v41 = vadd.f32 %v1509_v40, %v1508_v34  ;;  %v1573_v42 = vpop.f32.mrb[21].mxu1  ;;  %v1511_v43 = vpop.f32.mrb[22].mxu0 }
 0x131   : > { %1458 = vst [vmem:[%s1841_s26 + $0x20] sm:$0xff] %v1438_v36   ;;  %v1135_v44 = vadd.f32 %v1134_v35, %v1120_v38  ;;  %v1574_v45 = vadd.f32 %v1573_v42, %v1572_v39  ;;  %v1575_v46 = vpop.f32.mrb[22].mxu1  ;;  %v1512_v47 = vpop.f32.mrb[23].mxu0 }
 0x132   : > { %v1513_v48 = vadd.f32 %v1512_v47, %v1511_v43  ;;  %v1576_v49 = vpop.f32.mrb[23].mxu1 }
 0x133   : > { %v937_v50 = vadd.f32 %v1574_v45, %v1510_v41  ;;  %v1577_v51 = vadd.f32 %v1576_v49, %v1575_v46 }
 0x135   : > { %v1099_v52 = vadd.f32 %v1098_v37, %v937_v50  ;;  %v1121_v53 = vmul.f32 %v937_v50, %v937_v50  ;;  %v940_v54 = vadd.f32 %v1577_v51, %v1513_v48 }
 0x136   : > { %v1514_v55 = vpop.f32.mrb[24].mxu0 }
 0x137   : > { %v1136_v56 = vadd.f32 %v1135_v44, %v1121_v53  ;;  %v1443_v57 = vpack.c.bf16 %v940_v54, %v937_v50  ;;  %v1100_v58 = vadd.f32 %v1099_v52, %v940_v54  ;;  %v1122_v59 = vmul.f32 %v940_v54, %v940_v54  ;;  %v1578_v60 = vpop.f32.mrb[24].mxu1  ;;  %v1515_v61 = vpop.f32.mrb[25].mxu0 }
 0x138   : > { %v1516_v62 = vadd.f32 %v1515_v61, %v1514_v55  ;;  %v1579_v63 = vpop.f32.mrb[25].mxu1  ;;  %v1517_v0 = vpop.f32.mrb[26].mxu0 }
 0x139   : > { %1459 = vst [vmem:[%s1841_s26 + $0x28] sm:$0xff] %v1443_v57   ;;  %v1137_v1 = vadd.f32 %v1136_v56, %v1122_v59  ;;  %v1580_v2 = vadd.f32 %v1579_v63, %v1578_v60  ;;  %v1581_v3 = vpop.f32.mrb[26].mxu1  ;;  %v1518_v4 = vpop.f32.mrb[27].mxu0 }
 0x13a   : > { %v1519_v5 = vadd.f32 %v1518_v4, %v1517_v0  ;;  %v1582_v6 = vpop.f32.mrb[27].mxu1 }
 0x13b   : > { %v945_v7 = vadd.f32 %v1580_v2, %v1516_v62  ;;  %v1583_v8 = vadd.f32 %v1582_v6, %v1581_v3 }
 0x13d   : > { %v1101_v9 = vadd.f32 %v1100_v58, %v945_v7  ;;  %v1123_v10 = vmul.f32 %v945_v7, %v945_v7  ;;  %v948_v11 = vadd.f32 %v1583_v8, %v1519_v5 }
 0x13e   : > { %v1520_v12 = vpop.f32.mrb[28].mxu0 }
 0x13f   : > { %v1138_v13 = vadd.f32 %v1137_v1, %v1123_v10  ;;  %v1448_v14 = vpack.c.bf16 %v948_v11, %v945_v7  ;;  %v1102_v15 = vadd.f32 %v1101_v9, %v948_v11  ;;  %v1124_v16 = vmul.f32 %v948_v11, %v948_v11  ;;  %v1584_v17 = vpop.f32.mrb[28].mxu1  ;;  %v1521_v18 = vpop.f32.mrb[29].mxu0 }
 0x140   : > { %v1522_v19 = vadd.f32 %v1521_v18, %v1520_v12  ;;  %v1585_v20 = vpop.f32.mrb[29].mxu1  ;;  %v1523_v21 = vpop.f32.mrb[30].mxu0 }
 0x141   : > { %1460 = vst [vmem:[%s1841_s26 + $0x30] sm:$0xff] %v1448_v14   ;;  %v1139_v22 = vadd.f32 %v1138_v13, %v1124_v16  ;;  %v1586_v23 = vadd.f32 %v1585_v20, %v1584_v17  ;;  %v1587_v24 = vpop.f32.mrb[30].mxu1  ;;  %v1524_v25 = vpop.f32.mrb[31].mxu0 }
 0x142   : > { %v1525_v26 = vadd.f32 %v1524_v25, %v1523_v21  ;;  %v1588_v27 = vpop.f32.mrb[31].mxu1 }
 0x143   : > { %v953_v28 = vadd.f32 %v1586_v23, %v1522_v19  ;;  %v1589_v29 = vadd.f32 %v1588_v27, %v1587_v24 }
 0x145   : > { %v1103_v30 = vadd.f32 %v1102_v15, %v953_v28  ;;  %v1125_v31 = vmul.f32 %v953_v28, %v953_v28  ;;  %v956_v32 = vadd.f32 %v1589_v29, %v1525_v26 }
 0x147   : > { %v1140_v33 = vadd.f32 %v1139_v22, %v1125_v31  ;;  %v1453_v34 = vpack.c.bf16 %v956_v32, %v953_v28  ;;  %v1104_v35 = vadd.f32 %v1103_v30, %v956_v32  ;;  %v1126_v36 = vmul.f32 %v956_v32, %v956_v32 }
 0x149   : > { %1461 = vst [vmem:[%s1841_s26 + $0x38] sm:$0xff] %v1453_v34   ;;  %v1105_v37 = vrot.slane %v1104_v35, 4  ;;  %v1141_v38 = vadd.f32 %v1140_v33, %v1126_v36 }
 0x14b   : > { %v1106_v39 = vadd.f32 %v1105_v37, %v1104_v35  ;;  %v1142_v40 = vrot.slane %v1141_v38, 4 }
 0x14d   : > { %v1107_v41 = vrot.slane %v1106_v39, 2  ;;  %v1143_v42 = vadd.f32 %v1142_v40, %v1141_v38 }
 0x14f   : > { %v1108_v43 = vadd.f32 %v1107_v41, %v1106_v39  ;;  %v1144_v44 = vrot.slane %v1143_v42, 2 }
 0x151   : > { %v1109_v45 = vrot.slane %v1108_v43, 1  ;;  %v1145_v46 = vadd.f32 %v1144_v44, %v1143_v42 }
 0x153   : > { %v1146_v47 = vrot.slane %v1145_v46, 1  ;;  %v1110_v48 = vadd.f32 %v1109_v45, %v1108_v43 }
 0x155   : > { %v1147_v49 = vadd.f32 %v1146_v47, %v1145_v46 }
 0x157   : > { %v1149_v50 = vsel %vm1148_vm0, %v1110_v48, %v1147_v49 }
 0x158   : > { %1150 = vst [vmem:[%s274_s30] sm:$0x3] %v1149_v50 }
 0x159 PF: > { %s14_s14 = sadd.s32 1, %s1716_s14   ;;  %s1868_s12 = smov %s1712_s13 }
 0x15a   : > { %p11_p5 = scmp.ge.s32.totalorder %s14_s14, 6   ;;  %s1869_s13 = smov %s1871_s15 }
 0x15c   :  { %13 = sbr.rel (!%p11_p5) target bundleno = 2 (0x2), region = 82 }

// kernel: _lambda_.14
= control target key start
LH: loop header
LB: loop body
LE: loop exit
PB: predicated region body
PF: predicated region fallthrough
CT: control target
= control target key end

     0   :  { %s1502_s0 = inlined_call_operand.vmem [shape: bf16[4,128,128], index: 0, kind: input, shape index: {}]   ;;  %s1503_s1 = inlined_call_operand.vmem [shape: f32[1,1,128], index: 1, kind: input, shape index: {}]   ;;  %s1504_s2 = inlined_call_operand.vmem [shape: f32[1,1,128], index: 2, kind: input, shape index: {}]   ;;  %s1505_s3 = inlined_call_operand.vmem [shape: bf16[4,128,128], index: 3, kind: output, shape index: {}]  }
   0x1   :  { %v803_v0 = vld [vmem:[%s1502_s0] sm:$0xff]   ;;  %v1090_v4 = vld [vmem:[%s1502_s0 + $0x8] sm:$0xff]   ;;  %v1091_v5 = vld [vmem:[%s1502_s0 + $0x10] sm:$0xff]  }
   0x2   :  { %v1178_v1 = vld [vmem:[%s1503_s1] ss:$0 sm:$0xff]  ;;  %v804_v2 = vunpack.c.l.bf16 %v803_v0  ;;  %v805_v3 = vunpack.c.h.bf16 %v803_v0  ;;  %v1092_v6 = vld [vmem:[%s1502_s0 + $0x18] sm:$0xff]   ;;  %v808_v8 = vunpack.c.l.bf16 %v1090_v4  ;;  %v809_v9 = vunpack.c.h.bf16 %v1090_v4  ;;  %v1094_v33 = vld [vmem:[%s1502_s0 + $0x28] sm:$0xff]  }
   0x3   :  { %v1192_v7 = vld [vmem:[%s1504_s2] ss:$0 sm:$0xff]  ;;  %v812_v10 = vunpack.c.l.bf16 %v1091_v5  ;;  %v813_v11 = vunpack.c.h.bf16 %v1091_v5  ;;  %v816_v14 = vunpack.c.l.bf16 %v1092_v6  ;;  %v817_v15 = vunpack.c.h.bf16 %v1092_v6  ;;  %v1095_v38 = vld [vmem:[%s1502_s0 + $0x30] sm:$0xff]   ;;  %v1096_v43 = vld [vmem:[%s1502_s0 + $0x38] sm:$0xff]  }
   0x4   :  { %v149_v12 = vmul.f32 %v804_v2, %v1178_v1  ;;  %v150_v13 = vmul.f32 %v805_v3, %v1178_v1  ;;  %v151_v16 = vmul.f32 %v808_v8, %v1178_v1  ;;  %v152_v17 = vmul.f32 %v809_v9, %v1178_v1  ;;  %v1093_v28 = vld [vmem:[%s1502_s0 + $0x20] sm:$0xff]  }
   0x5   :  { %v153_v18 = vmul.f32 %v812_v10, %v1178_v1  ;;  %v154_v19 = vmul.f32 %v813_v11, %v1178_v1  ;;  %v155_v22 = vmul.f32 %v816_v14, %v1178_v1  ;;  %v156_v23 = vmul.f32 %v817_v15, %v1178_v1  ;;  %v1097_v0 = vld [vmem:[%s1502_s0 + $0x40] sm:$0xff]   ;;  %v1098_v11 = vld [vmem:[%s1502_s0 + $0x48] sm:$0xff]  }
   0x6   :  { %v220_v20 = vadd.f32 %v1192_v7, %v149_v12  ;;  %v221_v21 = vadd.f32 %v1192_v7, %v150_v13  ;;  %v222_v24 = vadd.f32 %v1192_v7, %v151_v16  ;;  %v223_v25 = vadd.f32 %v1192_v7, %v152_v17  ;;  %v1099_v16 = vld [vmem:[%s1502_s0 + $0x50] sm:$0xff]  }
   0x7   :  { %v224_v26 = vadd.f32 %v1192_v7, %v153_v18  ;;  %v225_v27 = vadd.f32 %v1192_v7, %v154_v19  ;;  %v226_v31 = vadd.f32 %v1192_v7, %v155_v22  ;;  %v227_v32 = vadd.f32 %v1192_v7, %v156_v23 }
   0x8   :  { %v284_v29 = vmax.f32 %v220_v20, 0.0  ;;  %v285_v30 = vmax.f32 %v221_v21, 0.0  ;;  %v286_v34 = vmax.f32 %v222_v24, 0.0  ;;  %v287_v35 = vmax.f32 %v223_v25, 0.0  ;;  %v1100_v25 = vld [vmem:[%s1502_s0 + $0x58] sm:$0xff]  }
   0x9   :  { %v288_v36 = vmax.f32 %v224_v26, 0.0  ;;  %v289_v37 = vmax.f32 %v225_v27, 0.0  ;;  %v290_v40 = vmax.f32 %v226_v31, 0.0  ;;  %v291_v41 = vmax.f32 %v227_v32, 0.0 }
   0xa   :  { %v933_v39 = vpack.c.bf16 %v285_v30, %v284_v29  ;;  %v820_v42 = vunpack.c.l.bf16 %v1093_v28  ;;  %v938_v44 = vpack.c.bf16 %v287_v35, %v286_v34  ;;  %v821_v46 = vunpack.c.h.bf16 %v1093_v28 }
   0xb   :  { %v943_v45 = vpack.c.bf16 %v289_v37, %v288_v36  ;;  %v824_v47 = vunpack.c.l.bf16 %v1094_v33  ;;  %v948_v48 = vpack.c.bf16 %v291_v41, %v290_v40  ;;  %v825_v50 = vunpack.c.h.bf16 %v1094_v33 }
   0xc   :  { %934 = vst [vmem:[%s1505_s3] sm:$0xff] %v933_v39   ;;  %v157_v49 = vmul.f32 %v820_v42, %v1178_v1  ;;  %v828_v51 = vunpack.c.l.bf16 %v1095_v38  ;;  %1121 = vst [vmem:[%s1505_s3 + $0x8] sm:$0xff] %v938_v44   ;;  %v158_v52 = vmul.f32 %v821_v46, %v1178_v1  ;;  %v829_v54 = vunpack.c.h.bf16 %v1095_v38  ;;  %v1101_v38 = vld [vmem:[%s1502_s0 + $0x60] sm:$0xff]  }
   0xd   :  { %1122 = vst [vmem:[%s1505_s3 + $0x10] sm:$0xff] %v943_v45   ;;  %v159_v53 = vmul.f32 %v824_v47, %v1178_v1  ;;  %v832_v55 = vunpack.c.l.bf16 %v1096_v43  ;;  %1123 = vst [vmem:[%s1505_s3 + $0x18] sm:$0xff] %v948_v48   ;;  %v160_v57 = vmul.f32 %v825_v50, %v1178_v1  ;;  %v833_v59 = vunpack.c.h.bf16 %v1096_v43 }
   0xe   :  { %v228_v56 = vadd.f32 %v1192_v7, %v157_v49  ;;  %v161_v58 = vmul.f32 %v828_v51, %v1178_v1  ;;  %v229_v60 = vadd.f32 %v1192_v7, %v158_v52  ;;  %v162_v62 = vmul.f32 %v829_v54, %v1178_v1  ;;  %v1102_v51 = vld [vmem:[%s1502_s0 + $0x68] sm:$0xff]  }
   0xf   :  { %v230_v61 = vadd.f32 %v1192_v7, %v159_v53  ;;  %v163_v63 = vmul.f32 %v832_v55, %v1178_v1  ;;  %v231_v3 = vadd.f32 %v1192_v7, %v160_v57  ;;  %v164_v5 = vmul.f32 %v833_v59, %v1178_v1 }
  0x10   :  { %v292_v2 = vmax.f32 %v228_v56, 0.0  ;;  %v232_v4 = vadd.f32 %v1192_v7, %v161_v58  ;;  %v293_v6 = vmax.f32 %v229_v60, 0.0  ;;  %v233_v9 = vadd.f32 %v1192_v7, %v162_v62  ;;  %v1103_v60 = vld [vmem:[%s1502_s0 + $0x70] sm:$0xff]  }
  0x11   :  { %v294_v8 = vmax.f32 %v230_v61, 0.0  ;;  %v234_v10 = vadd.f32 %v1192_v7, %v163_v63  ;;  %v295_v12 = vmax.f32 %v231_v3, 0.0  ;;  %v235_v14 = vadd.f32 %v1192_v7, %v164_v5 }
  0x12   :  { %v296_v13 = vmax.f32 %v232_v4, 0.0  ;;  %v836_v15 = vunpack.c.l.bf16 %v1097_v0  ;;  %v953_v17 = vpack.c.bf16 %v293_v6, %v292_v2  ;;  %v297_v18 = vmax.f32 %v233_v9, 0.0  ;;  %v1104_v2 = vld [vmem:[%s1502_s0 + $0x78] sm:$0xff]  }
  0x13   :  { %v298_v19 = vmax.f32 %v234_v10, 0.0  ;;  %v837_v20 = vunpack.c.h.bf16 %v1097_v0  ;;  %v958_v21 = vpack.c.bf16 %v295_v12, %v294_v8  ;;  %v299_v22 = vmax.f32 %v235_v14, 0.0  ;;  %v1105_v12 = vld [vmem:[%s1502_s0 + $0x80] sm:$0xff]  }
  0x14   :  { %v165_v23 = vmul.f32 %v836_v15, %v1178_v1  ;;  %v840_v24 = vunpack.c.l.bf16 %v1098_v11  ;;  %1124 = vst [vmem:[%s1505_s3 + $0x20] sm:$0xff] %v953_v17   ;;  %v963_v26 = vpack.c.bf16 %v297_v18, %v296_v13  ;;  %v841_v28 = vunpack.c.h.bf16 %v1098_v11 }
  0x15   :  { %v166_v27 = vmul.f32 %v837_v20, %v1178_v1  ;;  %v844_v29 = vunpack.c.l.bf16 %v1099_v16  ;;  %1125 = vst [vmem:[%s1505_s3 + $0x28] sm:$0xff] %v958_v21   ;;  %v968_v30 = vpack.c.bf16 %v299_v22, %v298_v19  ;;  %v845_v33 = vunpack.c.h.bf16 %v1099_v16 }
  0x16   :  { %v236_v31 = vadd.f32 %v1192_v7, %v165_v23  ;;  %v167_v32 = vmul.f32 %v840_v24, %v1178_v1  ;;  %1126 = vst [vmem:[%s1505_s3 + $0x30] sm:$0xff] %v963_v26   ;;  %v168_v35 = vmul.f32 %v841_v28, %v1178_v1  ;;  %v848_v37 = vunpack.c.l.bf16 %v1100_v25 }
  0x17   :  { %v237_v34 = vadd.f32 %v1192_v7, %v166_v27  ;;  %v169_v36 = vmul.f32 %v844_v29, %v1178_v1  ;;  %1127 = vst [vmem:[%s1505_s3 + $0x38] sm:$0xff] %v968_v30   ;;  %v170_v41 = vmul.f32 %v845_v33, %v1178_v1  ;;  %v849_v42 = vunpack.c.h.bf16 %v1100_v25  ;;  %v1106_v29 = vld [vmem:[%s1502_s0 + $0x88] sm:$0xff]  }
  0x18   :  { %v300_v39 = vmax.f32 %v236_v31, 0.0  ;;  %v238_v40 = vadd.f32 %v1192_v7, %v167_v32  ;;  %v239_v44 = vadd.f32 %v1192_v7, %v168_v35  ;;  %v171_v46 = vmul.f32 %v848_v37, %v1178_v1 }
  0x19   :  { %v301_v43 = vmax.f32 %v237_v34, 0.0  ;;  %v240_v45 = vadd.f32 %v1192_v7, %v169_v36  ;;  %v241_v48 = vadd.f32 %v1192_v7, %v170_v41  ;;  %v172_v49 = vmul.f32 %v849_v42, %v1178_v1  ;;  %v1107_v34 = vld [vmem:[%s1502_s0 + $0x90] sm:$0xff]  }
  0x1a   :  { %v302_v47 = vmax.f32 %v238_v40, 0.0  ;;  %v852_v50 = vunpack.c.l.bf16 %v1101_v38  ;;  %v303_v53 = vmax.f32 %v239_v44, 0.0  ;;  %v242_v55 = vadd.f32 %v1192_v7, %v171_v46 }
  0x1b   :  { %v973_v52 = vpack.c.bf16 %v301_v43, %v300_v39  ;;  %v304_v54 = vmax.f32 %v240_v45, 0.0  ;;  %v305_v56 = vmax.f32 %v241_v48, 0.0  ;;  %v243_v57 = vadd.f32 %v1192_v7, %v172_v49  ;;  %v1108_v43 = vld [vmem:[%s1502_s0 + $0x98] sm:$0xff]  }
  0x1c   :  { %v853_v58 = vunpack.c.h.bf16 %v1101_v38  ;;  %v173_v59 = vmul.f32 %v852_v50, %v1178_v1  ;;  %v978_v61 = vpack.c.bf16 %v303_v53, %v302_v47  ;;  %v306_v62 = vmax.f32 %v242_v55, 0.0 }
  0x1d   :  { %1128 = vst [vmem:[%s1505_s3 + $0x40] sm:$0xff] %v973_v52   ;;  %v856_v63 = vunpack.c.l.bf16 %v1102_v51  ;;  %v857_v0 = vunpack.c.h.bf16 %v1102_v51  ;;  %v983_v3 = vpack.c.bf16 %v305_v56, %v304_v54  ;;  %v307_v4 = vmax.f32 %v243_v57, 0.0  ;;  %v1109_v56 = vld [vmem:[%s1502_s0 + $0xa0] sm:$0xff]  }
  0x1e   :  { %v174_v5 = vmul.f32 %v853_v58, %v1178_v1  ;;  %v244_v6 = vadd.f32 %v1192_v7, %v173_v59  ;;  %1129 = vst [vmem:[%s1505_s3 + $0x48] sm:$0xff] %v978_v61   ;;  %v860_v10 = vunpack.c.l.bf16 %v1103_v60  ;;  %v861_v11 = vunpack.c.h.bf16 %v1103_v60 }
  0x1f   :  { %v175_v8 = vmul.f32 %v856_v63, %v1178_v1  ;;  %v176_v9 = vmul.f32 %v857_v0, %v1178_v1  ;;  %1130 = vst [vmem:[%s1505_s3 + $0x50] sm:$0xff] %v983_v3   ;;  %v988_v13 = vpack.c.bf16 %v307_v4, %v306_v62  ;;  %v864_v16 = vunpack.c.l.bf16 %v1104_v2 }
  0x20   :  { %v245_v14 = vadd.f32 %v1192_v7, %v174_v5  ;;  %v308_v15 = vmax.f32 %v244_v6, 0.0  ;;  %v177_v19 = vmul.f32 %v860_v10, %v1178_v1  ;;  %v178_v20 = vmul.f32 %v861_v11, %v1178_v1 }
  0x21   :  { %v246_v17 = vadd.f32 %v1192_v7, %v175_v8  ;;  %v247_v18 = vadd.f32 %v1192_v7, %v176_v9  ;;  %1131 = vst [vmem:[%s1505_s3 + $0x58] sm:$0xff] %v988_v13   ;;  %v865_v22 = vunpack.c.h.bf16 %v1104_v2  ;;  %v179_v23 = vmul.f32 %v864_v16, %v1178_v1  ;;  %v1110_v2 = vld [vmem:[%s1502_s0 + $0xa8] sm:$0xff]   ;;  %v1111_v16 = vld [vmem:[%s1502_s0 + $0xb0] sm:$0xff]  }
  0x22   :  { %v309_v21 = vmax.f32 %v245_v14, 0.0  ;;  %v868_v24 = vunpack.c.l.bf16 %v1105_v12  ;;  %v248_v27 = vadd.f32 %v1192_v7, %v177_v19  ;;  %v249_v28 = vadd.f32 %v1192_v7, %v178_v20 }
  0x23   :  { %v310_v25 = vmax.f32 %v246_v17, 0.0  ;;  %v311_v26 = vmax.f32 %v247_v18, 0.0  ;;  %v180_v31 = vmul.f32 %v865_v22, %v1178_v1  ;;  %v250_v32 = vadd.f32 %v1192_v7, %v179_v23 }
  0x24   :  { %v993_v30 = vpack.c.bf16 %v309_v21, %v308_v15  ;;  %v869_v33 = vunpack.c.h.bf16 %v1105_v12  ;;  %v312_v36 = vmax.f32 %v248_v27, 0.0  ;;  %v313_v37 = vmax.f32 %v249_v28, 0.0  ;;  %v1112_v21 = vld [vmem:[%s1502_s0 + $0xb8] sm:$0xff]  }
  0x25   :  { %v998_v35 = vpack.c.bf16 %v311_v26, %v310_v25  ;;  %v181_v38 = vmul.f32 %v868_v24, %v1178_v1  ;;  %v251_v39 = vadd.f32 %v1192_v7, %v180_v31  ;;  %v314_v40 = vmax.f32 %v250_v32, 0.0 }
  0x26   :  { %1132 = vst [vmem:[%s1505_s3 + $0x60] sm:$0xff] %v993_v30   ;;  %v182_v41 = vmul.f32 %v869_v33, %v1178_v1  ;;  %v872_v42 = vunpack.c.l.bf16 %v1106_v29  ;;  %v1003_v44 = vpack.c.bf16 %v313_v37, %v312_v36  ;;  %v873_v46 = vunpack.c.h.bf16 %v1106_v29 }
  0x27   :  { %1133 = vst [vmem:[%s1505_s3 + $0x68] sm:$0xff] %v998_v35   ;;  %v252_v45 = vadd.f32 %v1192_v7, %v181_v38  ;;  %v876_v47 = vunpack.c.l.bf16 %v1107_v34  ;;  %v315_v48 = vmax.f32 %v251_v39, 0.0  ;;  %v877_v51 = vunpack.c.h.bf16 %v1107_v34  ;;  %v1113_v34 = vld [vmem:[%s1502_s0 + $0xc0] sm:$0xff]  }
  0x28   :  { %v253_v49 = vadd.f32 %v1192_v7, %v182_v41  ;;  %v183_v50 = vmul.f32 %v872_v42, %v1178_v1  ;;  %1134 = vst [vmem:[%s1505_s3 + $0x70] sm:$0xff] %v1003_v44   ;;  %v184_v53 = vmul.f32 %v873_v46, %v1178_v1  ;;  %v880_v55 = vunpack.c.l.bf16 %v1108_v43 }
  0x29   :  { %v316_v52 = vmax.f32 %v252_v45, 0.0  ;;  %v185_v54 = vmul.f32 %v876_v47, %v1178_v1  ;;  %v1008_v57 = vpack.c.bf16 %v315_v48, %v314_v40  ;;  %v186_v60 = vmul.f32 %v877_v51, %v1178_v1  ;;  %v1114_v47 = vld [vmem:[%s1502_s0 + $0xc8] sm:$0xff]  }
  0x2a   :  { %v317_v58 = vmax.f32 %v253_v49, 0.0  ;;  %v254_v59 = vadd.f32 %v1192_v7, %v183_v50  ;;  %v255_v61 = vadd.f32 %v1192_v7, %v184_v53  ;;  %v881_v63 = vunpack.c.h.bf16 %v1108_v43 }
  0x2b   :  { %v256_v62 = vadd.f32 %v1192_v7, %v185_v54  ;;  %v187_v0 = vmul.f32 %v880_v55, %v1178_v1  ;;  %1135 = vst [vmem:[%s1505_s3 + $0x78] sm:$0xff] %v1008_v57   ;;  %v257_v5 = vadd.f32 %v1192_v7, %v186_v60  ;;  %v884_v6 = vunpack.c.l.bf16 %v1109_v56 }
  0x2c   :  { %v1013_v3 = vpack.c.bf16 %v317_v58, %v316_v52  ;;  %v318_v4 = vmax.f32 %v254_v59, 0.0  ;;  %v319_v8 = vmax.f32 %v255_v61, 0.0  ;;  %v188_v10 = vmul.f32 %v881_v63, %v1178_v1  ;;  %v1115_v52 = vld [vmem:[%s1502_s0 + $0xd0] sm:$0xff]   ;;  %v1116_v61 = vld [vmem:[%s1502_s0 + $0xd8] sm:$0xff]  }
  0x2d   :  { %v320_v9 = vmax.f32 %v256_v62, 0.0  ;;  %v258_v11 = vadd.f32 %v1192_v7, %v187_v0  ;;  %v321_v12 = vmax.f32 %v257_v5, 0.0  ;;  %v885_v13 = vunpack.c.h.bf16 %v1109_v56 }
  0x2e   :  { %1136 = vst [vmem:[%s1505_s3 + $0x80] sm:$0xff] %v1013_v3   ;;  %v189_v14 = vmul.f32 %v884_v6, %v1178_v1  ;;  %v888_v15 = vunpack.c.l.bf16 %v1110_v2  ;;  %v1018_v17 = vpack.c.bf16 %v319_v8, %v318_v4  ;;  %v259_v18 = vadd.f32 %v1192_v7, %v188_v10 }
  0x2f   :  { %v322_v19 = vmax.f32 %v258_v11, 0.0  ;;  %v889_v20 = vunpack.c.h.bf16 %v1110_v2  ;;  %v1023_v22 = vpack.c.bf16 %v321_v12, %v320_v9  ;;  %v190_v23 = vmul.f32 %v885_v13, %v1178_v1  ;;  %v1117_v12 = vld [vmem:[%s1502_s0 + $0xe0] sm:$0xff]  }
  0x30   :  { %v260_v24 = vadd.f32 %v1192_v7, %v189_v14  ;;  %v191_v25 = vmul.f32 %v888_v15, %v1178_v1  ;;  %1137 = vst [vmem:[%s1505_s3 + $0x88] sm:$0xff] %v1018_v17   ;;  %v323_v26 = vmax.f32 %v259_v18, 0.0  ;;  %v892_v28 = vunpack.c.l.bf16 %v1111_v16 }
  0x31   :  { %v192_v27 = vmul.f32 %v889_v20, %v1178_v1  ;;  %v893_v29 = vunpack.c.h.bf16 %v1111_v16  ;;  %1138 = vst [vmem:[%s1505_s3 + $0x90] sm:$0xff] %v1023_v22   ;;  %v261_v30 = vadd.f32 %v1192_v7, %v190_v23  ;;  %v896_v33 = vunpack.c.l.bf16 %v1112_v21 }
  0x32   :  { %v324_v31 = vmax.f32 %v260_v24, 0.0  ;;  %v262_v32 = vadd.f32 %v1192_v7, %v191_v25  ;;  %v1028_v35 = vpack.c.bf16 %v323_v26, %v322_v19  ;;  %v193_v37 = vmul.f32 %v892_v28, %v1178_v1 }
  0x33   :  { %v263_v36 = vadd.f32 %v1192_v7, %v192_v27  ;;  %v194_v38 = vmul.f32 %v893_v29, %v1178_v1  ;;  %v325_v39 = vmax.f32 %v261_v30, 0.0  ;;  %v897_v41 = vunpack.c.h.bf16 %v1112_v21  ;;  %v1118_v21 = vld [vmem:[%s1502_s0 + $0xe8] sm:$0xff]  }
  0x34   :  { %v326_v40 = vmax.f32 %v262_v32, 0.0  ;;  %v195_v42 = vmul.f32 %v896_v33, %v1178_v1  ;;  %1139 = vst [vmem:[%s1505_s3 + $0x98] sm:$0xff] %v1028_v35   ;;  %v264_v44 = vadd.f32 %v1192_v7, %v193_v37  ;;  %v900_v46 = vunpack.c.l.bf16 %v1113_v34 }
  0x35   :  { %v327_v43 = vmax.f32 %v263_v36, 0.0  ;;  %v265_v45 = vadd.f32 %v1192_v7, %v194_v38  ;;  %v1033_v48 = vpack.c.bf16 %v325_v39, %v324_v31  ;;  %v196_v49 = vmul.f32 %v897_v41, %v1178_v1  ;;  %v1120_v39 = vld [vmem:[%s1502_s0 + $0xf8] sm:$0xff]  }
  0x36   :  { %v266_v50 = vadd.f32 %v1192_v7, %v195_v42  ;;  %v901_v51 = vunpack.c.h.bf16 %v1113_v34  ;;  %v328_v54 = vmax.f32 %v264_v44, 0.0  ;;  %v197_v56 = vmul.f32 %v900_v46, %v1178_v1  ;;  %v1119_v34 = vld [vmem:[%s1502_s0 + $0xf0] sm:$0xff]  }
  0x37   :  { %v1038_v53 = vpack.c.bf16 %v327_v43, %v326_v40  ;;  %v329_v55 = vmax.f32 %v265_v45, 0.0  ;;  %1140 = vst [vmem:[%s1505_s3 + $0xa0] sm:$0xff] %v1033_v48   ;;  %v267_v57 = vadd.f32 %v1192_v7, %v196_v49  ;;  %v904_v60 = vunpack.c.l.bf16 %v1114_v47 }
  0x38   :  { %v330_v58 = vmax.f32 %v266_v50, 0.0  ;;  %v198_v59 = vmul.f32 %v901_v51, %v1178_v1  ;;  %v268_v63 = vadd.f32 %v1192_v7, %v197_v56  ;;  %v905_v0 = vunpack.c.h.bf16 %v1114_v47 }
  0x39   :  { %1141 = vst [vmem:[%s1505_s3 + $0xa8] sm:$0xff] %v1038_v53   ;;  %v1043_v62 = vpack.c.bf16 %v329_v55, %v328_v54  ;;  %v908_v2 = vunpack.c.l.bf16 %v1115_v52  ;;  %v331_v3 = vmax.f32 %v267_v57, 0.0  ;;  %v199_v5 = vmul.f32 %v904_v60, %v1178_v1 }
  0x3a   :  { %v269_v4 = vadd.f32 %v1192_v7, %v198_v59  ;;  %v909_v6 = vunpack.c.h.bf16 %v1115_v52  ;;  %v332_v8 = vmax.f32 %v268_v63, 0.0  ;;  %v200_v9 = vmul.f32 %v905_v0, %v1178_v1 }
  0x3b   :  { %1142 = vst [vmem:[%s1505_s3 + $0xb0] sm:$0xff] %v1043_v62   ;;  %v201_v10 = vmul.f32 %v908_v2, %v1178_v1  ;;  %v912_v11 = vunpack.c.l.bf16 %v1116_v61  ;;  %v1048_v13 = vpack.c.bf16 %v331_v3, %v330_v58  ;;  %v270_v15 = vadd.f32 %v1192_v7, %v199_v5 }
  0x3c   :  { %v333_v14 = vmax.f32 %v269_v4, 0.0  ;;  %v202_v16 = vmul.f32 %v909_v6, %v1178_v1  ;;  %v271_v17 = vadd.f32 %v1192_v7, %v200_v9  ;;  %v913_v19 = vunpack.c.h.bf16 %v1116_v61 }
  0x3d   :  { %v272_v18 = vadd.f32 %v1192_v7, %v201_v10  ;;  %v203_v20 = vmul.f32 %v912_v11, %v1178_v1  ;;  %1143 = vst [vmem:[%s1505_s3 + $0xb8] sm:$0xff] %v1048_v13   ;;  %v334_v23 = vmax.f32 %v270_v15, 0.0  ;;  %v916_v25 = vunpack.c.l.bf16 %v1117_v12 }
  0x3e   :  { %v1053_v22 = vpack.c.bf16 %v333_v14, %v332_v8  ;;  %v273_v24 = vadd.f32 %v1192_v7, %v202_v16  ;;  %v335_v26 = vmax.f32 %v271_v17, 0.0  ;;  %v204_v28 = vmul.f32 %v913_v19, %v1178_v1 }
  0x3f   :  { %v336_v27 = vmax.f32 %v272_v18, 0.0  ;;  %v274_v29 = vadd.f32 %v1192_v7, %v203_v20  ;;  %v917_v31 = vunpack.c.h.bf16 %v1117_v12  ;;  %v205_v32 = vmul.f32 %v916_v25, %v1178_v1 }
  0x40   :  { %1144 = vst [vmem:[%s1505_s3 + $0xc0] sm:$0xff] %v1053_v22   ;;  %v337_v30 = vmax.f32 %v273_v24, 0.0  ;;  %v920_v33 = vunpack.c.l.bf16 %v1118_v21  ;;  %v1058_v35 = vpack.c.bf16 %v335_v26, %v334_v23  ;;  %v275_v36 = vadd.f32 %v1192_v7, %v204_v28 }
  0x41   :  { %v338_v37 = vmax.f32 %v274_v29, 0.0  ;;  %v921_v38 = vunpack.c.h.bf16 %v1118_v21  ;;  %v206_v41 = vmul.f32 %v917_v31, %v1178_v1  ;;  %v276_v42 = vadd.f32 %v1192_v7, %v205_v32 }
  0x42   :  { %v1063_v40 = vpack.c.bf16 %v337_v30, %v336_v27  ;;  %v207_v43 = vmul.f32 %v920_v33, %v1178_v1  ;;  %1145 = vst [vmem:[%s1505_s3 + $0xc8] sm:$0xff] %v1058_v35   ;;  %v339_v44 = vmax.f32 %v275_v36, 0.0  ;;  %v924_v46 = vunpack.c.l.bf16 %v1119_v34 }
  0x43   :  { %v208_v45 = vmul.f32 %v921_v38, %v1178_v1  ;;  %v925_v47 = vunpack.c.h.bf16 %v1119_v34  ;;  %v277_v48 = vadd.f32 %v1192_v7, %v206_v41  ;;  %v340_v49 = vmax.f32 %v276_v42, 0.0 }
  0x44   :  { %1146 = vst [vmem:[%s1505_s3 + $0xd0] sm:$0xff] %v1063_v40   ;;  %v278_v50 = vadd.f32 %v1192_v7, %v207_v43  ;;  %v928_v51 = vunpack.c.l.bf16 %v1120_v39  ;;  %v1068_v52 = vpack.c.bf16 %v339_v44, %v338_v37  ;;  %v209_v54 = vmul.f32 %v924_v46, %v1178_v1 }
  0x45   :  { %v279_v53 = vadd.f32 %v1192_v7, %v208_v45  ;;  %v210_v55 = vmul.f32 %v925_v47, %v1178_v1  ;;  %v341_v56 = vmax.f32 %v277_v48, 0.0  ;;  %v929_v58 = vunpack.c.h.bf16 %v1120_v39 }
  0x46   :  { %v342_v57 = vmax.f32 %v278_v50, 0.0  ;;  %v211_v59 = vmul.f32 %v928_v51, %v1178_v1  ;;  %1147 = vst [vmem:[%s1505_s3 + $0xd8] sm:$0xff] %v1068_v52   ;;  %v280_v61 = vadd.f32 %v1192_v7, %v209_v54 }
  0x47   :  { %v343_v60 = vmax.f32 %v279_v53, 0.0  ;;  %v281_v62 = vadd.f32 %v1192_v7, %v210_v55  ;;  %v1073_v63 = vpack.c.bf16 %v341_v56, %v340_v49  ;;  %v212_v0 = vmul.f32 %v929_v58, %v1178_v1 }
  0x48   :  { %v282_v2 = vadd.f32 %v1192_v7, %v211_v59  ;;  %v344_v4 = vmax.f32 %v280_v61, 0.0 }
  0x49   :  { %v1078_v3 = vpack.c.bf16 %v343_v60, %v342_v57  ;;  %v345_v5 = vmax.f32 %v281_v62, 0.0  ;;  %1148 = vst [vmem:[%s1505_s3 + $0xe0] sm:$0xff] %v1073_v63   ;;  %v283_v6 = vadd.f32 %v1192_v7, %v212_v0 }
  0x4a   :  { %v346_v8 = vmax.f32 %v282_v2, 0.0 }
  0x4b   :  { %1149 = vst [vmem:[%s1505_s3 + $0xe8] sm:$0xff] %v1078_v3   ;;  %v1083_v9 = vpack.c.bf16 %v345_v5, %v344_v4  ;;  %v347_v10 = vmax.f32 %v283_v6, 0.0 }
  0x4d   :  { %1150 = vst [vmem:[%s1505_s3 + $0xf0] sm:$0xff] %v1083_v9   ;;  %v1088_v1 = vpack.c.bf16 %v347_v10, %v346_v8 }
  0x4f   :  { %1151 = vst [vmem:[%s1505_s3 + $0xf8] sm:$0xff] %v1088_v1  }

// kernel: _lambda_.15
= control target key start
LH: loop header
LB: loop body
LE: loop exit
PB: predicated region body
PF: predicated region fallthrough
CT: control target
= control target key end

     0   :  { %s2567_s12 = smov 0   ;;  %s2569_s13 = smov 0   ;;  %s2760_s0 = inlined_call_operand.vmem [shape: bf16[4,512,512], index: 0, kind: input, shape index: {}]   ;;  %s2761_s1 = inlined_call_operand.vmem [shape: bf16[4,512,128], index: 1, kind: input, shape index: {}]   ;;  %s2762_s2 = inlined_call_operand.vmem [shape: bf16[4,512,128], index: 2, kind: output, shape index: {0}]   ;;  %s2763_s3 = inlined_call_operand.vmem [shape: f32[4,2,2,128], index: 3, kind: output, shape index: {1}]  }
   0x1   :  { %s2571_s14 = smov 0   ;;  %s2573_s15 = smov 0  }
   0x2   :  { %s2575_s16 = smov 0  }
   0x3 LB: > { %s29_s17 = sadd.s32 1, %s2537_s14  ;;  %s33_s18 = sadd.s32 1, %s2541_s15  ;;  %s2545_s16 = sphi %s2575_s16, %s14_s16   ;;  %s2541_s15 = sphi %s2573_s15, %s2767_s15   ;;  %s2537_s14 = sphi %s2571_s14, %s2766_s14   ;;  %s2533_s13 = sphi %s2569_s13, %s2765_s13   ;;  %s2529_s12 = sphi %s2567_s12, %s2764_s12  }
   0x4   : > { %p31_p0 = scmp.ge.s32.totalorder %s29_s17, 2  ;;  %p1845_p1 = scmp.ge.s32.totalorder %s2545_s16, 1 }
   0x5   : > { %p188_p2 = scmp.lt.s32.totalorder %s2545_s16, 9 }
   0x6   : > { %s2769_s17 = smov (%p31_p0, %s29_s17), 0  ;;  %s2771_s18 = smov (!%p31_p0, %s33_s18), %s2541_s15 }
   0x7   : > { %p189_p3 = pnand %p1845_p1, %p188_p2  ;;  %p35_p4 = scmp.ge.s32.totalorder %s2771_s18, 4 }
   0x8   : > { %p240_p5 = scmp.lt.s32.totalorder (!%p189_p3), %s2533_s13, 3  ;;  %s1846_s23 = sshll.u32 (!%p189_p3), %s2529_s12, 5  ;;  %vm1678_vm0 = vcmask (!%p189_p3), 1040384  }
   0x9   : > { %s2773_s18 = smov (%p35_p4, %s2771_s18), 0  ;;  %192 = sbr.rel (%p189_p3) target bundleno = 411 (0x19b), region = 28 }
   0xa   : > { %p242_p6 = scmp.lt.s32.totalorder (!%p189_p3), %s1846_s23, 63  ;;  %p271_p7 = scmp.lt.s32.totalorder (!%p189_p3), %s2529_s12, 1 }
  0x10   : > { %s2775_s13 = smov (!%p240_p5, %s2533_s13), 3  ;;  %s2777_s23 = smov (!%p242_p6, %s1846_s23), 63 }
  0x11   : > { %s1848_s19 = sshll.u32 %s2775_s13, 8  ;;  %s1847_s24 = sshll.u32 %s2777_s23, 2 }
  0x12   : > { %s2607_s22 = scalar_lea.vmem %s2761_s1, %s1848_s19  ;;  %s249_s25 = sadd.s32 %s1848_s19, %s1847_s24 }
  0x13   : > { %v2379_v0 = vld [vmem:[%s2607_s22 + $0x40] sm:$0xff]   ;;  %v2383_v4 = vld [vmem:[%s2607_s22 + $0x48] sm:$0xff]   ;;  %v2387_v8 = vld [vmem:[%s2607_s22 + $0x50] sm:$0xff]   ;;  %s1849_s26 = sshll.u32 %s249_s25, 2  ;;  %s1853_s30 = sshll.u32 %s2775_s13, 6 }
  0x14   : > { %v2380_v1 = vld [vmem:[%s2607_s22 + $0xc0] sm:$0xff]   ;;  %2115 = vmatprep.subr.bf16.mxu0 %v2379_v0  ;;  %v2384_v5 = vld [vmem:[%s2607_s22 + $0xc8] sm:$0xff]   ;;  %v2388_v9 = vld [vmem:[%s2607_s22 + $0xd0] sm:$0xff]   ;;  %s2648_s29 = scalar_lea.vmem %s2760_s0, %s1849_s26  ;;  %s265_s4 = sadd.s32 %s1853_s30, %s2777_s23 }
  0x15   : > { %v2381_v2 = vld [vmem:[%s2607_s22] sm:$0xff]   ;;  %2227 = vmatprep.subr.bf16.mxu1 %v2380_v1  ;;  %v2385_v6 = vld [vmem:[%s2607_s22 + $0x8] sm:$0xff]   ;;  %v2389_v10 = vld [vmem:[%s2607_s22 + $0x10] sm:$0xff]   ;;  %s1854_s5 = sshll.u32 %s265_s4, 2  ;;  %s2779_s12 = smov (!%p271_p7, %s2529_s12), 1 }
  0x16   : > { %v2382_v3 = vld [vmem:[%s2607_s22 + $0x80] sm:$0xff]   ;;  %2116 = vmatpush3.bf16.msra.mxu0 %v2381_v2  ;;  %v2386_v7 = vld [vmem:[%s2607_s22 + $0x88] sm:$0xff]   ;;  %v2390_v11 = vld [vmem:[%s2607_s22 + $0x90] sm:$0xff]   ;;  %s2721_s8 = scalar_lea.vmem %s2762_s2, %s1854_s5  ;;  %s1855_s9 = sshll.u32 %s2775_s13, 1 }
  0x17   : > { %2228 = vmatpush3.bf16.msra.mxu1 %v2382_v3  ;;  %2117 = vmatprep.subr.bf16.mxu0 %v2383_v4  ;;  %v2391_v12 = vld [vmem:[%s2607_s22 + $0x58] sm:$0xff]   ;;  %v2395_v16 = vld [vmem:[%s2607_s22 + $0x60] sm:$0xff]   ;;  %v2399_v20 = vld [vmem:[%s2607_s22 + $0x68] sm:$0xff]   ;;  %s274_s10 = sadd.s32 %s1855_s9, %s2779_s12 }
  0x18   : > { %2229 = vmatprep.subr.bf16.mxu1 %v2384_v5  ;;  %v2392_v13 = vld [vmem:[%s2607_s22 + $0xd8] sm:$0xff]   ;;  %v2396_v17 = vld [vmem:[%s2607_s22 + $0xe0] sm:$0xff]   ;;  %v2400_v21 = vld [vmem:[%s2607_s22 + $0xe8] sm:$0xff]   ;;  %s1856_s11 = sshll.u32 %s274_s10, 1 }
  0x19   : > { %v2393_v14 = vld [vmem:[%s2607_s22 + $0x18] sm:$0xff]   ;;  %v2397_v18 = vld [vmem:[%s2607_s22 + $0x20] sm:$0xff]   ;;  %v2401_v22 = vld [vmem:[%s2607_s22 + $0x28] sm:$0xff]   ;;  %s276_s21 = scalar_lea.vmem %s2763_s3, %s1856_s11 }
  0x1a   : > { %2118 = vmatpush3.bf16.msra.mxu0 %v2385_v6  ;;  %v2394_v15 = vld [vmem:[%s2607_s22 + $0x98] sm:$0xff]   ;;  %v2398_v19 = vld [vmem:[%s2607_s22 + $0xa0] sm:$0xff]   ;;  %v2402_v23 = vld [vmem:[%s2607_s22 + $0xa8] sm:$0xff]  }
  0x1b   : > { %2230 = vmatpush3.bf16.msra.mxu1 %v2386_v7  ;;  %2119 = vmatprep.subr.bf16.mxu0 %v2387_v8  ;;  %v2403_v24 = vld [vmem:[%s2607_s22 + $0x70] sm:$0xff]   ;;  %v2407_v28 = vld [vmem:[%s2607_s22 + $0x78] sm:$0xff]  }
  0x1c   : > { %2231 = vmatprep.subr.bf16.mxu1 %v2388_v9  ;;  %v2404_v25 = vld [vmem:[%s2607_s22 + $0xf0] sm:$0xff]   ;;  %v2408_v29 = vld [vmem:[%s2607_s22 + $0xf8] sm:$0xff]  }
  0x1d   : > { %v2405_v26 = vld [vmem:[%s2607_s22 + $0x30] sm:$0xff]   ;;  %v2409_v30 = vld [vmem:[%s2607_s22 + $0x38] sm:$0xff]  }
  0x1e   : > { %2120 = vmatpush3.bf16.msra.mxu0 %v2389_v10  ;;  %v2406_v27 = vld [vmem:[%s2607_s22 + $0xb0] sm:$0xff]   ;;  %v2410_v31 = vld [vmem:[%s2607_s22 + $0xb8] sm:$0xff]  }
  0x1f   : > { %2232 = vmatpush3.bf16.msra.mxu1 %v2390_v11  ;;  %2121 = vmatprep.subr.bf16.mxu0 %v2391_v12  ;;  %v2411_v32 = vld [vmem:[%s2648_s29] ss:$16 sps:$4 sm:$0xff]   ;;  %v2413_v33 = vld [vmem:[%s2648_s29 + $0x4] ss:$16 sps:$4 sm:$0xff]   ;;  %v2414_v34 = vld [vmem:[%s2648_s29 + $0x8] ss:$16 sps:$4 sm:$0xff]  }
  0x20   : > { %2233 = vmatprep.subr.bf16.mxu1 %v2392_v13  ;;  %v2416_v35 = vld [vmem:[%s2648_s29 + $0xc] ss:$16 sps:$4 sm:$0xff]   ;;  %1023 = vmatprep.mubr.bf16.mxu0 %v2413_v33  ;;  %v2417_v36 = vld [vmem:[%s2648_s29 + $0x24] ss:$16 sps:$4 sm:$0xff]   ;;  %v2421_v38 = vld [vmem:[%s2648_s29 + $0x20] ss:$16 sps:$4 sm:$0xff]  }
  0x21   : > { %1184 = vmatprep.mubr.bf16.mxu1 %v2416_v35  ;;  %v2419_v37 = vld [vmem:[%s2648_s29 + $0x2c] ss:$16 sps:$4 sm:$0xff]   ;;  %v2422_v39 = vld [vmem:[%s2648_s29 + $0x28] ss:$16 sps:$4 sm:$0xff]   ;;  %v2423_v40 = vld [vmem:[%s2648_s29 + $0x44] ss:$16 sps:$4 sm:$0xff]  }
  0x22   : > { %2122 = vmatpush3.bf16.msra.mxu0 %v2393_v14  ;;  %v2425_v41 = vld [vmem:[%s2648_s29 + $0x4c] ss:$16 sps:$4 sm:$0xff]   ;;  %v2427_v42 = vld [vmem:[%s2648_s29 + $0x40] ss:$16 sps:$4 sm:$0xff]   ;;  %v2428_v43 = vld [vmem:[%s2648_s29 + $0x48] ss:$16 sps:$4 sm:$0xff]  }
  0x23   : > { %2234 = vmatpush3.bf16.msra.mxu1 %v2394_v15  ;;  %2123 = vmatprep.subr.bf16.mxu0 %v2395_v16  ;;  %v2429_v44 = vld [vmem:[%s2648_s29 + $0x64] ss:$16 sps:$4 sm:$0xff]   ;;  %v2431_v45 = vld [vmem:[%s2648_s29 + $0x6c] ss:$16 sps:$4 sm:$0xff]   ;;  %v2433_v46 = vld [vmem:[%s2648_s29 + $0x60] ss:$16 sps:$4 sm:$0xff]  }
  0x24   : > { %2235 = vmatprep.subr.bf16.mxu1 %v2396_v17  ;;  %v2434_v47 = vld [vmem:[%s2648_s29 + $0x68] ss:$16 sps:$4 sm:$0xff]   ;;  %v2435_v48 = vld [vmem:[%s2648_s29 + $0x84] ss:$16 sps:$4 sm:$0xff]   ;;  %v2437_v49 = vld [vmem:[%s2648_s29 + $0x8c] ss:$16 sps:$4 sm:$0xff]  }
  0x25   : > { %v2439_v50 = vld [vmem:[%s2648_s29 + $0x80] ss:$16 sps:$4 sm:$0xff]   ;;  %v2440_v51 = vld [vmem:[%s2648_s29 + $0x88] ss:$16 sps:$4 sm:$0xff]   ;;  %v2441_v52 = vld [vmem:[%s2648_s29 + $0xa4] ss:$16 sps:$4 sm:$0xff]  }
  0x26   : > { %2124 = vmatpush3.bf16.msra.mxu0 %v2397_v18  ;;  %v2443_v53 = vld [vmem:[%s2648_s29 + $0xac] ss:$16 sps:$4 sm:$0xff]   ;;  %v2445_v54 = vld [vmem:[%s2648_s29 + $0xa0] ss:$16 sps:$4 sm:$0xff]   ;;  %v2446_v55 = vld [vmem:[%s2648_s29 + $0xa8] ss:$16 sps:$4 sm:$0xff]  }
  0x27   : > { %2236 = vmatpush3.bf16.msra.mxu1 %v2398_v19  ;;  %2125 = vmatprep.subr.bf16.mxu0 %v2399_v20  ;;  %v2447_v56 = vld [vmem:[%s2648_s29 + $0xc4] ss:$16 sps:$4 sm:$0xff]   ;;  %v2449_v57 = vld [vmem:[%s2648_s29 + $0xcc] ss:$16 sps:$4 sm:$0xff]   ;;  %v2451_v58 = vld [vmem:[%s2648_s29 + $0xc0] ss:$16 sps:$4 sm:$0xff]  }
  0x28   : > { %2237 = vmatprep.subr.bf16.mxu1 %v2400_v21  ;;  %v2452_v59 = vld [vmem:[%s2648_s29 + $0xc8] ss:$16 sps:$4 sm:$0xff]   ;;  %v2453_v60 = vld [vmem:[%s2648_s29 + $0xe4] ss:$16 sps:$4 sm:$0xff]   ;;  %v2455_v61 = vld [vmem:[%s2648_s29 + $0xec] ss:$16 sps:$4 sm:$0xff]  }
  0x29   : > { %v2457_v62 = vld [vmem:[%s2648_s29 + $0xe0] ss:$16 sps:$4 sm:$0xff]   ;;  %v2458_v63 = vld [vmem:[%s2648_s29 + $0xe8] ss:$16 sps:$4 sm:$0xff]   ;;  %v2459_v0 = vld [vmem:[%s2648_s29 + $0x104] ss:$16 sps:$4 sm:$0xff]  }
  0x2a   : > { %2126 = vmatpush3.bf16.msra.mxu0 %v2401_v22  ;;  %v2461_v1 = vld [vmem:[%s2648_s29 + $0x10c] ss:$16 sps:$4 sm:$0xff]   ;;  %v2463_v2 = vld [vmem:[%s2648_s29 + $0x100] ss:$16 sps:$4 sm:$0xff]   ;;  %v2464_v3 = vld [vmem:[%s2648_s29 + $0x108] ss:$16 sps:$4 sm:$0xff]  }
  0x2b   : > { %2238 = vmatpush3.bf16.msra.mxu1 %v2402_v23  ;;  %2127 = vmatprep.subr.bf16.mxu0 %v2403_v24  ;;  %v2465_v4 = vld [vmem:[%s2648_s29 + $0x124] ss:$16 sps:$4 sm:$0xff]   ;;  %v2467_v5 = vld [vmem:[%s2648_s29 + $0x12c] ss:$16 sps:$4 sm:$0xff]   ;;  %v2469_v6 = vld [vmem:[%s2648_s29 + $0x120] ss:$16 sps:$4 sm:$0xff]  }
  0x2c   : > { %2239 = vmatprep.subr.bf16.mxu1 %v2404_v25  ;;  %v2470_v7 = vld [vmem:[%s2648_s29 + $0x128] ss:$16 sps:$4 sm:$0xff]   ;;  %v2471_v8 = vld [vmem:[%s2648_s29 + $0x144] ss:$16 sps:$4 sm:$0xff]   ;;  %v2473_v9 = vld [vmem:[%s2648_s29 + $0x14c] ss:$16 sps:$4 sm:$0xff]  }
  0x2d   : > { %v2475_v10 = vld [vmem:[%s2648_s29 + $0x140] ss:$16 sps:$4 sm:$0xff]   ;;  %v2476_v11 = vld [vmem:[%s2648_s29 + $0x148] ss:$16 sps:$4 sm:$0xff]   ;;  %v2477_v12 = vld [vmem:[%s2648_s29 + $0x164] ss:$16 sps:$4 sm:$0xff]  }
  0x2e   : > { %2128 = vmatpush3.bf16.msra.mxu0 %v2405_v26  ;;  %v2479_v13 = vld [vmem:[%s2648_s29 + $0x16c] ss:$16 sps:$4 sm:$0xff]   ;;  %v2481_v14 = vld [vmem:[%s2648_s29 + $0x160] ss:$16 sps:$4 sm:$0xff]   ;;  %v2482_v15 = vld [vmem:[%s2648_s29 + $0x168] ss:$16 sps:$4 sm:$0xff]  }
  0x2f   : > { %2240 = vmatpush3.bf16.msra.mxu1 %v2406_v27  ;;  %2129 = vmatprep.subr.bf16.mxu0 %v2407_v28  ;;  %v2483_v16 = vld [vmem:[%s2648_s29 + $0x184] ss:$16 sps:$4 sm:$0xff]   ;;  %v2485_v17 = vld [vmem:[%s2648_s29 + $0x18c] ss:$16 sps:$4 sm:$0xff]   ;;  %v2487_v18 = vld [vmem:[%s2648_s29 + $0x180] ss:$16 sps:$4 sm:$0xff]  }
  0x30   : > { %2241 = vmatprep.subr.bf16.mxu1 %v2408_v29  ;;  %v2488_v19 = vld [vmem:[%s2648_s29 + $0x188] ss:$16 sps:$4 sm:$0xff]   ;;  %v2489_v20 = vld [vmem:[%s2648_s29 + $0x1a4] ss:$16 sps:$4 sm:$0xff]   ;;  %v2491_v21 = vld [vmem:[%s2648_s29 + $0x1ac] ss:$16 sps:$4 sm:$0xff]  }
  0x31   : > { %v2493_v22 = vld [vmem:[%s2648_s29 + $0x1a0] ss:$16 sps:$4 sm:$0xff]   ;;  %v2494_v23 = vld [vmem:[%s2648_s29 + $0x1a8] ss:$16 sps:$4 sm:$0xff]   ;;  %v2495_v24 = vld [vmem:[%s2648_s29 + $0x1c4] ss:$16 sps:$4 sm:$0xff]  }
  0x32   : > { %2130 = vmatpush3.bf16.msra.mxu0 %v2409_v30  ;;  %v2497_v25 = vld [vmem:[%s2648_s29 + $0x1cc] ss:$16 sps:$4 sm:$0xff]   ;;  %v2499_v26 = vld [vmem:[%s2648_s29 + $0x1c0] ss:$16 sps:$4 sm:$0xff]   ;;  %v2500_v27 = vld [vmem:[%s2648_s29 + $0x1c8] ss:$16 sps:$4 sm:$0xff]  }
  0x33   : > { %2242 = vmatpush3.bf16.msra.mxu1 %v2410_v31  ;;  %v2501_v28 = vld [vmem:[%s2648_s29 + $0x1e4] ss:$16 sps:$4 sm:$0xff]   ;;  %v2503_v29 = vld [vmem:[%s2648_s29 + $0x1ec] ss:$16 sps:$4 sm:$0xff]   ;;  %v2505_v30 = vld [vmem:[%s2648_s29 + $0x1e0] ss:$16 sps:$4 sm:$0xff]  }
  0x34   : > { %v2506_v31 = vld [vmem:[%s2648_s29 + $0x1e8] ss:$16 sps:$4 sm:$0xff]  }
  0x35   : > { %1024 = vmatmul.mubr.bf16.vlgmr.msra.gmra.mrb[0].mxu0 %v2411_v32 }
  0x36   : > { %1185 = vmatmul.mubr.bf16.vlgmr.msra.gmra.mrb[0].mxu1 %v2414_v34  ;;  %1031 = vmatprep.mubr.bf16.mxu0 %v2417_v36 }
  0x37   : > { %1192 = vmatprep.mubr.bf16.mxu1 %v2419_v37 }
  0x3d   : > { %1032 = vmatmul.mubr.bf16.gmra.mrb[4].mxu0 %v2421_v38 }
  0x3e   : > { %1193 = vmatmul.mubr.bf16.gmra.mrb[4].mxu1 %v2422_v39  ;;  %1039 = vmatprep.mubr.bf16.mxu0 %v2423_v40 }
  0x3f   : > { %1200 = vmatprep.mubr.bf16.mxu1 %v2425_v41 }
  0x45   : > { %1040 = vmatmul.mubr.bf16.gmra.mrb[8].mxu0 %v2427_v42 }
  0x46   : > { %1201 = vmatmul.mubr.bf16.gmra.mrb[8].mxu1 %v2428_v43  ;;  %1047 = vmatprep.mubr.bf16.mxu0 %v2429_v44 }
  0x47   : > { %1208 = vmatprep.mubr.bf16.mxu1 %v2431_v45 }
  0x4d   : > { %1048 = vmatmul.mubr.bf16.gmra.mrb[12].mxu0 %v2433_v46 }
  0x4e   : > { %1209 = vmatmul.mubr.bf16.gmra.mrb[12].mxu1 %v2434_v47  ;;  %1055 = vmatprep.mubr.bf16.mxu0 %v2435_v48 }
  0x4f   : > { %1216 = vmatprep.mubr.bf16.mxu1 %v2437_v49 }
  0x55   : > { %1056 = vmatmul.mubr.bf16.gmra.mrb[16].mxu0 %v2439_v50 }
  0x56   : > { %1217 = vmatmul.mubr.bf16.gmra.mrb[16].mxu1 %v2440_v51  ;;  %1063 = vmatprep.mubr.bf16.mxu0 %v2441_v52 }
  0x57   : > { %1224 = vmatprep.mubr.bf16.mxu1 %v2443_v53 }
  0x5d   : > { %1064 = vmatmul.mubr.bf16.gmra.mrb[20].mxu0 %v2445_v54 }
  0x5e   : > { %1225 = vmatmul.mubr.bf16.gmra.mrb[20].mxu1 %v2446_v55  ;;  %1071 = vmatprep.mubr.bf16.mxu0 %v2447_v56 }
  0x5f   : > { %1232 = vmatprep.mubr.bf16.mxu1 %v2449_v57 }
  0x65   : > { %1072 = vmatmul.mubr.bf16.gmra.mrb[24].mxu0 %v2451_v58 }
  0x66   : > { %1233 = vmatmul.mubr.bf16.gmra.mrb[24].mxu1 %v2452_v59  ;;  %1079 = vmatprep.mubr.bf16.mxu0 %v2453_v60 }
  0x67   : > { %1240 = vmatprep.mubr.bf16.mxu1 %v2455_v61 }
  0x6d   : > { %1080 = vmatmul.mubr.bf16.gmra.mrb[28].mxu0 %v2457_v62 }
  0x6e   : > { %1241 = vmatmul.mubr.bf16.gmra.mrb[28].mxu1 %v2458_v63  ;;  %1087 = vmatprep.mubr.bf16.mxu0 %v2459_v0 }
  0x6f   : > { %1248 = vmatprep.mubr.bf16.mxu1 %v2461_v1 }
  0x75   : > { %1088 = vmatmul.mubr.bf16.gmra.mrb[32].mxu0 %v2463_v2 }
  0x76   : > { %1249 = vmatmul.mubr.bf16.gmra.mrb[32].mxu1 %v2464_v3  ;;  %1095 = vmatprep.mubr.bf16.mxu0 %v2465_v4 }
  0x77   : > { %1256 = vmatprep.mubr.bf16.mxu1 %v2467_v5 }
  0x7d   : > { %1096 = vmatmul.mubr.bf16.gmra.mrb[36].mxu0 %v2469_v6 }
  0x7e   : > { %1257 = vmatmul.mubr.bf16.gmra.mrb[36].mxu1 %v2470_v7  ;;  %1103 = vmatprep.mubr.bf16.mxu0 %v2471_v8 }
  0x7f   : > { %1264 = vmatprep.mubr.bf16.mxu1 %v2473_v9 }
  0x85   : > { %1104 = vmatmul.mubr.bf16.gmra.mrb[40].mxu0 %v2475_v10 }
  0x86   : > { %1265 = vmatmul.mubr.bf16.gmra.mrb[40].mxu1 %v2476_v11  ;;  %1111 = vmatprep.mubr.bf16.mxu0 %v2477_v12 }
  0x87   : > { %1272 = vmatprep.mubr.bf16.mxu1 %v2479_v13 }
  0x8d   : > { %1112 = vmatmul.mubr.bf16.gmra.mrb[44].mxu0 %v2481_v14 }
  0x8e   : > { %1273 = vmatmul.mubr.bf16.gmra.mrb[44].mxu1 %v2482_v15  ;;  %1119 = vmatprep.mubr.bf16.mxu0 %v2483_v16 }
  0x8f   : > { %1280 = vmatprep.mubr.bf16.mxu1 %v2485_v17 }
  0x95   : > { %1120 = vmatmul.mubr.bf16.gmra.mrb[48].mxu0 %v2487_v18 }
  0x96   : > { %1281 = vmatmul.mubr.bf16.gmra.mrb[48].mxu1 %v2488_v19  ;;  %1127 = vmatprep.mubr.bf16.mxu0 %v2489_v20 }
  0x97   : > { %1288 = vmatprep.mubr.bf16.mxu1 %v2491_v21 }
  0x9d   : > { %1128 = vmatmul.mubr.bf16.gmra.mrb[52].mxu0 %v2493_v22 }
  0x9e   : > { %1289 = vmatmul.mubr.bf16.gmra.mrb[52].mxu1 %v2494_v23  ;;  %1135 = vmatprep.mubr.bf16.mxu0 %v2495_v24 }
  0x9f   : > { %1296 = vmatprep.mubr.bf16.mxu1 %v2497_v25 }
  0xa5   : > { %1136 = vmatmul.mubr.bf16.gmra.mrb[56].mxu0 %v2499_v26 }
  0xa6   : > { %1297 = vmatmul.mubr.bf16.gmra.mrb[56].mxu1 %v2500_v27  ;;  %1143 = vmatprep.mubr.bf16.mxu0 %v2501_v28 }
  0xa7   : > { %1304 = vmatprep.mubr.bf16.mxu1 %v2503_v29 }
  0xad   : > { %1144 = vmatmul.mubr.bf16.gmra.mrb[60].mxu0 %v2505_v30 }
  0xae   : > { %1305 = vmatmul.mubr.bf16.gmra.mrb[60].mxu1 %v2506_v31 }
 0x108   : > { %v2131_v32 = vpop.f32.mrb[0].mxu0 }
 0x109   : > { %v2243_v33 = vpop.f32.mrb[0].mxu1  ;;  %v2132_v34 = vpop.f32.mrb[1].mxu0 }
 0x10a   : > { %v2133_v35 = vadd.f32 %v2132_v34, %v2131_v32  ;;  %v2244_v36 = vpop.f32.mrb[1].mxu1  ;;  %v2134_v37 = vpop.f32.mrb[2].mxu0 }
 0x10b   : > { %v2245_v38 = vadd.f32 %v2244_v36, %v2243_v33  ;;  %v2246_v39 = vpop.f32.mrb[2].mxu1  ;;  %v2135_v40 = vpop.f32.mrb[3].mxu0 }
 0x10c   : > { %v2136_v41 = vadd.f32 %v2135_v40, %v2134_v37  ;;  %v2247_v42 = vpop.f32.mrb[3].mxu1 }
 0x10d   : > { %v1187_v43 = vadd.f32 %v2245_v38, %v2133_v35  ;;  %v2248_v44 = vadd.f32 %v2247_v42, %v2246_v39 }
 0x10f   : > { %v1190_v45 = vadd.f32 %v2248_v44, %v2136_v41  ;;  %v1609_v47 = vmul.f32 %v1187_v43, %v1187_v43 }
 0x110   : > { %v2137_v46 = vpop.f32.mrb[4].mxu0 }
 0x111   : > { %v2023_v48 = vpack.c.bf16 %v1190_v45, %v1187_v43  ;;  %v1572_v49 = vadd.f32 %v1190_v45, %v1187_v43  ;;  %v1610_v50 = vmul.f32 %v1190_v45, %v1190_v45  ;;  %v2249_v51 = vpop.f32.mrb[4].mxu1  ;;  %v2138_v52 = vpop.f32.mrb[5].mxu0 }
 0x112   : > { %v2139_v53 = vadd.f32 %v2138_v52, %v2137_v46  ;;  %v2250_v54 = vpop.f32.mrb[5].mxu1  ;;  %v2140_v55 = vpop.f32.mrb[6].mxu0 }
 0x113   : > { %2024 = vst [vmem:[%s2721_s8] sm:$0xff] %v2023_v48   ;;  %v1641_v56 = vadd.f32 %v1610_v50, %v1609_v47  ;;  %v2251_v57 = vadd.f32 %v2250_v54, %v2249_v51  ;;  %v2252_v58 = vpop.f32.mrb[6].mxu1  ;;  %v2141_v59 = vpop.f32.mrb[7].mxu0 }
 0x114   : > { %v2142_v60 = vadd.f32 %v2141_v59, %v2140_v55  ;;  %v2253_v61 = vpop.f32.mrb[7].mxu1 }
 0x115   : > { %v1195_v62 = vadd.f32 %v2251_v57, %v2139_v53  ;;  %v2254_v63 = vadd.f32 %v2253_v61, %v2252_v58 }
 0x117   : > { %v1573_v0 = vadd.f32 %v1572_v49, %v1195_v62  ;;  %v1611_v1 = vmul.f32 %v1195_v62, %v1195_v62  ;;  %v1198_v2 = vadd.f32 %v2254_v63, %v2142_v60 }
 0x118   : > { %v2143_v3 = vpop.f32.mrb[8].mxu0 }
 0x119   : > { %v1642_v4 = vadd.f32 %v1641_v56, %v1611_v1  ;;  %v2028_v5 = vpack.c.bf16 %v1198_v2, %v1195_v62  ;;  %v1574_v6 = vadd.f32 %v1573_v0, %v1198_v2  ;;  %v1612_v7 = vmul.f32 %v1198_v2, %v1198_v2  ;;  %v2255_v8 = vpop.f32.mrb[8].mxu1  ;;  %v2144_v9 = vpop.f32.mrb[9].mxu0 }
 0x11a   : > { %v2145_v10 = vadd.f32 %v2144_v9, %v2143_v3  ;;  %v2256_v11 = vpop.f32.mrb[9].mxu1  ;;  %v2146_v12 = vpop.f32.mrb[10].mxu0 }
 0x11b   : > { %2100 = vst [vmem:[%s2721_s8 + $0x8] sm:$0xff] %v2028_v5   ;;  %v1643_v13 = vadd.f32 %v1642_v4, %v1612_v7  ;;  %v2257_v14 = vadd.f32 %v2256_v11, %v2255_v8  ;;  %v2258_v15 = vpop.f32.mrb[10].mxu1  ;;  %v2147_v16 = vpop.f32.mrb[11].mxu0 }
 0x11c   : > { %v2148_v17 = vadd.f32 %v2147_v16, %v2146_v12  ;;  %v2259_v18 = vpop.f32.mrb[11].mxu1 }
 0x11d   : > { %v1203_v19 = vadd.f32 %v2257_v14, %v2145_v10  ;;  %v2260_v20 = vadd.f32 %v2259_v18, %v2258_v15 }
 0x11f   : > { %v1575_v21 = vadd.f32 %v1574_v6, %v1203_v19  ;;  %v1613_v22 = vmul.f32 %v1203_v19, %v1203_v19  ;;  %v1206_v23 = vadd.f32 %v2260_v20, %v2148_v17 }
 0x120   : > { %v2149_v24 = vpop.f32.mrb[12].mxu0 }
 0x121   : > { %v1644_v25 = vadd.f32 %v1643_v13, %v1613_v22  ;;  %v2033_v26 = vpack.c.bf16 %v1206_v23, %v1203_v19  ;;  %v1576_v27 = vadd.f32 %v1575_v21, %v1206_v23  ;;  %v1614_v28 = vmul.f32 %v1206_v23, %v1206_v23  ;;  %v2261_v29 = vpop.f32.mrb[12].mxu1  ;;  %v2150_v30 = vpop.f32.mrb[13].mxu0 }
 0x122   : > { %v2151_v31 = vadd.f32 %v2150_v30, %v2149_v24  ;;  %v2262_v32 = vpop.f32.mrb[13].mxu1  ;;  %v2152_v33 = vpop.f32.mrb[14].mxu0 }
 0x123   : > { %2101 = vst [vmem:[%s2721_s8 + $0x10] sm:$0xff] %v2033_v26   ;;  %v1645_v34 = vadd.f32 %v1644_v25, %v1614_v28  ;;  %v2263_v35 = vadd.f32 %v2262_v32, %v2261_v29  ;;  %v2264_v36 = vpop.f32.mrb[14].mxu1  ;;  %v2153_v37 = vpop.f32.mrb[15].mxu0 }
 0x124   : > { %v2154_v38 = vadd.f32 %v2153_v37, %v2152_v33  ;;  %v2265_v39 = vpop.f32.mrb[15].mxu1 }
 0x125   : > { %v1211_v40 = vadd.f32 %v2263_v35, %v2151_v31  ;;  %v2266_v41 = vadd.f32 %v2265_v39, %v2264_v36 }
 0x127   : > { %v1577_v42 = vadd.f32 %v1576_v27, %v1211_v40  ;;  %v1615_v43 = vmul.f32 %v1211_v40, %v1211_v40  ;;  %v1214_v44 = vadd.f32 %v2266_v41, %v2154_v38 }
 0x128   : > { %v2155_v45 = vpop.f32.mrb[16].mxu0 }
 0x129   : > { %v1646_v46 = vadd.f32 %v1645_v34, %v1615_v43  ;;  %v2038_v47 = vpack.c.bf16 %v1214_v44, %v1211_v40  ;;  %v1578_v48 = vadd.f32 %v1577_v42, %v1214_v44  ;;  %v1616_v49 = vmul.f32 %v1214_v44, %v1214_v44  ;;  %v2267_v50 = vpop.f32.mrb[16].mxu1  ;;  %v2156_v51 = vpop.f32.mrb[17].mxu0 }
 0x12a   : > { %v2157_v52 = vadd.f32 %v2156_v51, %v2155_v45  ;;  %v2268_v53 = vpop.f32.mrb[17].mxu1  ;;  %v2158_v54 = vpop.f32.mrb[18].mxu0 }
 0x12b   : > { %2102 = vst [vmem:[%s2721_s8 + $0x18] sm:$0xff] %v2038_v47   ;;  %v1647_v55 = vadd.f32 %v1646_v46, %v1616_v49  ;;  %v2269_v56 = vadd.f32 %v2268_v53, %v2267_v50  ;;  %v2270_v57 = vpop.f32.mrb[18].mxu1  ;;  %v2159_v58 = vpop.f32.mrb[19].mxu0 }
 0x12c   : > { %v2160_v59 = vadd.f32 %v2159_v58, %v2158_v54  ;;  %v2271_v60 = vpop.f32.mrb[19].mxu1 }
 0x12d   : > { %v1219_v61 = vadd.f32 %v2269_v56, %v2157_v52  ;;  %v2272_v62 = vadd.f32 %v2271_v60, %v2270_v57 }
 0x12f   : > { %v1579_v63 = vadd.f32 %v1578_v48, %v1219_v61  ;;  %v1617_v0 = vmul.f32 %v1219_v61, %v1219_v61  ;;  %v1222_v1 = vadd.f32 %v2272_v62, %v2160_v59 }
 0x130   : > { %v2161_v2 = vpop.f32.mrb[20].mxu0 }
 0x131   : > { %v1648_v3 = vadd.f32 %v1647_v55, %v1617_v0  ;;  %v2043_v4 = vpack.c.bf16 %v1222_v1, %v1219_v61  ;;  %v1580_v5 = vadd.f32 %v1579_v63, %v1222_v1  ;;  %v1618_v6 = vmul.f32 %v1222_v1, %v1222_v1  ;;  %v2273_v7 = vpop.f32.mrb[20].mxu1  ;;  %v2162_v8 = vpop.f32.mrb[21].mxu0 }
 0x132   : > { %v2163_v9 = vadd.f32 %v2162_v8, %v2161_v2  ;;  %v2274_v10 = vpop.f32.mrb[21].mxu1  ;;  %v2164_v11 = vpop.f32.mrb[22].mxu0 }
 0x133   : > { %2103 = vst [vmem:[%s2721_s8 + $0x20] sm:$0xff] %v2043_v4   ;;  %v1649_v12 = vadd.f32 %v1648_v3, %v1618_v6  ;;  %v2275_v13 = vadd.f32 %v2274_v10, %v2273_v7  ;;  %v2276_v14 = vpop.f32.mrb[22].mxu1  ;;  %v2165_v15 = vpop.f32.mrb[23].mxu0 }
 0x134   : > { %v2166_v16 = vadd.f32 %v2165_v15, %v2164_v11  ;;  %v2277_v17 = vpop.f32.mrb[23].mxu1 }
 0x135   : > { %v1227_v18 = vadd.f32 %v2275_v13, %v2163_v9  ;;  %v2278_v19 = vadd.f32 %v2277_v17, %v2276_v14 }
 0x137   : > { %v1581_v20 = vadd.f32 %v1580_v5, %v1227_v18  ;;  %v1619_v21 = vmul.f32 %v1227_v18, %v1227_v18  ;;  %v1230_v22 = vadd.f32 %v2278_v19, %v2166_v16 }
 0x138   : > { %v2167_v23 = vpop.f32.mrb[24].mxu0 }
 0x139   : > { %v1650_v24 = vadd.f32 %v1649_v12, %v1619_v21  ;;  %v2048_v25 = vpack.c.bf16 %v1230_v22, %v1227_v18  ;;  %v1582_v26 = vadd.f32 %v1581_v20, %v1230_v22  ;;  %v1620_v27 = vmul.f32 %v1230_v22, %v1230_v22  ;;  %v2279_v28 = vpop.f32.mrb[24].mxu1  ;;  %v2168_v29 = vpop.f32.mrb[25].mxu0 }
 0x13a   : > { %v2169_v30 = vadd.f32 %v2168_v29, %v2167_v23  ;;  %v2280_v31 = vpop.f32.mrb[25].mxu1  ;;  %v2170_v32 = vpop.f32.mrb[26].mxu0 }
 0x13b   : > { %2104 = vst [vmem:[%s2721_s8 + $0x28] sm:$0xff] %v2048_v25   ;;  %v1651_v33 = vadd.f32 %v1650_v24, %v1620_v27  ;;  %v2281_v34 = vadd.f32 %v2280_v31, %v2279_v28  ;;  %v2282_v35 = vpop.f32.mrb[26].mxu1  ;;  %v2171_v36 = vpop.f32.mrb[27].mxu0 }
 0x13c   : > { %v2172_v37 = vadd.f32 %v2171_v36, %v2170_v32  ;;  %v2283_v38 = vpop.f32.mrb[27].mxu1 }
 0x13d   : > { %v1235_v39 = vadd.f32 %v2281_v34, %v2169_v30  ;;  %v2284_v40 = vadd.f32 %v2283_v38, %v2282_v35 }
 0x13f   : > { %v1583_v41 = vadd.f32 %v1582_v26, %v1235_v39  ;;  %v1621_v42 = vmul.f32 %v1235_v39, %v1235_v39  ;;  %v1238_v43 = vadd.f32 %v2284_v40, %v2172_v37 }
 0x140   : > { %v2173_v44 = vpop.f32.mrb[28].mxu0 }
 0x141   : > { %v1652_v45 = vadd.f32 %v1651_v33, %v1621_v42  ;;  %v2053_v46 = vpack.c.bf16 %v1238_v43, %v1235_v39  ;;  %v1584_v47 = vadd.f32 %v1583_v41, %v1238_v43  ;;  %v1622_v48 = vmul.f32 %v1238_v43, %v1238_v43  ;;  %v2285_v49 = vpop.f32.mrb[28].mxu1  ;;  %v2174_v50 = vpop.f32.mrb[29].mxu0 }
 0x142   : > { %v2175_v51 = vadd.f32 %v2174_v50, %v2173_v44  ;;  %v2286_v52 = vpop.f32.mrb[29].mxu1  ;;  %v2176_v53 = vpop.f32.mrb[30].mxu0 }
 0x143   : > { %2105 = vst [vmem:[%s2721_s8 + $0x30] sm:$0xff] %v2053_v46   ;;  %v1653_v54 = vadd.f32 %v1652_v45, %v1622_v48  ;;  %v2287_v55 = vadd.f32 %v2286_v52, %v2285_v49  ;;  %v2288_v56 = vpop.f32.mrb[30].mxu1  ;;  %v2177_v57 = vpop.f32.mrb[31].mxu0 }
 0x144   : > { %v2178_v58 = vadd.f32 %v2177_v57, %v2176_v53  ;;  %v2289_v59 = vpop.f32.mrb[31].mxu1 }
 0x145   : > { %v1243_v60 = vadd.f32 %v2287_v55, %v2175_v51  ;;  %v2290_v61 = vadd.f32 %v2289_v59, %v2288_v56 }
 0x147   : > { %v1585_v62 = vadd.f32 %v1584_v47, %v1243_v60  ;;  %v1623_v63 = vmul.f32 %v1243_v60, %v1243_v60  ;;  %v1246_v0 = vadd.f32 %v2290_v61, %v2178_v58 }
 0x148   : > { %v2179_v1 = vpop.f32.mrb[32].mxu0 }
 0x149   : > { %v1654_v2 = vadd.f32 %v1653_v54, %v1623_v63  ;;  %v2058_v3 = vpack.c.bf16 %v1246_v0, %v1243_v60  ;;  %v1586_v4 = vadd.f32 %v1585_v62, %v1246_v0  ;;  %v1624_v5 = vmul.f32 %v1246_v0, %v1246_v0  ;;  %v2291_v6 = vpop.f32.mrb[32].mxu1  ;;  %v2180_v7 = vpop.f32.mrb[33].mxu0 }
 0x14a   : > { %v2181_v8 = vadd.f32 %v2180_v7, %v2179_v1  ;;  %v2292_v9 = vpop.f32.mrb[33].mxu1  ;;  %v2182_v10 = vpop.f32.mrb[34].mxu0 }
 0x14b   : > { %2106 = vst [vmem:[%s2721_s8 + $0x38] sm:$0xff] %v2058_v3   ;;  %v1655_v11 = vadd.f32 %v1654_v2, %v1624_v5  ;;  %v2293_v12 = vadd.f32 %v2292_v9, %v2291_v6  ;;  %v2294_v13 = vpop.f32.mrb[34].mxu1  ;;  %v2183_v14 = vpop.f32.mrb[35].mxu0 }
 0x14c   : > { %v2184_v15 = vadd.f32 %v2183_v14, %v2182_v10  ;;  %v2295_v16 = vpop.f32.mrb[35].mxu1 }
 0x14d   : > { %v1251_v17 = vadd.f32 %v2293_v12, %v2181_v8  ;;  %v2296_v18 = vadd.f32 %v2295_v16, %v2294_v13 }
 0x14f   : > { %v1587_v19 = vadd.f32 %v1586_v4, %v1251_v17  ;;  %v1625_v20 = vmul.f32 %v1251_v17, %v1251_v17  ;;  %v1254_v21 = vadd.f32 %v2296_v18, %v2184_v15 }
 0x150   : > { %v2185_v22 = vpop.f32.mrb[36].mxu0 }
 0x151   : > { %v1656_v23 = vadd.f32 %v1655_v11, %v1625_v20  ;;  %v2063_v24 = vpack.c.bf16 %v1254_v21, %v1251_v17  ;;  %v1588_v25 = vadd.f32 %v1587_v19, %v1254_v21  ;;  %v1626_v26 = vmul.f32 %v1254_v21, %v1254_v21  ;;  %v2297_v27 = vpop.f32.mrb[36].mxu1  ;;  %v2186_v28 = vpop.f32.mrb[37].mxu0 }
 0x152   : > { %v2187_v29 = vadd.f32 %v2186_v28, %v2185_v22  ;;  %v2298_v30 = vpop.f32.mrb[37].mxu1  ;;  %v2188_v31 = vpop.f32.mrb[38].mxu0 }
 0x153   : > { %2107 = vst [vmem:[%s2721_s8 + $0x40] sm:$0xff] %v2063_v24   ;;  %v1657_v32 = vadd.f32 %v1656_v23, %v1626_v26  ;;  %v2299_v33 = vadd.f32 %v2298_v30, %v2297_v27  ;;  %v2300_v34 = vpop.f32.mrb[38].mxu1  ;;  %v2189_v35 = vpop.f32.mrb[39].mxu0 }
 0x154   : > { %v2190_v36 = vadd.f32 %v2189_v35, %v2188_v31  ;;  %v2301_v37 = vpop.f32.mrb[39].mxu1 }
 0x155   : > { %v1259_v38 = vadd.f32 %v2299_v33, %v2187_v29  ;;  %v2302_v39 = vadd.f32 %v2301_v37, %v2300_v34 }
 0x157   : > { %v1589_v40 = vadd.f32 %v1588_v25, %v1259_v38  ;;  %v1627_v41 = vmul.f32 %v1259_v38, %v1259_v38  ;;  %v1262_v42 = vadd.f32 %v2302_v39, %v2190_v36 }
 0x158   : > { %v2191_v43 = vpop.f32.mrb[40].mxu0 }
 0x159   : > { %v1658_v44 = vadd.f32 %v1657_v32, %v1627_v41  ;;  %v2068_v45 = vpack.c.bf16 %v1262_v42, %v1259_v38  ;;  %v1590_v46 = vadd.f32 %v1589_v40, %v1262_v42  ;;  %v1628_v47 = vmul.f32 %v1262_v42, %v1262_v42  ;;  %v2303_v48 = vpop.f32.mrb[40].mxu1  ;;  %v2192_v49 = vpop.f32.mrb[41].mxu0 }
 0x15a   : > { %v2193_v50 = vadd.f32 %v2192_v49, %v2191_v43  ;;  %v2304_v51 = vpop.f32.mrb[41].mxu1  ;;  %v2194_v52 = vpop.f32.mrb[42].mxu0 }
 0x15b   : > { %2108 = vst [vmem:[%s2721_s8 + $0x48] sm:$0xff] %v2068_v45   ;;  %v1659_v53 = vadd.f32 %v1658_v44, %v1628_v47  ;;  %v2305_v54 = vadd.f32 %v2304_v51, %v2303_v48  ;;  %v2306_v55 = vpop.f32.mrb[42].mxu1  ;;  %v2195_v56 = vpop.f32.mrb[43].mxu0 }
 0x15c   : > { %v2196_v57 = vadd.f32 %v2195_v56, %v2194_v52  ;;  %v2307_v58 = vpop.f32.mrb[43].mxu1 }
 0x15d   : > { %v1267_v59 = vadd.f32 %v2305_v54, %v2193_v50  ;;  %v2308_v60 = vadd.f32 %v2307_v58, %v2306_v55 }
 0x15f   : > { %v1591_v61 = vadd.f32 %v1590_v46, %v1267_v59  ;;  %v1629_v62 = vmul.f32 %v1267_v59, %v1267_v59  ;;  %v1270_v63 = vadd.f32 %v2308_v60, %v2196_v57 }
 0x160   : > { %v2197_v0 = vpop.f32.mrb[44].mxu0 }
 0x161   : > { %v1660_v1 = vadd.f32 %v1659_v53, %v1629_v62  ;;  %v2073_v2 = vpack.c.bf16 %v1270_v63, %v1267_v59  ;;  %v1592_v3 = vadd.f32 %v1591_v61, %v1270_v63  ;;  %v1630_v4 = vmul.f32 %v1270_v63, %v1270_v63  ;;  %v2309_v5 = vpop.f32.mrb[44].mxu1  ;;  %v2198_v6 = vpop.f32.mrb[45].mxu0 }
 0x162   : > { %v2199_v7 = vadd.f32 %v2198_v6, %v2197_v0  ;;  %v2310_v8 = vpop.f32.mrb[45].mxu1  ;;  %v2200_v9 = vpop.f32.mrb[46].mxu0 }
 0x163   : > { %2109 = vst [vmem:[%s2721_s8 + $0x50] sm:$0xff] %v2073_v2   ;;  %v1661_v10 = vadd.f32 %v1660_v1, %v1630_v4  ;;  %v2311_v11 = vadd.f32 %v2310_v8, %v2309_v5  ;;  %v2312_v12 = vpop.f32.mrb[46].mxu1  ;;  %v2201_v13 = vpop.f32.mrb[47].mxu0 }
 0x164   : > { %v2202_v14 = vadd.f32 %v2201_v13, %v2200_v9  ;;  %v2313_v15 = vpop.f32.mrb[47].mxu1 }
 0x165   : > { %v1275_v16 = vadd.f32 %v2311_v11, %v2199_v7  ;;  %v2314_v17 = vadd.f32 %v2313_v15, %v2312_v12 }
 0x167   : > { %v1593_v18 = vadd.f32 %v1592_v3, %v1275_v16  ;;  %v1631_v19 = vmul.f32 %v1275_v16, %v1275_v16  ;;  %v1278_v20 = vadd.f32 %v2314_v17, %v2202_v14 }
 0x168   : > { %v2203_v21 = vpop.f32.mrb[48].mxu0 }
 0x169   : > { %v1662_v22 = vadd.f32 %v1661_v10, %v1631_v19  ;;  %v2078_v23 = vpack.c.bf16 %v1278_v20, %v1275_v16  ;;  %v1594_v24 = vadd.f32 %v1593_v18, %v1278_v20  ;;  %v1632_v25 = vmul.f32 %v1278_v20, %v1278_v20  ;;  %v2315_v26 = vpop.f32.mrb[48].mxu1  ;;  %v2204_v27 = vpop.f32.mrb[49].mxu0 }
 0x16a   : > { %v2205_v28 = vadd.f32 %v2204_v27, %v2203_v21  ;;  %v2316_v29 = vpop.f32.mrb[49].mxu1  ;;  %v2206_v30 = vpop.f32.mrb[50].mxu0 }
 0x16b   : > { %2110 = vst [vmem:[%s2721_s8 + $0x58] sm:$0xff] %v2078_v23   ;;  %v1663_v31 = vadd.f32 %v1662_v22, %v1632_v25  ;;  %v2317_v32 = vadd.f32 %v2316_v29, %v2315_v26  ;;  %v2318_v33 = vpop.f32.mrb[50].mxu1  ;;  %v2207_v34 = vpop.f32.mrb[51].mxu0 }
 0x16c   : > { %v2208_v35 = vadd.f32 %v2207_v34, %v2206_v30  ;;  %v2319_v36 = vpop.f32.mrb[51].mxu1 }
 0x16d   : > { %v1283_v37 = vadd.f32 %v2317_v32, %v2205_v28  ;;  %v2320_v38 = vadd.f32 %v2319_v36, %v2318_v33 }
 0x16f   : > { %v1595_v39 = vadd.f32 %v1594_v24, %v1283_v37  ;;  %v1633_v40 = vmul.f32 %v1283_v37, %v1283_v37  ;;  %v1286_v41 = vadd.f32 %v2320_v38, %v2208_v35 }
 0x170   : > { %v2209_v42 = vpop.f32.mrb[52].mxu0 }
 0x171   : > { %v1664_v43 = vadd.f32 %v1663_v31, %v1633_v40  ;;  %v2083_v44 = vpack.c.bf16 %v1286_v41, %v1283_v37  ;;  %v1596_v45 = vadd.f32 %v1595_v39, %v1286_v41  ;;  %v1634_v46 = vmul.f32 %v1286_v41, %v1286_v41  ;;  %v2321_v47 = vpop.f32.mrb[52].mxu1  ;;  %v2210_v48 = vpop.f32.mrb[53].mxu0 }
 0x172   : > { %v2211_v49 = vadd.f32 %v2210_v48, %v2209_v42  ;;  %v2322_v50 = vpop.f32.mrb[53].mxu1  ;;  %v2212_v51 = vpop.f32.mrb[54].mxu0 }
 0x173   : > { %2111 = vst [vmem:[%s2721_s8 + $0x60] sm:$0xff] %v2083_v44   ;;  %v1665_v52 = vadd.f32 %v1664_v43, %v1634_v46  ;;  %v2323_v53 = vadd.f32 %v2322_v50, %v2321_v47  ;;  %v2324_v54 = vpop.f32.mrb[54].mxu1  ;;  %v2213_v55 = vpop.f32.mrb[55].mxu0 }
 0x174   : > { %v2214_v56 = vadd.f32 %v2213_v55, %v2212_v51  ;;  %v2325_v57 = vpop.f32.mrb[55].mxu1 }
 0x175   : > { %v1291_v58 = vadd.f32 %v2323_v53, %v2211_v49  ;;  %v2326_v59 = vadd.f32 %v2325_v57, %v2324_v54 }
 0x177   : > { %v1597_v60 = vadd.f32 %v1596_v45, %v1291_v58  ;;  %v1635_v61 = vmul.f32 %v1291_v58, %v1291_v58  ;;  %v1294_v62 = vadd.f32 %v2326_v59, %v2214_v56 }
 0x178   : > { %v2215_v63 = vpop.f32.mrb[56].mxu0 }
 0x179   : > { %v1666_v0 = vadd.f32 %v1665_v52, %v1635_v61  ;;  %v2088_v1 = vpack.c.bf16 %v1294_v62, %v1291_v58  ;;  %v1598_v2 = vadd.f32 %v1597_v60, %v1294_v62  ;;  %v1636_v3 = vmul.f32 %v1294_v62, %v1294_v62  ;;  %v2327_v4 = vpop.f32.mrb[56].mxu1  ;;  %v2216_v5 = vpop.f32.mrb[57].mxu0 }
 0x17a   : > { %v2217_v6 = vadd.f32 %v2216_v5, %v2215_v63  ;;  %v2328_v7 = vpop.f32.mrb[57].mxu1  ;;  %v2218_v8 = vpop.f32.mrb[58].mxu0 }
 0x17b   : > { %2112 = vst [vmem:[%s2721_s8 + $0x68] sm:$0xff] %v2088_v1   ;;  %v1667_v9 = vadd.f32 %v1666_v0, %v1636_v3  ;;  %v2329_v10 = vadd.f32 %v2328_v7, %v2327_v4  ;;  %v2330_v11 = vpop.f32.mrb[58].mxu1  ;;  %v2219_v12 = vpop.f32.mrb[59].mxu0 }
 0x17c   : > { %v2220_v13 = vadd.f32 %v2219_v12, %v2218_v8  ;;  %v2331_v14 = vpop.f32.mrb[59].mxu1 }
 0x17d   : > { %v1299_v15 = vadd.f32 %v2329_v10, %v2217_v6  ;;  %v2332_v16 = vadd.f32 %v2331_v14, %v2330_v11 }
 0x17f   : > { %v1599_v17 = vadd.f32 %v1598_v2, %v1299_v15  ;;  %v1637_v18 = vmul.f32 %v1299_v15, %v1299_v15  ;;  %v1302_v19 = vadd.f32 %v2332_v16, %v2220_v13 }
 0x180   : > { %v2221_v20 = vpop.f32.mrb[60].mxu0 }
 0x181   : > { %v1668_v21 = vadd.f32 %v1667_v9, %v1637_v18  ;;  %v2093_v22 = vpack.c.bf16 %v1302_v19, %v1299_v15  ;;  %v1600_v23 = vadd.f32 %v1599_v17, %v1302_v19  ;;  %v1638_v24 = vmul.f32 %v1302_v19, %v1302_v19  ;;  %v2333_v25 = vpop.f32.mrb[60].mxu1  ;;  %v2222_v26 = vpop.f32.mrb[61].mxu0 }
 0x182   : > { %v2223_v27 = vadd.f32 %v2222_v26, %v2221_v20  ;;  %v2334_v28 = vpop.f32.mrb[61].mxu1  ;;  %v2224_v29 = vpop.f32.mrb[62].mxu0 }
 0x183   : > { %2113 = vst [vmem:[%s2721_s8 + $0x70] sm:$0xff] %v2093_v22   ;;  %v1669_v30 = vadd.f32 %v1668_v21, %v1638_v24  ;;  %v2335_v31 = vadd.f32 %v2334_v28, %v2333_v25  ;;  %v2336_v32 = vpop.f32.mrb[62].mxu1  ;;  %v2225_v33 = vpop.f32.mrb[63].mxu0 }
 0x184   : > { %v2226_v34 = vadd.f32 %v2225_v33, %v2224_v29  ;;  %v2337_v35 = vpop.f32.mrb[63].mxu1 }
 0x185   : > { %v1307_v36 = vadd.f32 %v2335_v31, %v2223_v27  ;;  %v2338_v37 = vadd.f32 %v2337_v35, %v2336_v32 }
 0x187   : > { %v1601_v38 = vadd.f32 %v1600_v23, %v1307_v36  ;;  %v1639_v39 = vmul.f32 %v1307_v36, %v1307_v36  ;;  %v1310_v40 = vadd.f32 %v2338_v37, %v2226_v34 }
 0x189   : > { %v1670_v41 = vadd.f32 %v1669_v30, %v1639_v39  ;;  %v2098_v42 = vpack.c.bf16 %v1310_v40, %v1307_v36  ;;  %v1602_v43 = vadd.f32 %v1601_v38, %v1310_v40  ;;  %v1640_v44 = vmul.f32 %v1310_v40, %v1310_v40 }
 0x18b   : > { %2114 = vst [vmem:[%s2721_s8 + $0x78] sm:$0xff] %v2098_v42   ;;  %v1603_v45 = vrot.slane %v1602_v43, 4  ;;  %v1671_v46 = vadd.f32 %v1670_v41, %v1640_v44 }
 0x18d   : > { %v1604_v47 = vadd.f32 %v1603_v45, %v1602_v43  ;;  %v1672_v48 = vrot.slane %v1671_v46, 4 }
 0x18f   : > { %v1605_v49 = vrot.slane %v1604_v47, 2  ;;  %v1673_v50 = vadd.f32 %v1672_v48, %v1671_v46 }
 0x191   : > { %v1606_v51 = vadd.f32 %v1605_v49, %v1604_v47  ;;  %v1674_v52 = vrot.slane %v1673_v50, 2 }
 0x193   : > { %v1607_v53 = vrot.slane %v1606_v51, 1  ;;  %v1675_v54 = vadd.f32 %v1674_v52, %v1673_v50 }
 0x195   : > { %v1676_v55 = vrot.slane %v1675_v54, 1  ;;  %v1608_v56 = vadd.f32 %v1607_v53, %v1606_v51 }
 0x197   : > { %v1677_v57 = vadd.f32 %v1676_v55, %v1675_v54 }
 0x199   : > { %v1679_v58 = vsel %vm1678_vm0, %v1608_v56, %v1677_v57 }
 0x19a   : > { %1680 = vst [vmem:[%s276_s21] sm:$0x3] %v1679_v58 }
 0x19b PF: > { %s14_s16 = sadd.s32 1, %s2545_s16   ;;  %s2764_s12 = smov %s2537_s14 }
 0x19c   : > { %p11_p8 = scmp.ge.s32.totalorder %s14_s16, 10   ;;  %s2765_s13 = smov %s2541_s15 }
 0x19d   : > { %s2766_s14 = smov %s2769_s17  ;;  %s2767_s15 = smov %s2773_s18 }
 0x19e   :  { %13 = sbr.rel (!%p11_p8) target bundleno = 3 (0x3), region = 82 }

// kernel: _lambda_.16
= control target key start
LH: loop header
LB: loop body
LE: loop exit
PB: predicated region body
PF: predicated region fallthrough
CT: control target
= control target key end

     0   :  { %s5846_s0 = inlined_call_operand.vmem [shape: bf16[4,512,128], index: 0, kind: input, shape index: {}]   ;;  %s5847_s1 = inlined_call_operand.vmem [shape: f32[1,1,128], index: 1, kind: input, shape index: {}]   ;;  %s5848_s2 = inlined_call_operand.vmem [shape: f32[1,1,128], index: 2, kind: input, shape index: {}]   ;;  %s5849_s3 = inlined_call_operand.vmem [shape: bf16[4,512,128], index: 3, kind: output, shape index: {}]  }
   0x1   :  { %v3107_v0 = vld [vmem:[%s5846_s0] sm:$0xff]   ;;  %v4258_v4 = vld [vmem:[%s5846_s0 + $0x8] sm:$0xff]   ;;  %v4259_v5 = vld [vmem:[%s5846_s0 + $0x10] sm:$0xff]  }
   0x2   :  { %v4542_v1 = vld [vmem:[%s5847_s1] ss:$0 sm:$0xff]  ;;  %v3108_v2 = vunpack.c.l.bf16 %v3107_v0  ;;  %v3109_v3 = vunpack.c.h.bf16 %v3107_v0  ;;  %v4260_v6 = vld [vmem:[%s5846_s0 + $0x18] sm:$0xff]   ;;  %v3112_v8 = vunpack.c.l.bf16 %v4258_v4  ;;  %v3113_v9 = vunpack.c.h.bf16 %v4258_v4  ;;  %v4262_v33 = vld [vmem:[%s5846_s0 + $0x28] sm:$0xff]  }
   0x3   :  { %v4556_v7 = vld [vmem:[%s5848_s2] ss:$0 sm:$0xff]  ;;  %v3116_v10 = vunpack.c.l.bf16 %v4259_v5  ;;  %v3117_v11 = vunpack.c.h.bf16 %v4259_v5  ;;  %v3120_v14 = vunpack.c.l.bf16 %v4260_v6  ;;  %v3121_v15 = vunpack.c.h.bf16 %v4260_v6  ;;  %v4263_v38 = vld [vmem:[%s5846_s0 + $0x30] sm:$0xff]   ;;  %v4264_v43 = vld [vmem:[%s5846_s0 + $0x38] sm:$0xff]  }
   0x4   :  { %v533_v12 = vmul.f32 %v3108_v2, %v4542_v1  ;;  %v534_v13 = vmul.f32 %v3109_v3, %v4542_v1  ;;  %v535_v16 = vmul.f32 %v3112_v8, %v4542_v1  ;;  %v536_v17 = vmul.f32 %v3113_v9, %v4542_v1  ;;  %v4261_v28 = vld [vmem:[%s5846_s0 + $0x20] sm:$0xff]  }
   0x5   :  { %v537_v18 = vmul.f32 %v3116_v10, %v4542_v1  ;;  %v538_v19 = vmul.f32 %v3117_v11, %v4542_v1  ;;  %v539_v22 = vmul.f32 %v3120_v14, %v4542_v1  ;;  %v540_v23 = vmul.f32 %v3121_v15, %v4542_v1  ;;  %v4265_v0 = vld [vmem:[%s5846_s0 + $0x40] sm:$0xff]   ;;  %v4266_v11 = vld [vmem:[%s5846_s0 + $0x48] sm:$0xff]  }
   0x6   :  { %v796_v20 = vadd.f32 %v4556_v7, %v533_v12  ;;  %v797_v21 = vadd.f32 %v4556_v7, %v534_v13  ;;  %v798_v24 = vadd.f32 %v4556_v7, %v535_v16  ;;  %v799_v25 = vadd.f32 %v4556_v7, %v536_v17  ;;  %v4267_v16 = vld [vmem:[%s5846_s0 + $0x50] sm:$0xff]  }
   0x7   :  { %v800_v26 = vadd.f32 %v4556_v7, %v537_v18  ;;  %v801_v27 = vadd.f32 %v4556_v7, %v538_v19  ;;  %v802_v31 = vadd.f32 %v4556_v7, %v539_v22  ;;  %v803_v32 = vadd.f32 %v4556_v7, %v540_v23 }
   0x8   :  { %v1052_v29 = vmax.f32 %v796_v20, 0.0  ;;  %v1053_v30 = vmax.f32 %v797_v21, 0.0  ;;  %v1054_v34 = vmax.f32 %v798_v24, 0.0  ;;  %v1055_v35 = vmax.f32 %v799_v25, 0.0  ;;  %v4268_v25 = vld [vmem:[%s5846_s0 + $0x58] sm:$0xff]  }
   0x9   :  { %v1056_v36 = vmax.f32 %v800_v26, 0.0  ;;  %v1057_v37 = vmax.f32 %v801_v27, 0.0  ;;  %v1058_v40 = vmax.f32 %v802_v31, 0.0  ;;  %v1059_v41 = vmax.f32 %v803_v32, 0.0 }
   0xa   :  { %v3621_v39 = vpack.c.bf16 %v1053_v30, %v1052_v29  ;;  %v3124_v42 = vunpack.c.l.bf16 %v4261_v28  ;;  %v3626_v44 = vpack.c.bf16 %v1055_v35, %v1054_v34  ;;  %v3125_v46 = vunpack.c.h.bf16 %v4261_v28 }
   0xb   :  { %v3631_v45 = vpack.c.bf16 %v1057_v37, %v1056_v36  ;;  %v3128_v47 = vunpack.c.l.bf16 %v4262_v33  ;;  %v3636_v48 = vpack.c.bf16 %v1059_v41, %v1058_v40  ;;  %v3129_v50 = vunpack.c.h.bf16 %v4262_v33 }
   0xc   :  { %3622 = vst [vmem:[%s5849_s3] sm:$0xff] %v3621_v39   ;;  %v541_v49 = vmul.f32 %v3124_v42, %v4542_v1  ;;  %v3132_v51 = vunpack.c.l.bf16 %v4263_v38  ;;  %4385 = vst [vmem:[%s5849_s3 + $0x8] sm:$0xff] %v3626_v44   ;;  %v542_v52 = vmul.f32 %v3125_v46, %v4542_v1  ;;  %v3133_v54 = vunpack.c.h.bf16 %v4263_v38  ;;  %v4269_v38 = vld [vmem:[%s5846_s0 + $0x60] sm:$0xff]  }
   0xd   :  { %4386 = vst [vmem:[%s5849_s3 + $0x10] sm:$0xff] %v3631_v45   ;;  %v543_v53 = vmul.f32 %v3128_v47, %v4542_v1  ;;  %v3136_v55 = vunpack.c.l.bf16 %v4264_v43  ;;  %4387 = vst [vmem:[%s5849_s3 + $0x18] sm:$0xff] %v3636_v48   ;;  %v544_v57 = vmul.f32 %v3129_v50, %v4542_v1  ;;  %v3137_v59 = vunpack.c.h.bf16 %v4264_v43 }
   0xe   :  { %v804_v56 = vadd.f32 %v4556_v7, %v541_v49  ;;  %v545_v58 = vmul.f32 %v3132_v51, %v4542_v1  ;;  %v805_v60 = vadd.f32 %v4556_v7, %v542_v52  ;;  %v546_v62 = vmul.f32 %v3133_v54, %v4542_v1  ;;  %v4270_v51 = vld [vmem:[%s5846_s0 + $0x68] sm:$0xff]  }
   0xf   :  { %v806_v61 = vadd.f32 %v4556_v7, %v543_v53  ;;  %v547_v63 = vmul.f32 %v3136_v55, %v4542_v1  ;;  %v807_v3 = vadd.f32 %v4556_v7, %v544_v57  ;;  %v548_v5 = vmul.f32 %v3137_v59, %v4542_v1 }
  0x10   :  { %v1060_v2 = vmax.f32 %v804_v56, 0.0  ;;  %v808_v4 = vadd.f32 %v4556_v7, %v545_v58  ;;  %v1061_v6 = vmax.f32 %v805_v60, 0.0  ;;  %v809_v9 = vadd.f32 %v4556_v7, %v546_v62  ;;  %v4271_v60 = vld [vmem:[%s5846_s0 + $0x70] sm:$0xff]  }
  0x11   :  { %v1062_v8 = vmax.f32 %v806_v61, 0.0  ;;  %v810_v10 = vadd.f32 %v4556_v7, %v547_v63  ;;  %v1063_v12 = vmax.f32 %v807_v3, 0.0  ;;  %v811_v14 = vadd.f32 %v4556_v7, %v548_v5 }
  0x12   :  { %v1064_v13 = vmax.f32 %v808_v4, 0.0  ;;  %v3140_v15 = vunpack.c.l.bf16 %v4265_v0  ;;  %v3641_v17 = vpack.c.bf16 %v1061_v6, %v1060_v2  ;;  %v1065_v18 = vmax.f32 %v809_v9, 0.0  ;;  %v4272_v2 = vld [vmem:[%s5846_s0 + $0x78] sm:$0xff]  }
  0x13   :  { %v1066_v19 = vmax.f32 %v810_v10, 0.0  ;;  %v3141_v20 = vunpack.c.h.bf16 %v4265_v0  ;;  %v3646_v21 = vpack.c.bf16 %v1063_v12, %v1062_v8  ;;  %v1067_v22 = vmax.f32 %v811_v14, 0.0  ;;  %v4273_v12 = vld [vmem:[%s5846_s0 + $0x80] sm:$0xff]  }
  0x14   :  { %v549_v23 = vmul.f32 %v3140_v15, %v4542_v1  ;;  %v3144_v24 = vunpack.c.l.bf16 %v4266_v11  ;;  %4388 = vst [vmem:[%s5849_s3 + $0x20] sm:$0xff] %v3641_v17   ;;  %v3651_v26 = vpack.c.bf16 %v1065_v18, %v1064_v13  ;;  %v3145_v28 = vunpack.c.h.bf16 %v4266_v11 }
  0x15   :  { %v550_v27 = vmul.f32 %v3141_v20, %v4542_v1  ;;  %v3148_v29 = vunpack.c.l.bf16 %v4267_v16  ;;  %4389 = vst [vmem:[%s5849_s3 + $0x28] sm:$0xff] %v3646_v21   ;;  %v3656_v30 = vpack.c.bf16 %v1067_v22, %v1066_v19  ;;  %v3149_v33 = vunpack.c.h.bf16 %v4267_v16 }
  0x16   :  { %v812_v31 = vadd.f32 %v4556_v7, %v549_v23  ;;  %v551_v32 = vmul.f32 %v3144_v24, %v4542_v1  ;;  %4390 = vst [vmem:[%s5849_s3 + $0x30] sm:$0xff] %v3651_v26   ;;  %v552_v35 = vmul.f32 %v3145_v28, %v4542_v1  ;;  %v3152_v37 = vunpack.c.l.bf16 %v4268_v25 }
  0x17   :  { %v813_v34 = vadd.f32 %v4556_v7, %v550_v27  ;;  %v553_v36 = vmul.f32 %v3148_v29, %v4542_v1  ;;  %4391 = vst [vmem:[%s5849_s3 + $0x38] sm:$0xff] %v3656_v30   ;;  %v554_v41 = vmul.f32 %v3149_v33, %v4542_v1  ;;  %v3153_v42 = vunpack.c.h.bf16 %v4268_v25  ;;  %v4274_v29 = vld [vmem:[%s5846_s0 + $0x88] sm:$0xff]  }
  0x18   :  { %v1068_v39 = vmax.f32 %v812_v31, 0.0  ;;  %v814_v40 = vadd.f32 %v4556_v7, %v551_v32  ;;  %v815_v44 = vadd.f32 %v4556_v7, %v552_v35  ;;  %v555_v46 = vmul.f32 %v3152_v37, %v4542_v1 }
  0x19   :  { %v1069_v43 = vmax.f32 %v813_v34, 0.0  ;;  %v816_v45 = vadd.f32 %v4556_v7, %v553_v36  ;;  %v817_v48 = vadd.f32 %v4556_v7, %v554_v41  ;;  %v556_v49 = vmul.f32 %v3153_v42, %v4542_v1  ;;  %v4275_v34 = vld [vmem:[%s5846_s0 + $0x90] sm:$0xff]  }
  0x1a   :  { %v1070_v47 = vmax.f32 %v814_v40, 0.0  ;;  %v3156_v50 = vunpack.c.l.bf16 %v4269_v38  ;;  %v1071_v53 = vmax.f32 %v815_v44, 0.0  ;;  %v818_v55 = vadd.f32 %v4556_v7, %v555_v46 }
  0x1b   :  { %v3661_v52 = vpack.c.bf16 %v1069_v43, %v1068_v39  ;;  %v1072_v54 = vmax.f32 %v816_v45, 0.0  ;;  %v1073_v56 = vmax.f32 %v817_v48, 0.0  ;;  %v819_v57 = vadd.f32 %v4556_v7, %v556_v49  ;;  %v4276_v43 = vld [vmem:[%s5846_s0 + $0x98] sm:$0xff]  }
  0x1c   :  { %v3157_v58 = vunpack.c.h.bf16 %v4269_v38  ;;  %v557_v59 = vmul.f32 %v3156_v50, %v4542_v1  ;;  %v3666_v61 = vpack.c.bf16 %v1071_v53, %v1070_v47  ;;  %v1074_v62 = vmax.f32 %v818_v55, 0.0 }
  0x1d   :  { %4392 = vst [vmem:[%s5849_s3 + $0x40] sm:$0xff] %v3661_v52   ;;  %v3160_v63 = vunpack.c.l.bf16 %v4270_v51  ;;  %v3161_v0 = vunpack.c.h.bf16 %v4270_v51  ;;  %v3671_v3 = vpack.c.bf16 %v1073_v56, %v1072_v54  ;;  %v1075_v4 = vmax.f32 %v819_v57, 0.0  ;;  %v4277_v56 = vld [vmem:[%s5846_s0 + $0xa0] sm:$0xff]  }
  0x1e   :  { %v558_v5 = vmul.f32 %v3157_v58, %v4542_v1  ;;  %v820_v6 = vadd.f32 %v4556_v7, %v557_v59  ;;  %4393 = vst [vmem:[%s5849_s3 + $0x48] sm:$0xff] %v3666_v61   ;;  %v3164_v10 = vunpack.c.l.bf16 %v4271_v60  ;;  %v3165_v11 = vunpack.c.h.bf16 %v4271_v60 }
  0x1f   :  { %v559_v8 = vmul.f32 %v3160_v63, %v4542_v1  ;;  %v560_v9 = vmul.f32 %v3161_v0, %v4542_v1  ;;  %4394 = vst [vmem:[%s5849_s3 + $0x50] sm:$0xff] %v3671_v3   ;;  %v3676_v13 = vpack.c.bf16 %v1075_v4, %v1074_v62  ;;  %v3168_v16 = vunpack.c.l.bf16 %v4272_v2 }
  0x20   :  { %v821_v14 = vadd.f32 %v4556_v7, %v558_v5  ;;  %v1076_v15 = vmax.f32 %v820_v6, 0.0  ;;  %v561_v19 = vmul.f32 %v3164_v10, %v4542_v1  ;;  %v562_v20 = vmul.f32 %v3165_v11, %v4542_v1 }
  0x21   :  { %v822_v17 = vadd.f32 %v4556_v7, %v559_v8  ;;  %v823_v18 = vadd.f32 %v4556_v7, %v560_v9  ;;  %4395 = vst [vmem:[%s5849_s3 + $0x58] sm:$0xff] %v3676_v13   ;;  %v3169_v22 = vunpack.c.h.bf16 %v4272_v2  ;;  %v563_v23 = vmul.f32 %v3168_v16, %v4542_v1  ;;  %v4278_v2 = vld [vmem:[%s5846_s0 + $0xa8] sm:$0xff]   ;;  %v4279_v16 = vld [vmem:[%s5846_s0 + $0xb0] sm:$0xff]  }
  0x22   :  { %v1077_v21 = vmax.f32 %v821_v14, 0.0  ;;  %v3172_v24 = vunpack.c.l.bf16 %v4273_v12  ;;  %v824_v27 = vadd.f32 %v4556_v7, %v561_v19  ;;  %v825_v28 = vadd.f32 %v4556_v7, %v562_v20 }
  0x23   :  { %v1078_v25 = vmax.f32 %v822_v17, 0.0  ;;  %v1079_v26 = vmax.f32 %v823_v18, 0.0  ;;  %v564_v31 = vmul.f32 %v3169_v22, %v4542_v1  ;;  %v826_v32 = vadd.f32 %v4556_v7, %v563_v23 }
  0x24   :  { %v3681_v30 = vpack.c.bf16 %v1077_v21, %v1076_v15  ;;  %v3173_v33 = vunpack.c.h.bf16 %v4273_v12  ;;  %v1080_v36 = vmax.f32 %v824_v27, 0.0  ;;  %v1081_v37 = vmax.f32 %v825_v28, 0.0  ;;  %v4280_v21 = vld [vmem:[%s5846_s0 + $0xb8] sm:$0xff]  }
  0x25   :  { %v3686_v35 = vpack.c.bf16 %v1079_v26, %v1078_v25  ;;  %v565_v38 = vmul.f32 %v3172_v24, %v4542_v1  ;;  %v827_v39 = vadd.f32 %v4556_v7, %v564_v31  ;;  %v1082_v40 = vmax.f32 %v826_v32, 0.0 }
  0x26   :  { %4396 = vst [vmem:[%s5849_s3 + $0x60] sm:$0xff] %v3681_v30   ;;  %v566_v41 = vmul.f32 %v3173_v33, %v4542_v1  ;;  %v3176_v42 = vunpack.c.l.bf16 %v4274_v29  ;;  %v3691_v44 = vpack.c.bf16 %v1081_v37, %v1080_v36  ;;  %v3177_v46 = vunpack.c.h.bf16 %v4274_v29 }
  0x27   :  { %4397 = vst [vmem:[%s5849_s3 + $0x68] sm:$0xff] %v3686_v35   ;;  %v828_v45 = vadd.f32 %v4556_v7, %v565_v38  ;;  %v3180_v47 = vunpack.c.l.bf16 %v4275_v34  ;;  %v1083_v48 = vmax.f32 %v827_v39, 0.0  ;;  %v3181_v51 = vunpack.c.h.bf16 %v4275_v34  ;;  %v4281_v34 = vld [vmem:[%s5846_s0 + $0xc0] sm:$0xff]  }
  0x28   :  { %v829_v49 = vadd.f32 %v4556_v7, %v566_v41  ;;  %v567_v50 = vmul.f32 %v3176_v42, %v4542_v1  ;;  %4398 = vst [vmem:[%s5849_s3 + $0x70] sm:$0xff] %v3691_v44   ;;  %v568_v53 = vmul.f32 %v3177_v46, %v4542_v1  ;;  %v3184_v55 = vunpack.c.l.bf16 %v4276_v43 }
  0x29   :  { %v1084_v52 = vmax.f32 %v828_v45, 0.0  ;;  %v569_v54 = vmul.f32 %v3180_v47, %v4542_v1  ;;  %v3696_v57 = vpack.c.bf16 %v1083_v48, %v1082_v40  ;;  %v570_v60 = vmul.f32 %v3181_v51, %v4542_v1  ;;  %v4282_v47 = vld [vmem:[%s5846_s0 + $0xc8] sm:$0xff]  }
  0x2a   :  { %v1085_v58 = vmax.f32 %v829_v49, 0.0  ;;  %v830_v59 = vadd.f32 %v4556_v7, %v567_v50  ;;  %v831_v61 = vadd.f32 %v4556_v7, %v568_v53  ;;  %v3185_v63 = vunpack.c.h.bf16 %v4276_v43 }
  0x2b   :  { %v832_v62 = vadd.f32 %v4556_v7, %v569_v54  ;;  %v571_v0 = vmul.f32 %v3184_v55, %v4542_v1  ;;  %4399 = vst [vmem:[%s5849_s3 + $0x78] sm:$0xff] %v3696_v57   ;;  %v833_v5 = vadd.f32 %v4556_v7, %v570_v60  ;;  %v3188_v6 = vunpack.c.l.bf16 %v4277_v56 }
  0x2c   :  { %v3701_v3 = vpack.c.bf16 %v1085_v58, %v1084_v52  ;;  %v1086_v4 = vmax.f32 %v830_v59, 0.0  ;;  %v1087_v8 = vmax.f32 %v831_v61, 0.0  ;;  %v572_v10 = vmul.f32 %v3185_v63, %v4542_v1  ;;  %v4283_v52 = vld [vmem:[%s5846_s0 + $0xd0] sm:$0xff]   ;;  %v4284_v61 = vld [vmem:[%s5846_s0 + $0xd8] sm:$0xff]  }
  0x2d   :  { %v1088_v9 = vmax.f32 %v832_v62, 0.0  ;;  %v834_v11 = vadd.f32 %v4556_v7, %v571_v0  ;;  %v1089_v12 = vmax.f32 %v833_v5, 0.0  ;;  %v3189_v13 = vunpack.c.h.bf16 %v4277_v56 }
  0x2e   :  { %4400 = vst [vmem:[%s5849_s3 + $0x80] sm:$0xff] %v3701_v3   ;;  %v573_v14 = vmul.f32 %v3188_v6, %v4542_v1  ;;  %v3192_v15 = vunpack.c.l.bf16 %v4278_v2  ;;  %v3706_v17 = vpack.c.bf16 %v1087_v8, %v1086_v4  ;;  %v835_v18 = vadd.f32 %v4556_v7, %v572_v10 }
  0x2f   :  { %v1090_v19 = vmax.f32 %v834_v11, 0.0  ;;  %v3193_v20 = vunpack.c.h.bf16 %v4278_v2  ;;  %v3711_v22 = vpack.c.bf16 %v1089_v12, %v1088_v9  ;;  %v574_v23 = vmul.f32 %v3189_v13, %v4542_v1  ;;  %v4285_v12 = vld [vmem:[%s5846_s0 + $0xe0] sm:$0xff]  }
  0x30   :  { %v836_v24 = vadd.f32 %v4556_v7, %v573_v14  ;;  %v575_v25 = vmul.f32 %v3192_v15, %v4542_v1  ;;  %4401 = vst [vmem:[%s5849_s3 + $0x88] sm:$0xff] %v3706_v17   ;;  %v1091_v26 = vmax.f32 %v835_v18, 0.0  ;;  %v3196_v28 = vunpack.c.l.bf16 %v4279_v16 }
  0x31   :  { %v576_v27 = vmul.f32 %v3193_v20, %v4542_v1  ;;  %v3197_v29 = vunpack.c.h.bf16 %v4279_v16  ;;  %4402 = vst [vmem:[%s5849_s3 + $0x90] sm:$0xff] %v3711_v22   ;;  %v837_v30 = vadd.f32 %v4556_v7, %v574_v23  ;;  %v3200_v33 = vunpack.c.l.bf16 %v4280_v21 }
  0x32   :  { %v1092_v31 = vmax.f32 %v836_v24, 0.0  ;;  %v838_v32 = vadd.f32 %v4556_v7, %v575_v25  ;;  %v3716_v35 = vpack.c.bf16 %v1091_v26, %v1090_v19  ;;  %v577_v37 = vmul.f32 %v3196_v28, %v4542_v1 }
  0x33   :  { %v839_v36 = vadd.f32 %v4556_v7, %v576_v27  ;;  %v578_v38 = vmul.f32 %v3197_v29, %v4542_v1  ;;  %v1093_v39 = vmax.f32 %v837_v30, 0.0  ;;  %v3201_v41 = vunpack.c.h.bf16 %v4280_v21  ;;  %v4286_v21 = vld [vmem:[%s5846_s0 + $0xe8] sm:$0xff]  }
  0x34   :  { %v1094_v40 = vmax.f32 %v838_v32, 0.0  ;;  %v579_v42 = vmul.f32 %v3200_v33, %v4542_v1  ;;  %4403 = vst [vmem:[%s5849_s3 + $0x98] sm:$0xff] %v3716_v35   ;;  %v840_v44 = vadd.f32 %v4556_v7, %v577_v37  ;;  %v3204_v46 = vunpack.c.l.bf16 %v4281_v34 }
  0x35   :  { %v1095_v43 = vmax.f32 %v839_v36, 0.0  ;;  %v841_v45 = vadd.f32 %v4556_v7, %v578_v38  ;;  %v3721_v48 = vpack.c.bf16 %v1093_v39, %v1092_v31  ;;  %v580_v49 = vmul.f32 %v3201_v41, %v4542_v1  ;;  %v4288_v39 = vld [vmem:[%s5846_s0 + $0xf8] sm:$0xff]  }
  0x36   :  { %v842_v50 = vadd.f32 %v4556_v7, %v579_v42  ;;  %v3205_v51 = vunpack.c.h.bf16 %v4281_v34  ;;  %v1096_v54 = vmax.f32 %v840_v44, 0.0  ;;  %v581_v56 = vmul.f32 %v3204_v46, %v4542_v1  ;;  %v4287_v34 = vld [vmem:[%s5846_s0 + $0xf0] sm:$0xff]  }
  0x37   :  { %v3726_v53 = vpack.c.bf16 %v1095_v43, %v1094_v40  ;;  %v1097_v55 = vmax.f32 %v841_v45, 0.0  ;;  %4404 = vst [vmem:[%s5849_s3 + $0xa0] sm:$0xff] %v3721_v48   ;;  %v843_v57 = vadd.f32 %v4556_v7, %v580_v49  ;;  %v3208_v60 = vunpack.c.l.bf16 %v4282_v47 }
  0x38   :  { %v1098_v58 = vmax.f32 %v842_v50, 0.0  ;;  %v582_v59 = vmul.f32 %v3205_v51, %v4542_v1  ;;  %v844_v63 = vadd.f32 %v4556_v7, %v581_v56  ;;  %v3209_v0 = vunpack.c.h.bf16 %v4282_v47 }
  0x39   :  { %4405 = vst [vmem:[%s5849_s3 + $0xa8] sm:$0xff] %v3726_v53   ;;  %v3731_v62 = vpack.c.bf16 %v1097_v55, %v1096_v54  ;;  %v3212_v2 = vunpack.c.l.bf16 %v4283_v52  ;;  %v1099_v3 = vmax.f32 %v843_v57, 0.0  ;;  %v583_v5 = vmul.f32 %v3208_v60, %v4542_v1 }
  0x3a   :  { %v845_v4 = vadd.f32 %v4556_v7, %v582_v59  ;;  %v3213_v6 = vunpack.c.h.bf16 %v4283_v52  ;;  %v1100_v8 = vmax.f32 %v844_v63, 0.0  ;;  %v584_v9 = vmul.f32 %v3209_v0, %v4542_v1  ;;  %v4289_v52 = vld [vmem:[%s5846_s0 + $0x100] sm:$0xff]  }
  0x3b   :  { %4406 = vst [vmem:[%s5849_s3 + $0xb0] sm:$0xff] %v3731_v62   ;;  %v585_v10 = vmul.f32 %v3212_v2, %v4542_v1  ;;  %v3216_v11 = vunpack.c.l.bf16 %v4284_v61  ;;  %v3736_v13 = vpack.c.bf16 %v1099_v3, %v1098_v58  ;;  %v846_v15 = vadd.f32 %v4556_v7, %v583_v5  ;;  %v4290_v2 = vld [vmem:[%s5846_s0 + $0x108] sm:$0xff]  }
  0x3c   :  { %v1101_v14 = vmax.f32 %v845_v4, 0.0  ;;  %v586_v16 = vmul.f32 %v3213_v6, %v4542_v1  ;;  %v847_v17 = vadd.f32 %v4556_v7, %v584_v9  ;;  %v3217_v19 = vunpack.c.h.bf16 %v4284_v61 }
  0x3d   :  { %v848_v18 = vadd.f32 %v4556_v7, %v585_v10  ;;  %v587_v20 = vmul.f32 %v3216_v11, %v4542_v1  ;;  %4407 = vst [vmem:[%s5849_s3 + $0xb8] sm:$0xff] %v3736_v13   ;;  %v1102_v23 = vmax.f32 %v846_v15, 0.0  ;;  %v3220_v25 = vunpack.c.l.bf16 %v4285_v12 }
  0x3e   :  { %v3741_v22 = vpack.c.bf16 %v1101_v14, %v1100_v8  ;;  %v849_v24 = vadd.f32 %v4556_v7, %v586_v16  ;;  %v1103_v26 = vmax.f32 %v847_v17, 0.0  ;;  %v588_v28 = vmul.f32 %v3217_v19, %v4542_v1  ;;  %v4291_v8 = vld [vmem:[%s5846_s0 + $0x110] sm:$0xff]   ;;  %v4292_v17 = vld [vmem:[%s5846_s0 + $0x118] sm:$0xff]  }
  0x3f   :  { %v1104_v27 = vmax.f32 %v848_v18, 0.0  ;;  %v850_v29 = vadd.f32 %v4556_v7, %v587_v20  ;;  %v3221_v31 = vunpack.c.h.bf16 %v4285_v12  ;;  %v589_v32 = vmul.f32 %v3220_v25, %v4542_v1 }
  0x40   :  { %4408 = vst [vmem:[%s5849_s3 + $0xc0] sm:$0xff] %v3741_v22   ;;  %v1105_v30 = vmax.f32 %v849_v24, 0.0  ;;  %v3224_v33 = vunpack.c.l.bf16 %v4286_v21  ;;  %v3746_v35 = vpack.c.bf16 %v1103_v26, %v1102_v23  ;;  %v851_v36 = vadd.f32 %v4556_v7, %v588_v28 }
  0x41   :  { %v1106_v37 = vmax.f32 %v850_v29, 0.0  ;;  %v3225_v38 = vunpack.c.h.bf16 %v4286_v21  ;;  %v590_v41 = vmul.f32 %v3221_v31, %v4542_v1  ;;  %v852_v42 = vadd.f32 %v4556_v7, %v589_v32 }
  0x42   :  { %v3751_v40 = vpack.c.bf16 %v1105_v30, %v1104_v27  ;;  %v591_v43 = vmul.f32 %v3224_v33, %v4542_v1  ;;  %4409 = vst [vmem:[%s5849_s3 + $0xc8] sm:$0xff] %v3746_v35   ;;  %v1107_v44 = vmax.f32 %v851_v36, 0.0  ;;  %v3228_v46 = vunpack.c.l.bf16 %v4287_v34  ;;  %v4293_v30 = vld [vmem:[%s5846_s0 + $0x120] sm:$0xff]  }
  0x43   :  { %v592_v45 = vmul.f32 %v3225_v38, %v4542_v1  ;;  %v3229_v47 = vunpack.c.h.bf16 %v4287_v34  ;;  %v853_v48 = vadd.f32 %v4556_v7, %v590_v41  ;;  %v1108_v49 = vmax.f32 %v852_v42, 0.0 }
  0x44   :  { %4410 = vst [vmem:[%s5849_s3 + $0xd0] sm:$0xff] %v3751_v40   ;;  %v854_v50 = vadd.f32 %v4556_v7, %v591_v43  ;;  %v3232_v51 = vunpack.c.l.bf16 %v4288_v39  ;;  %v3756_v53 = vpack.c.bf16 %v1107_v44, %v1106_v37  ;;  %v593_v55 = vmul.f32 %v3228_v46, %v4542_v1 }
  0x45   :  { %v855_v54 = vadd.f32 %v4556_v7, %v592_v45  ;;  %v594_v56 = vmul.f32 %v3229_v47, %v4542_v1  ;;  %v1109_v57 = vmax.f32 %v853_v48, 0.0  ;;  %v3233_v59 = vunpack.c.h.bf16 %v4288_v39  ;;  %v4294_v39 = vld [vmem:[%s5846_s0 + $0x128] sm:$0xff]  }
  0x46   :  { %v1110_v58 = vmax.f32 %v854_v50, 0.0  ;;  %v595_v60 = vmul.f32 %v3232_v51, %v4542_v1  ;;  %4411 = vst [vmem:[%s5849_s3 + $0xd8] sm:$0xff] %v3756_v53   ;;  %v856_v62 = vadd.f32 %v4556_v7, %v593_v55  ;;  %v3236_v0 = vunpack.c.l.bf16 %v4289_v52 }
  0x47   :  { %v1111_v61 = vmax.f32 %v855_v54, 0.0  ;;  %v857_v63 = vadd.f32 %v4556_v7, %v594_v56  ;;  %v3761_v3 = vpack.c.bf16 %v1109_v57, %v1108_v49  ;;  %v596_v4 = vmul.f32 %v3233_v59, %v4542_v1  ;;  %v4296_v57 = vld [vmem:[%s5846_s0 + $0x138] sm:$0xff]  }
  0x48   :  { %v858_v5 = vadd.f32 %v4556_v7, %v595_v60  ;;  %v3237_v6 = vunpack.c.h.bf16 %v4289_v52  ;;  %v1112_v10 = vmax.f32 %v856_v62, 0.0  ;;  %v597_v12 = vmul.f32 %v3236_v0, %v4542_v1  ;;  %v4295_v52 = vld [vmem:[%s5846_s0 + $0x130] sm:$0xff]  }
  0x49   :  { %v3766_v9 = vpack.c.bf16 %v1111_v61, %v1110_v58  ;;  %v1113_v11 = vmax.f32 %v857_v63, 0.0  ;;  %4412 = vst [vmem:[%s5849_s3 + $0xe0] sm:$0xff] %v3761_v3   ;;  %v859_v13 = vadd.f32 %v4556_v7, %v596_v4  ;;  %v3240_v16 = vunpack.c.l.bf16 %v4290_v2 }
  0x4a   :  { %v1114_v14 = vmax.f32 %v858_v5, 0.0  ;;  %v598_v15 = vmul.f32 %v3237_v6, %v4542_v1  ;;  %v860_v19 = vadd.f32 %v4556_v7, %v597_v12  ;;  %v3241_v20 = vunpack.c.h.bf16 %v4290_v2 }
  0x4b   :  { %4413 = vst [vmem:[%s5849_s3 + $0xe8] sm:$0xff] %v3766_v9   ;;  %v3771_v18 = vpack.c.bf16 %v1113_v11, %v1112_v10  ;;  %v3244_v21 = vunpack.c.l.bf16 %v4291_v8  ;;  %v1115_v22 = vmax.f32 %v859_v13, 0.0  ;;  %v599_v24 = vmul.f32 %v3240_v16, %v4542_v1 }
  0x4c   :  { %v861_v23 = vadd.f32 %v4556_v7, %v598_v15  ;;  %v3245_v25 = vunpack.c.h.bf16 %v4291_v8  ;;  %v1116_v26 = vmax.f32 %v860_v19, 0.0  ;;  %v600_v27 = vmul.f32 %v3241_v20, %v4542_v1  ;;  %v4297_v8 = vld [vmem:[%s5846_s0 + $0x140] sm:$0xff]  }
  0x4d   :  { %4414 = vst [vmem:[%s5849_s3 + $0xf0] sm:$0xff] %v3771_v18   ;;  %v601_v28 = vmul.f32 %v3244_v21, %v4542_v1  ;;  %v3248_v29 = vunpack.c.l.bf16 %v4292_v17  ;;  %v3776_v31 = vpack.c.bf16 %v1115_v22, %v1114_v14  ;;  %v862_v33 = vadd.f32 %v4556_v7, %v599_v24  ;;  %v4298_v21 = vld [vmem:[%s5846_s0 + $0x148] sm:$0xff]  }
  0x4e   :  { %v1117_v32 = vmax.f32 %v861_v23, 0.0  ;;  %v602_v34 = vmul.f32 %v3245_v25, %v4542_v1  ;;  %v863_v35 = vadd.f32 %v4556_v7, %v600_v27  ;;  %v3249_v37 = vunpack.c.h.bf16 %v4292_v17 }
  0x4f   :  { %v864_v36 = vadd.f32 %v4556_v7, %v601_v28  ;;  %v603_v38 = vmul.f32 %v3248_v29, %v4542_v1  ;;  %4415 = vst [vmem:[%s5849_s3 + $0xf8] sm:$0xff] %v3776_v31   ;;  %v1118_v41 = vmax.f32 %v862_v33, 0.0  ;;  %v3252_v43 = vunpack.c.l.bf16 %v4293_v30 }
  0x50   :  { %v3781_v40 = vpack.c.bf16 %v1117_v32, %v1116_v26  ;;  %v865_v42 = vadd.f32 %v4556_v7, %v602_v34  ;;  %v1119_v44 = vmax.f32 %v863_v35, 0.0  ;;  %v604_v46 = vmul.f32 %v3249_v37, %v4542_v1  ;;  %v4299_v26 = vld [vmem:[%s5846_s0 + $0x150] sm:$0xff]   ;;  %v4300_v35 = vld [vmem:[%s5846_s0 + $0x158] sm:$0xff]  }
  0x51   :  { %v1120_v45 = vmax.f32 %v864_v36, 0.0  ;;  %v866_v47 = vadd.f32 %v4556_v7, %v603_v38  ;;  %v3253_v49 = vunpack.c.h.bf16 %v4293_v30  ;;  %v605_v50 = vmul.f32 %v3252_v43, %v4542_v1 }
  0x52   :  { %4416 = vst [vmem:[%s5849_s3 + $0x100] sm:$0xff] %v3781_v40   ;;  %v1121_v48 = vmax.f32 %v865_v42, 0.0  ;;  %v3256_v51 = vunpack.c.l.bf16 %v4294_v39  ;;  %v3786_v53 = vpack.c.bf16 %v1119_v44, %v1118_v41  ;;  %v867_v54 = vadd.f32 %v4556_v7, %v604_v46 }
  0x53   :  { %v1122_v55 = vmax.f32 %v866_v47, 0.0  ;;  %v3257_v56 = vunpack.c.h.bf16 %v4294_v39  ;;  %v606_v59 = vmul.f32 %v3253_v49, %v4542_v1  ;;  %v868_v60 = vadd.f32 %v4556_v7, %v605_v50 }
  0x54   :  { %v3791_v58 = vpack.c.bf16 %v1121_v48, %v1120_v45  ;;  %v607_v61 = vmul.f32 %v3256_v51, %v4542_v1  ;;  %4417 = vst [vmem:[%s5849_s3 + $0x108] sm:$0xff] %v3786_v53   ;;  %v1123_v62 = vmax.f32 %v867_v54, 0.0  ;;  %v3260_v0 = vunpack.c.l.bf16 %v4295_v52  ;;  %v4301_v48 = vld [vmem:[%s5846_s0 + $0x160] sm:$0xff]  }
  0x55   :  { %v608_v63 = vmul.f32 %v3257_v56, %v4542_v1  ;;  %v3261_v2 = vunpack.c.h.bf16 %v4295_v52  ;;  %v869_v3 = vadd.f32 %v4556_v7, %v606_v59  ;;  %v1124_v4 = vmax.f32 %v868_v60, 0.0 }
  0x56   :  { %4418 = vst [vmem:[%s5849_s3 + $0x110] sm:$0xff] %v3791_v58   ;;  %v870_v5 = vadd.f32 %v4556_v7, %v607_v61  ;;  %v3264_v6 = vunpack.c.l.bf16 %v4296_v57  ;;  %v3796_v9 = vpack.c.bf16 %v1123_v62, %v1122_v55  ;;  %v609_v11 = vmul.f32 %v3260_v0, %v4542_v1 }
  0x57   :  { %v871_v10 = vadd.f32 %v4556_v7, %v608_v63  ;;  %v610_v12 = vmul.f32 %v3261_v2, %v4542_v1  ;;  %v1125_v13 = vmax.f32 %v869_v3, 0.0  ;;  %v3265_v15 = vunpack.c.h.bf16 %v4296_v57  ;;  %v4302_v57 = vld [vmem:[%s5846_s0 + $0x168] sm:$0xff]  }
  0x58   :  { %v1126_v14 = vmax.f32 %v870_v5, 0.0  ;;  %v611_v16 = vmul.f32 %v3264_v6, %v4542_v1  ;;  %4419 = vst [vmem:[%s5849_s3 + $0x118] sm:$0xff] %v3796_v9   ;;  %v872_v18 = vadd.f32 %v4556_v7, %v609_v11  ;;  %v3268_v20 = vunpack.c.l.bf16 %v4297_v8 }
  0x59   :  { %v1127_v17 = vmax.f32 %v871_v10, 0.0  ;;  %v873_v19 = vadd.f32 %v4556_v7, %v610_v12  ;;  %v3801_v22 = vpack.c.bf16 %v1125_v13, %v1124_v4  ;;  %v612_v23 = vmul.f32 %v3265_v15, %v4542_v1  ;;  %v4304_v13 = vld [vmem:[%s5846_s0 + $0x178] sm:$0xff]  }
  0x5a   :  { %v874_v24 = vadd.f32 %v4556_v7, %v611_v16  ;;  %v3269_v25 = vunpack.c.h.bf16 %v4297_v8  ;;  %v1128_v28 = vmax.f32 %v872_v18, 0.0  ;;  %v613_v30 = vmul.f32 %v3268_v20, %v4542_v1  ;;  %v4303_v8 = vld [vmem:[%s5846_s0 + $0x170] sm:$0xff]  }
  0x5b   :  { %v3806_v27 = vpack.c.bf16 %v1127_v17, %v1126_v14  ;;  %v1129_v29 = vmax.f32 %v873_v19, 0.0  ;;  %4420 = vst [vmem:[%s5849_s3 + $0x120] sm:$0xff] %v3801_v22   ;;  %v875_v31 = vadd.f32 %v4556_v7, %v612_v23  ;;  %v3272_v34 = vunpack.c.l.bf16 %v4298_v21 }
  0x5c   :  { %v1130_v32 = vmax.f32 %v874_v24, 0.0  ;;  %v614_v33 = vmul.f32 %v3269_v25, %v4542_v1  ;;  %v876_v37 = vadd.f32 %v4556_v7, %v613_v30  ;;  %v3273_v38 = vunpack.c.h.bf16 %v4298_v21 }
  0x5d   :  { %4421 = vst [vmem:[%s5849_s3 + $0x128] sm:$0xff] %v3806_v27   ;;  %v3811_v36 = vpack.c.bf16 %v1129_v29, %v1128_v28  ;;  %v3276_v39 = vunpack.c.l.bf16 %v4299_v26  ;;  %v1131_v40 = vmax.f32 %v875_v31, 0.0  ;;  %v615_v42 = vmul.f32 %v3272_v34, %v4542_v1 }
  0x5e   :  { %v877_v41 = vadd.f32 %v4556_v7, %v614_v33  ;;  %v3277_v43 = vunpack.c.h.bf16 %v4299_v26  ;;  %v1132_v44 = vmax.f32 %v876_v37, 0.0  ;;  %v616_v45 = vmul.f32 %v3273_v38, %v4542_v1  ;;  %v4305_v26 = vld [vmem:[%s5846_s0 + $0x180] sm:$0xff]  }
  0x5f   :  { %4422 = vst [vmem:[%s5849_s3 + $0x130] sm:$0xff] %v3811_v36   ;;  %v617_v46 = vmul.f32 %v3276_v39, %v4542_v1  ;;  %v3280_v47 = vunpack.c.l.bf16 %v4300_v35  ;;  %v3816_v49 = vpack.c.bf16 %v1131_v40, %v1130_v32  ;;  %v878_v51 = vadd.f32 %v4556_v7, %v615_v42  ;;  %v4306_v39 = vld [vmem:[%s5846_s0 + $0x188] sm:$0xff]   ;;  %v5026_v42 = vld [vmem:[%s5848_s2] ss:$0 sm:$0xff] }
  0x60   :  { %v1133_v50 = vmax.f32 %v877_v41, 0.0  ;;  %v618_v52 = vmul.f32 %v3277_v43, %v4542_v1  ;;  %v879_v53 = vadd.f32 %v4556_v7, %v616_v45  ;;  %v3281_v55 = vunpack.c.h.bf16 %v4300_v35  ;;  %v5020_v41 = vld [vmem:[%s5847_s1] ss:$0 sm:$0xff] }
  0x61   :  { %v880_v54 = vadd.f32 %v4556_v7, %v617_v46  ;;  %v619_v56 = vmul.f32 %v3280_v47, %v4542_v1  ;;  %4423 = vst [vmem:[%s5849_s3 + $0x138] sm:$0xff] %v3816_v49   ;;  %v1134_v59 = vmax.f32 %v878_v51, 0.0  ;;  %v3284_v61 = vunpack.c.l.bf16 %v4301_v48 }
  0x62   :  { %v3821_v58 = vpack.c.bf16 %v1133_v50, %v1132_v44  ;;  %v881_v60 = vadd.f32 %v4556_v7, %v618_v52  ;;  %v1135_v62 = vmax.f32 %v879_v53, 0.0  ;;  %v620_v0 = vmul.f32 %v3281_v55, %v4542_v1  ;;  %v4307_v44 = vld [vmem:[%s5846_s0 + $0x190] sm:$0xff]   ;;  %v4308_v53 = vld [vmem:[%s5846_s0 + $0x198] sm:$0xff]  }
  0x63   :  { %v1136_v63 = vmax.f32 %v880_v54, 0.0  ;;  %v882_v2 = vadd.f32 %v4556_v7, %v619_v56  ;;  %v3285_v4 = vunpack.c.h.bf16 %v4301_v48  ;;  %v621_v5 = vmul.f32 %v3284_v61, %v4542_v1 }
  0x64   :  { %4424 = vst [vmem:[%s5849_s3 + $0x140] sm:$0xff] %v3821_v58   ;;  %v1137_v3 = vmax.f32 %v881_v60, 0.0  ;;  %v3288_v6 = vunpack.c.l.bf16 %v4302_v57  ;;  %v3826_v9 = vpack.c.bf16 %v1135_v62, %v1134_v59  ;;  %v883_v10 = vadd.f32 %v4556_v7, %v620_v0 }
  0x65   :  { %v1138_v11 = vmax.f32 %v882_v2, 0.0  ;;  %v3289_v12 = vunpack.c.h.bf16 %v4302_v57  ;;  %v622_v15 = vmul.f32 %v3285_v4, %v4542_v1  ;;  %v884_v16 = vadd.f32 %v4556_v7, %v621_v5 }
  0x66   :  { %v3831_v14 = vpack.c.bf16 %v1137_v3, %v1136_v63  ;;  %v623_v17 = vmul.f32 %v3288_v6, %v4542_v1  ;;  %4425 = vst [vmem:[%s5849_s3 + $0x148] sm:$0xff] %v3826_v9   ;;  %v1139_v18 = vmax.f32 %v883_v10, 0.0  ;;  %v3292_v20 = vunpack.c.l.bf16 %v4303_v8  ;;  %v4309_v3 = vld [vmem:[%s5846_s0 + $0x1a0] sm:$0xff]  }
  0x67   :  { %v624_v19 = vmul.f32 %v3289_v12, %v4542_v1  ;;  %v3293_v21 = vunpack.c.h.bf16 %v4303_v8  ;;  %v885_v22 = vadd.f32 %v4556_v7, %v622_v15  ;;  %v1140_v23 = vmax.f32 %v884_v16, 0.0 }
  0x68   :  { %4426 = vst [vmem:[%s5849_s3 + $0x150] sm:$0xff] %v3831_v14   ;;  %v886_v24 = vadd.f32 %v4556_v7, %v623_v17  ;;  %v3296_v25 = vunpack.c.l.bf16 %v4304_v13  ;;  %v3836_v27 = vpack.c.bf16 %v1139_v18, %v1138_v11  ;;  %v625_v29 = vmul.f32 %v3292_v20, %v4542_v1 }
  0x69   :  { %v887_v28 = vadd.f32 %v4556_v7, %v624_v19  ;;  %v626_v30 = vmul.f32 %v3293_v21, %v4542_v1  ;;  %v1141_v31 = vmax.f32 %v885_v22, 0.0  ;;  %v3297_v33 = vunpack.c.h.bf16 %v4304_v13  ;;  %v4310_v13 = vld [vmem:[%s5846_s0 + $0x1a8] sm:$0xff]  }
  0x6a   :  { %v1142_v32 = vmax.f32 %v886_v24, 0.0  ;;  %v627_v34 = vmul.f32 %v3296_v25, %v4542_v1  ;;  %4427 = vst [vmem:[%s5849_s3 + $0x158] sm:$0xff] %v3836_v27   ;;  %v888_v36 = vadd.f32 %v4556_v7, %v625_v29  ;;  %v3300_v38 = vunpack.c.l.bf16 %v4305_v26 }
  0x6b   :  { %v1143_v35 = vmax.f32 %v887_v28, 0.0  ;;  %v889_v37 = vadd.f32 %v4556_v7, %v626_v30  ;;  %v3841_v40 = vpack.c.bf16 %v1141_v31, %v1140_v23  ;;  %v628_v1 = vmul.f32 %v5020_v41, %v3297_v33  ;;  %v4312_v31 = vld [vmem:[%s5846_s0 + $0x1b8] sm:$0xff]  }
  0x6c   :  { %v890_v7 = vadd.f32 %v5026_v42, %v627_v34  ;;  %v3301_v43 = vunpack.c.h.bf16 %v4305_v26  ;;  %v1144_v46 = vmax.f32 %v888_v36, 0.0  ;;  %v629_v48 = vmul.f32 %v5020_v41, %v3300_v38  ;;  %v4311_v26 = vld [vmem:[%s5846_s0 + $0x1b0] sm:$0xff]  }
  0x6d   :  { %v3846_v45 = vpack.c.bf16 %v1143_v35, %v1142_v32  ;;  %v1145_v47 = vmax.f32 %v889_v37, 0.0  ;;  %4428 = vst [vmem:[%s5849_s3 + $0x160] sm:$0xff] %v3841_v40   ;;  %v891_v49 = vadd.f32 %v5026_v42, %v628_v1  ;;  %v3304_v52 = vunpack.c.l.bf16 %v4306_v39 }
  0x6e   :  { %v1146_v50 = vmax.f32 %v890_v7, 0.0  ;;  %v630_v51 = vmul.f32 %v5020_v41, %v3301_v43  ;;  %v892_v55 = vadd.f32 %v5026_v42, %v629_v48  ;;  %v3305_v56 = vunpack.c.h.bf16 %v4306_v39 }
  0x6f   :  { %4429 = vst [vmem:[%s5849_s3 + $0x168] sm:$0xff] %v3846_v45   ;;  %v3851_v54 = vpack.c.bf16 %v1145_v47, %v1144_v46  ;;  %v3308_v57 = vunpack.c.l.bf16 %v4307_v44  ;;  %v1147_v58 = vmax.f32 %v891_v49, 0.0  ;;  %v631_v60 = vmul.f32 %v5020_v41, %v3304_v52 }
  0x70   :  { %v893_v59 = vadd.f32 %v5026_v42, %v630_v51  ;;  %v3309_v61 = vunpack.c.h.bf16 %v4307_v44  ;;  %v1148_v62 = vmax.f32 %v892_v55, 0.0  ;;  %v632_v63 = vmul.f32 %v5020_v41, %v3305_v56  ;;  %v4313_v44 = vld [vmem:[%s5846_s0 + $0x1c0] sm:$0xff]  }
  0x71   :  { %4430 = vst [vmem:[%s5849_s3 + $0x170] sm:$0xff] %v3851_v54   ;;  %v633_v0 = vmul.f32 %v5020_v41, %v3308_v57  ;;  %v3312_v2 = vunpack.c.l.bf16 %v4308_v53  ;;  %v3856_v4 = vpack.c.bf16 %v1147_v58, %v1146_v50  ;;  %v894_v6 = vadd.f32 %v5026_v42, %v631_v60  ;;  %v4314_v57 = vld [vmem:[%s5846_s0 + $0x1c8] sm:$0xff]  }
  0x72   :  { %v1149_v5 = vmax.f32 %v893_v59, 0.0  ;;  %v634_v8 = vmul.f32 %v5020_v41, %v3309_v61  ;;  %v895_v9 = vadd.f32 %v5026_v42, %v632_v63  ;;  %v3313_v11 = vunpack.c.h.bf16 %v4308_v53 }
  0x73   :  { %v896_v10 = vadd.f32 %v5026_v42, %v633_v0  ;;  %v635_v12 = vmul.f32 %v5020_v41, %v3312_v2  ;;  %4431 = vst [vmem:[%s5849_s3 + $0x178] sm:$0xff] %v3856_v4   ;;  %v1150_v15 = vmax.f32 %v894_v6, 0.0  ;;  %v3316_v17 = vunpack.c.l.bf16 %v4309_v3 }
  0x74   :  { %v3861_v14 = vpack.c.bf16 %v1149_v5, %v1148_v62  ;;  %v897_v16 = vadd.f32 %v5026_v42, %v634_v8  ;;  %v1151_v18 = vmax.f32 %v895_v9, 0.0  ;;  %v636_v20 = vmul.f32 %v5020_v41, %v3313_v11  ;;  %v4315_v62 = vld [vmem:[%s5846_s0 + $0x1d0] sm:$0xff]   ;;  %v4316_v9 = vld [vmem:[%s5846_s0 + $0x1d8] sm:$0xff]  }
  0x75   :  { %v1152_v19 = vmax.f32 %v896_v10, 0.0  ;;  %v898_v21 = vadd.f32 %v5026_v42, %v635_v12  ;;  %v3317_v23 = vunpack.c.h.bf16 %v4309_v3  ;;  %v637_v24 = vmul.f32 %v5020_v41, %v3316_v17 }
  0x76   :  { %4432 = vst [vmem:[%s5849_s3 + $0x180] sm:$0xff] %v3861_v14   ;;  %v1153_v22 = vmax.f32 %v897_v16, 0.0  ;;  %v3320_v25 = vunpack.c.l.bf16 %v4310_v13  ;;  %v3866_v27 = vpack.c.bf16 %v1151_v18, %v1150_v15  ;;  %v899_v28 = vadd.f32 %v5026_v42, %v636_v20 }
  0x77   :  { %v1154_v29 = vmax.f32 %v898_v21, 0.0  ;;  %v3321_v30 = vunpack.c.h.bf16 %v4310_v13  ;;  %v638_v33 = vmul.f32 %v5020_v41, %v3317_v23  ;;  %v900_v34 = vadd.f32 %v5026_v42, %v637_v24 }
  0x78   :  { %v3871_v32 = vpack.c.bf16 %v1153_v22, %v1152_v19  ;;  %v639_v35 = vmul.f32 %v5020_v41, %v3320_v25  ;;  %4433 = vst [vmem:[%s5849_s3 + $0x188] sm:$0xff] %v3866_v27   ;;  %v1155_v36 = vmax.f32 %v899_v28, 0.0  ;;  %v3324_v38 = vunpack.c.l.bf16 %v4311_v26  ;;  %v4317_v22 = vld [vmem:[%s5846_s0 + $0x1e0] sm:$0xff]  }
  0x79   :  { %v640_v37 = vmul.f32 %v5020_v41, %v3321_v30  ;;  %v3325_v39 = vunpack.c.h.bf16 %v4311_v26  ;;  %v901_v40 = vadd.f32 %v5026_v42, %v638_v33  ;;  %v1156_v1 = vmax.f32 %v900_v34, 0.0 }
  0x7a   :  { %4434 = vst [vmem:[%s5849_s3 + $0x190] sm:$0xff] %v3871_v32   ;;  %v902_v7 = vadd.f32 %v5026_v42, %v639_v35  ;;  %v3328_v43 = vunpack.c.l.bf16 %v4312_v31  ;;  %v3876_v45 = vpack.c.bf16 %v1155_v36, %v1154_v29  ;;  %v641_v47 = vmul.f32 %v5020_v41, %v3324_v38 }
  0x7b   :  { %v903_v46 = vadd.f32 %v5026_v42, %v640_v37  ;;  %v642_v48 = vmul.f32 %v5020_v41, %v3325_v39  ;;  %v1157_v49 = vmax.f32 %v901_v40, 0.0  ;;  %v3329_v51 = vunpack.c.h.bf16 %v4312_v31  ;;  %v4318_v31 = vld [vmem:[%s5846_s0 + $0x1e8] sm:$0xff]  }
  0x7c   :  { %v1158_v50 = vmax.f32 %v902_v7, 0.0  ;;  %v643_v52 = vmul.f32 %v5020_v41, %v3328_v43  ;;  %4435 = vst [vmem:[%s5849_s3 + $0x198] sm:$0xff] %v3876_v45   ;;  %v904_v54 = vadd.f32 %v5026_v42, %v641_v47  ;;  %v3332_v56 = vunpack.c.l.bf16 %v4313_v44 }
  0x7d   :  { %v1159_v53 = vmax.f32 %v903_v46, 0.0  ;;  %v905_v55 = vadd.f32 %v5026_v42, %v642_v48  ;;  %v3881_v58 = vpack.c.bf16 %v1157_v49, %v1156_v1  ;;  %v644_v59 = vmul.f32 %v5020_v41, %v3329_v51  ;;  %v4320_v49 = vld [vmem:[%s5846_s0 + $0x1f8] sm:$0xff]  }
  0x7e   :  { %v906_v60 = vadd.f32 %v5026_v42, %v643_v52  ;;  %v3333_v61 = vunpack.c.h.bf16 %v4313_v44  ;;  %v1160_v0 = vmax.f32 %v904_v54, 0.0  ;;  %v645_v3 = vmul.f32 %v5020_v41, %v3332_v56  ;;  %v4319_v44 = vld [vmem:[%s5846_s0 + $0x1f0] sm:$0xff]  }
  0x7f   :  { %v3886_v63 = vpack.c.bf16 %v1159_v53, %v1158_v50  ;;  %v1161_v2 = vmax.f32 %v905_v55, 0.0  ;;  %4436 = vst [vmem:[%s5849_s3 + $0x1a0] sm:$0xff] %v3881_v58   ;;  %v907_v4 = vadd.f32 %v5026_v42, %v644_v59  ;;  %v3336_v8 = vunpack.c.l.bf16 %v4314_v57 }
  0x80   :  { %v1162_v5 = vmax.f32 %v906_v60, 0.0  ;;  %v646_v6 = vmul.f32 %v5020_v41, %v3333_v61  ;;  %v908_v11 = vadd.f32 %v5026_v42, %v645_v3  ;;  %v3337_v12 = vunpack.c.h.bf16 %v4314_v57 }
  0x81   :  { %4437 = vst [vmem:[%s5849_s3 + $0x1a8] sm:$0xff] %v3886_v63   ;;  %v3891_v10 = vpack.c.bf16 %v1161_v2, %v1160_v0  ;;  %v3340_v13 = vunpack.c.l.bf16 %v4315_v62  ;;  %v1163_v14 = vmax.f32 %v907_v4, 0.0  ;;  %v647_v16 = vmul.f32 %v5020_v41, %v3336_v8 }
  0x82   :  { %v909_v15 = vadd.f32 %v5026_v42, %v646_v6  ;;  %v3341_v17 = vunpack.c.h.bf16 %v4315_v62  ;;  %v1164_v18 = vmax.f32 %v908_v11, 0.0  ;;  %v648_v19 = vmul.f32 %v5020_v41, %v3337_v12  ;;  %v4321_v62 = vld [vmem:[%s5846_s0 + $0x200] sm:$0xff]  }
  0x83   :  { %4438 = vst [vmem:[%s5849_s3 + $0x1b0] sm:$0xff] %v3891_v10   ;;  %v649_v20 = vmul.f32 %v5020_v41, %v3340_v13  ;;  %v3344_v21 = vunpack.c.l.bf16 %v4316_v9  ;;  %v3896_v23 = vpack.c.bf16 %v1163_v14, %v1162_v5  ;;  %v910_v25 = vadd.f32 %v5026_v42, %v647_v16  ;;  %v4322_v13 = vld [vmem:[%s5846_s0 + $0x208] sm:$0xff]  }
  0x84   :  { %v1165_v24 = vmax.f32 %v909_v15, 0.0  ;;  %v650_v26 = vmul.f32 %v5020_v41, %v3341_v17  ;;  %v911_v27 = vadd.f32 %v5026_v42, %v648_v19  ;;  %v3345_v29 = vunpack.c.h.bf16 %v4316_v9 }
  0x85   :  { %v912_v28 = vadd.f32 %v5026_v42, %v649_v20  ;;  %v651_v30 = vmul.f32 %v5020_v41, %v3344_v21  ;;  %4439 = vst [vmem:[%s5849_s3 + $0x1b8] sm:$0xff] %v3896_v23   ;;  %v1166_v33 = vmax.f32 %v910_v25, 0.0  ;;  %v3348_v35 = vunpack.c.l.bf16 %v4317_v22 }
  0x86   :  { %v3901_v32 = vpack.c.bf16 %v1165_v24, %v1164_v18  ;;  %v913_v34 = vadd.f32 %v5026_v42, %v650_v26  ;;  %v1167_v36 = vmax.f32 %v911_v27, 0.0  ;;  %v652_v38 = vmul.f32 %v5020_v41, %v3345_v29  ;;  %v4323_v18 = vld [vmem:[%s5846_s0 + $0x210] sm:$0xff]   ;;  %v4324_v27 = vld [vmem:[%s5846_s0 + $0x218] sm:$0xff]  }
  0x87   :  { %v1168_v37 = vmax.f32 %v912_v28, 0.0  ;;  %v914_v39 = vadd.f32 %v5026_v42, %v651_v30  ;;  %v3349_v1 = vunpack.c.h.bf16 %v4317_v22  ;;  %v653_v7 = vmul.f32 %v5020_v41, %v3348_v35 }
  0x88   :  { %4440 = vst [vmem:[%s5849_s3 + $0x1c0] sm:$0xff] %v3901_v32   ;;  %v1169_v40 = vmax.f32 %v913_v34, 0.0  ;;  %v3352_v43 = vunpack.c.l.bf16 %v4318_v31  ;;  %v3906_v45 = vpack.c.bf16 %v1167_v36, %v1166_v33  ;;  %v915_v46 = vadd.f32 %v5026_v42, %v652_v38 }
  0x89   :  { %v1170_v47 = vmax.f32 %v914_v39, 0.0  ;;  %v3353_v48 = vunpack.c.h.bf16 %v4318_v31  ;;  %v654_v51 = vmul.f32 %v5020_v41, %v3349_v1  ;;  %v916_v52 = vadd.f32 %v5026_v42, %v653_v7 }
  0x8a   :  { %v3911_v50 = vpack.c.bf16 %v1169_v40, %v1168_v37  ;;  %v655_v53 = vmul.f32 %v5020_v41, %v3352_v43  ;;  %4441 = vst [vmem:[%s5849_s3 + $0x1c8] sm:$0xff] %v3906_v45   ;;  %v1171_v54 = vmax.f32 %v915_v46, 0.0  ;;  %v3356_v56 = vunpack.c.l.bf16 %v4319_v44  ;;  %v4325_v40 = vld [vmem:[%s5846_s0 + $0x220] sm:$0xff]  }
  0x8b   :  { %v656_v55 = vmul.f32 %v5020_v41, %v3353_v48  ;;  %v3357_v57 = vunpack.c.h.bf16 %v4319_v44  ;;  %v917_v58 = vadd.f32 %v5026_v42, %v654_v51  ;;  %v1172_v59 = vmax.f32 %v916_v52, 0.0 }
  0x8c   :  { %4442 = vst [vmem:[%s5849_s3 + $0x1d0] sm:$0xff] %v3911_v50   ;;  %v918_v60 = vadd.f32 %v5026_v42, %v655_v53  ;;  %v3360_v61 = vunpack.c.l.bf16 %v4320_v49  ;;  %v3916_v63 = vpack.c.bf16 %v1171_v54, %v1170_v47  ;;  %v657_v2 = vmul.f32 %v5020_v41, %v3356_v56 }
  0x8d   :  { %v919_v0 = vadd.f32 %v5026_v42, %v656_v55  ;;  %v658_v3 = vmul.f32 %v5020_v41, %v3357_v57  ;;  %v1173_v4 = vmax.f32 %v917_v58, 0.0  ;;  %v3361_v6 = vunpack.c.h.bf16 %v4320_v49  ;;  %v4326_v49 = vld [vmem:[%s5846_s0 + $0x228] sm:$0xff]  }
  0x8e   :  { %v1174_v5 = vmax.f32 %v918_v60, 0.0  ;;  %v659_v8 = vmul.f32 %v5020_v41, %v3360_v61  ;;  %4443 = vst [vmem:[%s5849_s3 + $0x1d8] sm:$0xff] %v3916_v63   ;;  %v920_v10 = vadd.f32 %v5026_v42, %v657_v2  ;;  %v3364_v12 = vunpack.c.l.bf16 %v4321_v62 }
  0x8f   :  { %v1175_v9 = vmax.f32 %v919_v0, 0.0  ;;  %v921_v11 = vadd.f32 %v5026_v42, %v658_v3  ;;  %v3921_v14 = vpack.c.bf16 %v1173_v4, %v1172_v59  ;;  %v660_v15 = vmul.f32 %v5020_v41, %v3361_v6  ;;  %v4328_v4 = vld [vmem:[%s5846_s0 + $0x238] sm:$0xff]  }
  0x90   :  { %v922_v16 = vadd.f32 %v5026_v42, %v659_v8  ;;  %v3365_v17 = vunpack.c.h.bf16 %v4321_v62  ;;  %v1176_v20 = vmax.f32 %v920_v10, 0.0  ;;  %v661_v22 = vmul.f32 %v5020_v41, %v3364_v12  ;;  %v4327_v62 = vld [vmem:[%s5846_s0 + $0x230] sm:$0xff]  }
  0x91   :  { %v3926_v19 = vpack.c.bf16 %v1175_v9, %v1174_v5  ;;  %v1177_v21 = vmax.f32 %v921_v11, 0.0  ;;  %4444 = vst [vmem:[%s5849_s3 + $0x1e0] sm:$0xff] %v3921_v14   ;;  %v923_v23 = vadd.f32 %v5026_v42, %v660_v15  ;;  %v3368_v26 = vunpack.c.l.bf16 %v4322_v13 }
  0x92   :  { %v1178_v24 = vmax.f32 %v922_v16, 0.0  ;;  %v662_v25 = vmul.f32 %v5020_v41, %v3365_v17  ;;  %v924_v29 = vadd.f32 %v5026_v42, %v661_v22  ;;  %v3369_v30 = vunpack.c.h.bf16 %v4322_v13 }
  0x93   :  { %4445 = vst [vmem:[%s5849_s3 + $0x1e8] sm:$0xff] %v3926_v19   ;;  %v3931_v28 = vpack.c.bf16 %v1177_v21, %v1176_v20  ;;  %v3372_v31 = vunpack.c.l.bf16 %v4323_v18  ;;  %v1179_v32 = vmax.f32 %v923_v23, 0.0  ;;  %v663_v34 = vmul.f32 %v5020_v41, %v3368_v26 }
  0x94   :  { %v925_v33 = vadd.f32 %v5026_v42, %v662_v25  ;;  %v3373_v35 = vunpack.c.h.bf16 %v4323_v18  ;;  %v1180_v36 = vmax.f32 %v924_v29, 0.0  ;;  %v664_v37 = vmul.f32 %v5020_v41, %v3369_v30  ;;  %v4329_v18 = vld [vmem:[%s5846_s0 + $0x240] sm:$0xff]  }
  0x95   :  { %4446 = vst [vmem:[%s5849_s3 + $0x1f0] sm:$0xff] %v3931_v28   ;;  %v665_v38 = vmul.f32 %v5020_v41, %v3372_v31  ;;  %v3376_v39 = vunpack.c.l.bf16 %v4324_v27  ;;  %v3936_v1 = vpack.c.bf16 %v1179_v32, %v1178_v24  ;;  %v926_v43 = vadd.f32 %v5026_v42, %v663_v34  ;;  %v4330_v31 = vld [vmem:[%s5846_s0 + $0x248] sm:$0xff]  }
  0x96   :  { %v1181_v7 = vmax.f32 %v925_v33, 0.0  ;;  %v666_v44 = vmul.f32 %v5020_v41, %v3373_v35  ;;  %v927_v45 = vadd.f32 %v5026_v42, %v664_v37  ;;  %v3377_v47 = vunpack.c.h.bf16 %v4324_v27 }
  0x97   :  { %v928_v46 = vadd.f32 %v5026_v42, %v665_v38  ;;  %v667_v48 = vmul.f32 %v5020_v41, %v3376_v39  ;;  %4447 = vst [vmem:[%s5849_s3 + $0x1f8] sm:$0xff] %v3936_v1   ;;  %v1182_v51 = vmax.f32 %v926_v43, 0.0  ;;  %v3380_v53 = vunpack.c.l.bf16 %v4325_v40 }
  0x98   :  { %v3941_v50 = vpack.c.bf16 %v1181_v7, %v1180_v36  ;;  %v929_v52 = vadd.f32 %v5026_v42, %v666_v44  ;;  %v1183_v54 = vmax.f32 %v927_v45, 0.0  ;;  %v668_v56 = vmul.f32 %v5020_v41, %v3377_v47  ;;  %v4331_v36 = vld [vmem:[%s5846_s0 + $0x250] sm:$0xff]   ;;  %v4332_v45 = vld [vmem:[%s5846_s0 + $0x258] sm:$0xff]  }
  0x99   :  { %v1184_v55 = vmax.f32 %v928_v46, 0.0  ;;  %v930_v57 = vadd.f32 %v5026_v42, %v667_v48  ;;  %v3381_v59 = vunpack.c.h.bf16 %v4325_v40  ;;  %v669_v60 = vmul.f32 %v5020_v41, %v3380_v53 }
  0x9a   :  { %4448 = vst [vmem:[%s5849_s3 + $0x200] sm:$0xff] %v3941_v50   ;;  %v1185_v58 = vmax.f32 %v929_v52, 0.0  ;;  %v3384_v61 = vunpack.c.l.bf16 %v4326_v49  ;;  %v3946_v63 = vpack.c.bf16 %v1183_v54, %v1182_v51  ;;  %v931_v0 = vadd.f32 %v5026_v42, %v668_v56 }
  0x9b   :  { %v1186_v2 = vmax.f32 %v930_v57, 0.0  ;;  %v3385_v3 = vunpack.c.h.bf16 %v4326_v49  ;;  %v670_v6 = vmul.f32 %v5020_v41, %v3381_v59  ;;  %v932_v8 = vadd.f32 %v5026_v42, %v669_v60 }
  0x9c   :  { %v3951_v5 = vpack.c.bf16 %v1185_v58, %v1184_v55  ;;  %v671_v9 = vmul.f32 %v5020_v41, %v3384_v61  ;;  %4449 = vst [vmem:[%s5849_s3 + $0x208] sm:$0xff] %v3946_v63   ;;  %v1187_v10 = vmax.f32 %v931_v0, 0.0  ;;  %v3388_v12 = vunpack.c.l.bf16 %v4327_v62  ;;  %v4333_v58 = vld [vmem:[%s5846_s0 + $0x260] sm:$0xff]  }
  0x9d   :  { %v672_v11 = vmul.f32 %v5020_v41, %v3385_v3  ;;  %v3389_v13 = vunpack.c.h.bf16 %v4327_v62  ;;  %v933_v14 = vadd.f32 %v5026_v42, %v670_v6  ;;  %v1188_v15 = vmax.f32 %v932_v8, 0.0 }
  0x9e   :  { %4450 = vst [vmem:[%s5849_s3 + $0x210] sm:$0xff] %v3951_v5   ;;  %v934_v16 = vadd.f32 %v5026_v42, %v671_v9  ;;  %v3392_v17 = vunpack.c.l.bf16 %v4328_v4  ;;  %v3956_v19 = vpack.c.bf16 %v1187_v10, %v1186_v2  ;;  %v673_v21 = vmul.f32 %v5020_v41, %v3388_v12 }
  0x9f   :  { %v935_v20 = vadd.f32 %v5026_v42, %v672_v11  ;;  %v674_v22 = vmul.f32 %v5020_v41, %v3389_v13  ;;  %v1189_v23 = vmax.f32 %v933_v14, 0.0  ;;  %v3393_v25 = vunpack.c.h.bf16 %v4328_v4  ;;  %v4334_v4 = vld [vmem:[%s5846_s0 + $0x268] sm:$0xff]  }
  0xa0   :  { %v1190_v24 = vmax.f32 %v934_v16, 0.0  ;;  %v675_v26 = vmul.f32 %v5020_v41, %v3392_v17  ;;  %4451 = vst [vmem:[%s5849_s3 + $0x218] sm:$0xff] %v3956_v19   ;;  %v936_v28 = vadd.f32 %v5026_v42, %v673_v21  ;;  %v3396_v30 = vunpack.c.l.bf16 %v4329_v18 }
  0xa1   :  { %v1191_v27 = vmax.f32 %v935_v20, 0.0  ;;  %v937_v29 = vadd.f32 %v5026_v42, %v674_v22  ;;  %v3961_v32 = vpack.c.bf16 %v1189_v23, %v1188_v15  ;;  %v676_v33 = vmul.f32 %v5020_v41, %v3393_v25  ;;  %v4336_v23 = vld [vmem:[%s5846_s0 + $0x278] sm:$0xff]  }
  0xa2   :  { %v938_v34 = vadd.f32 %v5026_v42, %v675_v26  ;;  %v3397_v35 = vunpack.c.h.bf16 %v4329_v18  ;;  %v1192_v38 = vmax.f32 %v936_v28, 0.0  ;;  %v677_v40 = vmul.f32 %v5020_v41, %v3396_v30  ;;  %v4335_v18 = vld [vmem:[%s5846_s0 + $0x270] sm:$0xff]  }
  0xa3   :  { %v3966_v37 = vpack.c.bf16 %v1191_v27, %v1190_v24  ;;  %v1193_v39 = vmax.f32 %v937_v29, 0.0  ;;  %4452 = vst [vmem:[%s5849_s3 + $0x220] sm:$0xff] %v3961_v32   ;;  %v939_v1 = vadd.f32 %v5026_v42, %v676_v33  ;;  %v3400_v44 = vunpack.c.l.bf16 %v4330_v31 }
  0xa4   :  { %v1194_v7 = vmax.f32 %v938_v34, 0.0  ;;  %v678_v43 = vmul.f32 %v5020_v41, %v3397_v35  ;;  %v940_v47 = vadd.f32 %v5026_v42, %v677_v40  ;;  %v3401_v48 = vunpack.c.h.bf16 %v4330_v31 }
  0xa5   :  { %4453 = vst [vmem:[%s5849_s3 + $0x228] sm:$0xff] %v3966_v37   ;;  %v3971_v46 = vpack.c.bf16 %v1193_v39, %v1192_v38  ;;  %v3404_v49 = vunpack.c.l.bf16 %v4331_v36  ;;  %v1195_v50 = vmax.f32 %v939_v1, 0.0  ;;  %v679_v52 = vmul.f32 %v5020_v41, %v3400_v44 }
  0xa6   :  { %v941_v51 = vadd.f32 %v5026_v42, %v678_v43  ;;  %v3405_v53 = vunpack.c.h.bf16 %v4331_v36  ;;  %v1196_v54 = vmax.f32 %v940_v47, 0.0  ;;  %v680_v55 = vmul.f32 %v5020_v41, %v3401_v48  ;;  %v4337_v36 = vld [vmem:[%s5846_s0 + $0x280] sm:$0xff]  }
  0xa7   :  { %4454 = vst [vmem:[%s5849_s3 + $0x230] sm:$0xff] %v3971_v46   ;;  %v681_v56 = vmul.f32 %v5020_v41, %v3404_v49  ;;  %v3408_v57 = vunpack.c.l.bf16 %v4332_v45  ;;  %v3976_v59 = vpack.c.bf16 %v1195_v50, %v1194_v7  ;;  %v942_v61 = vadd.f32 %v5026_v42, %v679_v52  ;;  %v4338_v49 = vld [vmem:[%s5846_s0 + $0x288] sm:$0xff]  }
  0xa8   :  { %v1197_v60 = vmax.f32 %v941_v51, 0.0  ;;  %v682_v62 = vmul.f32 %v5020_v41, %v3405_v53  ;;  %v943_v63 = vadd.f32 %v5026_v42, %v680_v55  ;;  %v3409_v2 = vunpack.c.h.bf16 %v4332_v45 }
  0xa9   :  { %v944_v0 = vadd.f32 %v5026_v42, %v681_v56  ;;  %v683_v3 = vmul.f32 %v5020_v41, %v3408_v57  ;;  %4455 = vst [vmem:[%s5849_s3 + $0x238] sm:$0xff] %v3976_v59   ;;  %v1198_v6 = vmax.f32 %v942_v61, 0.0  ;;  %v3412_v9 = vunpack.c.l.bf16 %v4333_v58 }
  0xaa   :  { %v3981_v5 = vpack.c.bf16 %v1197_v60, %v1196_v54  ;;  %v945_v8 = vadd.f32 %v5026_v42, %v682_v62  ;;  %v1199_v10 = vmax.f32 %v943_v63, 0.0  ;;  %v684_v12 = vmul.f32 %v5020_v41, %v3409_v2  ;;  %v4339_v54 = vld [vmem:[%s5846_s0 + $0x290] sm:$0xff]   ;;  %v4340_v63 = vld [vmem:[%s5846_s0 + $0x298] sm:$0xff]  }
  0xab   :  { %v1200_v11 = vmax.f32 %v944_v0, 0.0  ;;  %v946_v13 = vadd.f32 %v5026_v42, %v683_v3  ;;  %v3413_v15 = vunpack.c.h.bf16 %v4333_v58  ;;  %v685_v16 = vmul.f32 %v5020_v41, %v3412_v9 }
  0xac   :  { %4456 = vst [vmem:[%s5849_s3 + $0x240] sm:$0xff] %v3981_v5   ;;  %v1201_v14 = vmax.f32 %v945_v8, 0.0  ;;  %v3416_v17 = vunpack.c.l.bf16 %v4334_v4  ;;  %v3986_v19 = vpack.c.bf16 %v1199_v10, %v1198_v6  ;;  %v947_v20 = vadd.f32 %v5026_v42, %v684_v12 }
  0xad   :  { %v1202_v21 = vmax.f32 %v946_v13, 0.0  ;;  %v3417_v22 = vunpack.c.h.bf16 %v4334_v4  ;;  %v686_v25 = vmul.f32 %v5020_v41, %v3413_v15  ;;  %v948_v26 = vadd.f32 %v5026_v42, %v685_v16 }
  0xae   :  { %v3991_v24 = vpack.c.bf16 %v1201_v14, %v1200_v11  ;;  %v687_v27 = vmul.f32 %v5020_v41, %v3416_v17  ;;  %4457 = vst [vmem:[%s5849_s3 + $0x248] sm:$0xff] %v3986_v19   ;;  %v1203_v28 = vmax.f32 %v947_v20, 0.0  ;;  %v3420_v30 = vunpack.c.l.bf16 %v4335_v18  ;;  %v4341_v14 = vld [vmem:[%s5846_s0 + $0x2a0] sm:$0xff]  }
  0xaf   :  { %v688_v29 = vmul.f32 %v5020_v41, %v3417_v22  ;;  %v3421_v31 = vunpack.c.h.bf16 %v4335_v18  ;;  %v949_v32 = vadd.f32 %v5026_v42, %v686_v25  ;;  %v1204_v33 = vmax.f32 %v948_v26, 0.0 }
  0xb0   :  { %4458 = vst [vmem:[%s5849_s3 + $0x250] sm:$0xff] %v3991_v24   ;;  %v950_v34 = vadd.f32 %v5026_v42, %v687_v27  ;;  %v3424_v35 = vunpack.c.l.bf16 %v4336_v23  ;;  %v3996_v37 = vpack.c.bf16 %v1203_v28, %v1202_v21  ;;  %v689_v39 = vmul.f32 %v5020_v41, %v3420_v30 }
  0xb1   :  { %v951_v38 = vadd.f32 %v5026_v42, %v688_v29  ;;  %v690_v40 = vmul.f32 %v5020_v41, %v3421_v31  ;;  %v1205_v1 = vmax.f32 %v949_v32, 0.0  ;;  %v3425_v43 = vunpack.c.h.bf16 %v4336_v23  ;;  %v4342_v23 = vld [vmem:[%s5846_s0 + $0x2a8] sm:$0xff]  }
  0xb2   :  { %v1206_v7 = vmax.f32 %v950_v34, 0.0  ;;  %v691_v44 = vmul.f32 %v5020_v41, %v3424_v35  ;;  %4459 = vst [vmem:[%s5849_s3 + $0x258] sm:$0xff] %v3996_v37   ;;  %v952_v46 = vadd.f32 %v5026_v42, %v689_v39  ;;  %v3428_v48 = vunpack.c.l.bf16 %v4337_v36 }
  0xb3   :  { %v1207_v45 = vmax.f32 %v951_v38, 0.0  ;;  %v953_v47 = vadd.f32 %v5026_v42, %v690_v40  ;;  %v4001_v50 = vpack.c.bf16 %v1205_v1, %v1204_v33  ;;  %v692_v51 = vmul.f32 %v5020_v41, %v3425_v43  ;;  %v4344_v1 = vld [vmem:[%s5846_s0 + $0x2b8] sm:$0xff]  }
  0xb4   :  { %v954_v52 = vadd.f32 %v5026_v42, %v691_v44  ;;  %v3429_v53 = vunpack.c.h.bf16 %v4337_v36  ;;  %v1208_v56 = vmax.f32 %v952_v46, 0.0  ;;  %v693_v58 = vmul.f32 %v5020_v41, %v3428_v48  ;;  %v4343_v36 = vld [vmem:[%s5846_s0 + $0x2b0] sm:$0xff]  }
  0xb5   :  { %v4006_v55 = vpack.c.bf16 %v1207_v45, %v1206_v7  ;;  %v1209_v57 = vmax.f32 %v953_v47, 0.0  ;;  %4460 = vst [vmem:[%s5849_s3 + $0x260] sm:$0xff] %v4001_v50   ;;  %v955_v59 = vadd.f32 %v5026_v42, %v692_v51  ;;  %v3432_v62 = vunpack.c.l.bf16 %v4338_v49 }
  0xb6   :  { %v1210_v60 = vmax.f32 %v954_v52, 0.0  ;;  %v694_v61 = vmul.f32 %v5020_v41, %v3429_v53  ;;  %v956_v2 = vadd.f32 %v5026_v42, %v693_v58  ;;  %v3433_v3 = vunpack.c.h.bf16 %v4338_v49 }
  0xb7   :  { %4461 = vst [vmem:[%s5849_s3 + $0x268] sm:$0xff] %v4006_v55   ;;  %v4011_v0 = vpack.c.bf16 %v1209_v57, %v1208_v56  ;;  %v3436_v4 = vunpack.c.l.bf16 %v4339_v54  ;;  %v1211_v5 = vmax.f32 %v955_v59, 0.0  ;;  %v695_v8 = vmul.f32 %v5020_v41, %v3432_v62 }
  0xb8   :  { %v957_v6 = vadd.f32 %v5026_v42, %v694_v61  ;;  %v3437_v9 = vunpack.c.h.bf16 %v4339_v54  ;;  %v1212_v10 = vmax.f32 %v956_v2, 0.0  ;;  %v696_v11 = vmul.f32 %v5020_v41, %v3433_v3  ;;  %v4345_v54 = vld [vmem:[%s5846_s0 + $0x2c0] sm:$0xff]  }
  0xb9   :  { %4462 = vst [vmem:[%s5849_s3 + $0x270] sm:$0xff] %v4011_v0   ;;  %v697_v12 = vmul.f32 %v5020_v41, %v3436_v4  ;;  %v3440_v13 = vunpack.c.l.bf16 %v4340_v63  ;;  %v4016_v15 = vpack.c.bf16 %v1211_v5, %v1210_v60  ;;  %v958_v17 = vadd.f32 %v5026_v42, %v695_v8  ;;  %v4346_v4 = vld [vmem:[%s5846_s0 + $0x2c8] sm:$0xff]  }
  0xba   :  { %v1213_v16 = vmax.f32 %v957_v6, 0.0  ;;  %v698_v18 = vmul.f32 %v5020_v41, %v3437_v9  ;;  %v959_v19 = vadd.f32 %v5026_v42, %v696_v11  ;;  %v3441_v21 = vunpack.c.h.bf16 %v4340_v63 }
  0xbb   :  { %v960_v20 = vadd.f32 %v5026_v42, %v697_v12  ;;  %v699_v22 = vmul.f32 %v5020_v41, %v3440_v13  ;;  %4463 = vst [vmem:[%s5849_s3 + $0x278] sm:$0xff] %v4016_v15   ;;  %v1214_v25 = vmax.f32 %v958_v17, 0.0  ;;  %v3444_v27 = vunpack.c.l.bf16 %v4341_v14 }
  0xbc   :  { %v4021_v24 = vpack.c.bf16 %v1213_v16, %v1212_v10  ;;  %v961_v26 = vadd.f32 %v5026_v42, %v698_v18  ;;  %v1215_v28 = vmax.f32 %v959_v19, 0.0  ;;  %v700_v30 = vmul.f32 %v5020_v41, %v3441_v21  ;;  %v4347_v10 = vld [vmem:[%s5846_s0 + $0x2d0] sm:$0xff]   ;;  %v4348_v19 = vld [vmem:[%s5846_s0 + $0x2d8] sm:$0xff]  }
  0xbd   :  { %v1216_v29 = vmax.f32 %v960_v20, 0.0  ;;  %v962_v31 = vadd.f32 %v5026_v42, %v699_v22  ;;  %v3445_v33 = vunpack.c.h.bf16 %v4341_v14  ;;  %v701_v34 = vmul.f32 %v5020_v41, %v3444_v27 }
  0xbe   :  { %4464 = vst [vmem:[%s5849_s3 + $0x280] sm:$0xff] %v4021_v24   ;;  %v1217_v32 = vmax.f32 %v961_v26, 0.0  ;;  %v3448_v35 = vunpack.c.l.bf16 %v4342_v23  ;;  %v4026_v37 = vpack.c.bf16 %v1215_v28, %v1214_v25  ;;  %v963_v38 = vadd.f32 %v5026_v42, %v700_v30 }
  0xbf   :  { %v1218_v39 = vmax.f32 %v962_v31, 0.0  ;;  %v3449_v40 = vunpack.c.h.bf16 %v4342_v23  ;;  %v702_v43 = vmul.f32 %v5020_v41, %v3445_v33  ;;  %v964_v44 = vadd.f32 %v5026_v42, %v701_v34 }
  0xc0   :  { %v4031_v7 = vpack.c.bf16 %v1217_v32, %v1216_v29  ;;  %v703_v45 = vmul.f32 %v5020_v41, %v3448_v35  ;;  %4465 = vst [vmem:[%s5849_s3 + $0x288] sm:$0xff] %v4026_v37   ;;  %v1219_v46 = vmax.f32 %v963_v38, 0.0  ;;  %v3452_v48 = vunpack.c.l.bf16 %v4343_v36  ;;  %v4349_v32 = vld [vmem:[%s5846_s0 + $0x2e0] sm:$0xff]  }
  0xc1   :  { %v704_v47 = vmul.f32 %v5020_v41, %v3449_v40  ;;  %v3453_v49 = vunpack.c.h.bf16 %v4343_v36  ;;  %v965_v50 = vadd.f32 %v5026_v42, %v702_v43  ;;  %v1220_v51 = vmax.f32 %v964_v44, 0.0 }
  0xc2   :  { %4466 = vst [vmem:[%s5849_s3 + $0x290] sm:$0xff] %v4031_v7   ;;  %v966_v52 = vadd.f32 %v5026_v42, %v703_v45  ;;  %v3456_v53 = vunpack.c.l.bf16 %v4344_v1  ;;  %v4036_v55 = vpack.c.bf16 %v1219_v46, %v1218_v39  ;;  %v705_v57 = vmul.f32 %v5020_v41, %v3452_v48 }
  0xc3   :  { %v967_v56 = vadd.f32 %v5026_v42, %v704_v47  ;;  %v706_v58 = vmul.f32 %v5020_v41, %v3453_v49  ;;  %v1221_v59 = vmax.f32 %v965_v50, 0.0  ;;  %v3457_v61 = vunpack.c.h.bf16 %v4344_v1  ;;  %v4350_v1 = vld [vmem:[%s5846_s0 + $0x2e8] sm:$0xff]  }
  0xc4   :  { %v1222_v60 = vmax.f32 %v966_v52, 0.0  ;;  %v707_v62 = vmul.f32 %v5020_v41, %v3456_v53  ;;  %4467 = vst [vmem:[%s5849_s3 + $0x298] sm:$0xff] %v4036_v55   ;;  %v968_v0 = vadd.f32 %v5026_v42, %v705_v57  ;;  %v3460_v3 = vunpack.c.l.bf16 %v4345_v54 }
  0xc5   :  { %v1223_v63 = vmax.f32 %v967_v56, 0.0  ;;  %v969_v2 = vadd.f32 %v5026_v42, %v706_v58  ;;  %v4041_v5 = vpack.c.bf16 %v1221_v59, %v1220_v51  ;;  %v708_v6 = vmul.f32 %v5020_v41, %v3457_v61  ;;  %v4352_v59 = vld [vmem:[%s5846_s0 + $0x2f8] sm:$0xff]  }
  0xc6   :  { %v970_v8 = vadd.f32 %v5026_v42, %v707_v62  ;;  %v3461_v9 = vunpack.c.h.bf16 %v4345_v54  ;;  %v1224_v12 = vmax.f32 %v968_v0, 0.0  ;;  %v709_v14 = vmul.f32 %v5020_v41, %v3460_v3  ;;  %v4351_v54 = vld [vmem:[%s5846_s0 + $0x2f0] sm:$0xff]  }
  0xc7   :  { %v4046_v11 = vpack.c.bf16 %v1223_v63, %v1222_v60  ;;  %v1225_v13 = vmax.f32 %v969_v2, 0.0  ;;  %4468 = vst [vmem:[%s5849_s3 + $0x2a0] sm:$0xff] %v4041_v5   ;;  %v971_v15 = vadd.f32 %v5026_v42, %v708_v6  ;;  %v3464_v18 = vunpack.c.l.bf16 %v4346_v4 }
  0xc8   :  { %v1226_v16 = vmax.f32 %v970_v8, 0.0  ;;  %v710_v17 = vmul.f32 %v5020_v41, %v3461_v9  ;;  %v972_v21 = vadd.f32 %v5026_v42, %v709_v14  ;;  %v3465_v22 = vunpack.c.h.bf16 %v4346_v4 }
  0xc9   :  { %4469 = vst [vmem:[%s5849_s3 + $0x2a8] sm:$0xff] %v4046_v11   ;;  %v4051_v20 = vpack.c.bf16 %v1225_v13, %v1224_v12  ;;  %v3468_v23 = vunpack.c.l.bf16 %v4347_v10  ;;  %v1227_v24 = vmax.f32 %v971_v15, 0.0  ;;  %v711_v26 = vmul.f32 %v5020_v41, %v3464_v18  ;;  %v5504_v13 = vld [vmem:[%s5847_s1] ss:$0 sm:$0xff] }
  0xca   :  { %v973_v25 = vadd.f32 %v5026_v42, %v710_v17  ;;  %v3469_v27 = vunpack.c.h.bf16 %v4347_v10  ;;  %v1228_v28 = vmax.f32 %v972_v21, 0.0  ;;  %v712_v29 = vmul.f32 %v5020_v41, %v3465_v22  ;;  %v4353_v10 = vld [vmem:[%s5846_s0 + $0x300] sm:$0xff]  }
  0xcb   :  { %4470 = vst [vmem:[%s5849_s3 + $0x2b0] sm:$0xff] %v4051_v20   ;;  %v713_v30 = vmul.f32 %v5020_v41, %v3468_v23  ;;  %v3472_v31 = vunpack.c.l.bf16 %v4348_v19  ;;  %v4056_v33 = vpack.c.bf16 %v1227_v24, %v1226_v16  ;;  %v974_v35 = vadd.f32 %v5026_v42, %v711_v26  ;;  %v4354_v23 = vld [vmem:[%s5846_s0 + $0x308] sm:$0xff]  }
  0xcc   :  { %v1229_v34 = vmax.f32 %v973_v25, 0.0  ;;  %v714_v36 = vmul.f32 %v5020_v41, %v3469_v27  ;;  %v975_v37 = vadd.f32 %v5026_v42, %v712_v29  ;;  %v3473_v39 = vunpack.c.h.bf16 %v4348_v19 }
  0xcd   :  { %v976_v38 = vadd.f32 %v5026_v42, %v713_v30  ;;  %v715_v40 = vmul.f32 %v5020_v41, %v3472_v31  ;;  %4471 = vst [vmem:[%s5849_s3 + $0x2b8] sm:$0xff] %v4056_v33   ;;  %v1230_v43 = vmax.f32 %v974_v35, 0.0  ;;  %v3476_v45 = vunpack.c.l.bf16 %v4349_v32 }
  0xce   :  { %v4061_v7 = vpack.c.bf16 %v1229_v34, %v1228_v28  ;;  %v977_v44 = vadd.f32 %v5026_v42, %v714_v36  ;;  %v1231_v46 = vmax.f32 %v975_v37, 0.0  ;;  %v716_v48 = vmul.f32 %v5020_v41, %v3473_v39  ;;  %v4355_v28 = vld [vmem:[%s5846_s0 + $0x310] sm:$0xff]   ;;  %v4356_v37 = vld [vmem:[%s5846_s0 + $0x318] sm:$0xff]  }
  0xcf   :  { %v1232_v47 = vmax.f32 %v976_v38, 0.0  ;;  %v978_v49 = vadd.f32 %v5026_v42, %v715_v40  ;;  %v3477_v51 = vunpack.c.h.bf16 %v4349_v32  ;;  %v717_v52 = vmul.f32 %v5020_v41, %v3476_v45 }
  0xd0   :  { %4472 = vst [vmem:[%s5849_s3 + $0x2c0] sm:$0xff] %v4061_v7   ;;  %v1233_v50 = vmax.f32 %v977_v44, 0.0  ;;  %v3480_v53 = vunpack.c.l.bf16 %v4350_v1  ;;  %v4066_v55 = vpack.c.bf16 %v1231_v46, %v1230_v43  ;;  %v979_v56 = vadd.f32 %v5026_v42, %v716_v48 }
  0xd1   :  { %v1234_v57 = vmax.f32 %v978_v49, 0.0  ;;  %v3481_v58 = vunpack.c.h.bf16 %v4350_v1  ;;  %v718_v61 = vmul.f32 %v5020_v41, %v3477_v51  ;;  %v980_v62 = vadd.f32 %v5026_v42, %v717_v52 }
  0xd2   :  { %v4071_v60 = vpack.c.bf16 %v1233_v50, %v1232_v47  ;;  %v719_v63 = vmul.f32 %v5020_v41, %v3480_v53  ;;  %4473 = vst [vmem:[%s5849_s3 + $0x2c8] sm:$0xff] %v4066_v55   ;;  %v1235_v0 = vmax.f32 %v979_v56, 0.0  ;;  %v3484_v3 = vunpack.c.l.bf16 %v4351_v54  ;;  %v4357_v50 = vld [vmem:[%s5846_s0 + $0x320] sm:$0xff]  }
  0xd3   :  { %v720_v2 = vmul.f32 %v5020_v41, %v3481_v58  ;;  %v3485_v4 = vunpack.c.h.bf16 %v4351_v54  ;;  %v981_v5 = vadd.f32 %v5026_v42, %v718_v61  ;;  %v1236_v6 = vmax.f32 %v980_v62, 0.0  ;;  %v5498_v41 = vld [vmem:[%s5848_s2] ss:$0 sm:$0xff] }
  0xd4   :  { %4474 = vst [vmem:[%s5849_s3 + $0x2d0] sm:$0xff] %v4071_v60   ;;  %v982_v8 = vadd.f32 %v5026_v42, %v719_v63  ;;  %v3488_v9 = vunpack.c.l.bf16 %v4352_v59  ;;  %v4076_v11 = vpack.c.bf16 %v1235_v0, %v1234_v57  ;;  %v721_v42 = vmul.f32 %v5504_v13, %v3484_v3 }
  0xd5   :  { %v983_v12 = vadd.f32 %v5498_v41, %v720_v2  ;;  %v722_v14 = vmul.f32 %v5504_v13, %v3485_v4  ;;  %v1237_v15 = vmax.f32 %v981_v5, 0.0  ;;  %v3489_v17 = vunpack.c.h.bf16 %v4352_v59  ;;  %v4358_v59 = vld [vmem:[%s5846_s0 + $0x328] sm:$0xff]  }
  0xd6   :  { %v1238_v16 = vmax.f32 %v982_v8, 0.0  ;;  %v723_v18 = vmul.f32 %v5504_v13, %v3488_v9  ;;  %4475 = vst [vmem:[%s5849_s3 + $0x2d8] sm:$0xff] %v4076_v11   ;;  %v984_v20 = vadd.f32 %v5498_v41, %v721_v42  ;;  %v3492_v22 = vunpack.c.l.bf16 %v4353_v10 }
  0xd7   :  { %v1239_v19 = vmax.f32 %v983_v12, 0.0  ;;  %v985_v21 = vadd.f32 %v5498_v41, %v722_v14  ;;  %v4081_v24 = vpack.c.bf16 %v1237_v15, %v1236_v6  ;;  %v724_v25 = vmul.f32 %v5504_v13, %v3489_v17  ;;  %v4360_v15 = vld [vmem:[%s5846_s0 + $0x338] sm:$0xff]  }
  0xd8   :  { %v986_v26 = vadd.f32 %v5498_v41, %v723_v18  ;;  %v3493_v27 = vunpack.c.h.bf16 %v4353_v10  ;;  %v1240_v30 = vmax.f32 %v984_v20, 0.0  ;;  %v725_v32 = vmul.f32 %v5504_v13, %v3492_v22  ;;  %v4359_v10 = vld [vmem:[%s5846_s0 + $0x330] sm:$0xff]  }
  0xd9   :  { %v4086_v29 = vpack.c.bf16 %v1239_v19, %v1238_v16  ;;  %v1241_v31 = vmax.f32 %v985_v21, 0.0  ;;  %4476 = vst [vmem:[%s5849_s3 + $0x2e0] sm:$0xff] %v4081_v24   ;;  %v987_v33 = vadd.f32 %v5498_v41, %v724_v25  ;;  %v3496_v36 = vunpack.c.l.bf16 %v4354_v23 }
  0xda   :  { %v1242_v34 = vmax.f32 %v986_v26, 0.0  ;;  %v726_v35 = vmul.f32 %v5504_v13, %v3493_v27  ;;  %v988_v39 = vadd.f32 %v5498_v41, %v725_v32  ;;  %v3497_v40 = vunpack.c.h.bf16 %v4354_v23 }
  0xdb   :  { %4477 = vst [vmem:[%s5849_s3 + $0x2e8] sm:$0xff] %v4086_v29   ;;  %v4091_v38 = vpack.c.bf16 %v1241_v31, %v1240_v30  ;;  %v3500_v1 = vunpack.c.l.bf16 %v4355_v28  ;;  %v1243_v7 = vmax.f32 %v987_v33, 0.0  ;;  %v727_v44 = vmul.f32 %v5504_v13, %v3496_v36 }
  0xdc   :  { %v989_v43 = vadd.f32 %v5498_v41, %v726_v35  ;;  %v3501_v45 = vunpack.c.h.bf16 %v4355_v28  ;;  %v1244_v46 = vmax.f32 %v988_v39, 0.0  ;;  %v728_v47 = vmul.f32 %v5504_v13, %v3497_v40  ;;  %v4361_v28 = vld [vmem:[%s5846_s0 + $0x340] sm:$0xff]  }
  0xdd   :  { %4478 = vst [vmem:[%s5849_s3 + $0x2f0] sm:$0xff] %v4091_v38   ;;  %v729_v48 = vmul.f32 %v5504_v13, %v3500_v1  ;;  %v3504_v49 = vunpack.c.l.bf16 %v4356_v37  ;;  %v4096_v51 = vpack.c.bf16 %v1243_v7, %v1242_v34  ;;  %v990_v53 = vadd.f32 %v5498_v41, %v727_v44  ;;  %v4362_v1 = vld [vmem:[%s5846_s0 + $0x348] sm:$0xff]  }
  0xde   :  { %v1245_v52 = vmax.f32 %v989_v43, 0.0  ;;  %v730_v54 = vmul.f32 %v5504_v13, %v3501_v45  ;;  %v991_v55 = vadd.f32 %v5498_v41, %v728_v47  ;;  %v3505_v57 = vunpack.c.h.bf16 %v4356_v37 }
  0xdf   :  { %v992_v56 = vadd.f32 %v5498_v41, %v729_v48  ;;  %v731_v58 = vmul.f32 %v5504_v13, %v3504_v49  ;;  %4479 = vst [vmem:[%s5849_s3 + $0x2f8] sm:$0xff] %v4096_v51   ;;  %v1246_v61 = vmax.f32 %v990_v53, 0.0  ;;  %v3508_v63 = vunpack.c.l.bf16 %v4357_v50 }
  0xe0   :  { %v4101_v60 = vpack.c.bf16 %v1245_v52, %v1244_v46  ;;  %v993_v62 = vadd.f32 %v5498_v41, %v730_v54  ;;  %v1247_v0 = vmax.f32 %v991_v55, 0.0  ;;  %v732_v3 = vmul.f32 %v5504_v13, %v3505_v57  ;;  %v4363_v46 = vld [vmem:[%s5846_s0 + $0x350] sm:$0xff]   ;;  %v4364_v55 = vld [vmem:[%s5846_s0 + $0x358] sm:$0xff]  }
  0xe1   :  { %v1248_v2 = vmax.f32 %v992_v56, 0.0  ;;  %v994_v4 = vadd.f32 %v5498_v41, %v731_v58  ;;  %v3509_v6 = vunpack.c.h.bf16 %v4357_v50  ;;  %v733_v8 = vmul.f32 %v5504_v13, %v3508_v63 }
  0xe2   :  { %4480 = vst [vmem:[%s5849_s3 + $0x300] sm:$0xff] %v4101_v60   ;;  %v1249_v5 = vmax.f32 %v993_v62, 0.0  ;;  %v3512_v9 = vunpack.c.l.bf16 %v4358_v59  ;;  %v4106_v11 = vpack.c.bf16 %v1247_v0, %v1246_v61  ;;  %v995_v12 = vadd.f32 %v5498_v41, %v732_v3 }
  0xe3   :  { %v1250_v42 = vmax.f32 %v994_v4, 0.0  ;;  %v3513_v14 = vunpack.c.h.bf16 %v4358_v59  ;;  %v734_v17 = vmul.f32 %v5504_v13, %v3509_v6  ;;  %v996_v18 = vadd.f32 %v5498_v41, %v733_v8 }
  0xe4   :  { %v4111_v16 = vpack.c.bf16 %v1249_v5, %v1248_v2  ;;  %v735_v19 = vmul.f32 %v5504_v13, %v3512_v9  ;;  %4481 = vst [vmem:[%s5849_s3 + $0x308] sm:$0xff] %v4106_v11   ;;  %v1251_v20 = vmax.f32 %v995_v12, 0.0  ;;  %v3516_v22 = vunpack.c.l.bf16 %v4359_v10  ;;  %v4365_v5 = vld [vmem:[%s5846_s0 + $0x360] sm:$0xff]  }
  0xe5   :  { %v736_v21 = vmul.f32 %v5504_v13, %v3513_v14  ;;  %v3517_v23 = vunpack.c.h.bf16 %v4359_v10  ;;  %v997_v24 = vadd.f32 %v5498_v41, %v734_v17  ;;  %v1252_v25 = vmax.f32 %v996_v18, 0.0 }
  0xe6   :  { %4482 = vst [vmem:[%s5849_s3 + $0x310] sm:$0xff] %v4111_v16   ;;  %v998_v26 = vadd.f32 %v5498_v41, %v735_v19  ;;  %v3520_v27 = vunpack.c.l.bf16 %v4360_v15  ;;  %v4116_v29 = vpack.c.bf16 %v1251_v20, %v1250_v42  ;;  %v737_v31 = vmul.f32 %v5504_v13, %v3516_v22 }
  0xe7   :  { %v999_v30 = vadd.f32 %v5498_v41, %v736_v21  ;;  %v738_v32 = vmul.f32 %v5504_v13, %v3517_v23  ;;  %v1253_v33 = vmax.f32 %v997_v24, 0.0  ;;  %v3521_v35 = vunpack.c.h.bf16 %v4360_v15  ;;  %v4366_v15 = vld [vmem:[%s5846_s0 + $0x368] sm:$0xff]  }
  0xe8   :  { %v1254_v34 = vmax.f32 %v998_v26, 0.0  ;;  %v739_v36 = vmul.f32 %v5504_v13, %v3520_v27  ;;  %4483 = vst [vmem:[%s5849_s3 + $0x318] sm:$0xff] %v4116_v29   ;;  %v1000_v38 = vadd.f32 %v5498_v41, %v737_v31  ;;  %v3524_v40 = vunpack.c.l.bf16 %v4361_v28 }
  0xe9   :  { %v1255_v37 = vmax.f32 %v999_v30, 0.0  ;;  %v1001_v39 = vadd.f32 %v5498_v41, %v738_v32  ;;  %v4121_v7 = vpack.c.bf16 %v1253_v33, %v1252_v25  ;;  %v740_v43 = vmul.f32 %v5504_v13, %v3521_v35  ;;  %v4368_v33 = vld [vmem:[%s5846_s0 + $0x378] sm:$0xff]  }
  0xea   :  { %v1002_v44 = vadd.f32 %v5498_v41, %v739_v36  ;;  %v3525_v45 = vunpack.c.h.bf16 %v4361_v28  ;;  %v1256_v48 = vmax.f32 %v1000_v38, 0.0  ;;  %v741_v50 = vmul.f32 %v5504_v13, %v3524_v40  ;;  %v4367_v28 = vld [vmem:[%s5846_s0 + $0x370] sm:$0xff]  }
  0xeb   :  { %v4126_v47 = vpack.c.bf16 %v1255_v37, %v1254_v34  ;;  %v1257_v49 = vmax.f32 %v1001_v39, 0.0  ;;  %4484 = vst [vmem:[%s5849_s3 + $0x320] sm:$0xff] %v4121_v7   ;;  %v1003_v51 = vadd.f32 %v5498_v41, %v740_v43  ;;  %v3528_v54 = vunpack.c.l.bf16 %v4362_v1 }
  0xec   :  { %v1258_v52 = vmax.f32 %v1002_v44, 0.0  ;;  %v742_v53 = vmul.f32 %v5504_v13, %v3525_v45  ;;  %v1004_v57 = vadd.f32 %v5498_v41, %v741_v50  ;;  %v3529_v58 = vunpack.c.h.bf16 %v4362_v1 }
  0xed   :  { %4485 = vst [vmem:[%s5849_s3 + $0x328] sm:$0xff] %v4126_v47   ;;  %v4131_v56 = vpack.c.bf16 %v1257_v49, %v1256_v48  ;;  %v3532_v59 = vunpack.c.l.bf16 %v4363_v46  ;;  %v1259_v60 = vmax.f32 %v1003_v51, 0.0  ;;  %v743_v62 = vmul.f32 %v5504_v13, %v3528_v54 }
  0xee   :  { %v1005_v61 = vadd.f32 %v5498_v41, %v742_v53  ;;  %v3533_v63 = vunpack.c.h.bf16 %v4363_v46  ;;  %v1260_v0 = vmax.f32 %v1004_v57, 0.0  ;;  %v744_v2 = vmul.f32 %v5504_v13, %v3529_v58  ;;  %v4369_v46 = vld [vmem:[%s5846_s0 + $0x380] sm:$0xff]  }
  0xef   :  { %4486 = vst [vmem:[%s5849_s3 + $0x330] sm:$0xff] %v4131_v56   ;;  %v745_v3 = vmul.f32 %v5504_v13, %v3532_v59  ;;  %v3536_v4 = vunpack.c.l.bf16 %v4364_v55  ;;  %v4136_v6 = vpack.c.bf16 %v1259_v60, %v1258_v52  ;;  %v1006_v9 = vadd.f32 %v5498_v41, %v743_v62  ;;  %v4370_v59 = vld [vmem:[%s5846_s0 + $0x388] sm:$0xff]  }
  0xf0   :  { %v1261_v8 = vmax.f32 %v1005_v61, 0.0  ;;  %v746_v10 = vmul.f32 %v5504_v13, %v3533_v63  ;;  %v1007_v11 = vadd.f32 %v5498_v41, %v744_v2  ;;  %v3537_v42 = vunpack.c.h.bf16 %v4364_v55 }
  0xf1   :  { %v1008_v12 = vadd.f32 %v5498_v41, %v745_v3  ;;  %v747_v14 = vmul.f32 %v5504_v13, %v3536_v4  ;;  %4487 = vst [vmem:[%s5849_s3 + $0x338] sm:$0xff] %v4136_v6   ;;  %v1262_v17 = vmax.f32 %v1006_v9, 0.0  ;;  %v3540_v19 = vunpack.c.l.bf16 %v4365_v5 }
  0xf2   :  { %v4141_v16 = vpack.c.bf16 %v1261_v8, %v1260_v0  ;;  %v1009_v18 = vadd.f32 %v5498_v41, %v746_v10  ;;  %v1263_v20 = vmax.f32 %v1007_v11, 0.0  ;;  %v748_v22 = vmul.f32 %v5504_v13, %v3537_v42  ;;  %v4371_v0 = vld [vmem:[%s5846_s0 + $0x390] sm:$0xff]   ;;  %v4372_v11 = vld [vmem:[%s5846_s0 + $0x398] sm:$0xff]  }
  0xf3   :  { %v1264_v21 = vmax.f32 %v1008_v12, 0.0  ;;  %v1010_v23 = vadd.f32 %v5498_v41, %v747_v14  ;;  %v3541_v25 = vunpack.c.h.bf16 %v4365_v5  ;;  %v749_v26 = vmul.f32 %v5504_v13, %v3540_v19 }
  0xf4   :  { %4488 = vst [vmem:[%s5849_s3 + $0x340] sm:$0xff] %v4141_v16   ;;  %v1265_v24 = vmax.f32 %v1009_v18, 0.0  ;;  %v3544_v27 = vunpack.c.l.bf16 %v4366_v15  ;;  %v4146_v29 = vpack.c.bf16 %v1263_v20, %v1262_v17  ;;  %v1011_v30 = vadd.f32 %v5498_v41, %v748_v22 }
  0xf5   :  { %v1266_v31 = vmax.f32 %v1010_v23, 0.0  ;;  %v3545_v32 = vunpack.c.h.bf16 %v4366_v15  ;;  %v750_v35 = vmul.f32 %v5504_v13, %v3541_v25  ;;  %v1012_v36 = vadd.f32 %v5498_v41, %v749_v26 }
  0xf6   :  { %v4151_v34 = vpack.c.bf16 %v1265_v24, %v1264_v21  ;;  %v751_v37 = vmul.f32 %v5504_v13, %v3544_v27  ;;  %4489 = vst [vmem:[%s5849_s3 + $0x348] sm:$0xff] %v4146_v29   ;;  %v1267_v38 = vmax.f32 %v1011_v30, 0.0  ;;  %v3548_v40 = vunpack.c.l.bf16 %v4367_v28  ;;  %v4373_v24 = vld [vmem:[%s5846_s0 + $0x3a0] sm:$0xff]  }
  0xf7   :  { %v752_v39 = vmul.f32 %v5504_v13, %v3545_v32  ;;  %v3549_v1 = vunpack.c.h.bf16 %v4367_v28  ;;  %v1013_v7 = vadd.f32 %v5498_v41, %v750_v35  ;;  %v1268_v43 = vmax.f32 %v1012_v36, 0.0 }
  0xf8   :  { %4490 = vst [vmem:[%s5849_s3 + $0x350] sm:$0xff] %v4151_v34   ;;  %v1014_v44 = vadd.f32 %v5498_v41, %v751_v37  ;;  %v3552_v45 = vunpack.c.l.bf16 %v4368_v33  ;;  %v4156_v47 = vpack.c.bf16 %v1267_v38, %v1266_v31  ;;  %v753_v49 = vmul.f32 %v5504_v13, %v3548_v40 }
  0xf9   :  { %v1015_v48 = vadd.f32 %v5498_v41, %v752_v39  ;;  %v754_v50 = vmul.f32 %v5504_v13, %v3549_v1  ;;  %v1269_v51 = vmax.f32 %v1013_v7, 0.0  ;;  %v3553_v53 = vunpack.c.h.bf16 %v4368_v33  ;;  %v4374_v33 = vld [vmem:[%s5846_s0 + $0x3a8] sm:$0xff]  }
  0xfa   :  { %v1270_v52 = vmax.f32 %v1014_v44, 0.0  ;;  %v755_v54 = vmul.f32 %v5504_v13, %v3552_v45  ;;  %4491 = vst [vmem:[%s5849_s3 + $0x358] sm:$0xff] %v4156_v47   ;;  %v1016_v56 = vadd.f32 %v5498_v41, %v753_v49  ;;  %v3556_v58 = vunpack.c.l.bf16 %v4369_v46 }
  0xfb   :  { %v1271_v55 = vmax.f32 %v1015_v48, 0.0  ;;  %v1017_v57 = vadd.f32 %v5498_v41, %v754_v50  ;;  %v4161_v60 = vpack.c.bf16 %v1269_v51, %v1268_v43  ;;  %v756_v61 = vmul.f32 %v5504_v13, %v3553_v53  ;;  %v4376_v51 = vld [vmem:[%s5846_s0 + $0x3b8] sm:$0xff]  }
  0xfc   :  { %v1018_v62 = vadd.f32 %v5498_v41, %v755_v54  ;;  %v3557_v63 = vunpack.c.h.bf16 %v4369_v46  ;;  %v1272_v3 = vmax.f32 %v1016_v56, 0.0  ;;  %v757_v5 = vmul.f32 %v5504_v13, %v3556_v58  ;;  %v4375_v46 = vld [vmem:[%s5846_s0 + $0x3b0] sm:$0xff]  }
  0xfd   :  { %v4166_v2 = vpack.c.bf16 %v1271_v55, %v1270_v52  ;;  %v1273_v4 = vmax.f32 %v1017_v57, 0.0  ;;  %4492 = vst [vmem:[%s5849_s3 + $0x360] sm:$0xff] %v4161_v60   ;;  %v1019_v6 = vadd.f32 %v5498_v41, %v756_v61  ;;  %v3560_v10 = vunpack.c.l.bf16 %v4370_v59 }
  0xfe   :  { %v1274_v8 = vmax.f32 %v1018_v62, 0.0  ;;  %v758_v9 = vmul.f32 %v5504_v13, %v3557_v63  ;;  %v1020_v42 = vadd.f32 %v5498_v41, %v757_v5  ;;  %v3561_v14 = vunpack.c.h.bf16 %v4370_v59 }
  0xff   :  { %4493 = vst [vmem:[%s5849_s3 + $0x368] sm:$0xff] %v4166_v2   ;;  %v4171_v12 = vpack.c.bf16 %v1273_v4, %v1272_v3  ;;  %v3564_v15 = vunpack.c.l.bf16 %v4371_v0  ;;  %v1275_v16 = vmax.f32 %v1019_v6, 0.0  ;;  %v759_v18 = vmul.f32 %v5504_v13, %v3560_v10 }
 0x100   :  { %v1021_v17 = vadd.f32 %v5498_v41, %v758_v9  ;;  %v3565_v19 = vunpack.c.h.bf16 %v4371_v0  ;;  %v1276_v20 = vmax.f32 %v1020_v42, 0.0  ;;  %v760_v21 = vmul.f32 %v5504_v13, %v3561_v14  ;;  %v4377_v0 = vld [vmem:[%s5846_s0 + $0x3c0] sm:$0xff]  }
 0x101   :  { %4494 = vst [vmem:[%s5849_s3 + $0x370] sm:$0xff] %v4171_v12   ;;  %v761_v22 = vmul.f32 %v5504_v13, %v3564_v15  ;;  %v3568_v23 = vunpack.c.l.bf16 %v4372_v11  ;;  %v4176_v25 = vpack.c.bf16 %v1275_v16, %v1274_v8  ;;  %v1022_v27 = vadd.f32 %v5498_v41, %v759_v18  ;;  %v4378_v15 = vld [vmem:[%s5846_s0 + $0x3c8] sm:$0xff]  }
 0x102   :  { %v1277_v26 = vmax.f32 %v1021_v17, 0.0  ;;  %v762_v28 = vmul.f32 %v5504_v13, %v3565_v19  ;;  %v1023_v29 = vadd.f32 %v5498_v41, %v760_v21  ;;  %v3569_v31 = vunpack.c.h.bf16 %v4372_v11 }
 0x103   :  { %v1024_v30 = vadd.f32 %v5498_v41, %v761_v22  ;;  %v763_v32 = vmul.f32 %v5504_v13, %v3568_v23  ;;  %4495 = vst [vmem:[%s5849_s3 + $0x378] sm:$0xff] %v4176_v25   ;;  %v1278_v35 = vmax.f32 %v1022_v27, 0.0  ;;  %v3572_v37 = vunpack.c.l.bf16 %v4373_v24 }
 0x104   :  { %v4181_v34 = vpack.c.bf16 %v1277_v26, %v1276_v20  ;;  %v1025_v36 = vadd.f32 %v5498_v41, %v762_v28  ;;  %v1279_v38 = vmax.f32 %v1023_v29, 0.0  ;;  %v764_v40 = vmul.f32 %v5504_v13, %v3569_v31  ;;  %v4379_v20 = vld [vmem:[%s5846_s0 + $0x3d0] sm:$0xff]   ;;  %v4380_v29 = vld [vmem:[%s5846_s0 + $0x3d8] sm:$0xff]  }
 0x105   :  { %v1280_v39 = vmax.f32 %v1024_v30, 0.0  ;;  %v1026_v1 = vadd.f32 %v5498_v41, %v763_v32  ;;  %v3573_v43 = vunpack.c.h.bf16 %v4373_v24  ;;  %v765_v44 = vmul.f32 %v5504_v13, %v3572_v37 }
 0x106   :  { %4496 = vst [vmem:[%s5849_s3 + $0x380] sm:$0xff] %v4181_v34   ;;  %v1281_v7 = vmax.f32 %v1025_v36, 0.0  ;;  %v3576_v45 = vunpack.c.l.bf16 %v4374_v33  ;;  %v4186_v47 = vpack.c.bf16 %v1279_v38, %v1278_v35  ;;  %v1027_v48 = vadd.f32 %v5498_v41, %v764_v40 }
 0x107   :  { %v1282_v49 = vmax.f32 %v1026_v1, 0.0  ;;  %v3577_v50 = vunpack.c.h.bf16 %v4374_v33  ;;  %v766_v53 = vmul.f32 %v5504_v13, %v3573_v43  ;;  %v1028_v54 = vadd.f32 %v5498_v41, %v765_v44 }
 0x108   :  { %v4191_v52 = vpack.c.bf16 %v1281_v7, %v1280_v39  ;;  %v767_v55 = vmul.f32 %v5504_v13, %v3576_v45  ;;  %4497 = vst [vmem:[%s5849_s3 + $0x388] sm:$0xff] %v4186_v47   ;;  %v1283_v56 = vmax.f32 %v1027_v48, 0.0  ;;  %v3580_v58 = vunpack.c.l.bf16 %v4375_v46  ;;  %v4381_v7 = vld [vmem:[%s5846_s0 + $0x3e0] sm:$0xff]  }
 0x109   :  { %v768_v57 = vmul.f32 %v5504_v13, %v3577_v50  ;;  %v3581_v59 = vunpack.c.h.bf16 %v4375_v46  ;;  %v1029_v60 = vadd.f32 %v5498_v41, %v766_v53  ;;  %v1284_v61 = vmax.f32 %v1028_v54, 0.0 }
 0x10a   :  { %4498 = vst [vmem:[%s5849_s3 + $0x390] sm:$0xff] %v4191_v52   ;;  %v1030_v62 = vadd.f32 %v5498_v41, %v767_v55  ;;  %v3584_v63 = vunpack.c.l.bf16 %v4376_v51  ;;  %v4196_v2 = vpack.c.bf16 %v1283_v56, %v1282_v49  ;;  %v769_v4 = vmul.f32 %v5504_v13, %v3580_v58 }
 0x10b   :  { %v1031_v3 = vadd.f32 %v5498_v41, %v768_v57  ;;  %v770_v5 = vmul.f32 %v5504_v13, %v3581_v59  ;;  %v1285_v6 = vmax.f32 %v1029_v60, 0.0  ;;  %v3585_v9 = vunpack.c.h.bf16 %v4376_v51  ;;  %v4382_v51 = vld [vmem:[%s5846_s0 + $0x3e8] sm:$0xff]  }
 0x10c   :  { %v1286_v8 = vmax.f32 %v1030_v62, 0.0  ;;  %v771_v10 = vmul.f32 %v5504_v13, %v3584_v63  ;;  %4499 = vst [vmem:[%s5849_s3 + $0x398] sm:$0xff] %v4196_v2   ;;  %v1032_v12 = vadd.f32 %v5498_v41, %v769_v4  ;;  %v3588_v14 = vunpack.c.l.bf16 %v4377_v0 }
 0x10d   :  { %v1287_v11 = vmax.f32 %v1031_v3, 0.0  ;;  %v1033_v42 = vadd.f32 %v5498_v41, %v770_v5  ;;  %v4201_v16 = vpack.c.bf16 %v1285_v6, %v1284_v61  ;;  %v772_v17 = vmul.f32 %v5504_v13, %v3585_v9  ;;  %v4384_v6 = vld [vmem:[%s5846_s0 + $0x3f8] sm:$0xff]  }
 0x10e   :  { %v1034_v18 = vadd.f32 %v5498_v41, %v771_v10  ;;  %v3589_v19 = vunpack.c.h.bf16 %v4377_v0  ;;  %v1288_v22 = vmax.f32 %v1032_v12, 0.0  ;;  %v773_v24 = vmul.f32 %v5504_v13, %v3588_v14  ;;  %v4383_v0 = vld [vmem:[%s5846_s0 + $0x3f0] sm:$0xff]  }
 0x10f   :  { %v4206_v21 = vpack.c.bf16 %v1287_v11, %v1286_v8  ;;  %v1289_v23 = vmax.f32 %v1033_v42, 0.0  ;;  %4500 = vst [vmem:[%s5849_s3 + $0x3a0] sm:$0xff] %v4201_v16   ;;  %v1035_v25 = vadd.f32 %v5498_v41, %v772_v17  ;;  %v3592_v28 = vunpack.c.l.bf16 %v4378_v15 }
 0x110   :  { %v1290_v26 = vmax.f32 %v1034_v18, 0.0  ;;  %v774_v27 = vmul.f32 %v5504_v13, %v3589_v19  ;;  %v1036_v31 = vadd.f32 %v5498_v41, %v773_v24  ;;  %v3593_v32 = vunpack.c.h.bf16 %v4378_v15 }
 0x111   :  { %4501 = vst [vmem:[%s5849_s3 + $0x3a8] sm:$0xff] %v4206_v21   ;;  %v4211_v30 = vpack.c.bf16 %v1289_v23, %v1288_v22  ;;  %v3596_v33 = vunpack.c.l.bf16 %v4379_v20  ;;  %v1291_v34 = vmax.f32 %v1035_v25, 0.0  ;;  %v775_v36 = vmul.f32 %v5504_v13, %v3592_v28 }
 0x112   :  { %v1037_v35 = vadd.f32 %v5498_v41, %v774_v27  ;;  %v3597_v37 = vunpack.c.h.bf16 %v4379_v20  ;;  %v1292_v38 = vmax.f32 %v1036_v31, 0.0  ;;  %v776_v39 = vmul.f32 %v5504_v13, %v3593_v32 }
 0x113   :  { %4502 = vst [vmem:[%s5849_s3 + $0x3b0] sm:$0xff] %v4211_v30   ;;  %v777_v40 = vmul.f32 %v5504_v13, %v3596_v33  ;;  %v3600_v1 = vunpack.c.l.bf16 %v4380_v29  ;;  %v4216_v43 = vpack.c.bf16 %v1291_v34, %v1290_v26  ;;  %v1038_v45 = vadd.f32 %v5498_v41, %v775_v36 }
 0x114   :  { %v1293_v44 = vmax.f32 %v1037_v35, 0.0  ;;  %v778_v46 = vmul.f32 %v5504_v13, %v3597_v37  ;;  %v1039_v47 = vadd.f32 %v5498_v41, %v776_v39  ;;  %v3601_v49 = vunpack.c.h.bf16 %v4380_v29 }
 0x115   :  { %v1040_v48 = vadd.f32 %v5498_v41, %v777_v40  ;;  %v779_v50 = vmul.f32 %v5504_v13, %v3600_v1  ;;  %4503 = vst [vmem:[%s5849_s3 + $0x3b8] sm:$0xff] %v4216_v43   ;;  %v1294_v53 = vmax.f32 %v1038_v45, 0.0  ;;  %v3604_v55 = vunpack.c.l.bf16 %v4381_v7 }
 0x116   :  { %v4221_v52 = vpack.c.bf16 %v1293_v44, %v1292_v38  ;;  %v1041_v54 = vadd.f32 %v5498_v41, %v778_v46  ;;  %v1295_v56 = vmax.f32 %v1039_v47, 0.0  ;;  %v780_v58 = vmul.f32 %v5504_v13, %v3601_v49 }
 0x117   :  { %v1296_v57 = vmax.f32 %v1040_v48, 0.0  ;;  %v1042_v59 = vadd.f32 %v5498_v41, %v779_v50  ;;  %v3605_v61 = vunpack.c.h.bf16 %v4381_v7  ;;  %v781_v62 = vmul.f32 %v5504_v13, %v3604_v55 }
 0x118   :  { %4504 = vst [vmem:[%s5849_s3 + $0x3c0] sm:$0xff] %v4221_v52   ;;  %v1297_v60 = vmax.f32 %v1041_v54, 0.0  ;;  %v3608_v63 = vunpack.c.l.bf16 %v4382_v51  ;;  %v4226_v2 = vpack.c.bf16 %v1295_v56, %v1294_v53  ;;  %v1043_v3 = vadd.f32 %v5498_v41, %v780_v58 }
 0x119   :  { %v1298_v4 = vmax.f32 %v1042_v59, 0.0  ;;  %v3609_v5 = vunpack.c.h.bf16 %v4382_v51  ;;  %v782_v9 = vmul.f32 %v5504_v13, %v3605_v61  ;;  %v1044_v10 = vadd.f32 %v5498_v41, %v781_v62 }
 0x11a   :  { %v4231_v8 = vpack.c.bf16 %v1297_v60, %v1296_v57  ;;  %v783_v11 = vmul.f32 %v5504_v13, %v3608_v63  ;;  %4505 = vst [vmem:[%s5849_s3 + $0x3c8] sm:$0xff] %v4226_v2   ;;  %v1299_v12 = vmax.f32 %v1043_v3, 0.0  ;;  %v3612_v14 = vunpack.c.l.bf16 %v4383_v0 }
 0x11b   :  { %v784_v42 = vmul.f32 %v5504_v13, %v3609_v5  ;;  %v3613_v15 = vunpack.c.h.bf16 %v4383_v0  ;;  %v1045_v16 = vadd.f32 %v5498_v41, %v782_v9  ;;  %v1300_v17 = vmax.f32 %v1044_v10, 0.0 }
 0x11c   :  { %4506 = vst [vmem:[%s5849_s3 + $0x3d0] sm:$0xff] %v4231_v8   ;;  %v1046_v18 = vadd.f32 %v5498_v41, %v783_v11  ;;  %v3616_v19 = vunpack.c.l.bf16 %v4384_v6  ;;  %v4236_v20 = vpack.c.bf16 %v1299_v12, %v1298_v4  ;;  %v785_v22 = vmul.f32 %v5504_v13, %v3612_v14 }
 0x11d   :  { %v1047_v21 = vadd.f32 %v5498_v41, %v784_v42  ;;  %v786_v23 = vmul.f32 %v5504_v13, %v3613_v15  ;;  %v1301_v24 = vmax.f32 %v1045_v16, 0.0  ;;  %v3617_v26 = vunpack.c.h.bf16 %v4384_v6 }
 0x11e   :  { %v1302_v25 = vmax.f32 %v1046_v18, 0.0  ;;  %v787_v27 = vmul.f32 %v5504_v13, %v3616_v19  ;;  %4507 = vst [vmem:[%s5849_s3 + $0x3d8] sm:$0xff] %v4236_v20   ;;  %v1048_v29 = vadd.f32 %v5498_v41, %v785_v22 }
 0x11f   :  { %v1303_v28 = vmax.f32 %v1047_v21, 0.0  ;;  %v1049_v30 = vadd.f32 %v5498_v41, %v786_v23  ;;  %v4241_v31 = vpack.c.bf16 %v1301_v24, %v1300_v17  ;;  %v788_v32 = vmul.f32 %v5504_v13, %v3617_v26 }
 0x120   :  { %v1050_v33 = vadd.f32 %v5498_v41, %v787_v27  ;;  %v1304_v35 = vmax.f32 %v1048_v29, 0.0 }
 0x121   :  { %v4246_v34 = vpack.c.bf16 %v1303_v28, %v1302_v25  ;;  %v1305_v36 = vmax.f32 %v1049_v30, 0.0  ;;  %4508 = vst [vmem:[%s5849_s3 + $0x3e0] sm:$0xff] %v4241_v31   ;;  %v1051_v37 = vadd.f32 %v5498_v41, %v788_v32 }
 0x122   :  { %v1306_v38 = vmax.f32 %v1050_v33, 0.0 }
 0x123   :  { %4509 = vst [vmem:[%s5849_s3 + $0x3e8] sm:$0xff] %v4246_v34   ;;  %v4251_v39 = vpack.c.bf16 %v1305_v36, %v1304_v35  ;;  %v1307_v40 = vmax.f32 %v1051_v37, 0.0 }
 0x125   :  { %4510 = vst [vmem:[%s5849_s3 + $0x3f0] sm:$0xff] %v4251_v39   ;;  %v4256_v13 = vpack.c.bf16 %v1307_v40, %v1306_v38 }
 0x127   :  { %4511 = vst [vmem:[%s5849_s3 + $0x3f8] sm:$0xff] %v4256_v13  }

// kernel: _lambda_.17
= control target key start
LH: loop header
LB: loop body
LE: loop exit
PB: predicated region body
PF: predicated region fallthrough
CT: control target
= control target key end

     0   :  { %s4741_s9 = smov 0   ;;  %s4743_s10 = smov 0   ;;  %s5370_s0 = inlined_call_operand.vmem [shape: bf16[4,8,512], index: 0, kind: input, shape index: {}]   ;;  %s5371_s1 = inlined_call_operand.vmem [shape: bf16[4,512,2048], index: 1, kind: input, shape index: {}]   ;;  %s5372_s2 = inlined_call_operand.vmem [shape: f32[4,8,2048], index: 2, kind: output, shape index: {}]  }
   0x1   :  { %s4745_s11 = smov 0  }
   0x2 LB: > { %s24_s12 = sadd.s32 1, %s4720_s10  ;;  %p4082_p0 = scmp.ge.s32.totalorder %s4724_s11, 1  ;;  %s4724_s11 = sphi %s4745_s11, %s12_s11   ;;  %s4720_s10 = sphi %s4743_s10, %s5374_s10   ;;  %s4716_s9 = sphi %s4741_s9, %s5373_s9  }
   0x3   : > { %p26_p1 = scmp.ge.s32.totalorder %s24_s12, 4  ;;  %p143_p2 = scmp.lt.s32.totalorder %s4724_s11, 5 }
   0x5   : > { %s5376_s12 = smov (%p26_p1, %s24_s12), 0  ;;  %p144_p3 = pnand %p4082_p0, %p143_p2 }
   0x6   : > { %p178_p4 = scmp.lt.s32.totalorder (!%p144_p3), %s4716_s9, 3 }
   0x7   : > { %147 = sbr.rel (%p144_p3) target bundleno = 760 (0x2f8), region = 28 }
   0xe   : > { %s5378_s9 = smov (!%p178_p4, %s4716_s9), 3 }
   0xf   : > { %s4608_s13 = sshll.u32 %s5378_s9, 12  ;;  %s4607_s17 = sshll.u32 %s5378_s9, 4 }
  0x10   : > { %s4765_s16 = scalar_lea.vmem %s5371_s1, %s4608_s13  ;;  %s4797_s20 = scalar_lea.vmem %s5370_s0, %s4607_s17 }
  0x11   : > { %v205_v0 = vld [vmem:[%s4765_s16] sm:$0xff]  ;;  %v206_v2 = vld [vmem:[%s4765_s16 + $0x8] sm:$0xff]  ;;  %s4609_s21 = sshll.u32 %s5378_s9, 7 }
  0x12   : > { %v213_v1 = vld [vmem:[%s4765_s16 + $0x40] sm:$0xff]  ;;  %v214_v4 = vld [vmem:[%s4765_s16 + $0x48] sm:$0xff]  ;;  %s5179_s24 = scalar_lea.vmem %s5372_s2, %s4609_s21 }
  0x13   : > { %v4094_v3 = vcombine.high %v205_v0, %v213_v1  ;;  %v4093_v5 = vcombine.low %v205_v0, %v213_v1  ;;  %v221_v6 = vld [vmem:[%s4765_s16 + $0x80] sm:$0xff]  ;;  %v4096_v8 = vcombine.high %v206_v2, %v214_v4  ;;  %v4095_v9 = vcombine.low %v206_v2, %v214_v4  ;;  %v222_v11 = vld [vmem:[%s4765_s16 + $0x88] sm:$0xff] }
  0x14   : > { %v229_v7 = vld [vmem:[%s4765_s16 + $0xc0] sm:$0xff]  ;;  %v230_v12 = vld [vmem:[%s4765_s16 + $0xc8] sm:$0xff] }
  0x15   : > { %v4110_v10 = vcombine.high %v221_v6, %v229_v7  ;;  %v237_v13 = vld [vmem:[%s4765_s16 + $0x100] sm:$0xff]  ;;  %3291 = vmatprep.subr.bf16.mxu0 %v4094_v3  ;;  %v4112_v14 = vcombine.high %v222_v11, %v230_v12  ;;  %v238_v16 = vld [vmem:[%s4765_s16 + $0x108] sm:$0xff]  ;;  %3373 = vmatprep.subr.bf16.mxu1 %v4096_v8  ;;  %v4109_v18 = vcombine.low %v221_v6, %v229_v7 }
  0x16   : > { %v245_v15 = vld [vmem:[%s4765_s16 + $0x140] sm:$0xff]  ;;  %v246_v17 = vld [vmem:[%s4765_s16 + $0x148] sm:$0xff]  ;;  %3292 = vmatpush1.bf16.msra.mxu0 %v4093_v5  ;;  %3374 = vmatpush1.bf16.msra.mxu1 %v4095_v9  ;;  %v4111_v19 = vcombine.low %v222_v11, %v230_v12 }
  0x17   : > { %3293 = vmatprep.subr.bf16.mxu0 %v4110_v10  ;;  %v4126_v20 = vcombine.high %v237_v13, %v245_v15  ;;  %3375 = vmatprep.subr.bf16.mxu1 %v4112_v14  ;;  %v4128_v21 = vcombine.high %v238_v16, %v246_v17  ;;  %v253_v22 = vld [vmem:[%s4765_s16 + $0x180] sm:$0xff]  ;;  %v254_v24 = vld [vmem:[%s4765_s16 + $0x188] sm:$0xff]  ;;  %v4125_v26 = vcombine.low %v237_v13, %v245_v15 }
  0x18   : > { %v261_v23 = vld [vmem:[%s4765_s16 + $0x1c0] sm:$0xff]  ;;  %v262_v25 = vld [vmem:[%s4765_s16 + $0x1c8] sm:$0xff]  ;;  %v4127_v27 = vcombine.low %v238_v16, %v246_v17 }
  0x19   : > { %v4142_v28 = vcombine.high %v253_v22, %v261_v23  ;;  %v4144_v29 = vcombine.high %v254_v24, %v262_v25  ;;  %v269_v30 = vld [vmem:[%s4765_s16 + $0x200] sm:$0xff]  ;;  %v270_v32 = vld [vmem:[%s4765_s16 + $0x208] sm:$0xff]  ;;  %v4141_v34 = vcombine.low %v253_v22, %v261_v23  ;;  %v4143_v35 = vcombine.low %v254_v24, %v262_v25 }
  0x1a   : > { %3294 = vmatpush1.bf16.msra.mxu0 %v4109_v18  ;;  %3376 = vmatpush1.bf16.msra.mxu1 %v4111_v19  ;;  %v277_v31 = vld [vmem:[%s4765_s16 + $0x240] sm:$0xff]  ;;  %v278_v33 = vld [vmem:[%s4765_s16 + $0x248] sm:$0xff] }
  0x1b   : > { %3295 = vmatprep.subr.bf16.mxu0 %v4126_v20  ;;  %3377 = vmatprep.subr.bf16.mxu1 %v4128_v21  ;;  %v4158_v36 = vcombine.high %v269_v30, %v277_v31  ;;  %v4160_v37 = vcombine.high %v270_v32, %v278_v33  ;;  %v285_v38 = vld [vmem:[%s4765_s16 + $0x280] sm:$0xff]  ;;  %v286_v40 = vld [vmem:[%s4765_s16 + $0x288] sm:$0xff]  ;;  %v4157_v42 = vcombine.low %v269_v30, %v277_v31 }
  0x1c   : > { %v293_v39 = vld [vmem:[%s4765_s16 + $0x2c0] sm:$0xff]  ;;  %v294_v41 = vld [vmem:[%s4765_s16 + $0x2c8] sm:$0xff]  ;;  %v4159_v43 = vcombine.low %v270_v32, %v278_v33 }
  0x1d   : > { %v4174_v44 = vcombine.high %v285_v38, %v293_v39  ;;  %v4176_v45 = vcombine.high %v286_v40, %v294_v41  ;;  %v301_v46 = vld [vmem:[%s4765_s16 + $0x300] sm:$0xff]  ;;  %v302_v48 = vld [vmem:[%s4765_s16 + $0x308] sm:$0xff]  ;;  %v4173_v50 = vcombine.low %v285_v38, %v293_v39  ;;  %v4175_v51 = vcombine.low %v286_v40, %v294_v41 }
  0x1e   : > { %3296 = vmatpush1.bf16.msra.mxu0 %v4125_v26  ;;  %3378 = vmatpush1.bf16.msra.mxu1 %v4127_v27  ;;  %v309_v47 = vld [vmem:[%s4765_s16 + $0x340] sm:$0xff]  ;;  %v310_v49 = vld [vmem:[%s4765_s16 + $0x348] sm:$0xff] }
  0x1f   : > { %3297 = vmatprep.subr.bf16.mxu0 %v4142_v28  ;;  %3379 = vmatprep.subr.bf16.mxu1 %v4144_v29  ;;  %v4190_v52 = vcombine.high %v301_v46, %v309_v47  ;;  %v4802_v53 = vld [vmem:[%s4797_s20] sm:$0xff]  ;;  %v4192_v54 = vcombine.high %v302_v48, %v310_v49  ;;  %v318_v58 = vld [vmem:[%s4765_s16 + $0x388] sm:$0xff]  ;;  %v4189_v60 = vcombine.low %v301_v46, %v309_v47 }
  0x20   : > { %v317_v55 = vld [vmem:[%s4765_s16 + $0x380] sm:$0xff]  ;;  %v4808_v57 = vcombine.high %v4802_v53, %v4802_v53  ;;  %v326_v59 = vld [vmem:[%s4765_s16 + $0x3c8] sm:$0xff]  ;;  %v4191_v61 = vcombine.low %v302_v48, %v310_v49 }
  0x21   : > { %v325_v56 = vld [vmem:[%s4765_s16 + $0x3c0] sm:$0xff]  ;;  %v4208_v63 = vcombine.high %v318_v58, %v326_v59  ;;  %v334_v2 = vld [vmem:[%s4765_s16 + $0x408] sm:$0xff]  ;;  %v4207_v5 = vcombine.low %v318_v58, %v326_v59 }
  0x22   : > { %3298 = vmatpush1.bf16.msra.mxu0 %v4141_v34  ;;  %3380 = vmatpush1.bf16.msra.mxu1 %v4143_v35  ;;  %v4206_v62 = vcombine.high %v317_v55, %v325_v56  ;;  %v333_v0 = vld [vmem:[%s4765_s16 + $0x400] sm:$0xff]  ;;  %v342_v3 = vld [vmem:[%s4765_s16 + $0x448] sm:$0xff]  ;;  %v4205_v4 = vcombine.low %v317_v55, %v325_v56 }
  0x23   : > { %3299 = vmatprep.subr.bf16.mxu0 %v4158_v36  ;;  %3381 = vmatprep.subr.bf16.mxu1 %v4160_v37  ;;  %v341_v1 = vld [vmem:[%s4765_s16 + $0x440] sm:$0xff]  ;;  %v4224_v7 = vcombine.high %v334_v2, %v342_v3  ;;  %v350_v10 = vld [vmem:[%s4765_s16 + $0x488] sm:$0xff]  ;;  %v4223_v13 = vcombine.low %v334_v2, %v342_v3 }
  0x24   : > { %3323 = vmatprep.mubr.bf16.mxu0 %v4808_v57  ;;  %3405 = vmatprep.mubr.bf16.mxu1 %v4808_v57  ;;  %v4222_v6 = vcombine.high %v333_v0, %v341_v1  ;;  %v349_v8 = vld [vmem:[%s4765_s16 + $0x480] sm:$0xff]  ;;  %v358_v11 = vld [vmem:[%s4765_s16 + $0x4c8] sm:$0xff]  ;;  %v4221_v12 = vcombine.low %v333_v0, %v341_v1 }
  0x25   : > { %v357_v9 = vld [vmem:[%s4765_s16 + $0x4c0] sm:$0xff]  ;;  %v4240_v15 = vcombine.high %v350_v10, %v358_v11  ;;  %v366_v18 = vld [vmem:[%s4765_s16 + $0x508] sm:$0xff]  ;;  %v4239_v21 = vcombine.low %v350_v10, %v358_v11 }
  0x26   : > { %3300 = vmatpush1.bf16.msra.mxu0 %v4157_v42  ;;  %3382 = vmatpush1.bf16.msra.mxu1 %v4159_v43  ;;  %v4238_v14 = vcombine.high %v349_v8, %v357_v9  ;;  %v365_v16 = vld [vmem:[%s4765_s16 + $0x500] sm:$0xff]  ;;  %v374_v19 = vld [vmem:[%s4765_s16 + $0x548] sm:$0xff]  ;;  %v4237_v20 = vcombine.low %v349_v8, %v357_v9 }
  0x27   : > { %3301 = vmatprep.subr.bf16.mxu0 %v4174_v44  ;;  %3383 = vmatprep.subr.bf16.mxu1 %v4176_v45  ;;  %v373_v17 = vld [vmem:[%s4765_s16 + $0x540] sm:$0xff]  ;;  %v4256_v23 = vcombine.high %v366_v18, %v374_v19  ;;  %v382_v26 = vld [vmem:[%s4765_s16 + $0x588] sm:$0xff]  ;;  %v4255_v29 = vcombine.low %v366_v18, %v374_v19 }
  0x28   : > { %v4254_v22 = vcombine.high %v365_v16, %v373_v17  ;;  %v381_v24 = vld [vmem:[%s4765_s16 + $0x580] sm:$0xff]  ;;  %v390_v27 = vld [vmem:[%s4765_s16 + $0x5c8] sm:$0xff]  ;;  %v4253_v28 = vcombine.low %v365_v16, %v373_v17 }
  0x29   : > { %v389_v25 = vld [vmem:[%s4765_s16 + $0x5c0] sm:$0xff]  ;;  %v4272_v31 = vcombine.high %v382_v26, %v390_v27  ;;  %v398_v34 = vld [vmem:[%s4765_s16 + $0x608] sm:$0xff]  ;;  %v4271_v37 = vcombine.low %v382_v26, %v390_v27 }
  0x2a   : > { %3302 = vmatpush1.bf16.msra.mxu0 %v4173_v50  ;;  %3384 = vmatpush1.bf16.msra.mxu1 %v4175_v51  ;;  %v4270_v30 = vcombine.high %v381_v24, %v389_v25  ;;  %v397_v32 = vld [vmem:[%s4765_s16 + $0x600] sm:$0xff]  ;;  %v406_v35 = vld [vmem:[%s4765_s16 + $0x648] sm:$0xff]  ;;  %v4269_v36 = vcombine.low %v381_v24, %v389_v25 }
  0x2b   : > { %3303 = vmatprep.subr.bf16.mxu0 %v4190_v52  ;;  %3385 = vmatprep.subr.bf16.mxu1 %v4192_v54  ;;  %v405_v33 = vld [vmem:[%s4765_s16 + $0x640] sm:$0xff]  ;;  %v4288_v39 = vcombine.high %v398_v34, %v406_v35  ;;  %v414_v42 = vld [vmem:[%s4765_s16 + $0x688] sm:$0xff]  ;;  %v4287_v45 = vcombine.low %v398_v34, %v406_v35 }
  0x2c   : > { %v4286_v38 = vcombine.high %v397_v32, %v405_v33  ;;  %v413_v40 = vld [vmem:[%s4765_s16 + $0x680] sm:$0xff]  ;;  %v422_v43 = vld [vmem:[%s4765_s16 + $0x6c8] sm:$0xff]  ;;  %v4285_v44 = vcombine.low %v397_v32, %v405_v33 }
  0x2d   : > { %v421_v41 = vld [vmem:[%s4765_s16 + $0x6c0] sm:$0xff]  ;;  %v4304_v47 = vcombine.high %v414_v42, %v422_v43  ;;  %v430_v50 = vld [vmem:[%s4765_s16 + $0x708] sm:$0xff]  ;;  %v4303_v54 = vcombine.low %v414_v42, %v422_v43 }
  0x2e   : > { %3304 = vmatpush1.bf16.msra.mxu0 %v4189_v60  ;;  %3386 = vmatpush1.bf16.msra.mxu1 %v4191_v61  ;;  %v4302_v46 = vcombine.high %v413_v40, %v421_v41  ;;  %v429_v48 = vld [vmem:[%s4765_s16 + $0x700] sm:$0xff]  ;;  %v438_v51 = vld [vmem:[%s4765_s16 + $0x748] sm:$0xff]  ;;  %v4301_v52 = vcombine.low %v413_v40, %v421_v41 }
  0x2f   : > { %3305 = vmatprep.subr.bf16.mxu0 %v4206_v62  ;;  %3387 = vmatprep.subr.bf16.mxu1 %v4208_v63  ;;  %v437_v49 = vld [vmem:[%s4765_s16 + $0x740] sm:$0xff]  ;;  %v4320_v56 = vcombine.high %v430_v50, %v438_v51  ;;  %v446_v60 = vld [vmem:[%s4765_s16 + $0x788] sm:$0xff]  ;;  %v4319_v63 = vcombine.low %v430_v50, %v438_v51 }
  0x30   : > { %v4318_v55 = vcombine.high %v429_v48, %v437_v49  ;;  %v445_v58 = vld [vmem:[%s4765_s16 + $0x780] sm:$0xff]  ;;  %v454_v61 = vld [vmem:[%s4765_s16 + $0x7c8] sm:$0xff]  ;;  %v4317_v62 = vcombine.low %v429_v48, %v437_v49 }
  0x31   : > { %v453_v59 = vld [vmem:[%s4765_s16 + $0x7c0] sm:$0xff]  ;;  %v4336_v1 = vcombine.high %v446_v60, %v454_v61 }
  0x32   : > { %3306 = vmatpush1.bf16.msra.mxu0 %v4205_v4  ;;  %3388 = vmatpush1.bf16.msra.mxu1 %v4207_v5  ;;  %v4334_v0 = vcombine.high %v445_v58, %v453_v59  ;;  %v461_v2 = vld [vmem:[%s4765_s16 + $0x800] sm:$0xff]  ;;  %v462_v4 = vld [vmem:[%s4765_s16 + $0x808] sm:$0xff] }
  0x33   : > { %3307 = vmatprep.subr.bf16.mxu0 %v4222_v6  ;;  %3389 = vmatprep.subr.bf16.mxu1 %v4224_v7  ;;  %v469_v3 = vld [vmem:[%s4765_s16 + $0x840] sm:$0xff]  ;;  %v470_v5 = vld [vmem:[%s4765_s16 + $0x848] sm:$0xff]  ;;  %v4333_v6 = vcombine.low %v445_v58, %v453_v59  ;;  %v4335_v7 = vcombine.low %v446_v60, %v454_v61 }
  0x34   : > { %v4350_v8 = vcombine.high %v461_v2, %v469_v3  ;;  %v4352_v9 = vcombine.high %v462_v4, %v470_v5  ;;  %v477_v10 = vld [vmem:[%s4765_s16 + $0x880] sm:$0xff]  ;;  %v4349_v16 = vcombine.low %v461_v2, %v469_v3  ;;  %v4351_v17 = vcombine.low %v462_v4, %v470_v5 }
  0x35   : > { %v485_v11 = vld [vmem:[%s4765_s16 + $0x8c0] sm:$0xff] }
  0x36   : > { %3308 = vmatpush1.bf16.msra.mxu0 %v4221_v12  ;;  %3390 = vmatpush1.bf16.msra.mxu1 %v4223_v13  ;;  %v4854_v12 = vcombine.low %v4802_v53, %v4802_v53  ;;  %v478_v13 = vld [vmem:[%s4765_s16 + $0x888] sm:$0xff]  ;;  %v4366_v18 = vcombine.high %v477_v10, %v485_v11  ;;  %v4365_v24 = vcombine.low %v477_v10, %v485_v11 }
  0x37   : > { %3309 = vmatprep.subr.bf16.mxu0 %v4238_v14  ;;  %3391 = vmatprep.subr.bf16.mxu1 %v4240_v15  ;;  %v486_v14 = vld [vmem:[%s4765_s16 + $0x8c8] sm:$0xff] }
  0x38   : > { %v4859_v15 = vld [vmem:[%s4797_s20 + $0x8] sm:$0xff]  ;;  %v4368_v19 = vcombine.high %v478_v13, %v486_v14  ;;  %v4367_v25 = vcombine.low %v478_v13, %v486_v14 }
  0x39   : > { %v4865_v53 = vcombine.high %v4859_v15, %v4859_v15 }
  0x3a   : > { %3310 = vmatpush1.bf16.msra.mxu0 %v4237_v20  ;;  %3392 = vmatpush1.bf16.msra.mxu1 %v4239_v21  ;;  %v493_v20 = vld [vmem:[%s4765_s16 + $0x900] sm:$0xff] }
  0x3b   : > { %3311 = vmatprep.subr.bf16.mxu0 %v4254_v22  ;;  %3393 = vmatprep.subr.bf16.mxu1 %v4256_v23  ;;  %v501_v21 = vld [vmem:[%s4765_s16 + $0x940] sm:$0xff]  ;;  %v494_v22 = vld [vmem:[%s4765_s16 + $0x908] sm:$0xff] }
  0x3c   : > { %v502_v23 = vld [vmem:[%s4765_s16 + $0x948] sm:$0xff]  ;;  %v4382_v26 = vcombine.high %v493_v20, %v501_v21  ;;  %v4381_v32 = vcombine.low %v493_v20, %v501_v21 }
  0x3d   : > { %v4384_v27 = vcombine.high %v494_v22, %v502_v23  ;;  %v4383_v33 = vcombine.low %v494_v22, %v502_v23 }
  0x3e   : > { %3312 = vmatpush1.bf16.msra.mxu0 %v4253_v28  ;;  %3394 = vmatpush1.bf16.msra.mxu1 %v4255_v29  ;;  %v509_v28 = vld [vmem:[%s4765_s16 + $0x980] sm:$0xff] }
  0x3f   : > { %3313 = vmatprep.subr.bf16.mxu0 %v4270_v30  ;;  %3395 = vmatprep.subr.bf16.mxu1 %v4272_v31  ;;  %v517_v29 = vld [vmem:[%s4765_s16 + $0x9c0] sm:$0xff]  ;;  %v510_v30 = vld [vmem:[%s4765_s16 + $0x988] sm:$0xff] }
  0x40   : > { %v518_v31 = vld [vmem:[%s4765_s16 + $0x9c8] sm:$0xff]  ;;  %v4398_v34 = vcombine.high %v509_v28, %v517_v29  ;;  %v4397_v40 = vcombine.low %v509_v28, %v517_v29 }
  0x41   : > { %v4400_v35 = vcombine.high %v510_v30, %v518_v31  ;;  %v4399_v41 = vcombine.low %v510_v30, %v518_v31 }
  0x42   : > { %3314 = vmatpush1.bf16.msra.mxu0 %v4269_v36  ;;  %3396 = vmatpush1.bf16.msra.mxu1 %v4271_v37  ;;  %v525_v36 = vld [vmem:[%s4765_s16 + $0xa00] sm:$0xff] }
  0x43   : > { %3315 = vmatprep.subr.bf16.mxu0 %v4286_v38  ;;  %3397 = vmatprep.subr.bf16.mxu1 %v4288_v39  ;;  %v533_v37 = vld [vmem:[%s4765_s16 + $0xa40] sm:$0xff]  ;;  %v526_v38 = vld [vmem:[%s4765_s16 + $0xa08] sm:$0xff] }
  0x44   : > { %v534_v39 = vld [vmem:[%s4765_s16 + $0xa48] sm:$0xff]  ;;  %v4414_v42 = vcombine.high %v525_v36, %v533_v37  ;;  %v4413_v48 = vcombine.low %v525_v36, %v533_v37 }
  0x45   : > { %v4416_v43 = vcombine.high %v526_v38, %v534_v39  ;;  %v4415_v49 = vcombine.low %v526_v38, %v534_v39 }
  0x46   : > { %3316 = vmatpush1.bf16.msra.mxu0 %v4285_v44  ;;  %3398 = vmatpush1.bf16.msra.mxu1 %v4287_v45  ;;  %v541_v44 = vld [vmem:[%s4765_s16 + $0xa80] sm:$0xff] }
  0x47   : > { %3317 = vmatprep.subr.bf16.mxu0 %v4302_v46  ;;  %3399 = vmatprep.subr.bf16.mxu1 %v4304_v47  ;;  %v549_v45 = vld [vmem:[%s4765_s16 + $0xac0] sm:$0xff]  ;;  %v542_v46 = vld [vmem:[%s4765_s16 + $0xa88] sm:$0xff] }
  0x48   : > { %v550_v47 = vld [vmem:[%s4765_s16 + $0xac8] sm:$0xff]  ;;  %v4430_v50 = vcombine.high %v541_v44, %v549_v45  ;;  %v4429_v58 = vcombine.low %v541_v44, %v549_v45 }
  0x49   : > { %v4432_v51 = vcombine.high %v542_v46, %v550_v47  ;;  %v4431_v59 = vcombine.low %v542_v46, %v550_v47 }
  0x4a   : > { %3318 = vmatpush1.bf16.msra.mxu0 %v4301_v52  ;;  %3400 = vmatpush1.bf16.msra.mxu1 %v4303_v54  ;;  %v557_v52 = vld [vmem:[%s4765_s16 + $0xb00] sm:$0xff] }
  0x4b   : > { %3319 = vmatprep.subr.bf16.mxu0 %v4318_v55  ;;  %3401 = vmatprep.subr.bf16.mxu1 %v4320_v56  ;;  %v565_v54 = vld [vmem:[%s4765_s16 + $0xb40] sm:$0xff]  ;;  %v558_v55 = vld [vmem:[%s4765_s16 + $0xb08] sm:$0xff] }
  0x4c   : > { %v566_v56 = vld [vmem:[%s4765_s16 + $0xb48] sm:$0xff]  ;;  %v4446_v60 = vcombine.high %v557_v52, %v565_v54  ;;  %v4445_v2 = vcombine.low %v557_v52, %v565_v54 }
  0x4d   : > { %v4448_v61 = vcombine.high %v558_v55, %v566_v56  ;;  %v4447_v3 = vcombine.low %v558_v55, %v566_v56 }
  0x4e   : > { %3320 = vmatpush1.bf16.msra.mxu0 %v4317_v62  ;;  %3402 = vmatpush1.bf16.msra.mxu1 %v4319_v63  ;;  %v573_v62 = vld [vmem:[%s4765_s16 + $0xb80] sm:$0xff] }
  0x4f   : > { %3321 = vmatprep.subr.bf16.mxu0 %v4334_v0  ;;  %3403 = vmatprep.subr.bf16.mxu1 %v4336_v1  ;;  %v581_v63 = vld [vmem:[%s4765_s16 + $0xbc0] sm:$0xff]  ;;  %v574_v0 = vld [vmem:[%s4765_s16 + $0xb88] sm:$0xff] }
  0x50   : > { %v582_v1 = vld [vmem:[%s4765_s16 + $0xbc8] sm:$0xff]  ;;  %v4462_v4 = vcombine.high %v573_v62, %v581_v63  ;;  %v4461_v10 = vcombine.low %v573_v62, %v581_v63 }
  0x51   : > { %v4464_v5 = vcombine.high %v574_v0, %v582_v1  ;;  %v4463_v11 = vcombine.low %v574_v0, %v582_v1 }
  0x52   : > { %3322 = vmatpush1.bf16.msra.mxu0 %v4333_v6  ;;  %3404 = vmatpush1.bf16.msra.mxu1 %v4335_v7  ;;  %v589_v6 = vld [vmem:[%s4765_s16 + $0xc00] sm:$0xff] }
  0x53   : > { %3332 = vmatprep.subr.bf16.mxu0 %v4350_v8  ;;  %3414 = vmatprep.subr.bf16.mxu1 %v4352_v9  ;;  %v597_v7 = vld [vmem:[%s4765_s16 + $0xc40] sm:$0xff]  ;;  %v590_v8 = vld [vmem:[%s4765_s16 + $0xc08] sm:$0xff] }
  0x54   : > { %v598_v9 = vld [vmem:[%s4765_s16 + $0xc48] sm:$0xff]  ;;  %v4478_v13 = vcombine.high %v589_v6, %v597_v7  ;;  %v4477_v20 = vcombine.low %v589_v6, %v597_v7 }
  0x55   : > { %3324 = vmatmul.mubr.bf16.vlgmr.msra.gmra.mrb[0].mxu0 %v4854_v12  ;;  %3406 = vmatmul.mubr.bf16.vlgmr.msra.gmra.mrb[0].mxu1 %v4854_v12  ;;  %v4480_v14 = vcombine.high %v590_v8, %v598_v9  ;;  %v4479_v21 = vcombine.low %v590_v8, %v598_v9 }
  0x56   : > { %3333 = vmatpush1.bf16.msra.mxu0 %v4349_v16  ;;  %3415 = vmatpush1.bf16.msra.mxu1 %v4351_v17  ;;  %v605_v16 = vld [vmem:[%s4765_s16 + $0xc80] sm:$0xff] }
  0x57   : > { %3334 = vmatprep.subr.bf16.mxu0 %v4366_v18  ;;  %3416 = vmatprep.subr.bf16.mxu1 %v4368_v19  ;;  %v613_v17 = vld [vmem:[%s4765_s16 + $0xcc0] sm:$0xff]  ;;  %v606_v18 = vld [vmem:[%s4765_s16 + $0xc88] sm:$0xff] }
  0x58   : > { %3364 = vmatprep.mubr.bf16.mxu0 %v4865_v53  ;;  %3446 = vmatprep.mubr.bf16.mxu1 %v4865_v53  ;;  %v614_v19 = vld [vmem:[%s4765_s16 + $0xcc8] sm:$0xff]  ;;  %v4494_v22 = vcombine.high %v605_v16, %v613_v17  ;;  %v4493_v28 = vcombine.low %v605_v16, %v613_v17 }
  0x59   : > { %v4496_v23 = vcombine.high %v606_v18, %v614_v19  ;;  %v4495_v29 = vcombine.low %v606_v18, %v614_v19 }
  0x5a   : > { %3335 = vmatpush1.bf16.msra.mxu0 %v4365_v24  ;;  %3417 = vmatpush1.bf16.msra.mxu1 %v4367_v25  ;;  %v621_v24 = vld [vmem:[%s4765_s16 + $0xd00] sm:$0xff] }
  0x5b   : > { %3336 = vmatprep.subr.bf16.mxu0 %v4382_v26  ;;  %3418 = vmatprep.subr.bf16.mxu1 %v4384_v27  ;;  %v629_v25 = vld [vmem:[%s4765_s16 + $0xd40] sm:$0xff]  ;;  %v622_v26 = vld [vmem:[%s4765_s16 + $0xd08] sm:$0xff] }
  0x5c   : > { %v630_v27 = vld [vmem:[%s4765_s16 + $0xd48] sm:$0xff]  ;;  %v4510_v30 = vcombine.high %v621_v24, %v629_v25  ;;  %v4509_v36 = vcombine.low %v621_v24, %v629_v25  ;;  %v232_v24 = vld [vmem:[%s4765_s16 + $0xd8] sm:$0xff] }
  0x5d   : > { %v4512_v31 = vcombine.high %v622_v26, %v630_v27  ;;  %v4511_v37 = vcombine.low %v622_v26, %v630_v27 }
  0x5e   : > { %3337 = vmatpush1.bf16.msra.mxu0 %v4381_v32  ;;  %3419 = vmatpush1.bf16.msra.mxu1 %v4383_v33  ;;  %v637_v32 = vld [vmem:[%s4765_s16 + $0xd80] sm:$0xff] }
  0x5f   : > { %3338 = vmatprep.subr.bf16.mxu0 %v4398_v34  ;;  %3420 = vmatprep.subr.bf16.mxu1 %v4400_v35  ;;  %v645_v33 = vld [vmem:[%s4765_s16 + $0xdc0] sm:$0xff]  ;;  %v638_v34 = vld [vmem:[%s4765_s16 + $0xd88] sm:$0xff] }
  0x60   : > { %v646_v35 = vld [vmem:[%s4765_s16 + $0xdc8] sm:$0xff]  ;;  %v4526_v38 = vcombine.high %v637_v32, %v645_v33  ;;  %v4525_v44 = vcombine.low %v637_v32, %v645_v33 }
  0x61   : > { %v4528_v39 = vcombine.high %v638_v34, %v646_v35  ;;  %v4527_v45 = vcombine.low %v638_v34, %v646_v35 }
  0x62   : > { %3339 = vmatpush1.bf16.msra.mxu0 %v4397_v40  ;;  %3421 = vmatpush1.bf16.msra.mxu1 %v4399_v41  ;;  %v653_v40 = vld [vmem:[%s4765_s16 + $0xe00] sm:$0xff] }
  0x63   : > { %3340 = vmatprep.subr.bf16.mxu0 %v4414_v42  ;;  %3422 = vmatprep.subr.bf16.mxu1 %v4416_v43  ;;  %v661_v41 = vld [vmem:[%s4765_s16 + $0xe40] sm:$0xff]  ;;  %v654_v42 = vld [vmem:[%s4765_s16 + $0xe08] sm:$0xff] }
  0x64   : > { %v662_v43 = vld [vmem:[%s4765_s16 + $0xe48] sm:$0xff]  ;;  %v4542_v46 = vcombine.high %v653_v40, %v661_v41  ;;  %v4541_v52 = vcombine.low %v653_v40, %v661_v41 }
  0x65   : > { %v4544_v47 = vcombine.high %v654_v42, %v662_v43  ;;  %v4543_v54 = vcombine.low %v654_v42, %v662_v43 }
  0x66   : > { %3341 = vmatpush1.bf16.msra.mxu0 %v4413_v48  ;;  %3423 = vmatpush1.bf16.msra.mxu1 %v4415_v49  ;;  %v669_v48 = vld [vmem:[%s4765_s16 + $0xe80] sm:$0xff] }
  0x67   : > { %3342 = vmatprep.subr.bf16.mxu0 %v4430_v50  ;;  %3424 = vmatprep.subr.bf16.mxu1 %v4432_v51  ;;  %v677_v49 = vld [vmem:[%s4765_s16 + $0xec0] sm:$0xff]  ;;  %v670_v50 = vld [vmem:[%s4765_s16 + $0xe88] sm:$0xff] }
  0x68   : > { %v678_v51 = vld [vmem:[%s4765_s16 + $0xec8] sm:$0xff]  ;;  %v4558_v55 = vcombine.high %v669_v48, %v677_v49  ;;  %v4557_v62 = vcombine.low %v669_v48, %v677_v49 }
  0x69   : > { %v4560_v56 = vcombine.high %v670_v50, %v678_v51  ;;  %v4559_v63 = vcombine.low %v670_v50, %v678_v51 }
  0x6a   : > { %3343 = vmatpush1.bf16.msra.mxu0 %v4429_v58  ;;  %3425 = vmatpush1.bf16.msra.mxu1 %v4431_v59  ;;  %v685_v58 = vld [vmem:[%s4765_s16 + $0xf00] sm:$0xff] }
  0x6b   : > { %3344 = vmatprep.subr.bf16.mxu0 %v4446_v60  ;;  %3426 = vmatprep.subr.bf16.mxu1 %v4448_v61  ;;  %v693_v59 = vld [vmem:[%s4765_s16 + $0xf40] sm:$0xff]  ;;  %v686_v60 = vld [vmem:[%s4765_s16 + $0xf08] sm:$0xff] }
  0x6c   : > { %v694_v61 = vld [vmem:[%s4765_s16 + $0xf48] sm:$0xff]  ;;  %v4574_v0 = vcombine.high %v685_v58, %v693_v59  ;;  %v4573_v6 = vcombine.low %v685_v58, %v693_v59 }
  0x6d   : > { %v4576_v1 = vcombine.high %v686_v60, %v694_v61  ;;  %v4575_v7 = vcombine.low %v686_v60, %v694_v61 }
  0x6e   : > { %3345 = vmatpush1.bf16.msra.mxu0 %v4445_v2  ;;  %3427 = vmatpush1.bf16.msra.mxu1 %v4447_v3  ;;  %v701_v2 = vld [vmem:[%s4765_s16 + $0xf80] sm:$0xff] }
  0x6f   : > { %3346 = vmatprep.subr.bf16.mxu0 %v4462_v4  ;;  %3428 = vmatprep.subr.bf16.mxu1 %v4464_v5  ;;  %v709_v3 = vld [vmem:[%s4765_s16 + $0xfc0] sm:$0xff]  ;;  %v702_v4 = vld [vmem:[%s4765_s16 + $0xf88] sm:$0xff] }
  0x70   : > { %v710_v5 = vld [vmem:[%s4765_s16 + $0xfc8] sm:$0xff]  ;;  %v4590_v8 = vcombine.high %v701_v2, %v709_v3  ;;  %v4589_v16 = vcombine.low %v701_v2, %v709_v3 }
  0x71   : > { %v4592_v9 = vcombine.high %v702_v4, %v710_v5  ;;  %v4591_v17 = vcombine.low %v702_v4, %v710_v5 }
  0x72   : > { %3347 = vmatpush1.bf16.msra.mxu0 %v4461_v10  ;;  %3429 = vmatpush1.bf16.msra.mxu1 %v4463_v11  ;;  %v207_v10 = vld [vmem:[%s4765_s16 + $0x10] sm:$0xff] }
  0x73   : > { %3348 = vmatprep.subr.bf16.mxu0 %v4478_v13  ;;  %3430 = vmatprep.subr.bf16.mxu1 %v4480_v14  ;;  %v215_v11 = vld [vmem:[%s4765_s16 + $0x50] sm:$0xff]  ;;  %v208_v13 = vld [vmem:[%s4765_s16 + $0x18] sm:$0xff] }
  0x74   : > { %v216_v14 = vld [vmem:[%s4765_s16 + $0x58] sm:$0xff]  ;;  %v4098_v18 = vcombine.high %v207_v10, %v215_v11  ;;  %v4097_v25 = vcombine.low %v207_v10, %v215_v11 }
  0x75   : > { %v4100_v19 = vcombine.high %v208_v13, %v216_v14  ;;  %v4099_v26 = vcombine.low %v208_v13, %v216_v14 }
  0x76   : > { %3349 = vmatpush1.bf16.msra.mxu0 %v4477_v20  ;;  %3431 = vmatpush1.bf16.msra.mxu1 %v4479_v21  ;;  %v223_v20 = vld [vmem:[%s4765_s16 + $0x90] sm:$0xff] }
  0x77   : > { %3350 = vmatprep.subr.bf16.mxu0 %v4494_v22  ;;  %3432 = vmatprep.subr.bf16.mxu1 %v4496_v23  ;;  %v231_v21 = vld [vmem:[%s4765_s16 + $0xd0] sm:$0xff]  ;;  %v4933_v22 = vcombine.low %v4859_v15, %v4859_v15  ;;  %v224_v23 = vld [vmem:[%s4765_s16 + $0x98] sm:$0xff] }
  0x78   : > { %v4114_v27 = vcombine.high %v223_v20, %v231_v21  ;;  %v240_v15 = vld [vmem:[%s4765_s16 + $0x118] sm:$0xff]  ;;  %v4113_v32 = vcombine.low %v223_v20, %v231_v21  ;;  %v4115_v33 = vcombine.low %v224_v23, %v232_v24 }
  0x7a   : > { %3351 = vmatpush1.bf16.msra.mxu0 %v4493_v28  ;;  %3433 = vmatpush1.bf16.msra.mxu1 %v4495_v29  ;;  %v4116_v28 = vcombine.high %v224_v23, %v232_v24  ;;  %v239_v29 = vld [vmem:[%s4765_s16 + $0x110] sm:$0xff] }
  0x7b   : > { %3352 = vmatprep.subr.bf16.mxu0 %v4510_v30  ;;  %3434 = vmatprep.subr.bf16.mxu1 %v4512_v31  ;;  %v247_v30 = vld [vmem:[%s4765_s16 + $0x150] sm:$0xff]  ;;  %v248_v31 = vld [vmem:[%s4765_s16 + $0x158] sm:$0xff] }
  0x7c   : > { %v4130_v34 = vcombine.high %v239_v29, %v247_v30  ;;  %v4132_v35 = vcombine.high %v240_v15, %v248_v31  ;;  %v4129_v40 = vcombine.low %v239_v29, %v247_v30  ;;  %v4131_v41 = vcombine.low %v240_v15, %v248_v31 }
  0x7e   : > { %3353 = vmatpush1.bf16.msra.mxu0 %v4509_v36  ;;  %3435 = vmatpush1.bf16.msra.mxu1 %v4511_v37  ;;  %v255_v36 = vld [vmem:[%s4765_s16 + $0x190] sm:$0xff] }
  0x7f   : > { %3354 = vmatprep.subr.bf16.mxu0 %v4526_v38  ;;  %3436 = vmatprep.subr.bf16.mxu1 %v4528_v39  ;;  %v263_v37 = vld [vmem:[%s4765_s16 + $0x1d0] sm:$0xff]  ;;  %v256_v38 = vld [vmem:[%s4765_s16 + $0x198] sm:$0xff] }
  0x80   : > { %v264_v39 = vld [vmem:[%s4765_s16 + $0x1d8] sm:$0xff]  ;;  %v4146_v42 = vcombine.high %v255_v36, %v263_v37  ;;  %v4145_v48 = vcombine.low %v255_v36, %v263_v37 }
  0x81   : > { %v4148_v43 = vcombine.high %v256_v38, %v264_v39  ;;  %v4147_v49 = vcombine.low %v256_v38, %v264_v39 }
  0x82   : > { %3355 = vmatpush1.bf16.msra.mxu0 %v4525_v44  ;;  %3437 = vmatpush1.bf16.msra.mxu1 %v4527_v45  ;;  %v271_v44 = vld [vmem:[%s4765_s16 + $0x210] sm:$0xff] }
  0x83   : > { %3356 = vmatprep.subr.bf16.mxu0 %v4542_v46  ;;  %3438 = vmatprep.subr.bf16.mxu1 %v4544_v47  ;;  %v279_v45 = vld [vmem:[%s4765_s16 + $0x250] sm:$0xff]  ;;  %v272_v46 = vld [vmem:[%s4765_s16 + $0x218] sm:$0xff] }
  0x84   : > { %v280_v47 = vld [vmem:[%s4765_s16 + $0x258] sm:$0xff]  ;;  %v4162_v50 = vcombine.high %v271_v44, %v279_v45  ;;  %v4161_v58 = vcombine.low %v271_v44, %v279_v45 }
  0x85   : > { %v4164_v51 = vcombine.high %v272_v46, %v280_v47  ;;  %v4163_v59 = vcombine.low %v272_v46, %v280_v47 }
  0x86   : > { %3357 = vmatpush1.bf16.msra.mxu0 %v4541_v52  ;;  %3439 = vmatpush1.bf16.msra.mxu1 %v4543_v54  ;;  %v287_v52 = vld [vmem:[%s4765_s16 + $0x290] sm:$0xff] }
  0x87   : > { %3358 = vmatprep.subr.bf16.mxu0 %v4558_v55  ;;  %3440 = vmatprep.subr.bf16.mxu1 %v4560_v56  ;;  %v295_v54 = vld [vmem:[%s4765_s16 + $0x2d0] sm:$0xff]  ;;  %v288_v55 = vld [vmem:[%s4765_s16 + $0x298] sm:$0xff] }
  0x88   : > { %v296_v56 = vld [vmem:[%s4765_s16 + $0x2d8] sm:$0xff]  ;;  %v4178_v60 = vcombine.high %v287_v52, %v295_v54  ;;  %v4177_v2 = vcombine.low %v287_v52, %v295_v54 }
  0x89   : > { %v4180_v61 = vcombine.high %v288_v55, %v296_v56  ;;  %v4179_v3 = vcombine.low %v288_v55, %v296_v56 }
  0x8a   : > { %3359 = vmatpush1.bf16.msra.mxu0 %v4557_v62  ;;  %3441 = vmatpush1.bf16.msra.mxu1 %v4559_v63  ;;  %v303_v62 = vld [vmem:[%s4765_s16 + $0x310] sm:$0xff] }
  0x8b   : > { %3360 = vmatprep.subr.bf16.mxu0 %v4574_v0  ;;  %3442 = vmatprep.subr.bf16.mxu1 %v4576_v1  ;;  %v311_v63 = vld [vmem:[%s4765_s16 + $0x350] sm:$0xff]  ;;  %v304_v0 = vld [vmem:[%s4765_s16 + $0x318] sm:$0xff] }
  0x8c   : > { %v312_v1 = vld [vmem:[%s4765_s16 + $0x358] sm:$0xff]  ;;  %v4194_v4 = vcombine.high %v303_v62, %v311_v63  ;;  %v4193_v10 = vcombine.low %v303_v62, %v311_v63 }
  0x8d   : > { %v4196_v5 = vcombine.high %v304_v0, %v312_v1  ;;  %v4195_v11 = vcombine.low %v304_v0, %v312_v1 }
  0x8e   : > { %3361 = vmatpush1.bf16.msra.mxu0 %v4573_v6  ;;  %3443 = vmatpush1.bf16.msra.mxu1 %v4575_v7  ;;  %v319_v6 = vld [vmem:[%s4765_s16 + $0x390] sm:$0xff] }
  0x8f   : > { %3362 = vmatprep.subr.bf16.mxu0 %v4590_v8  ;;  %3444 = vmatprep.subr.bf16.mxu1 %v4592_v9  ;;  %v327_v7 = vld [vmem:[%s4765_s16 + $0x3d0] sm:$0xff]  ;;  %v320_v8 = vld [vmem:[%s4765_s16 + $0x398] sm:$0xff] }
  0x90   : > { %v328_v9 = vld [vmem:[%s4765_s16 + $0x3d8] sm:$0xff]  ;;  %v4210_v13 = vcombine.high %v319_v6, %v327_v7  ;;  %v4209_v20 = vcombine.low %v319_v6, %v327_v7 }
  0x91   : > { %v4212_v14 = vcombine.high %v320_v8, %v328_v9  ;;  %v4211_v21 = vcombine.low %v320_v8, %v328_v9 }
  0x92   : > { %3363 = vmatpush1.bf16.msra.mxu0 %v4589_v16  ;;  %3445 = vmatpush1.bf16.msra.mxu1 %v4591_v17  ;;  %v335_v16 = vld [vmem:[%s4765_s16 + $0x410] sm:$0xff] }
  0x93   : > { %3455 = vmatprep.subr.bf16.mxu0 %v4098_v18  ;;  %3537 = vmatprep.subr.bf16.mxu1 %v4100_v19  ;;  %v343_v17 = vld [vmem:[%s4765_s16 + $0x450] sm:$0xff]  ;;  %v336_v18 = vld [vmem:[%s4765_s16 + $0x418] sm:$0xff] }
  0x94   : > { %v344_v19 = vld [vmem:[%s4765_s16 + $0x458] sm:$0xff]  ;;  %v4226_v23 = vcombine.high %v335_v16, %v343_v17  ;;  %v4225_v29 = vcombine.low %v335_v16, %v343_v17 }
  0x95   : > { %3365 = vmatmul.mubr.bf16.vlgmr.msra.gmra.mrb[0].mxu0 %v4933_v22  ;;  %3447 = vmatmul.mubr.bf16.vlgmr.msra.gmra.mrb[0].mxu1 %v4933_v22  ;;  %v4228_v24 = vcombine.high %v336_v18, %v344_v19  ;;  %v4227_v30 = vcombine.low %v336_v18, %v344_v19 }
  0x96   : > { %3456 = vmatpush1.bf16.msra.mxu0 %v4097_v25  ;;  %3538 = vmatpush1.bf16.msra.mxu1 %v4099_v26  ;;  %v351_v25 = vld [vmem:[%s4765_s16 + $0x490] sm:$0xff] }
  0x97   : > { %3457 = vmatprep.subr.bf16.mxu0 %v4114_v27  ;;  %3539 = vmatprep.subr.bf16.mxu1 %v4116_v28  ;;  %v359_v26 = vld [vmem:[%s4765_s16 + $0x4d0] sm:$0xff]  ;;  %v352_v27 = vld [vmem:[%s4765_s16 + $0x498] sm:$0xff] }
  0x98   : > { %3487 = vmatprep.mubr.bf16.mxu0 %v4808_v57  ;;  %3569 = vmatprep.mubr.bf16.mxu1 %v4808_v57  ;;  %v360_v28 = vld [vmem:[%s4765_s16 + $0x4d8] sm:$0xff]  ;;  %v4242_v15 = vcombine.high %v351_v25, %v359_v26  ;;  %v4241_v36 = vcombine.low %v351_v25, %v359_v26 }
  0x99   : > { %v4244_v31 = vcombine.high %v352_v27, %v360_v28  ;;  %v4243_v37 = vcombine.low %v352_v27, %v360_v28 }
  0x9a   : > { %3458 = vmatpush1.bf16.msra.mxu0 %v4113_v32  ;;  %3540 = vmatpush1.bf16.msra.mxu1 %v4115_v33  ;;  %v367_v32 = vld [vmem:[%s4765_s16 + $0x510] sm:$0xff] }
  0x9b   : > { %3459 = vmatprep.subr.bf16.mxu0 %v4130_v34  ;;  %3541 = vmatprep.subr.bf16.mxu1 %v4132_v35  ;;  %v375_v33 = vld [vmem:[%s4765_s16 + $0x550] sm:$0xff]  ;;  %v368_v34 = vld [vmem:[%s4765_s16 + $0x518] sm:$0xff] }
  0x9c   : > { %v376_v35 = vld [vmem:[%s4765_s16 + $0x558] sm:$0xff]  ;;  %v4258_v38 = vcombine.high %v367_v32, %v375_v33  ;;  %v4257_v44 = vcombine.low %v367_v32, %v375_v33 }
  0x9d   : > { %v4260_v39 = vcombine.high %v368_v34, %v376_v35  ;;  %v4259_v45 = vcombine.low %v368_v34, %v376_v35 }
  0x9e   : > { %3460 = vmatpush1.bf16.msra.mxu0 %v4129_v40  ;;  %3542 = vmatpush1.bf16.msra.mxu1 %v4131_v41  ;;  %v383_v40 = vld [vmem:[%s4765_s16 + $0x590] sm:$0xff] }
  0x9f   : > { %3461 = vmatprep.subr.bf16.mxu0 %v4146_v42  ;;  %3543 = vmatprep.subr.bf16.mxu1 %v4148_v43  ;;  %v391_v41 = vld [vmem:[%s4765_s16 + $0x5d0] sm:$0xff]  ;;  %v384_v42 = vld [vmem:[%s4765_s16 + $0x598] sm:$0xff] }
  0xa0   : > { %v392_v43 = vld [vmem:[%s4765_s16 + $0x5d8] sm:$0xff]  ;;  %v4274_v46 = vcombine.high %v383_v40, %v391_v41  ;;  %v4273_v52 = vcombine.low %v383_v40, %v391_v41 }
  0xa1   : > { %v4276_v47 = vcombine.high %v384_v42, %v392_v43  ;;  %v4275_v54 = vcombine.low %v384_v42, %v392_v43 }
  0xa2   : > { %3462 = vmatpush1.bf16.msra.mxu0 %v4145_v48  ;;  %3544 = vmatpush1.bf16.msra.mxu1 %v4147_v49  ;;  %v399_v48 = vld [vmem:[%s4765_s16 + $0x610] sm:$0xff] }
  0xa3   : > { %3463 = vmatprep.subr.bf16.mxu0 %v4162_v50  ;;  %3545 = vmatprep.subr.bf16.mxu1 %v4164_v51  ;;  %v407_v49 = vld [vmem:[%s4765_s16 + $0x650] sm:$0xff]  ;;  %v400_v50 = vld [vmem:[%s4765_s16 + $0x618] sm:$0xff] }
  0xa4   : > { %v408_v51 = vld [vmem:[%s4765_s16 + $0x658] sm:$0xff]  ;;  %v4290_v55 = vcombine.high %v399_v48, %v407_v49  ;;  %v4289_v62 = vcombine.low %v399_v48, %v407_v49 }
  0xa5   : > { %v4292_v56 = vcombine.high %v400_v50, %v408_v51  ;;  %v4291_v63 = vcombine.low %v400_v50, %v408_v51 }
  0xa6   : > { %3464 = vmatpush1.bf16.msra.mxu0 %v4161_v58  ;;  %3546 = vmatpush1.bf16.msra.mxu1 %v4163_v59  ;;  %v415_v58 = vld [vmem:[%s4765_s16 + $0x690] sm:$0xff] }
  0xa7   : > { %3465 = vmatprep.subr.bf16.mxu0 %v4178_v60  ;;  %3547 = vmatprep.subr.bf16.mxu1 %v4180_v61  ;;  %v423_v59 = vld [vmem:[%s4765_s16 + $0x6d0] sm:$0xff]  ;;  %v416_v60 = vld [vmem:[%s4765_s16 + $0x698] sm:$0xff] }
  0xa8   : > { %v424_v61 = vld [vmem:[%s4765_s16 + $0x6d8] sm:$0xff]  ;;  %v4306_v0 = vcombine.high %v415_v58, %v423_v59  ;;  %v4305_v6 = vcombine.low %v415_v58, %v423_v59 }
  0xa9   : > { %v4308_v1 = vcombine.high %v416_v60, %v424_v61  ;;  %v4307_v7 = vcombine.low %v416_v60, %v424_v61 }
  0xaa   : > { %3466 = vmatpush1.bf16.msra.mxu0 %v4177_v2  ;;  %3548 = vmatpush1.bf16.msra.mxu1 %v4179_v3  ;;  %v431_v2 = vld [vmem:[%s4765_s16 + $0x710] sm:$0xff] }
  0xab   : > { %3467 = vmatprep.subr.bf16.mxu0 %v4194_v4  ;;  %3549 = vmatprep.subr.bf16.mxu1 %v4196_v5  ;;  %v439_v3 = vld [vmem:[%s4765_s16 + $0x750] sm:$0xff]  ;;  %v432_v4 = vld [vmem:[%s4765_s16 + $0x718] sm:$0xff] }
  0xac   : > { %v440_v5 = vld [vmem:[%s4765_s16 + $0x758] sm:$0xff]  ;;  %v4322_v8 = vcombine.high %v431_v2, %v439_v3  ;;  %v4321_v16 = vcombine.low %v431_v2, %v439_v3 }
  0xad   : > { %v4324_v9 = vcombine.high %v432_v4, %v440_v5  ;;  %v4323_v17 = vcombine.low %v432_v4, %v440_v5 }
  0xae   : > { %3468 = vmatpush1.bf16.msra.mxu0 %v4193_v10  ;;  %3550 = vmatpush1.bf16.msra.mxu1 %v4195_v11  ;;  %v447_v10 = vld [vmem:[%s4765_s16 + $0x790] sm:$0xff] }
  0xaf   : > { %3469 = vmatprep.subr.bf16.mxu0 %v4210_v13  ;;  %3551 = vmatprep.subr.bf16.mxu1 %v4212_v14  ;;  %v455_v11 = vld [vmem:[%s4765_s16 + $0x7d0] sm:$0xff]  ;;  %v448_v13 = vld [vmem:[%s4765_s16 + $0x798] sm:$0xff] }
  0xb0   : > { %v456_v14 = vld [vmem:[%s4765_s16 + $0x7d8] sm:$0xff]  ;;  %v4338_v18 = vcombine.high %v447_v10, %v455_v11  ;;  %v4337_v25 = vcombine.low %v447_v10, %v455_v11 }
  0xb1   : > { %v4340_v19 = vcombine.high %v448_v13, %v456_v14  ;;  %v4339_v26 = vcombine.low %v448_v13, %v456_v14 }
  0xb2   : > { %3470 = vmatpush1.bf16.msra.mxu0 %v4209_v20  ;;  %3552 = vmatpush1.bf16.msra.mxu1 %v4211_v21  ;;  %v463_v20 = vld [vmem:[%s4765_s16 + $0x810] sm:$0xff] }
  0xb3   : > { %3471 = vmatprep.subr.bf16.mxu0 %v4226_v23  ;;  %3553 = vmatprep.subr.bf16.mxu1 %v4228_v24  ;;  %v471_v21 = vld [vmem:[%s4765_s16 + $0x850] sm:$0xff]  ;;  %v464_v23 = vld [vmem:[%s4765_s16 + $0x818] sm:$0xff] }
  0xb4   : > { %v472_v24 = vld [vmem:[%s4765_s16 + $0x858] sm:$0xff]  ;;  %v4354_v27 = vcombine.high %v463_v20, %v471_v21  ;;  %v4353_v32 = vcombine.low %v463_v20, %v471_v21 }
  0xb5   : > { %v4356_v28 = vcombine.high %v464_v23, %v472_v24  ;;  %v4355_v33 = vcombine.low %v464_v23, %v472_v24 }
  0xb6   : > { %3472 = vmatpush1.bf16.msra.mxu0 %v4225_v29  ;;  %3554 = vmatpush1.bf16.msra.mxu1 %v4227_v30  ;;  %v479_v29 = vld [vmem:[%s4765_s16 + $0x890] sm:$0xff] }
  0xb7   : > { %3473 = vmatprep.subr.bf16.mxu0 %v4242_v15  ;;  %3555 = vmatprep.subr.bf16.mxu1 %v4244_v31  ;;  %v487_v30 = vld [vmem:[%s4765_s16 + $0x8d0] sm:$0xff]  ;;  %v480_v15 = vld [vmem:[%s4765_s16 + $0x898] sm:$0xff] }
  0xb8   : > { %v488_v31 = vld [vmem:[%s4765_s16 + $0x8d8] sm:$0xff]  ;;  %v4370_v34 = vcombine.high %v479_v29, %v487_v30  ;;  %v4369_v40 = vcombine.low %v479_v29, %v487_v30 }
  0xb9   : > { %v4372_v35 = vcombine.high %v480_v15, %v488_v31  ;;  %v4371_v41 = vcombine.low %v480_v15, %v488_v31 }
  0xba   : > { %3474 = vmatpush1.bf16.msra.mxu0 %v4241_v36  ;;  %3556 = vmatpush1.bf16.msra.mxu1 %v4243_v37  ;;  %v495_v36 = vld [vmem:[%s4765_s16 + $0x910] sm:$0xff] }
  0xbb   : > { %3475 = vmatprep.subr.bf16.mxu0 %v4258_v38  ;;  %3557 = vmatprep.subr.bf16.mxu1 %v4260_v39  ;;  %v503_v37 = vld [vmem:[%s4765_s16 + $0x950] sm:$0xff]  ;;  %v496_v38 = vld [vmem:[%s4765_s16 + $0x918] sm:$0xff] }
  0xbc   : > { %v504_v39 = vld [vmem:[%s4765_s16 + $0x958] sm:$0xff]  ;;  %v4386_v42 = vcombine.high %v495_v36, %v503_v37  ;;  %v4385_v48 = vcombine.low %v495_v36, %v503_v37 }
  0xbd   : > { %v4388_v43 = vcombine.high %v496_v38, %v504_v39  ;;  %v4387_v49 = vcombine.low %v496_v38, %v504_v39 }
  0xbe   : > { %3476 = vmatpush1.bf16.msra.mxu0 %v4257_v44  ;;  %3558 = vmatpush1.bf16.msra.mxu1 %v4259_v45  ;;  %v511_v44 = vld [vmem:[%s4765_s16 + $0x990] sm:$0xff] }
  0xbf   : > { %3477 = vmatprep.subr.bf16.mxu0 %v4274_v46  ;;  %3559 = vmatprep.subr.bf16.mxu1 %v4276_v47  ;;  %v519_v45 = vld [vmem:[%s4765_s16 + $0x9d0] sm:$0xff]  ;;  %v512_v46 = vld [vmem:[%s4765_s16 + $0x998] sm:$0xff] }
  0xc0   : > { %v520_v47 = vld [vmem:[%s4765_s16 + $0x9d8] sm:$0xff]  ;;  %v4402_v50 = vcombine.high %v511_v44, %v519_v45  ;;  %v4401_v58 = vcombine.low %v511_v44, %v519_v45 }
  0xc1   : > { %v4404_v51 = vcombine.high %v512_v46, %v520_v47  ;;  %v4403_v59 = vcombine.low %v512_v46, %v520_v47 }
  0xc2   : > { %3478 = vmatpush1.bf16.msra.mxu0 %v4273_v52  ;;  %3560 = vmatpush1.bf16.msra.mxu1 %v4275_v54  ;;  %v527_v52 = vld [vmem:[%s4765_s16 + $0xa10] sm:$0xff] }
  0xc3   : > { %3479 = vmatprep.subr.bf16.mxu0 %v4290_v55  ;;  %3561 = vmatprep.subr.bf16.mxu1 %v4292_v56  ;;  %v535_v54 = vld [vmem:[%s4765_s16 + $0xa50] sm:$0xff]  ;;  %v528_v55 = vld [vmem:[%s4765_s16 + $0xa18] sm:$0xff] }
  0xc4   : > { %v536_v56 = vld [vmem:[%s4765_s16 + $0xa58] sm:$0xff]  ;;  %v4418_v60 = vcombine.high %v527_v52, %v535_v54  ;;  %v4417_v2 = vcombine.low %v527_v52, %v535_v54 }
  0xc5   : > { %v4420_v61 = vcombine.high %v528_v55, %v536_v56  ;;  %v4419_v3 = vcombine.low %v528_v55, %v536_v56 }
  0xc6   : > { %3480 = vmatpush1.bf16.msra.mxu0 %v4289_v62  ;;  %3562 = vmatpush1.bf16.msra.mxu1 %v4291_v63  ;;  %v543_v62 = vld [vmem:[%s4765_s16 + $0xa90] sm:$0xff] }
  0xc7   : > { %3481 = vmatprep.subr.bf16.mxu0 %v4306_v0  ;;  %3563 = vmatprep.subr.bf16.mxu1 %v4308_v1  ;;  %v551_v63 = vld [vmem:[%s4765_s16 + $0xad0] sm:$0xff]  ;;  %v544_v0 = vld [vmem:[%s4765_s16 + $0xa98] sm:$0xff] }
  0xc8   : > { %v552_v1 = vld [vmem:[%s4765_s16 + $0xad8] sm:$0xff]  ;;  %v4434_v4 = vcombine.high %v543_v62, %v551_v63  ;;  %v4433_v10 = vcombine.low %v543_v62, %v551_v63 }
  0xc9   : > { %v4436_v5 = vcombine.high %v544_v0, %v552_v1  ;;  %v4435_v11 = vcombine.low %v544_v0, %v552_v1 }
  0xca   : > { %3482 = vmatpush1.bf16.msra.mxu0 %v4305_v6  ;;  %3564 = vmatpush1.bf16.msra.mxu1 %v4307_v7  ;;  %v559_v6 = vld [vmem:[%s4765_s16 + $0xb10] sm:$0xff] }
  0xcb   : > { %3483 = vmatprep.subr.bf16.mxu0 %v4322_v8  ;;  %3565 = vmatprep.subr.bf16.mxu1 %v4324_v9  ;;  %v567_v7 = vld [vmem:[%s4765_s16 + $0xb50] sm:$0xff]  ;;  %v560_v8 = vld [vmem:[%s4765_s16 + $0xb18] sm:$0xff] }
  0xcc   : > { %v568_v9 = vld [vmem:[%s4765_s16 + $0xb58] sm:$0xff]  ;;  %v4450_v13 = vcombine.high %v559_v6, %v567_v7  ;;  %v4449_v20 = vcombine.low %v559_v6, %v567_v7 }
  0xcd   : > { %v4452_v14 = vcombine.high %v560_v8, %v568_v9  ;;  %v4451_v21 = vcombine.low %v560_v8, %v568_v9 }
  0xce   : > { %3484 = vmatpush1.bf16.msra.mxu0 %v4321_v16  ;;  %3566 = vmatpush1.bf16.msra.mxu1 %v4323_v17  ;;  %v575_v16 = vld [vmem:[%s4765_s16 + $0xb90] sm:$0xff] }
  0xcf   : > { %3485 = vmatprep.subr.bf16.mxu0 %v4338_v18  ;;  %3567 = vmatprep.subr.bf16.mxu1 %v4340_v19  ;;  %v583_v17 = vld [vmem:[%s4765_s16 + $0xbd0] sm:$0xff]  ;;  %v576_v18 = vld [vmem:[%s4765_s16 + $0xb98] sm:$0xff] }
  0xd0   : > { %v584_v19 = vld [vmem:[%s4765_s16 + $0xbd8] sm:$0xff]  ;;  %v4466_v23 = vcombine.high %v575_v16, %v583_v17  ;;  %v4465_v29 = vcombine.low %v575_v16, %v583_v17 }
  0xd1   : > { %v4468_v24 = vcombine.high %v576_v18, %v584_v19  ;;  %v4467_v30 = vcombine.low %v576_v18, %v584_v19 }
  0xd2   : > { %3486 = vmatpush1.bf16.msra.mxu0 %v4337_v25  ;;  %3568 = vmatpush1.bf16.msra.mxu1 %v4339_v26  ;;  %v591_v25 = vld [vmem:[%s4765_s16 + $0xc10] sm:$0xff] }
  0xd3   : > { %3496 = vmatprep.subr.bf16.mxu0 %v4354_v27  ;;  %3578 = vmatprep.subr.bf16.mxu1 %v4356_v28  ;;  %v599_v26 = vld [vmem:[%s4765_s16 + $0xc50] sm:$0xff]  ;;  %v592_v27 = vld [vmem:[%s4765_s16 + $0xc18] sm:$0xff] }
  0xd4   : > { %v600_v28 = vld [vmem:[%s4765_s16 + $0xc58] sm:$0xff]  ;;  %v4482_v15 = vcombine.high %v591_v25, %v599_v26  ;;  %v4481_v36 = vcombine.low %v591_v25, %v599_v26 }
  0xd5   : > { %3488 = vmatmul.mubr.bf16.vlgmr.msra.gmra.mrb[4].mxu0 %v4854_v12  ;;  %3570 = vmatmul.mubr.bf16.vlgmr.msra.gmra.mrb[4].mxu1 %v4854_v12  ;;  %v4484_v31 = vcombine.high %v592_v27, %v600_v28  ;;  %v4483_v37 = vcombine.low %v592_v27, %v600_v28 }
  0xd6   : > { %3497 = vmatpush1.bf16.msra.mxu0 %v4353_v32  ;;  %3579 = vmatpush1.bf16.msra.mxu1 %v4355_v33  ;;  %v607_v32 = vld [vmem:[%s4765_s16 + $0xc90] sm:$0xff] }
  0xd7   : > { %3498 = vmatprep.subr.bf16.mxu0 %v4370_v34  ;;  %3580 = vmatprep.subr.bf16.mxu1 %v4372_v35  ;;  %v615_v33 = vld [vmem:[%s4765_s16 + $0xcd0] sm:$0xff]  ;;  %v608_v34 = vld [vmem:[%s4765_s16 + $0xc98] sm:$0xff] }
  0xd8   : > { %3528 = vmatprep.mubr.bf16.mxu0 %v4865_v53  ;;  %3610 = vmatprep.mubr.bf16.mxu1 %v4865_v53  ;;  %v616_v35 = vld [vmem:[%s4765_s16 + $0xcd8] sm:$0xff]  ;;  %v4498_v38 = vcombine.high %v607_v32, %v615_v33  ;;  %v4497_v44 = vcombine.low %v607_v32, %v615_v33 }
  0xd9   : > { %v4500_v39 = vcombine.high %v608_v34, %v616_v35  ;;  %v4499_v45 = vcombine.low %v608_v34, %v616_v35 }
  0xda   : > { %3499 = vmatpush1.bf16.msra.mxu0 %v4369_v40  ;;  %3581 = vmatpush1.bf16.msra.mxu1 %v4371_v41  ;;  %v623_v40 = vld [vmem:[%s4765_s16 + $0xd10] sm:$0xff] }
  0xdb   : > { %3500 = vmatprep.subr.bf16.mxu0 %v4386_v42  ;;  %3582 = vmatprep.subr.bf16.mxu1 %v4388_v43  ;;  %v631_v41 = vld [vmem:[%s4765_s16 + $0xd50] sm:$0xff]  ;;  %v624_v42 = vld [vmem:[%s4765_s16 + $0xd18] sm:$0xff] }
  0xdc   : > { %v632_v43 = vld [vmem:[%s4765_s16 + $0xd58] sm:$0xff]  ;;  %v4514_v46 = vcombine.high %v623_v40, %v631_v41  ;;  %v4513_v52 = vcombine.low %v623_v40, %v631_v41 }
  0xdd   : > { %v4516_v47 = vcombine.high %v624_v42, %v632_v43  ;;  %v4515_v54 = vcombine.low %v624_v42, %v632_v43 }
  0xde   : > { %3501 = vmatpush1.bf16.msra.mxu0 %v4385_v48  ;;  %3583 = vmatpush1.bf16.msra.mxu1 %v4387_v49  ;;  %v639_v48 = vld [vmem:[%s4765_s16 + $0xd90] sm:$0xff] }
  0xdf   : > { %3502 = vmatprep.subr.bf16.mxu0 %v4402_v50  ;;  %3584 = vmatprep.subr.bf16.mxu1 %v4404_v51  ;;  %v647_v49 = vld [vmem:[%s4765_s16 + $0xdd0] sm:$0xff]  ;;  %v640_v50 = vld [vmem:[%s4765_s16 + $0xd98] sm:$0xff] }
  0xe0   : > { %v648_v51 = vld [vmem:[%s4765_s16 + $0xdd8] sm:$0xff]  ;;  %v4530_v55 = vcombine.high %v639_v48, %v647_v49  ;;  %v4529_v62 = vcombine.low %v639_v48, %v647_v49 }
  0xe1   : > { %v4532_v56 = vcombine.high %v640_v50, %v648_v51  ;;  %v4531_v63 = vcombine.low %v640_v50, %v648_v51 }
  0xe2   : > { %3503 = vmatpush1.bf16.msra.mxu0 %v4401_v58  ;;  %3585 = vmatpush1.bf16.msra.mxu1 %v4403_v59  ;;  %v655_v58 = vld [vmem:[%s4765_s16 + $0xe10] sm:$0xff] }
  0xe3   : > { %3504 = vmatprep.subr.bf16.mxu0 %v4418_v60  ;;  %3586 = vmatprep.subr.bf16.mxu1 %v4420_v61  ;;  %v663_v59 = vld [vmem:[%s4765_s16 + $0xe50] sm:$0xff]  ;;  %v656_v60 = vld [vmem:[%s4765_s16 + $0xe18] sm:$0xff] }
  0xe4   : > { %v664_v61 = vld [vmem:[%s4765_s16 + $0xe58] sm:$0xff]  ;;  %v4546_v0 = vcombine.high %v655_v58, %v663_v59  ;;  %v4545_v6 = vcombine.low %v655_v58, %v663_v59 }
  0xe5   : > { %v4548_v1 = vcombine.high %v656_v60, %v664_v61  ;;  %v4547_v7 = vcombine.low %v656_v60, %v664_v61 }
  0xe6   : > { %3505 = vmatpush1.bf16.msra.mxu0 %v4417_v2  ;;  %3587 = vmatpush1.bf16.msra.mxu1 %v4419_v3  ;;  %v671_v2 = vld [vmem:[%s4765_s16 + $0xe90] sm:$0xff] }
  0xe7   : > { %3506 = vmatprep.subr.bf16.mxu0 %v4434_v4  ;;  %3588 = vmatprep.subr.bf16.mxu1 %v4436_v5  ;;  %v679_v3 = vld [vmem:[%s4765_s16 + $0xed0] sm:$0xff]  ;;  %v672_v4 = vld [vmem:[%s4765_s16 + $0xe98] sm:$0xff] }
  0xe8   : > { %v680_v5 = vld [vmem:[%s4765_s16 + $0xed8] sm:$0xff]  ;;  %v4562_v8 = vcombine.high %v671_v2, %v679_v3  ;;  %v4561_v16 = vcombine.low %v671_v2, %v679_v3 }
  0xe9   : > { %v4564_v9 = vcombine.high %v672_v4, %v680_v5  ;;  %v4563_v17 = vcombine.low %v672_v4, %v680_v5 }
  0xea   : > { %3507 = vmatpush1.bf16.msra.mxu0 %v4433_v10  ;;  %3589 = vmatpush1.bf16.msra.mxu1 %v4435_v11  ;;  %v687_v10 = vld [vmem:[%s4765_s16 + $0xf10] sm:$0xff] }
  0xeb   : > { %3508 = vmatprep.subr.bf16.mxu0 %v4450_v13  ;;  %3590 = vmatprep.subr.bf16.mxu1 %v4452_v14  ;;  %v695_v11 = vld [vmem:[%s4765_s16 + $0xf50] sm:$0xff]  ;;  %v688_v13 = vld [vmem:[%s4765_s16 + $0xf18] sm:$0xff] }
  0xec   : > { %v696_v14 = vld [vmem:[%s4765_s16 + $0xf58] sm:$0xff]  ;;  %v4578_v18 = vcombine.high %v687_v10, %v695_v11  ;;  %v4577_v25 = vcombine.low %v687_v10, %v695_v11 }
  0xed   : > { %v4580_v19 = vcombine.high %v688_v13, %v696_v14  ;;  %v4579_v26 = vcombine.low %v688_v13, %v696_v14 }
  0xee   : > { %3509 = vmatpush1.bf16.msra.mxu0 %v4449_v20  ;;  %3591 = vmatpush1.bf16.msra.mxu1 %v4451_v21  ;;  %v703_v20 = vld [vmem:[%s4765_s16 + $0xf90] sm:$0xff] }
  0xef   : > { %3510 = vmatprep.subr.bf16.mxu0 %v4466_v23  ;;  %3592 = vmatprep.subr.bf16.mxu1 %v4468_v24  ;;  %v711_v21 = vld [vmem:[%s4765_s16 + $0xfd0] sm:$0xff]  ;;  %v704_v23 = vld [vmem:[%s4765_s16 + $0xf98] sm:$0xff] }
  0xf0   : > { %v712_v24 = vld [vmem:[%s4765_s16 + $0xfd8] sm:$0xff]  ;;  %v4594_v27 = vcombine.high %v703_v20, %v711_v21  ;;  %v4593_v32 = vcombine.low %v703_v20, %v711_v21 }
  0xf1   : > { %v4596_v28 = vcombine.high %v704_v23, %v712_v24  ;;  %v4595_v33 = vcombine.low %v704_v23, %v712_v24 }
  0xf2   : > { %3511 = vmatpush1.bf16.msra.mxu0 %v4465_v29  ;;  %3593 = vmatpush1.bf16.msra.mxu1 %v4467_v30  ;;  %v209_v29 = vld [vmem:[%s4765_s16 + $0x20] sm:$0xff] }
  0xf3   : > { %3512 = vmatprep.subr.bf16.mxu0 %v4482_v15  ;;  %3594 = vmatprep.subr.bf16.mxu1 %v4484_v31  ;;  %v217_v30 = vld [vmem:[%s4765_s16 + $0x60] sm:$0xff]  ;;  %v210_v15 = vld [vmem:[%s4765_s16 + $0x28] sm:$0xff] }
  0xf4   : > { %v218_v31 = vld [vmem:[%s4765_s16 + $0x68] sm:$0xff]  ;;  %v4102_v34 = vcombine.high %v209_v29, %v217_v30  ;;  %v4101_v40 = vcombine.low %v209_v29, %v217_v30 }
  0xf5   : > { %v4104_v35 = vcombine.high %v210_v15, %v218_v31  ;;  %v4103_v41 = vcombine.low %v210_v15, %v218_v31 }
  0xf6   : > { %3513 = vmatpush1.bf16.msra.mxu0 %v4481_v36  ;;  %3595 = vmatpush1.bf16.msra.mxu1 %v4483_v37  ;;  %v225_v36 = vld [vmem:[%s4765_s16 + $0xa0] sm:$0xff] }
  0xf7   : > { %3514 = vmatprep.subr.bf16.mxu0 %v4498_v38  ;;  %3596 = vmatprep.subr.bf16.mxu1 %v4500_v39  ;;  %v233_v37 = vld [vmem:[%s4765_s16 + $0xe0] sm:$0xff]  ;;  %v226_v38 = vld [vmem:[%s4765_s16 + $0xa8] sm:$0xff] }
  0xf8   : > { %v234_v39 = vld [vmem:[%s4765_s16 + $0xe8] sm:$0xff]  ;;  %v4118_v42 = vcombine.high %v225_v36, %v233_v37  ;;  %v4117_v48 = vcombine.low %v225_v36, %v233_v37 }
  0xf9   : > { %v4120_v43 = vcombine.high %v226_v38, %v234_v39  ;;  %v4119_v49 = vcombine.low %v226_v38, %v234_v39 }
  0xfa   : > { %3515 = vmatpush1.bf16.msra.mxu0 %v4497_v44  ;;  %3597 = vmatpush1.bf16.msra.mxu1 %v4499_v45  ;;  %v241_v44 = vld [vmem:[%s4765_s16 + $0x120] sm:$0xff] }
  0xfb   : > { %3516 = vmatprep.subr.bf16.mxu0 %v4514_v46  ;;  %3598 = vmatprep.subr.bf16.mxu1 %v4516_v47  ;;  %v249_v45 = vld [vmem:[%s4765_s16 + $0x160] sm:$0xff]  ;;  %v242_v46 = vld [vmem:[%s4765_s16 + $0x128] sm:$0xff] }
  0xfc   : > { %v250_v47 = vld [vmem:[%s4765_s16 + $0x168] sm:$0xff]  ;;  %v4134_v50 = vcombine.high %v241_v44, %v249_v45  ;;  %v4133_v58 = vcombine.low %v241_v44, %v249_v45 }
  0xfd   : > { %v4136_v51 = vcombine.high %v242_v46, %v250_v47  ;;  %v4135_v59 = vcombine.low %v242_v46, %v250_v47 }
  0xfe   : > { %3517 = vmatpush1.bf16.msra.mxu0 %v4513_v52  ;;  %3599 = vmatpush1.bf16.msra.mxu1 %v4515_v54  ;;  %v257_v52 = vld [vmem:[%s4765_s16 + $0x1a0] sm:$0xff] }
  0xff   : > { %3518 = vmatprep.subr.bf16.mxu0 %v4530_v55  ;;  %3600 = vmatprep.subr.bf16.mxu1 %v4532_v56  ;;  %v265_v54 = vld [vmem:[%s4765_s16 + $0x1e0] sm:$0xff]  ;;  %v258_v55 = vld [vmem:[%s4765_s16 + $0x1a8] sm:$0xff] }
 0x100   : > { %v266_v56 = vld [vmem:[%s4765_s16 + $0x1e8] sm:$0xff]  ;;  %v4150_v60 = vcombine.high %v257_v52, %v265_v54  ;;  %v4149_v2 = vcombine.low %v257_v52, %v265_v54 }
 0x101   : > { %v4152_v61 = vcombine.high %v258_v55, %v266_v56  ;;  %v4151_v3 = vcombine.low %v258_v55, %v266_v56 }
 0x102   : > { %3519 = vmatpush1.bf16.msra.mxu0 %v4529_v62  ;;  %3601 = vmatpush1.bf16.msra.mxu1 %v4531_v63  ;;  %v273_v62 = vld [vmem:[%s4765_s16 + $0x220] sm:$0xff] }
 0x103   : > { %3520 = vmatprep.subr.bf16.mxu0 %v4546_v0  ;;  %3602 = vmatprep.subr.bf16.mxu1 %v4548_v1  ;;  %v281_v63 = vld [vmem:[%s4765_s16 + $0x260] sm:$0xff]  ;;  %v274_v0 = vld [vmem:[%s4765_s16 + $0x228] sm:$0xff] }
 0x104   : > { %v282_v1 = vld [vmem:[%s4765_s16 + $0x268] sm:$0xff]  ;;  %v4166_v4 = vcombine.high %v273_v62, %v281_v63  ;;  %v4165_v10 = vcombine.low %v273_v62, %v281_v63 }
 0x105   : > { %v4168_v5 = vcombine.high %v274_v0, %v282_v1  ;;  %v4167_v11 = vcombine.low %v274_v0, %v282_v1 }
 0x106   : > { %3521 = vmatpush1.bf16.msra.mxu0 %v4545_v6  ;;  %3603 = vmatpush1.bf16.msra.mxu1 %v4547_v7  ;;  %v289_v6 = vld [vmem:[%s4765_s16 + $0x2a0] sm:$0xff] }
 0x107   : > { %3522 = vmatprep.subr.bf16.mxu0 %v4562_v8  ;;  %3604 = vmatprep.subr.bf16.mxu1 %v4564_v9  ;;  %v297_v7 = vld [vmem:[%s4765_s16 + $0x2e0] sm:$0xff]  ;;  %v290_v8 = vld [vmem:[%s4765_s16 + $0x2a8] sm:$0xff] }
 0x108   : > { %v298_v9 = vld [vmem:[%s4765_s16 + $0x2e8] sm:$0xff]  ;;  %v4182_v13 = vcombine.high %v289_v6, %v297_v7  ;;  %v4181_v20 = vcombine.low %v289_v6, %v297_v7 }
 0x109   : > { %v4184_v14 = vcombine.high %v290_v8, %v298_v9  ;;  %v4183_v21 = vcombine.low %v290_v8, %v298_v9 }
 0x10a   : > { %3523 = vmatpush1.bf16.msra.mxu0 %v4561_v16  ;;  %3605 = vmatpush1.bf16.msra.mxu1 %v4563_v17  ;;  %v305_v16 = vld [vmem:[%s4765_s16 + $0x320] sm:$0xff] }
 0x10b   : > { %3524 = vmatprep.subr.bf16.mxu0 %v4578_v18  ;;  %3606 = vmatprep.subr.bf16.mxu1 %v4580_v19  ;;  %v313_v17 = vld [vmem:[%s4765_s16 + $0x360] sm:$0xff]  ;;  %v306_v18 = vld [vmem:[%s4765_s16 + $0x328] sm:$0xff] }
 0x10c   : > { %v314_v19 = vld [vmem:[%s4765_s16 + $0x368] sm:$0xff]  ;;  %v4198_v23 = vcombine.high %v305_v16, %v313_v17  ;;  %v4197_v29 = vcombine.low %v305_v16, %v313_v17 }
 0x10d   : > { %v4200_v24 = vcombine.high %v306_v18, %v314_v19  ;;  %v4199_v30 = vcombine.low %v306_v18, %v314_v19 }
 0x10e   : > { %3525 = vmatpush1.bf16.msra.mxu0 %v4577_v25  ;;  %3607 = vmatpush1.bf16.msra.mxu1 %v4579_v26  ;;  %v321_v25 = vld [vmem:[%s4765_s16 + $0x3a0] sm:$0xff] }
 0x10f   : > { %3526 = vmatprep.subr.bf16.mxu0 %v4594_v27  ;;  %3608 = vmatprep.subr.bf16.mxu1 %v4596_v28  ;;  %v329_v26 = vld [vmem:[%s4765_s16 + $0x3e0] sm:$0xff]  ;;  %v322_v27 = vld [vmem:[%s4765_s16 + $0x3a8] sm:$0xff] }
 0x110   : > { %v330_v28 = vld [vmem:[%s4765_s16 + $0x3e8] sm:$0xff]  ;;  %v4214_v15 = vcombine.high %v321_v25, %v329_v26  ;;  %v4213_v36 = vcombine.low %v321_v25, %v329_v26 }
 0x111   : > { %v4216_v31 = vcombine.high %v322_v27, %v330_v28  ;;  %v4215_v37 = vcombine.low %v322_v27, %v330_v28 }
 0x112   : > { %3527 = vmatpush1.bf16.msra.mxu0 %v4593_v32  ;;  %3609 = vmatpush1.bf16.msra.mxu1 %v4595_v33  ;;  %v337_v32 = vld [vmem:[%s4765_s16 + $0x420] sm:$0xff] }
 0x113   : > { %3619 = vmatprep.subr.bf16.mxu0 %v4102_v34  ;;  %3701 = vmatprep.subr.bf16.mxu1 %v4104_v35  ;;  %v345_v33 = vld [vmem:[%s4765_s16 + $0x460] sm:$0xff]  ;;  %v338_v34 = vld [vmem:[%s4765_s16 + $0x428] sm:$0xff] }
 0x114   : > { %v346_v35 = vld [vmem:[%s4765_s16 + $0x468] sm:$0xff]  ;;  %v4230_v38 = vcombine.high %v337_v32, %v345_v33  ;;  %v4229_v44 = vcombine.low %v337_v32, %v345_v33 }
 0x115   : > { %3529 = vmatmul.mubr.bf16.vlgmr.msra.gmra.mrb[4].mxu0 %v4933_v22  ;;  %3611 = vmatmul.mubr.bf16.vlgmr.msra.gmra.mrb[4].mxu1 %v4933_v22  ;;  %v4232_v39 = vcombine.high %v338_v34, %v346_v35  ;;  %v4231_v45 = vcombine.low %v338_v34, %v346_v35 }
 0x116   : > { %3620 = vmatpush1.bf16.msra.mxu0 %v4101_v40  ;;  %3702 = vmatpush1.bf16.msra.mxu1 %v4103_v41  ;;  %v353_v40 = vld [vmem:[%s4765_s16 + $0x4a0] sm:$0xff] }
 0x117   : > { %3621 = vmatprep.subr.bf16.mxu0 %v4118_v42  ;;  %3703 = vmatprep.subr.bf16.mxu1 %v4120_v43  ;;  %v361_v41 = vld [vmem:[%s4765_s16 + $0x4e0] sm:$0xff]  ;;  %v354_v42 = vld [vmem:[%s4765_s16 + $0x4a8] sm:$0xff] }
 0x118   : > { %3651 = vmatprep.mubr.bf16.mxu0 %v4808_v57  ;;  %3733 = vmatprep.mubr.bf16.mxu1 %v4808_v57  ;;  %v362_v43 = vld [vmem:[%s4765_s16 + $0x4e8] sm:$0xff]  ;;  %v4246_v46 = vcombine.high %v353_v40, %v361_v41  ;;  %v4245_v52 = vcombine.low %v353_v40, %v361_v41 }
 0x119   : > { %v4248_v47 = vcombine.high %v354_v42, %v362_v43  ;;  %v4247_v54 = vcombine.low %v354_v42, %v362_v43 }
 0x11a   : > { %3622 = vmatpush1.bf16.msra.mxu0 %v4117_v48  ;;  %3704 = vmatpush1.bf16.msra.mxu1 %v4119_v49  ;;  %v369_v48 = vld [vmem:[%s4765_s16 + $0x520] sm:$0xff] }
 0x11b   : > { %3623 = vmatprep.subr.bf16.mxu0 %v4134_v50  ;;  %3705 = vmatprep.subr.bf16.mxu1 %v4136_v51  ;;  %v377_v49 = vld [vmem:[%s4765_s16 + $0x560] sm:$0xff]  ;;  %v370_v50 = vld [vmem:[%s4765_s16 + $0x528] sm:$0xff] }
 0x11c   : > { %v378_v51 = vld [vmem:[%s4765_s16 + $0x568] sm:$0xff]  ;;  %v4262_v55 = vcombine.high %v369_v48, %v377_v49  ;;  %v4261_v62 = vcombine.low %v369_v48, %v377_v49 }
 0x11d   : > { %v4264_v56 = vcombine.high %v370_v50, %v378_v51  ;;  %v4263_v63 = vcombine.low %v370_v50, %v378_v51 }
 0x11e   : > { %3624 = vmatpush1.bf16.msra.mxu0 %v4133_v58  ;;  %3706 = vmatpush1.bf16.msra.mxu1 %v4135_v59  ;;  %v385_v58 = vld [vmem:[%s4765_s16 + $0x5a0] sm:$0xff] }
 0x11f   : > { %3625 = vmatprep.subr.bf16.mxu0 %v4150_v60  ;;  %3707 = vmatprep.subr.bf16.mxu1 %v4152_v61  ;;  %v393_v59 = vld [vmem:[%s4765_s16 + $0x5e0] sm:$0xff]  ;;  %v386_v60 = vld [vmem:[%s4765_s16 + $0x5a8] sm:$0xff] }
 0x120   : > { %v394_v61 = vld [vmem:[%s4765_s16 + $0x5e8] sm:$0xff]  ;;  %v4278_v0 = vcombine.high %v385_v58, %v393_v59  ;;  %v4277_v6 = vcombine.low %v385_v58, %v393_v59 }
 0x121   : > { %v4280_v1 = vcombine.high %v386_v60, %v394_v61  ;;  %v4279_v7 = vcombine.low %v386_v60, %v394_v61 }
 0x122   : > { %3626 = vmatpush1.bf16.msra.mxu0 %v4149_v2  ;;  %3708 = vmatpush1.bf16.msra.mxu1 %v4151_v3  ;;  %v401_v2 = vld [vmem:[%s4765_s16 + $0x620] sm:$0xff] }
 0x123   : > { %3627 = vmatprep.subr.bf16.mxu0 %v4166_v4  ;;  %3709 = vmatprep.subr.bf16.mxu1 %v4168_v5  ;;  %v409_v3 = vld [vmem:[%s4765_s16 + $0x660] sm:$0xff]  ;;  %v402_v4 = vld [vmem:[%s4765_s16 + $0x628] sm:$0xff] }
 0x124   : > { %v410_v5 = vld [vmem:[%s4765_s16 + $0x668] sm:$0xff]  ;;  %v4294_v8 = vcombine.high %v401_v2, %v409_v3  ;;  %v4293_v16 = vcombine.low %v401_v2, %v409_v3 }
 0x125   : > { %v4296_v9 = vcombine.high %v402_v4, %v410_v5  ;;  %v4295_v17 = vcombine.low %v402_v4, %v410_v5 }
 0x126   : > { %3628 = vmatpush1.bf16.msra.mxu0 %v4165_v10  ;;  %3710 = vmatpush1.bf16.msra.mxu1 %v4167_v11  ;;  %v417_v10 = vld [vmem:[%s4765_s16 + $0x6a0] sm:$0xff] }
 0x127   : > { %3629 = vmatprep.subr.bf16.mxu0 %v4182_v13  ;;  %3711 = vmatprep.subr.bf16.mxu1 %v4184_v14  ;;  %v425_v11 = vld [vmem:[%s4765_s16 + $0x6e0] sm:$0xff]  ;;  %v418_v13 = vld [vmem:[%s4765_s16 + $0x6a8] sm:$0xff] }
 0x128   : > { %v426_v14 = vld [vmem:[%s4765_s16 + $0x6e8] sm:$0xff]  ;;  %v4310_v18 = vcombine.high %v417_v10, %v425_v11  ;;  %v4309_v25 = vcombine.low %v417_v10, %v425_v11 }
 0x129   : > { %v4312_v19 = vcombine.high %v418_v13, %v426_v14  ;;  %v4311_v26 = vcombine.low %v418_v13, %v426_v14 }
 0x12a   : > { %3630 = vmatpush1.bf16.msra.mxu0 %v4181_v20  ;;  %3712 = vmatpush1.bf16.msra.mxu1 %v4183_v21  ;;  %v433_v20 = vld [vmem:[%s4765_s16 + $0x720] sm:$0xff] }
 0x12b   : > { %3631 = vmatprep.subr.bf16.mxu0 %v4198_v23  ;;  %3713 = vmatprep.subr.bf16.mxu1 %v4200_v24  ;;  %v441_v21 = vld [vmem:[%s4765_s16 + $0x760] sm:$0xff]  ;;  %v434_v23 = vld [vmem:[%s4765_s16 + $0x728] sm:$0xff] }
 0x12c   : > { %v442_v24 = vld [vmem:[%s4765_s16 + $0x768] sm:$0xff]  ;;  %v4326_v27 = vcombine.high %v433_v20, %v441_v21  ;;  %v4325_v32 = vcombine.low %v433_v20, %v441_v21 }
 0x12d   : > { %v4328_v28 = vcombine.high %v434_v23, %v442_v24  ;;  %v4327_v33 = vcombine.low %v434_v23, %v442_v24 }
 0x12e   : > { %3632 = vmatpush1.bf16.msra.mxu0 %v4197_v29  ;;  %3714 = vmatpush1.bf16.msra.mxu1 %v4199_v30  ;;  %v449_v29 = vld [vmem:[%s4765_s16 + $0x7a0] sm:$0xff] }
 0x12f   : > { %3633 = vmatprep.subr.bf16.mxu0 %v4214_v15  ;;  %3715 = vmatprep.subr.bf16.mxu1 %v4216_v31  ;;  %v457_v30 = vld [vmem:[%s4765_s16 + $0x7e0] sm:$0xff]  ;;  %v450_v15 = vld [vmem:[%s4765_s16 + $0x7a8] sm:$0xff] }
 0x130   : > { %v458_v31 = vld [vmem:[%s4765_s16 + $0x7e8] sm:$0xff]  ;;  %v4342_v34 = vcombine.high %v449_v29, %v457_v30  ;;  %v4341_v40 = vcombine.low %v449_v29, %v457_v30 }
 0x131   : > { %v4344_v35 = vcombine.high %v450_v15, %v458_v31  ;;  %v4343_v41 = vcombine.low %v450_v15, %v458_v31 }
 0x132   : > { %3634 = vmatpush1.bf16.msra.mxu0 %v4213_v36  ;;  %3716 = vmatpush1.bf16.msra.mxu1 %v4215_v37  ;;  %v465_v36 = vld [vmem:[%s4765_s16 + $0x820] sm:$0xff] }
 0x133   : > { %3635 = vmatprep.subr.bf16.mxu0 %v4230_v38  ;;  %3717 = vmatprep.subr.bf16.mxu1 %v4232_v39  ;;  %v473_v37 = vld [vmem:[%s4765_s16 + $0x860] sm:$0xff]  ;;  %v466_v38 = vld [vmem:[%s4765_s16 + $0x828] sm:$0xff] }
 0x134   : > { %v474_v39 = vld [vmem:[%s4765_s16 + $0x868] sm:$0xff]  ;;  %v4358_v42 = vcombine.high %v465_v36, %v473_v37  ;;  %v4357_v48 = vcombine.low %v465_v36, %v473_v37 }
 0x135   : > { %v4360_v43 = vcombine.high %v466_v38, %v474_v39  ;;  %v4359_v49 = vcombine.low %v466_v38, %v474_v39  ;;  %v578_v37 = vld [vmem:[%s4765_s16 + $0xba8] sm:$0xff] }
 0x136   : > { %3636 = vmatpush1.bf16.msra.mxu0 %v4229_v44  ;;  %3718 = vmatpush1.bf16.msra.mxu1 %v4231_v45  ;;  %v481_v44 = vld [vmem:[%s4765_s16 + $0x8a0] sm:$0xff]  ;;  %v586_v38 = vld [vmem:[%s4765_s16 + $0xbe8] sm:$0xff] }
 0x137   : > { %3637 = vmatprep.subr.bf16.mxu0 %v4246_v46  ;;  %3719 = vmatprep.subr.bf16.mxu1 %v4248_v47  ;;  %v489_v45 = vld [vmem:[%s4765_s16 + $0x8e0] sm:$0xff]  ;;  %v482_v46 = vld [vmem:[%s4765_s16 + $0x8a8] sm:$0xff] }
 0x138   : > { %v490_v47 = vld [vmem:[%s4765_s16 + $0x8e8] sm:$0xff]  ;;  %v4374_v50 = vcombine.high %v481_v44, %v489_v45  ;;  %v4373_v58 = vcombine.low %v481_v44, %v489_v45 }
 0x139   : > { %v4376_v51 = vcombine.high %v482_v46, %v490_v47  ;;  %v4375_v59 = vcombine.low %v482_v46, %v490_v47  ;;  %v4472_v47 = vcombine.high %v578_v37, %v586_v38 }
 0x13a   : > { %3638 = vmatpush1.bf16.msra.mxu0 %v4245_v52  ;;  %3720 = vmatpush1.bf16.msra.mxu1 %v4247_v54  ;;  %v497_v52 = vld [vmem:[%s4765_s16 + $0x920] sm:$0xff] }
 0x13b   : > { %3639 = vmatprep.subr.bf16.mxu0 %v4262_v55  ;;  %3721 = vmatprep.subr.bf16.mxu1 %v4264_v56  ;;  %v505_v54 = vld [vmem:[%s4765_s16 + $0x960] sm:$0xff]  ;;  %v498_v55 = vld [vmem:[%s4765_s16 + $0x928] sm:$0xff] }
 0x13c   : > { %v506_v56 = vld [vmem:[%s4765_s16 + $0x968] sm:$0xff]  ;;  %v4390_v60 = vcombine.high %v497_v52, %v505_v54  ;;  %v4389_v2 = vcombine.low %v497_v52, %v505_v54  ;;  %v4471_v54 = vcombine.low %v578_v37, %v586_v38 }
 0x13d   : > { %v4392_v61 = vcombine.high %v498_v55, %v506_v56  ;;  %v4391_v3 = vcombine.low %v498_v55, %v506_v56 }
 0x13e   : > { %3640 = vmatpush1.bf16.msra.mxu0 %v4261_v62  ;;  %3722 = vmatpush1.bf16.msra.mxu1 %v4263_v63  ;;  %v513_v62 = vld [vmem:[%s4765_s16 + $0x9a0] sm:$0xff] }
 0x13f   : > { %3641 = vmatprep.subr.bf16.mxu0 %v4278_v0  ;;  %3723 = vmatprep.subr.bf16.mxu1 %v4280_v1  ;;  %v521_v63 = vld [vmem:[%s4765_s16 + $0x9e0] sm:$0xff]  ;;  %v514_v0 = vld [vmem:[%s4765_s16 + $0x9a8] sm:$0xff] }
 0x140   : > { %v522_v1 = vld [vmem:[%s4765_s16 + $0x9e8] sm:$0xff]  ;;  %v4406_v4 = vcombine.high %v513_v62, %v521_v63  ;;  %v4405_v10 = vcombine.low %v513_v62, %v521_v63 }
 0x141   : > { %v4408_v5 = vcombine.high %v514_v0, %v522_v1  ;;  %v4407_v11 = vcombine.low %v514_v0, %v522_v1 }
 0x142   : > { %3642 = vmatpush1.bf16.msra.mxu0 %v4277_v6  ;;  %3724 = vmatpush1.bf16.msra.mxu1 %v4279_v7  ;;  %v529_v6 = vld [vmem:[%s4765_s16 + $0xa20] sm:$0xff] }
 0x143   : > { %3643 = vmatprep.subr.bf16.mxu0 %v4294_v8  ;;  %3725 = vmatprep.subr.bf16.mxu1 %v4296_v9  ;;  %v537_v7 = vld [vmem:[%s4765_s16 + $0xa60] sm:$0xff]  ;;  %v530_v8 = vld [vmem:[%s4765_s16 + $0xa28] sm:$0xff] }
 0x144   : > { %v538_v9 = vld [vmem:[%s4765_s16 + $0xa68] sm:$0xff]  ;;  %v4422_v13 = vcombine.high %v529_v6, %v537_v7  ;;  %v4421_v20 = vcombine.low %v529_v6, %v537_v7 }
 0x145   : > { %v4424_v14 = vcombine.high %v530_v8, %v538_v9  ;;  %v4423_v21 = vcombine.low %v530_v8, %v538_v9  ;;  %v626_v7 = vld [vmem:[%s4765_s16 + $0xd28] sm:$0xff] }
 0x146   : > { %3644 = vmatpush1.bf16.msra.mxu0 %v4293_v16  ;;  %3726 = vmatpush1.bf16.msra.mxu1 %v4295_v17  ;;  %v545_v16 = vld [vmem:[%s4765_s16 + $0xaa0] sm:$0xff]  ;;  %v634_v8 = vld [vmem:[%s4765_s16 + $0xd68] sm:$0xff] }
 0x147   : > { %3645 = vmatprep.subr.bf16.mxu0 %v4310_v18  ;;  %3727 = vmatprep.subr.bf16.mxu1 %v4312_v19  ;;  %v553_v17 = vld [vmem:[%s4765_s16 + $0xae0] sm:$0xff]  ;;  %v546_v18 = vld [vmem:[%s4765_s16 + $0xaa8] sm:$0xff] }
 0x148   : > { %v554_v19 = vld [vmem:[%s4765_s16 + $0xae8] sm:$0xff]  ;;  %v4438_v23 = vcombine.high %v545_v16, %v553_v17  ;;  %v4437_v29 = vcombine.low %v545_v16, %v553_v17  ;;  %v641_v16 = vld [vmem:[%s4765_s16 + $0xda0] sm:$0xff] }
 0x149   : > { %v4440_v24 = vcombine.high %v546_v18, %v554_v19  ;;  %v4439_v30 = vcombine.low %v546_v18, %v554_v19  ;;  %v649_v17 = vld [vmem:[%s4765_s16 + $0xde0] sm:$0xff]  ;;  %v642_v18 = vld [vmem:[%s4765_s16 + $0xda8] sm:$0xff] }
 0x14a   : > { %3646 = vmatpush1.bf16.msra.mxu0 %v4309_v25  ;;  %3728 = vmatpush1.bf16.msra.mxu1 %v4311_v26  ;;  %v561_v25 = vld [vmem:[%s4765_s16 + $0xb20] sm:$0xff]  ;;  %v650_v19 = vld [vmem:[%s4765_s16 + $0xde8] sm:$0xff] }
 0x14b   : > { %3647 = vmatprep.subr.bf16.mxu0 %v4326_v27  ;;  %3729 = vmatprep.subr.bf16.mxu1 %v4328_v28  ;;  %v569_v26 = vld [vmem:[%s4765_s16 + $0xb60] sm:$0xff]  ;;  %v562_v27 = vld [vmem:[%s4765_s16 + $0xb28] sm:$0xff] }
 0x14c   : > { %v570_v28 = vld [vmem:[%s4765_s16 + $0xb68] sm:$0xff]  ;;  %v4454_v15 = vcombine.high %v561_v25, %v569_v26 }
 0x14d   : > { %v4455_v44 = vcombine.low %v562_v27, %v570_v28 }
 0x14e   : > { %3648 = vmatpush1.bf16.msra.mxu0 %v4325_v32  ;;  %3730 = vmatpush1.bf16.msra.mxu1 %v4327_v33  ;;  %v4456_v32 = vcombine.high %v562_v27, %v570_v28  ;;  %v577_v33 = vld [vmem:[%s4765_s16 + $0xba0] sm:$0xff]  ;;  %v658_v27 = vld [vmem:[%s4765_s16 + $0xe28] sm:$0xff] }
 0x14f   : > { %3649 = vmatprep.subr.bf16.mxu0 %v4342_v34  ;;  %3731 = vmatprep.subr.bf16.mxu1 %v4344_v35  ;;  %v585_v34 = vld [vmem:[%s4765_s16 + $0xbe0] sm:$0xff]  ;;  %v666_v28 = vld [vmem:[%s4765_s16 + $0xe68] sm:$0xff] }
 0x150   : > { %v4470_v45 = vcombine.high %v577_v33, %v585_v34  ;;  %v4469_v52 = vcombine.low %v577_v33, %v585_v34  ;;  %v681_v33 = vld [vmem:[%s4765_s16 + $0xee0] sm:$0xff]  ;;  %v674_v34 = vld [vmem:[%s4765_s16 + $0xea8] sm:$0xff]  ;;  %v4551_v37 = vcombine.low %v658_v27, %v666_v28 }
 0x152   : > { %3650 = vmatpush1.bf16.msra.mxu0 %v4341_v40  ;;  %3732 = vmatpush1.bf16.msra.mxu1 %v4343_v41  ;;  %v4453_v41 = vcombine.low %v561_v25, %v569_v26  ;;  %v657_v25 = vld [vmem:[%s4765_s16 + $0xe20] sm:$0xff] }
 0x153   : > { %3660 = vmatprep.subr.bf16.mxu0 %v4358_v42  ;;  %3742 = vmatprep.subr.bf16.mxu1 %v4360_v43  ;;  %v665_v26 = vld [vmem:[%s4765_s16 + $0xe60] sm:$0xff] }
 0x155   : > { %3652 = vmatmul.mubr.bf16.vlgmr.msra.gmra.mrb[8].mxu0 %v4854_v12  ;;  %3734 = vmatmul.mubr.bf16.vlgmr.msra.gmra.mrb[8].mxu1 %v4854_v12 }
 0x156   : > { %3661 = vmatpush1.bf16.msra.mxu0 %v4357_v48  ;;  %3743 = vmatpush1.bf16.msra.mxu1 %v4359_v49  ;;  %v593_v48 = vld [vmem:[%s4765_s16 + $0xc20] sm:$0xff] }
 0x157   : > { %3662 = vmatprep.subr.bf16.mxu0 %v4374_v50  ;;  %3744 = vmatprep.subr.bf16.mxu1 %v4376_v51  ;;  %v601_v49 = vld [vmem:[%s4765_s16 + $0xc60] sm:$0xff]  ;;  %v594_v50 = vld [vmem:[%s4765_s16 + $0xc28] sm:$0xff] }
 0x158   : > { %3692 = vmatprep.mubr.bf16.mxu0 %v4865_v53  ;;  %3774 = vmatprep.mubr.bf16.mxu1 %v4865_v53  ;;  %v602_v51 = vld [vmem:[%s4765_s16 + $0xc68] sm:$0xff]  ;;  %v4486_v55 = vcombine.high %v593_v48, %v601_v49  ;;  %v4485_v62 = vcombine.low %v593_v48, %v601_v49  ;;  %v705_v48 = vld [vmem:[%s4765_s16 + $0xfa0] sm:$0xff] }
 0x159   : > { %v4488_v56 = vcombine.high %v594_v50, %v602_v51  ;;  %v4487_v0 = vcombine.low %v594_v50, %v602_v51  ;;  %v713_v49 = vld [vmem:[%s4765_s16 + $0xfe0] sm:$0xff]  ;;  %v706_v50 = vld [vmem:[%s4765_s16 + $0xfa8] sm:$0xff] }
 0x15a   : > { %3663 = vmatpush1.bf16.msra.mxu0 %v4373_v58  ;;  %3745 = vmatpush1.bf16.msra.mxu1 %v4375_v59  ;;  %v609_v58 = vld [vmem:[%s4765_s16 + $0xca0] sm:$0xff]  ;;  %v714_v51 = vld [vmem:[%s4765_s16 + $0xfe8] sm:$0xff] }
 0x15b   : > { %3664 = vmatprep.subr.bf16.mxu0 %v4390_v60  ;;  %3746 = vmatprep.subr.bf16.mxu1 %v4392_v61  ;;  %v617_v59 = vld [vmem:[%s4765_s16 + $0xce0] sm:$0xff]  ;;  %v610_v60 = vld [vmem:[%s4765_s16 + $0xca8] sm:$0xff] }
 0x15c   : > { %v618_v61 = vld [vmem:[%s4765_s16 + $0xce8] sm:$0xff]  ;;  %v4502_v1 = vcombine.high %v609_v58, %v617_v59 }
 0x15e   : > { %3665 = vmatpush1.bf16.msra.mxu0 %v4389_v2  ;;  %3747 = vmatpush1.bf16.msra.mxu1 %v4391_v3  ;;  %v4504_v3 = vcombine.high %v610_v60, %v618_v61 }
 0x15f   : > { %3666 = vmatprep.subr.bf16.mxu0 %v4406_v4  ;;  %3748 = vmatprep.subr.bf16.mxu1 %v4408_v5  ;;  %v625_v4 = vld [vmem:[%s4765_s16 + $0xd20] sm:$0xff] }
 0x160   : > { %v633_v5 = vld [vmem:[%s4765_s16 + $0xd60] sm:$0xff] }
 0x162   : > { %3667 = vmatpush1.bf16.msra.mxu0 %v4405_v10  ;;  %3749 = vmatpush1.bf16.msra.mxu1 %v4407_v11  ;;  %v4501_v10 = vcombine.low %v609_v58, %v617_v59  ;;  %v4503_v11 = vcombine.low %v610_v60, %v618_v61  ;;  %v211_v58 = vld [vmem:[%s4765_s16 + $0x30] sm:$0xff]  ;;  %v212_v60 = vld [vmem:[%s4765_s16 + $0x38] sm:$0xff] }
 0x163   : > { %3668 = vmatprep.subr.bf16.mxu0 %v4422_v13  ;;  %3750 = vmatprep.subr.bf16.mxu1 %v4424_v14  ;;  %v4518_v13 = vcombine.high %v625_v4, %v633_v5  ;;  %v4520_v14 = vcombine.high %v626_v7, %v634_v8  ;;  %v219_v59 = vld [vmem:[%s4765_s16 + $0x70] sm:$0xff]  ;;  %v220_v61 = vld [vmem:[%s4765_s16 + $0x78] sm:$0xff] }
 0x166   : > { %3669 = vmatpush1.bf16.msra.mxu0 %v4421_v20  ;;  %3751 = vmatpush1.bf16.msra.mxu1 %v4423_v21  ;;  %v4517_v20 = vcombine.low %v625_v4, %v633_v5  ;;  %v4519_v21 = vcombine.low %v626_v7, %v634_v8  ;;  %v228_v4 = vld [vmem:[%s4765_s16 + $0xb8] sm:$0xff]  ;;  %v4107_v7 = vcombine.low %v212_v60, %v220_v61 }
 0x167   : > { %3670 = vmatprep.subr.bf16.mxu0 %v4438_v23  ;;  %3752 = vmatprep.subr.bf16.mxu1 %v4440_v24  ;;  %v4534_v23 = vcombine.high %v641_v16, %v649_v17  ;;  %v4536_v24 = vcombine.high %v642_v18, %v650_v19  ;;  %v236_v5 = vld [vmem:[%s4765_s16 + $0xf8] sm:$0xff] }
 0x168   : > { %v3366_v31 = vpop.f32.mrb[0].mxu0  ;;  %v3448_v35 = vpop.f32.mrb[0].mxu1 }
 0x169   : > { %4670 = vtanh.f32 %v3366_v31  ;;  %v3368_v36 = vpop.f32.mrb[1].mxu0  ;;  %v3450_v39 = vpop.f32.mrb[1].mxu1  ;;  %v4552_v31 = vcombine.high %v658_v27, %v666_v28 }
 0x16a   : > { %4672 = vtanh.f32 %v3448_v35  ;;  %v3370_v40 = vpop.f32.mrb[2].mxu0  ;;  %3671 = vmatpush1.bf16.msra.mxu0 %v4437_v29  ;;  %v3452_v42 = vpop.f32.mrb[2].mxu1  ;;  %3753 = vmatpush1.bf16.msra.mxu1 %v4439_v30  ;;  %v4533_v29 = vcombine.low %v641_v16, %v649_v17  ;;  %v4535_v30 = vcombine.low %v642_v18, %v650_v19  ;;  %v682_v35 = vld [vmem:[%s4765_s16 + $0xee8] sm:$0xff]  ;;  %v4123_v17 = vcombine.low %v228_v4, %v236_v5 }
 0x16b   : > { %4674 = vtanh.f32 %v3368_v36  ;;  %v3371_v43 = vpop.f32.mrb[3].mxu0  ;;  %3672 = vmatprep.subr.bf16.mxu0 %v4454_v15  ;;  %v3453_v46 = vpop.f32.mrb[3].mxu1  ;;  %3754 = vmatprep.subr.bf16.mxu1 %v4456_v32  ;;  %v4550_v15 = vcombine.high %v657_v25, %v665_v26  ;;  %v673_v32 = vld [vmem:[%s4765_s16 + $0xea0] sm:$0xff]  ;;  %v4549_v36 = vcombine.low %v657_v25, %v665_v26  ;;  %v690_v42 = vld [vmem:[%s4765_s16 + $0xf28] sm:$0xff] }
 0x16c   : > { %4676 = vtanh.f32 %v3450_v39  ;;  %v4566_v38 = vcombine.high %v673_v32, %v681_v33  ;;  %v4568_v39 = vcombine.high %v674_v34, %v682_v35  ;;  %v689_v40 = vld [vmem:[%s4765_s16 + $0xf20] sm:$0xff]  ;;  %v698_v43 = vld [vmem:[%s4765_s16 + $0xf68] sm:$0xff] }
 0x16e   : > { %3673 = vmatpush1.bf16.msra.mxu0 %v4453_v41  ;;  %3755 = vmatpush1.bf16.msra.mxu1 %v4455_v44  ;;  %v697_v41 = vld [vmem:[%s4765_s16 + $0xf60] sm:$0xff]  ;;  %v4565_v44 = vcombine.low %v673_v32, %v681_v33 }
 0x16f   : > { %3674 = vmatprep.subr.bf16.mxu0 %v4470_v45  ;;  %3756 = vmatprep.subr.bf16.mxu1 %v4472_v47  ;;  %v4567_v45 = vcombine.low %v674_v34, %v682_v35  ;;  %v4582_v46 = vcombine.high %v689_v40, %v697_v41  ;;  %v4584_v47 = vcombine.high %v690_v42, %v698_v43  ;;  %v291_v35 = vld [vmem:[%s4765_s16 + $0x2b0] sm:$0xff] }
 0x172   : > { %3675 = vmatpush1.bf16.msra.mxu0 %v4469_v52  ;;  %3757 = vmatpush1.bf16.msra.mxu1 %v4471_v54  ;;  %v4581_v52 = vcombine.low %v689_v40, %v697_v41  ;;  %v4583_v54 = vcombine.low %v690_v42, %v698_v43  ;;  %v307_v43 = vld [vmem:[%s4765_s16 + $0x330] sm:$0xff] }
 0x173   : > { %v4671_v63 = vpop.eup %4670  ;;  %3676 = vmatprep.subr.bf16.mxu0 %v4486_v55  ;;  %3758 = vmatprep.subr.bf16.mxu1 %v4488_v56  ;;  %v4598_v55 = vcombine.high %v705_v48, %v713_v49  ;;  %v4600_v56 = vcombine.high %v706_v50, %v714_v51 }
 0x174   : > { %v4673_v2 = vpop.eup %4672  ;;  %3963 = vst [vmem:[%s5179_s24] sm:$0xff] %v4671_v63  ;;  %v4599_v63 = vcombine.low %v706_v50, %v714_v51  ;;  %v323_v51 = vld [vmem:[%s4765_s16 + $0x3b0] sm:$0xff] }
 0x175   : > { %v4675_v6 = vpop.eup %4674  ;;  %3965 = vst [vmem:[%s5179_s24 + $0x10] sm:$0xff] %v4673_v2  ;;  %v227_v2 = vld [vmem:[%s4765_s16 + $0xb0] sm:$0xff] }
 0x176   : > { %v4677_v9 = vpop.eup %4676  ;;  %3964 = vst [vmem:[%s5179_s24 + $0x8] sm:$0xff] %v4675_v6  ;;  %3677 = vmatpush1.bf16.msra.mxu0 %v4485_v62  ;;  %3759 = vmatpush1.bf16.msra.mxu1 %v4487_v0  ;;  %v4597_v62 = vcombine.low %v705_v48, %v713_v49  ;;  %v4106_v0 = vcombine.high %v211_v58, %v219_v59 }
 0x177   : > { %3966 = vst [vmem:[%s5179_s24 + $0x18] sm:$0xff] %v4677_v9  ;;  %3678 = vmatprep.subr.bf16.mxu0 %v4502_v1  ;;  %3760 = vmatprep.subr.bf16.mxu1 %v4504_v3  ;;  %v4108_v1 = vcombine.high %v212_v60, %v220_v61  ;;  %v235_v3 = vld [vmem:[%s4765_s16 + $0xf0] sm:$0xff]  ;;  %v4105_v6 = vcombine.low %v211_v58, %v219_v59 }
 0x178   : > { %v4122_v8 = vcombine.high %v227_v2, %v235_v3  ;;  %v4124_v9 = vcombine.high %v228_v4, %v236_v5  ;;  %v4121_v16 = vcombine.low %v227_v2, %v235_v3  ;;  %v339_v61 = vld [vmem:[%s4765_s16 + $0x430] sm:$0xff] }
 0x179   : > { %v355_v5 = vld [vmem:[%s4765_s16 + $0x4b0] sm:$0xff] }
 0x17a   : > { %3679 = vmatpush1.bf16.msra.mxu0 %v4501_v10  ;;  %3761 = vmatpush1.bf16.msra.mxu1 %v4503_v11  ;;  %v243_v10 = vld [vmem:[%s4765_s16 + $0x130] sm:$0xff] }
 0x17b   : > { %3680 = vmatprep.subr.bf16.mxu0 %v4518_v13  ;;  %3762 = vmatprep.subr.bf16.mxu1 %v4520_v14  ;;  %v251_v11 = vld [vmem:[%s4765_s16 + $0x170] sm:$0xff]  ;;  %v244_v13 = vld [vmem:[%s4765_s16 + $0x138] sm:$0xff] }
 0x17c   : > { %v252_v14 = vld [vmem:[%s4765_s16 + $0x178] sm:$0xff]  ;;  %v4138_v18 = vcombine.high %v243_v10, %v251_v11  ;;  %v4137_v25 = vcombine.low %v243_v10, %v251_v11 }
 0x17d   : > { %v4140_v19 = vcombine.high %v244_v13, %v252_v14  ;;  %v4139_v26 = vcombine.low %v244_v13, %v252_v14  ;;  %v371_v14 = vld [vmem:[%s4765_s16 + $0x530] sm:$0xff] }
 0x17e   : > { %3681 = vmatpush1.bf16.msra.mxu0 %v4517_v20  ;;  %3763 = vmatpush1.bf16.msra.mxu1 %v4519_v21  ;;  %v259_v20 = vld [vmem:[%s4765_s16 + $0x1b0] sm:$0xff] }
 0x17f   : > { %3682 = vmatprep.subr.bf16.mxu0 %v4534_v23  ;;  %3764 = vmatprep.subr.bf16.mxu1 %v4536_v24  ;;  %v267_v21 = vld [vmem:[%s4765_s16 + $0x1f0] sm:$0xff]  ;;  %v260_v23 = vld [vmem:[%s4765_s16 + $0x1b8] sm:$0xff] }
 0x180   : > { %v268_v24 = vld [vmem:[%s4765_s16 + $0x1f8] sm:$0xff]  ;;  %v4154_v27 = vcombine.high %v259_v20, %v267_v21  ;;  %v4153_v32 = vcombine.low %v259_v20, %v267_v21 }
 0x181   : > { %v4156_v28 = vcombine.high %v260_v23, %v268_v24 }
 0x182   : > { %3683 = vmatpush1.bf16.msra.mxu0 %v4533_v29  ;;  %3765 = vmatpush1.bf16.msra.mxu1 %v4535_v30  ;;  %v275_v29 = vld [vmem:[%s4765_s16 + $0x230] sm:$0xff] }
 0x183   : > { %3684 = vmatprep.subr.bf16.mxu0 %v4550_v15  ;;  %3766 = vmatprep.subr.bf16.mxu1 %v4552_v31  ;;  %v283_v30 = vld [vmem:[%s4765_s16 + $0x270] sm:$0xff]  ;;  %v276_v15 = vld [vmem:[%s4765_s16 + $0x238] sm:$0xff] }
 0x184   : > { %v284_v31 = vld [vmem:[%s4765_s16 + $0x278] sm:$0xff]  ;;  %v4170_v33 = vcombine.high %v275_v29, %v283_v30 }
 0x185   : > { %v4172_v34 = vcombine.high %v276_v15, %v284_v31  ;;  %v4171_v40 = vcombine.low %v276_v15, %v284_v31  ;;  %v403_v31 = vld [vmem:[%s4765_s16 + $0x630] sm:$0xff] }
 0x186   : > { %3685 = vmatpush1.bf16.msra.mxu0 %v4549_v36  ;;  %3767 = vmatpush1.bf16.msra.mxu1 %v4551_v37  ;;  %v299_v36 = vld [vmem:[%s4765_s16 + $0x2f0] sm:$0xff]  ;;  %v292_v37 = vld [vmem:[%s4765_s16 + $0x2b8] sm:$0xff] }
 0x187   : > { %3686 = vmatprep.subr.bf16.mxu0 %v4566_v38  ;;  %3768 = vmatprep.subr.bf16.mxu1 %v4568_v39  ;;  %v300_v38 = vld [vmem:[%s4765_s16 + $0x2f8] sm:$0xff]  ;;  %v4169_v39 = vcombine.low %v275_v29, %v283_v30  ;;  %v4186_v41 = vcombine.high %v291_v35, %v299_v36 }
 0x188   : > { %v4188_v42 = vcombine.high %v292_v37, %v300_v38  ;;  %v4187_v48 = vcombine.low %v292_v37, %v300_v38  ;;  %v419_v38 = vld [vmem:[%s4765_s16 + $0x6b0] sm:$0xff] }
 0x18a   : > { %3687 = vmatpush1.bf16.msra.mxu0 %v4565_v44  ;;  %3769 = vmatpush1.bf16.msra.mxu1 %v4567_v45  ;;  %v315_v44 = vld [vmem:[%s4765_s16 + $0x370] sm:$0xff]  ;;  %v308_v45 = vld [vmem:[%s4765_s16 + $0x338] sm:$0xff] }
 0x18b   : > { %3688 = vmatprep.subr.bf16.mxu0 %v4582_v46  ;;  %3770 = vmatprep.subr.bf16.mxu1 %v4584_v47  ;;  %v316_v46 = vld [vmem:[%s4765_s16 + $0x378] sm:$0xff]  ;;  %v4185_v47 = vcombine.low %v291_v35, %v299_v36  ;;  %v4202_v49 = vcombine.high %v307_v43, %v315_v44 }
 0x18c   : > { %v4204_v50 = vcombine.high %v308_v45, %v316_v46  ;;  %v4203_v58 = vcombine.low %v308_v45, %v316_v46  ;;  %v435_v46 = vld [vmem:[%s4765_s16 + $0x730] sm:$0xff] }
 0x18e   : > { %3689 = vmatpush1.bf16.msra.mxu0 %v4581_v52  ;;  %3771 = vmatpush1.bf16.msra.mxu1 %v4583_v54  ;;  %v331_v52 = vld [vmem:[%s4765_s16 + $0x3f0] sm:$0xff]  ;;  %v324_v54 = vld [vmem:[%s4765_s16 + $0x3b8] sm:$0xff] }
 0x18f   : > { %3690 = vmatprep.subr.bf16.mxu0 %v4598_v55  ;;  %3772 = vmatprep.subr.bf16.mxu1 %v4600_v56  ;;  %v332_v55 = vld [vmem:[%s4765_s16 + $0x3f8] sm:$0xff]  ;;  %v4201_v56 = vcombine.low %v307_v43, %v315_v44  ;;  %v4218_v59 = vcombine.high %v323_v51, %v331_v52 }
 0x190   : > { %v4220_v60 = vcombine.high %v324_v54, %v332_v55  ;;  %v4219_v2 = vcombine.low %v324_v54, %v332_v55  ;;  %v451_v55 = vld [vmem:[%s4765_s16 + $0x7b0] sm:$0xff] }
 0x192   : > { %3691 = vmatpush1.bf16.msra.mxu0 %v4597_v62  ;;  %3773 = vmatpush1.bf16.msra.mxu1 %v4599_v63  ;;  %v347_v62 = vld [vmem:[%s4765_s16 + $0x470] sm:$0xff]  ;;  %v340_v63 = vld [vmem:[%s4765_s16 + $0x438] sm:$0xff] }
 0x193   : > { %3783 = vmatprep.subr.bf16.mxu0 %v4106_v0  ;;  %3865 = vmatprep.subr.bf16.mxu1 %v4108_v1  ;;  %v348_v0 = vld [vmem:[%s4765_s16 + $0x478] sm:$0xff]  ;;  %v4217_v1 = vcombine.low %v323_v51, %v331_v52  ;;  %v4234_v3 = vcombine.high %v339_v61, %v347_v62 }
 0x194   : > { %v4236_v4 = vcombine.high %v340_v63, %v348_v0  ;;  %v4235_v10 = vcombine.low %v340_v63, %v348_v0  ;;  %v467_v0 = vld [vmem:[%s4765_s16 + $0x830] sm:$0xff] }
 0x195   : > { %3693 = vmatmul.mubr.bf16.vlgmr.msra.gmra.mrb[8].mxu0 %v4933_v22  ;;  %3775 = vmatmul.mubr.bf16.vlgmr.msra.gmra.mrb[8].mxu1 %v4933_v22 }
 0x196   : > { %3784 = vmatpush1.bf16.msra.mxu0 %v4105_v6  ;;  %3866 = vmatpush1.bf16.msra.mxu1 %v4107_v7  ;;  %v363_v6 = vld [vmem:[%s4765_s16 + $0x4f0] sm:$0xff]  ;;  %v356_v7 = vld [vmem:[%s4765_s16 + $0x4b8] sm:$0xff] }
 0x197   : > { %3785 = vmatprep.subr.bf16.mxu0 %v4122_v8  ;;  %3867 = vmatprep.subr.bf16.mxu1 %v4124_v9  ;;  %v364_v8 = vld [vmem:[%s4765_s16 + $0x4f8] sm:$0xff]  ;;  %v4233_v9 = vcombine.low %v339_v61, %v347_v62  ;;  %v4250_v11 = vcombine.high %v355_v5, %v363_v6 }
 0x198   : > { %3815 = vmatprep.mubr.bf16.mxu0 %v4808_v57  ;;  %3897 = vmatprep.mubr.bf16.mxu1 %v4808_v57  ;;  %v4155_v57 = vcombine.low %v260_v23, %v268_v24  ;;  %v4252_v13 = vcombine.high %v356_v7, %v364_v8  ;;  %v4251_v20 = vcombine.low %v356_v7, %v364_v8  ;;  %v387_v24 = vld [vmem:[%s4765_s16 + $0x5b0] sm:$0xff] }
 0x199   : > { %v483_v8 = vld [vmem:[%s4765_s16 + $0x8b0] sm:$0xff] }
 0x19a   : > { %3786 = vmatpush1.bf16.msra.mxu0 %v4121_v16  ;;  %3868 = vmatpush1.bf16.msra.mxu1 %v4123_v17  ;;  %v379_v16 = vld [vmem:[%s4765_s16 + $0x570] sm:$0xff]  ;;  %v372_v17 = vld [vmem:[%s4765_s16 + $0x538] sm:$0xff] }
 0x19b   : > { %3787 = vmatprep.subr.bf16.mxu0 %v4138_v18  ;;  %3869 = vmatprep.subr.bf16.mxu1 %v4140_v19  ;;  %v380_v18 = vld [vmem:[%s4765_s16 + $0x578] sm:$0xff]  ;;  %v4249_v19 = vcombine.low %v355_v5, %v363_v6  ;;  %v4266_v21 = vcombine.high %v371_v14, %v379_v16 }
 0x19c   : > { %v4268_v23 = vcombine.high %v372_v17, %v380_v18  ;;  %v4267_v29 = vcombine.low %v372_v17, %v380_v18  ;;  %v499_v18 = vld [vmem:[%s4765_s16 + $0x930] sm:$0xff] }
 0x19e   : > { %3788 = vmatpush1.bf16.msra.mxu0 %v4137_v25  ;;  %3870 = vmatpush1.bf16.msra.mxu1 %v4139_v26  ;;  %v395_v25 = vld [vmem:[%s4765_s16 + $0x5f0] sm:$0xff]  ;;  %v388_v26 = vld [vmem:[%s4765_s16 + $0x5b8] sm:$0xff] }
 0x19f   : > { %3789 = vmatprep.subr.bf16.mxu0 %v4154_v27  ;;  %3871 = vmatprep.subr.bf16.mxu1 %v4156_v28  ;;  %v396_v27 = vld [vmem:[%s4765_s16 + $0x5f8] sm:$0xff]  ;;  %v4265_v28 = vcombine.low %v371_v14, %v379_v16  ;;  %v4282_v30 = vcombine.high %v387_v24, %v395_v25 }
 0x1a0   : > { %v4284_v15 = vcombine.high %v388_v26, %v396_v27  ;;  %v4283_v35 = vcombine.low %v388_v26, %v396_v27  ;;  %v515_v27 = vld [vmem:[%s4765_s16 + $0x9b0] sm:$0xff] }
 0x1a2   : > { %3790 = vmatpush1.bf16.msra.mxu0 %v4153_v32  ;;  %3872 = vmatpush1.bf16.msra.mxu1 %v4155_v57  ;;  %v411_v32 = vld [vmem:[%s4765_s16 + $0x670] sm:$0xff]  ;;  %v404_v57 = vld [vmem:[%s4765_s16 + $0x638] sm:$0xff] }
 0x1a3   : > { %3791 = vmatprep.subr.bf16.mxu0 %v4170_v33  ;;  %3873 = vmatprep.subr.bf16.mxu1 %v4172_v34  ;;  %v412_v33 = vld [vmem:[%s4765_s16 + $0x678] sm:$0xff]  ;;  %v4281_v34 = vcombine.low %v387_v24, %v395_v25  ;;  %v4298_v36 = vcombine.high %v403_v31, %v411_v32 }
 0x1a4   : > { %v4300_v37 = vcombine.high %v404_v57, %v412_v33  ;;  %v4299_v43 = vcombine.low %v404_v57, %v412_v33  ;;  %v531_v57 = vld [vmem:[%s4765_s16 + $0xa30] sm:$0xff] }
 0x1a5   : > { %v539_v33 = vld [vmem:[%s4765_s16 + $0xa70] sm:$0xff] }
 0x1a6   : > { %3792 = vmatpush1.bf16.msra.mxu0 %v4169_v39  ;;  %3874 = vmatpush1.bf16.msra.mxu1 %v4171_v40  ;;  %v427_v39 = vld [vmem:[%s4765_s16 + $0x6f0] sm:$0xff]  ;;  %v420_v40 = vld [vmem:[%s4765_s16 + $0x6b8] sm:$0xff] }
 0x1a7   : > { %3793 = vmatprep.subr.bf16.mxu0 %v4186_v41  ;;  %3875 = vmatprep.subr.bf16.mxu1 %v4188_v42  ;;  %v428_v41 = vld [vmem:[%s4765_s16 + $0x6f8] sm:$0xff]  ;;  %v4297_v42 = vcombine.low %v403_v31, %v411_v32  ;;  %v4314_v44 = vcombine.high %v419_v38, %v427_v39 }
 0x1a8   : > { %v4316_v45 = vcombine.high %v420_v40, %v428_v41  ;;  %v4315_v51 = vcombine.low %v420_v40, %v428_v41  ;;  %v555_v40 = vld [vmem:[%s4765_s16 + $0xaf0] sm:$0xff]  ;;  %v548_v41 = vld [vmem:[%s4765_s16 + $0xab8] sm:$0xff] }
 0x1aa   : > { %3794 = vmatpush1.bf16.msra.mxu0 %v4185_v47  ;;  %3876 = vmatpush1.bf16.msra.mxu1 %v4187_v48  ;;  %v443_v47 = vld [vmem:[%s4765_s16 + $0x770] sm:$0xff]  ;;  %v436_v48 = vld [vmem:[%s4765_s16 + $0x738] sm:$0xff] }
 0x1ab   : > { %3795 = vmatprep.subr.bf16.mxu0 %v4202_v49  ;;  %3877 = vmatprep.subr.bf16.mxu1 %v4204_v50  ;;  %v444_v49 = vld [vmem:[%s4765_s16 + $0x778] sm:$0xff]  ;;  %v4313_v50 = vcombine.low %v419_v38, %v427_v39  ;;  %v4330_v52 = vcombine.high %v435_v46, %v443_v47  ;;  %v547_v39 = vld [vmem:[%s4765_s16 + $0xab0] sm:$0xff] }
 0x1ac   : > { %v4332_v54 = vcombine.high %v436_v48, %v444_v49  ;;  %v4331_v61 = vcombine.low %v436_v48, %v444_v49  ;;  %v571_v48 = vld [vmem:[%s4765_s16 + $0xb70] sm:$0xff]  ;;  %v564_v49 = vld [vmem:[%s4765_s16 + $0xb38] sm:$0xff] }
 0x1ae   : > { %3796 = vmatpush1.bf16.msra.mxu0 %v4201_v56  ;;  %3878 = vmatpush1.bf16.msra.mxu1 %v4203_v58  ;;  %v459_v56 = vld [vmem:[%s4765_s16 + $0x7f0] sm:$0xff]  ;;  %v452_v58 = vld [vmem:[%s4765_s16 + $0x7b8] sm:$0xff] }
 0x1af   : > { %3797 = vmatprep.subr.bf16.mxu0 %v4218_v59  ;;  %3879 = vmatprep.subr.bf16.mxu1 %v4220_v60  ;;  %v460_v59 = vld [vmem:[%s4765_s16 + $0x7f8] sm:$0xff]  ;;  %v4329_v60 = vcombine.low %v435_v46, %v443_v47  ;;  %v4346_v62 = vcombine.high %v451_v55, %v459_v56  ;;  %v563_v47 = vld [vmem:[%s4765_s16 + $0xb30] sm:$0xff] }
 0x1b0   : > { %v4348_v63 = vcombine.high %v452_v58, %v460_v59  ;;  %v4347_v5 = vcombine.low %v452_v58, %v460_v59  ;;  %v579_v58 = vld [vmem:[%s4765_s16 + $0xbb0] sm:$0xff] }
 0x1b1   : > { %v587_v59 = vld [vmem:[%s4765_s16 + $0xbf0] sm:$0xff] }
 0x1b2   : > { %3798 = vmatpush1.bf16.msra.mxu0 %v4217_v1  ;;  %3880 = vmatpush1.bf16.msra.mxu1 %v4219_v2  ;;  %v475_v1 = vld [vmem:[%s4765_s16 + $0x870] sm:$0xff]  ;;  %v468_v2 = vld [vmem:[%s4765_s16 + $0x838] sm:$0xff] }
 0x1b3   : > { %3799 = vmatprep.subr.bf16.mxu0 %v4234_v3  ;;  %3881 = vmatprep.subr.bf16.mxu1 %v4236_v4  ;;  %v476_v3 = vld [vmem:[%s4765_s16 + $0x878] sm:$0xff]  ;;  %v4345_v4 = vcombine.low %v451_v55, %v459_v56  ;;  %v4362_v6 = vcombine.high %v467_v0, %v475_v1 }
 0x1b4   : > { %v4364_v7 = vcombine.high %v468_v2, %v476_v3  ;;  %v4363_v14 = vcombine.low %v468_v2, %v476_v3  ;;  %v4457_v2 = vcombine.low %v563_v47, %v571_v48 }
 0x1b6   : > { %3800 = vmatpush1.bf16.msra.mxu0 %v4233_v9  ;;  %3882 = vmatpush1.bf16.msra.mxu1 %v4235_v10  ;;  %v491_v9 = vld [vmem:[%s4765_s16 + $0x8f0] sm:$0xff]  ;;  %v484_v10 = vld [vmem:[%s4765_s16 + $0x8b8] sm:$0xff] }
 0x1b7   : > { %3801 = vmatprep.subr.bf16.mxu0 %v4250_v11  ;;  %3883 = vmatprep.subr.bf16.mxu1 %v4252_v13  ;;  %v492_v11 = vld [vmem:[%s4765_s16 + $0x8f8] sm:$0xff]  ;;  %v4361_v13 = vcombine.low %v467_v0, %v475_v1  ;;  %v4378_v16 = vcombine.high %v483_v8, %v491_v9 }
 0x1b8   : > { %v4380_v17 = vcombine.high %v484_v10, %v492_v11  ;;  %v4379_v24 = vcombine.low %v484_v10, %v492_v11  ;;  %v603_v10 = vld [vmem:[%s4765_s16 + $0xc70] sm:$0xff]  ;;  %v596_v11 = vld [vmem:[%s4765_s16 + $0xc38] sm:$0xff] }
 0x1ba   : > { %3802 = vmatpush1.bf16.msra.mxu0 %v4249_v19  ;;  %3884 = vmatpush1.bf16.msra.mxu1 %v4251_v20  ;;  %v507_v19 = vld [vmem:[%s4765_s16 + $0x970] sm:$0xff]  ;;  %v500_v20 = vld [vmem:[%s4765_s16 + $0x938] sm:$0xff] }
 0x1bb   : > { %3803 = vmatprep.subr.bf16.mxu0 %v4266_v21  ;;  %3885 = vmatprep.subr.bf16.mxu1 %v4268_v23  ;;  %v508_v21 = vld [vmem:[%s4765_s16 + $0x978] sm:$0xff]  ;;  %v4377_v23 = vcombine.low %v483_v8, %v491_v9  ;;  %v4394_v25 = vcombine.high %v499_v18, %v507_v19  ;;  %v595_v9 = vld [vmem:[%s4765_s16 + $0xc30] sm:$0xff] }
 0x1bc   : > { %v4396_v26 = vcombine.high %v500_v20, %v508_v21 }
 0x1be   : > { %3804 = vmatpush1.bf16.msra.mxu0 %v4265_v28  ;;  %3886 = vmatpush1.bf16.msra.mxu1 %v4267_v29  ;;  %v523_v28 = vld [vmem:[%s4765_s16 + $0x9f0] sm:$0xff]  ;;  %v516_v29 = vld [vmem:[%s4765_s16 + $0x9b8] sm:$0xff] }
 0x1bf   : > { %3805 = vmatprep.subr.bf16.mxu0 %v4282_v30  ;;  %3887 = vmatprep.subr.bf16.mxu1 %v4284_v15  ;;  %v524_v30 = vld [vmem:[%s4765_s16 + $0x9f8] sm:$0xff]  ;;  %v4395_v15 = vcombine.low %v500_v20, %v508_v21  ;;  %v4410_v31 = vcombine.high %v515_v27, %v523_v28  ;;  %v619_v20 = vld [vmem:[%s4765_s16 + $0xcf0] sm:$0xff] }
 0x1c0   : > { %v4412_v32 = vcombine.high %v516_v29, %v524_v30  ;;  %v612_v21 = vld [vmem:[%s4765_s16 + $0xcb8] sm:$0xff] }
 0x1c2   : > { %3806 = vmatpush1.bf16.msra.mxu0 %v4281_v34  ;;  %3888 = vmatpush1.bf16.msra.mxu1 %v4283_v35  ;;  %v532_v34 = vld [vmem:[%s4765_s16 + $0xa38] sm:$0xff] }
 0x1c3   : > { %3807 = vmatprep.subr.bf16.mxu0 %v4298_v36  ;;  %3889 = vmatprep.subr.bf16.mxu1 %v4300_v37  ;;  %v540_v35 = vld [vmem:[%s4765_s16 + $0xa78] sm:$0xff]  ;;  %v4409_v36 = vcombine.low %v515_v27, %v523_v28  ;;  %v4426_v37 = vcombine.high %v531_v57, %v539_v33 }
 0x1c4   : > { %v4428_v38 = vcombine.high %v532_v34, %v540_v35 }
 0x1c6   : > { %3808 = vmatpush1.bf16.msra.mxu0 %v4297_v42  ;;  %3890 = vmatpush1.bf16.msra.mxu1 %v4299_v43  ;;  %v556_v42 = vld [vmem:[%s4765_s16 + $0xaf8] sm:$0xff]  ;;  %v4425_v43 = vcombine.low %v531_v57, %v539_v33 }
 0x1c7   : > { %3809 = vmatprep.subr.bf16.mxu0 %v4314_v44  ;;  %3891 = vmatprep.subr.bf16.mxu1 %v4316_v45  ;;  %v4427_v44 = vcombine.low %v532_v34, %v540_v35  ;;  %v4442_v45 = vcombine.high %v547_v39, %v555_v40  ;;  %v4444_v46 = vcombine.high %v548_v41, %v556_v42 }
 0x1ca   : > { %3810 = vmatpush1.bf16.msra.mxu0 %v4313_v50  ;;  %3892 = vmatpush1.bf16.msra.mxu1 %v4315_v51  ;;  %v572_v50 = vld [vmem:[%s4765_s16 + $0xb78] sm:$0xff]  ;;  %v4441_v51 = vcombine.low %v547_v39, %v555_v40 }
 0x1cb   : > { %3811 = vmatprep.subr.bf16.mxu0 %v4330_v52  ;;  %3893 = vmatprep.subr.bf16.mxu1 %v4332_v54  ;;  %v4443_v52 = vcombine.low %v548_v41, %v556_v42  ;;  %v4458_v54 = vcombine.high %v563_v47, %v571_v48  ;;  %v4460_v56 = vcombine.high %v564_v49, %v572_v50  ;;  %v652_v39 = vld [vmem:[%s4765_s16 + $0xdf8] sm:$0xff] }
 0x1cc   : > { %v668_v47 = vld [vmem:[%s4765_s16 + $0xe78] sm:$0xff] }
 0x1ce   : > { %3812 = vmatpush1.bf16.msra.mxu0 %v4329_v60  ;;  %3894 = vmatpush1.bf16.msra.mxu1 %v4331_v61 }
 0x1cf   : > { %3813 = vmatprep.subr.bf16.mxu0 %v4346_v62  ;;  %3895 = vmatprep.subr.bf16.mxu1 %v4348_v63  ;;  %v580_v62 = vld [vmem:[%s4765_s16 + $0xbb8] sm:$0xff] }
 0x1d0   : > { %v588_v63 = vld [vmem:[%s4765_s16 + $0xbf8] sm:$0xff] }
 0x1d1   : > { %v4476_v8 = vcombine.high %v580_v62, %v588_v63 }
 0x1d2   : > { %3814 = vmatpush1.bf16.msra.mxu0 %v4345_v4  ;;  %3896 = vmatpush1.bf16.msra.mxu1 %v4347_v5  ;;  %v4459_v5 = vcombine.low %v564_v49, %v572_v50 }
 0x1d3   : > { %3824 = vmatprep.subr.bf16.mxu0 %v4362_v6  ;;  %3906 = vmatprep.subr.bf16.mxu1 %v4364_v7  ;;  %v4474_v6 = vcombine.high %v579_v58, %v587_v59 }
 0x1d5   : > { %3816 = vmatmul.mubr.bf16.vlgmr.msra.gmra.mrb[12].mxu0 %v4854_v12  ;;  %3898 = vmatmul.mubr.bf16.vlgmr.msra.gmra.mrb[12].mxu1 %v4854_v12  ;;  %v4393_v12 = vcombine.low %v499_v18, %v507_v19  ;;  %v611_v19 = vld [vmem:[%s4765_s16 + $0xcb0] sm:$0xff] }
 0x1d6   : > { %3825 = vmatpush1.bf16.msra.mxu0 %v4361_v13  ;;  %3907 = vmatpush1.bf16.msra.mxu1 %v4363_v14  ;;  %v604_v13 = vld [vmem:[%s4765_s16 + $0xc78] sm:$0xff]  ;;  %v4473_v14 = vcombine.low %v579_v58, %v587_v59  ;;  %v4506_v27 = vcombine.high %v611_v19, %v619_v20  ;;  %v4505_v33 = vcombine.low %v611_v19, %v619_v20 }
 0x1d7   : > { %3826 = vmatprep.subr.bf16.mxu0 %v4378_v16  ;;  %3908 = vmatprep.subr.bf16.mxu1 %v4380_v17  ;;  %v4475_v16 = vcombine.low %v580_v62, %v588_v63  ;;  %v4490_v17 = vcombine.high %v595_v9, %v603_v10  ;;  %v4492_v18 = vcombine.high %v596_v11, %v604_v13  ;;  %v691_v62 = vld [vmem:[%s4765_s16 + $0xf30] sm:$0xff] }
 0x1d8   : > { %3856 = vmatprep.mubr.bf16.mxu0 %v4865_v53  ;;  %3938 = vmatprep.mubr.bf16.mxu1 %v4865_v53  ;;  %v4411_v53 = vcombine.low %v516_v29, %v524_v30  ;;  %v627_v30 = vld [vmem:[%s4765_s16 + $0xd30] sm:$0xff] }
 0x1d9   : > { %v699_v63 = vld [vmem:[%s4765_s16 + $0xf70] sm:$0xff] }
 0x1da   : > { %3827 = vmatpush1.bf16.msra.mxu0 %v4377_v23  ;;  %3909 = vmatpush1.bf16.msra.mxu1 %v4379_v24  ;;  %v620_v23 = vld [vmem:[%s4765_s16 + $0xcf8] sm:$0xff]  ;;  %v4489_v24 = vcombine.low %v595_v9, %v603_v10  ;;  %v4585_v10 = vcombine.low %v691_v62, %v699_v63 }
 0x1db   : > { %3828 = vmatprep.subr.bf16.mxu0 %v4394_v25  ;;  %3910 = vmatprep.subr.bf16.mxu1 %v4396_v26  ;;  %v4491_v26 = vcombine.low %v596_v11, %v604_v13  ;;  %v4508_v29 = vcombine.high %v612_v21, %v620_v23  ;;  %v4507_v34 = vcombine.low %v612_v21, %v620_v23  ;;  %v716_v9 = vld [vmem:[%s4765_s16 + $0xff8] sm:$0xff] }
 0x1de   : > { %3829 = vmatpush1.bf16.msra.mxu0 %v4393_v12  ;;  %3911 = vmatpush1.bf16.msra.mxu1 %v4395_v15  ;;  %v635_v12 = vld [vmem:[%s4765_s16 + $0xd70] sm:$0xff] }
 0x1df   : > { %3830 = vmatprep.subr.bf16.mxu0 %v4410_v31  ;;  %3912 = vmatprep.subr.bf16.mxu1 %v4412_v32  ;;  %v628_v31 = vld [vmem:[%s4765_s16 + $0xd38] sm:$0xff]  ;;  %v4522_v35 = vcombine.high %v627_v30, %v635_v12  ;;  %v4521_v40 = vcombine.low %v627_v30, %v635_v12 }
 0x1e0   : > { %v636_v32 = vld [vmem:[%s4765_s16 + $0xd78] sm:$0xff] }
 0x1e1   : > { %v4523_v41 = vcombine.low %v628_v31, %v636_v32 }
 0x1e2   : > { %3831 = vmatpush1.bf16.msra.mxu0 %v4409_v36  ;;  %3913 = vmatpush1.bf16.msra.mxu1 %v4411_v53  ;;  %v4524_v36 = vcombine.high %v628_v31, %v636_v32  ;;  %v643_v53 = vld [vmem:[%s4765_s16 + $0xdb0] sm:$0xff] }
 0x1e3   : > { %3832 = vmatprep.subr.bf16.mxu0 %v4426_v37  ;;  %3914 = vmatprep.subr.bf16.mxu1 %v4428_v38  ;;  %v651_v37 = vld [vmem:[%s4765_s16 + $0xdf0] sm:$0xff]  ;;  %v644_v38 = vld [vmem:[%s4765_s16 + $0xdb8] sm:$0xff] }
 0x1e4   : > { %v4538_v42 = vcombine.high %v643_v53, %v651_v37  ;;  %v4537_v48 = vcombine.low %v643_v53, %v651_v37  ;;  %v4539_v49 = vcombine.low %v644_v38, %v652_v39 }
 0x1e6   : > { %3833 = vmatpush1.bf16.msra.mxu0 %v4425_v43  ;;  %3915 = vmatpush1.bf16.msra.mxu1 %v4427_v44  ;;  %v4540_v43 = vcombine.high %v644_v38, %v652_v39  ;;  %v659_v44 = vld [vmem:[%s4765_s16 + $0xe30] sm:$0xff] }
 0x1e7   : > { %3834 = vmatprep.subr.bf16.mxu0 %v4442_v45  ;;  %3916 = vmatprep.subr.bf16.mxu1 %v4444_v46  ;;  %v667_v45 = vld [vmem:[%s4765_s16 + $0xe70] sm:$0xff]  ;;  %v660_v46 = vld [vmem:[%s4765_s16 + $0xe38] sm:$0xff] }
 0x1e8   : > { %v3530_v55 = vpop.f32.mrb[4].mxu0  ;;  %v3612_v60 = vpop.f32.mrb[4].mxu1  ;;  %v4554_v50 = vcombine.high %v659_v44, %v667_v45  ;;  %v4553_v58 = vcombine.low %v659_v44, %v667_v45  ;;  %v4555_v59 = vcombine.low %v660_v46, %v668_v47 }
 0x1e9   : > { %4678 = vtanh.f32 %v3530_v55  ;;  %v3532_v61 = vpop.f32.mrb[5].mxu0  ;;  %v3614_v0 = vpop.f32.mrb[5].mxu1  ;;  %v676_v55 = vld [vmem:[%s4765_s16 + $0xeb8] sm:$0xff] }
 0x1ea   : > { %4680 = vtanh.f32 %v3612_v60  ;;  %v3534_v1 = vpop.f32.mrb[6].mxu0  ;;  %3835 = vmatpush1.bf16.msra.mxu0 %v4441_v51  ;;  %v3616_v3 = vpop.f32.mrb[6].mxu1  ;;  %3917 = vmatpush1.bf16.msra.mxu1 %v4443_v52  ;;  %v4556_v51 = vcombine.high %v660_v46, %v668_v47  ;;  %v675_v52 = vld [vmem:[%s4765_s16 + $0xeb0] sm:$0xff] }
 0x1eb   : > { %4682 = vtanh.f32 %v3532_v61  ;;  %v3535_v4 = vpop.f32.mrb[7].mxu0  ;;  %3836 = vmatprep.subr.bf16.mxu0 %v4458_v54  ;;  %v3617_v7 = vpop.f32.mrb[7].mxu1  ;;  %3918 = vmatprep.subr.bf16.mxu1 %v4460_v56  ;;  %v683_v54 = vld [vmem:[%s4765_s16 + $0xef0] sm:$0xff]  ;;  %v684_v56 = vld [vmem:[%s4765_s16 + $0xef8] sm:$0xff] }
 0x1ec   : > { %4684 = vtanh.f32 %v3614_v0  ;;  %v4570_v60 = vcombine.high %v675_v52, %v683_v54  ;;  %v4572_v61 = vcombine.high %v676_v55, %v684_v56  ;;  %v692_v0 = vld [vmem:[%s4765_s16 + $0xf38] sm:$0xff]  ;;  %v4571_v3 = vcombine.low %v676_v55, %v684_v56  ;;  %v715_v7 = vld [vmem:[%s4765_s16 + $0xff0] sm:$0xff] }
 0x1ed   : > { %v700_v1 = vld [vmem:[%s4765_s16 + $0xf78] sm:$0xff]  ;;  %v4586_v4 = vcombine.high %v691_v62, %v699_v63 }
 0x1ee   : > { %3837 = vmatpush1.bf16.msra.mxu0 %v4457_v2  ;;  %3919 = vmatpush1.bf16.msra.mxu1 %v4459_v5  ;;  %v4569_v2 = vcombine.low %v675_v52, %v683_v54  ;;  %v4588_v5 = vcombine.high %v692_v0, %v700_v1  ;;  %v4587_v11 = vcombine.low %v692_v0, %v700_v1 }
 0x1ef   : > { %3838 = vmatprep.subr.bf16.mxu0 %v4474_v6  ;;  %3920 = vmatprep.subr.bf16.mxu1 %v4476_v8  ;;  %v707_v6 = vld [vmem:[%s4765_s16 + $0xfb0] sm:$0xff]  ;;  %v708_v8 = vld [vmem:[%s4765_s16 + $0xfb8] sm:$0xff] }
 0x1f0   : > { %v4602_v13 = vcombine.high %v707_v6, %v715_v7 }
 0x1f2   : > { %3839 = vmatpush1.bf16.msra.mxu0 %v4473_v14  ;;  %3921 = vmatpush1.bf16.msra.mxu1 %v4475_v16  ;;  %v4604_v14 = vcombine.high %v708_v8, %v716_v9  ;;  %v4601_v16 = vcombine.low %v707_v6, %v715_v7 }
 0x1f3   : > { %v4679_v25 = vpop.eup %4678  ;;  %3840 = vmatprep.subr.bf16.mxu0 %v4490_v17  ;;  %3922 = vmatprep.subr.bf16.mxu1 %v4492_v18  ;;  %v4603_v17 = vcombine.low %v708_v8, %v716_v9 }
 0x1f4   : > { %v4681_v28 = vpop.eup %4680  ;;  %3967 = vst [vmem:[%s5179_s24 + $0x20] sm:$0xff] %v4679_v25 }
 0x1f5   : > { %v4683_v15 = vpop.eup %4682  ;;  %3969 = vst [vmem:[%s5179_s24 + $0x30] sm:$0xff] %v4681_v28 }
 0x1f6   : > { %v4685_v57 = vpop.eup %4684  ;;  %3968 = vst [vmem:[%s5179_s24 + $0x28] sm:$0xff] %v4683_v15  ;;  %3841 = vmatpush1.bf16.msra.mxu0 %v4489_v24  ;;  %3923 = vmatpush1.bf16.msra.mxu1 %v4491_v26 }
 0x1f7   : > { %3970 = vst [vmem:[%s5179_s24 + $0x38] sm:$0xff] %v4685_v57  ;;  %3842 = vmatprep.subr.bf16.mxu0 %v4506_v27  ;;  %3924 = vmatprep.subr.bf16.mxu1 %v4508_v29 }
 0x1fa   : > { %3843 = vmatpush1.bf16.msra.mxu0 %v4505_v33  ;;  %3925 = vmatpush1.bf16.msra.mxu1 %v4507_v34 }
 0x1fb   : > { %3844 = vmatprep.subr.bf16.mxu0 %v4522_v35  ;;  %3926 = vmatprep.subr.bf16.mxu1 %v4524_v36 }
 0x1fe   : > { %3845 = vmatpush1.bf16.msra.mxu0 %v4521_v40  ;;  %3927 = vmatpush1.bf16.msra.mxu1 %v4523_v41 }
 0x1ff   : > { %3846 = vmatprep.subr.bf16.mxu0 %v4538_v42  ;;  %3928 = vmatprep.subr.bf16.mxu1 %v4540_v43 }
 0x202   : > { %3847 = vmatpush1.bf16.msra.mxu0 %v4537_v48  ;;  %3929 = vmatpush1.bf16.msra.mxu1 %v4539_v49 }
 0x203   : > { %3848 = vmatprep.subr.bf16.mxu0 %v4554_v50  ;;  %3930 = vmatprep.subr.bf16.mxu1 %v4556_v51 }
 0x206   : > { %3849 = vmatpush1.bf16.msra.mxu0 %v4553_v58  ;;  %3931 = vmatpush1.bf16.msra.mxu1 %v4555_v59 }
 0x207   : > { %3850 = vmatprep.subr.bf16.mxu0 %v4570_v60  ;;  %3932 = vmatprep.subr.bf16.mxu1 %v4572_v61 }
 0x20a   : > { %3851 = vmatpush1.bf16.msra.mxu0 %v4569_v2  ;;  %3933 = vmatpush1.bf16.msra.mxu1 %v4571_v3 }
 0x20b   : > { %3852 = vmatprep.subr.bf16.mxu0 %v4586_v4  ;;  %3934 = vmatprep.subr.bf16.mxu1 %v4588_v5 }
 0x20e   : > { %3853 = vmatpush1.bf16.msra.mxu0 %v4585_v10  ;;  %3935 = vmatpush1.bf16.msra.mxu1 %v4587_v11 }
 0x20f   : > { %3854 = vmatprep.subr.bf16.mxu0 %v4602_v13  ;;  %3936 = vmatprep.subr.bf16.mxu1 %v4604_v14 }
 0x212   : > { %3855 = vmatpush1.bf16.msra.mxu0 %v4601_v16  ;;  %3937 = vmatpush1.bf16.msra.mxu1 %v4603_v17 }
 0x215   : > { %3857 = vmatmul.mubr.bf16.vlgmr.msra.gmra.mrb[12].mxu0 %v4933_v22  ;;  %3939 = vmatmul.mubr.bf16.vlgmr.msra.gmra.mrb[12].mxu1 %v4933_v22 }
 0x268   : > { %v3694_v18 = vpop.f32.mrb[8].mxu0  ;;  %v3776_v19 = vpop.f32.mrb[8].mxu1 }
 0x269   : > { %4686 = vtanh.f32 %v3694_v18  ;;  %v3696_v20 = vpop.f32.mrb[9].mxu0  ;;  %v3778_v21 = vpop.f32.mrb[9].mxu1 }
 0x26a   : > { %4688 = vtanh.f32 %v3776_v19  ;;  %v3698_v23 = vpop.f32.mrb[10].mxu0  ;;  %v3780_v24 = vpop.f32.mrb[10].mxu1 }
 0x26b   : > { %4690 = vtanh.f32 %v3696_v20  ;;  %v3699_v25 = vpop.f32.mrb[11].mxu0  ;;  %v3781_v26 = vpop.f32.mrb[11].mxu1 }
 0x26c   : > { %4692 = vtanh.f32 %v3778_v21 }
 0x273   : > { %v4687_v27 = vpop.eup %4686 }
 0x274   : > { %v4689_v28 = vpop.eup %4688  ;;  %3971 = vst [vmem:[%s5179_s24 + $0x40] sm:$0xff] %v4687_v27 }
 0x275   : > { %v4691_v29 = vpop.eup %4690  ;;  %3973 = vst [vmem:[%s5179_s24 + $0x50] sm:$0xff] %v4689_v28 }
 0x276   : > { %v4693_v22 = vpop.eup %4692  ;;  %3972 = vst [vmem:[%s5179_s24 + $0x48] sm:$0xff] %v4691_v29 }
 0x277   : > { %3974 = vst [vmem:[%s5179_s24 + $0x58] sm:$0xff] %v4693_v22 }
 0x2e8   : > { %v3858_v30 = vpop.f32.mrb[12].mxu0  ;;  %v3940_v12 = vpop.f32.mrb[12].mxu1 }
 0x2e9   : > { %4694 = vtanh.f32 %v3858_v30  ;;  %v3860_v15 = vpop.f32.mrb[13].mxu0  ;;  %v3942_v31 = vpop.f32.mrb[13].mxu1 }
 0x2ea   : > { %4696 = vtanh.f32 %v3940_v12  ;;  %v3862_v32 = vpop.f32.mrb[14].mxu0  ;;  %v3944_v57 = vpop.f32.mrb[14].mxu1 }
 0x2eb   : > { %4698 = vtanh.f32 %v3860_v15  ;;  %v3863_v33 = vpop.f32.mrb[15].mxu0  ;;  %v3945_v34 = vpop.f32.mrb[15].mxu1 }
 0x2ec   : > { %4700 = vtanh.f32 %v3942_v31 }
 0x2f3   : > { %v4695_v35 = vpop.eup %4694 }
 0x2f4   : > { %v4697_v36 = vpop.eup %4696  ;;  %3975 = vst [vmem:[%s5179_s24 + $0x60] sm:$0xff] %v4695_v35 }
 0x2f5   : > { %v4699_v53 = vpop.eup %4698  ;;  %3977 = vst [vmem:[%s5179_s24 + $0x70] sm:$0xff] %v4697_v36 }
 0x2f6   : > { %v4701_v37 = vpop.eup %4700  ;;  %3976 = vst [vmem:[%s5179_s24 + $0x68] sm:$0xff] %v4699_v53 }
 0x2f7   : > { %3978 = vst [vmem:[%s5179_s24 + $0x78] sm:$0xff] %v4701_v37 }
 0x2f8 PF: > { %s12_s11 = sadd.s32 1, %s4724_s11   ;;  %s5373_s9 = smov %s4720_s10 }
 0x2f9   : > { %p9_p5 = scmp.ge.s32.totalorder %s12_s11, 6   ;;  %s5374_s10 = smov %s5376_s12 }
 0x2fb   :  { %11 = sbr.rel (!%p9_p5) target bundleno = 2 (0x2), region = 61 }

</bundles_post_ra>
